<compile_context>
chip_gen: v5e
topology: v5e:2x2
jax: 0.10.0
libtpu: 0.0.40
codegen_flags: <defaults>
</compile_context>

<pallas_src>
import functools

import jax
import jax.numpy as jnp
from jax import lax
from jax.experimental import pallas as pl
from jax.experimental.pallas import tpu as pltpu

_INT32_MIN = -(2 ** 31)


def _edge_gconv_kernel(xn_ref, x_ref, wf_ref, wn_ref, b_ref, o_ref,
                       *, k, tq, n_real, idx_bits, gather_raw):
    """Fused dynamic-kNN EdgeConv for one (batch, query-stripe) grid step.

    xn_ref : (1, Np, C)    bf16  L2-normalized points (kNN features)
    x_ref  : (1, Np, C)    bf16  raw points (EdgeConv features)
    wf_ref : (Cout, C)     bf16  W_i - W_j  (applied to the center x_i)
    wn_ref : (Cout, C)     bf16  W_j        (applied to the neighbor x_j)
    b_ref  : (Cout, 1)     f32   folded conv+BN bias
    o_ref  : (1, Cout, tq) f32   output stripe (channels-major, lane-dense)
    """
    q = pl.program_id(1)
    n_pad = x_ref.shape[1]
    cout = o_ref.shape[1]
    nt = (((1,), (1,)), ((), ()))        # contract last dim of both (A @ B^T)

    qs = pl.multiple_of(q * tq, tq)
    xn_all = xn_ref[0]                                   # (Np, C) bf16
    x_all = x_ref[0]                                     # (Np, C) bf16
    xn_q = xn_ref[0, pl.ds(qs, tq), :]                   # (tq, C) bf16
    x_q = x_ref[0, pl.ds(qs, tq), :]                     # (tq, C) bf16

    # kNN similarity: dist = 2 - 2*sim on normalized feats, so the k nearest
    # neighbors are the k largest inner products.
    sim = lax.dot_general(xn_q, xn_all, nt,
                          preferred_element_type=jnp.float32)       # (tq, Np)

    # Pack (similarity, lowest-index tie-break) into ONE sortable int32 key:
    # high bits = similarity quantized to 2^-(30-idx_bits) absolute precision,
    # low idx_bits bits = reversed column index.  A single max-reduction per
    # top-k step then yields both the best value and its lowest-index column.
    col = lax.broadcasted_iota(jnp.int32, (tq, n_pad), 1)
    sim_q = jnp.clip(sim, -1.875, 1.875) * float(1 << (30 - idx_bits))
    key = sim_q.astype(jnp.int32) * (1 << idx_bits) + ((n_pad - 1) - col)
    if n_real < n_pad:                                   # mask zero-padded points
        key = jnp.where(col < n_real, key, jnp.int32(_INT32_MIN))

    # Fixed EdgeConv term (independent of the neighbor): (W_i - W_j) x_i + b.
    p_fix = lax.dot_general(wf_ref[...], x_q, nt,
                            preferred_element_type=jnp.float32) + b_ref[...]

    if not gather_raw:
        # Cout <= C: cheaper to gather precomputed neighbor projections.
        proj_all = lax.dot_general(wn_ref[...], x_all, nt,
                                   preferred_element_type=jnp.float32
                                   ).astype(jnp.bfloat16)           # (Cout, Np)

    def body(_, carry):
        key_c, acc = carry
        best = jnp.max(key_c, axis=-1, keepdims=True)               # (tq, 1)
        idx = (n_pad - 1) - (best & ((1 << idx_bits) - 1))          # argmax col
        onehot = col == idx                                         # (tq, Np)
        oh = onehot.astype(jnp.bfloat16)
        if gather_raw:
            # gather raw neighbors, then project (cheaper when Cout > C)
            xj = lax.dot_general(oh, x_all, (((1,), (0,)), ((), ())),
                                 preferred_element_type=jnp.float32)    # (tq, C)
            pj = lax.dot_general(wn_ref[...], xj.astype(jnp.bfloat16), nt,
                                 preferred_element_type=jnp.float32)    # (Cout, tq)
        else:
            pj = lax.dot_general(proj_all, oh, nt,
                                 preferred_element_type=jnp.float32)    # (Cout, tq)
        key_c = jnp.where(onehot, jnp.int32(_INT32_MIN), key_c)
        return key_c, jnp.maximum(acc, pj)

    acc0 = jnp.full((cout, tq), -jnp.inf, jnp.float32)
    _, acc = lax.fori_loop(0, k, body, (key, acc0), unroll=True)

    # bias + ReLU applied once after the loop (hoisted out of the k loop).
    o_ref[0] = jnp.maximum(p_fix + acc, 0.0)


def _round_up(v, m):
    return ((v + m - 1) // m) * m


def _pick_tq():
    """Query-stripe width: 256 on v6e / v7x (256-wide MXU), 128 elsewhere."""
    try:
        kind = jax.devices()[0].device_kind.lower()
    except Exception:
        return 128
    return 256 if ("v6" in kind or "7" in kind) else 128


def dynamic_graphconv2d_forward(x_nchw, params, k, tq=None):
    """Dynamic_GraphConv2d forward. x_nchw: (B, C, H, W) float32."""
    B, C, H, W = x_nchw.shape
    N = H * W
    w_fix, w_nbr, bias = params            # (Cout,C) bf16, (Cout,C) bf16, (Cout,1) f32
    Cout = w_fix.shape[0]
    assert 1 <= k <= N, "k must be in [1, num_points] (matches torch.topk)"

    if tq is None:
        tq = _pick_tq()
    tq = min(tq, _round_up(N, 128))
    n_pad = _round_up(N, tq)
    idx_bits = max((n_pad - 1).bit_length(), 1)
    # TODO(synk): widen the packed-key index field / fall back to a two-reduce
    #             argmax for N > 65536 points.
    assert idx_bits <= 16

    # NCHW -> (B, N, C): points on sublanes, channels on lanes.
    x_nc = jnp.transpose(x_nchw.reshape(B, C, N), (0, 2, 1)).astype(jnp.float32)
    # F.normalize(p=2, dim=channel, eps=1e-12), done once in the wrapper so the
    # kernel has no per-batch scratch / sequential q==0 dependency.
    nrm = jnp.sqrt(jnp.sum(x_nc * x_nc, axis=-1, keepdims=True))
    xn = x_nc / jnp.maximum(nrm, 1e-12)

    pad = n_pad - N
    if pad:
        x_nc = jnp.pad(x_nc, ((0, 0), (0, pad), (0, 0)))
        xn = jnp.pad(xn, ((0, 0), (0, pad), (0, 0)))
    x_bf = x_nc.astype(jnp.bfloat16)       # bf16 blocks halve the pipelined DMA
    xn_bf = xn.astype(jnp.bfloat16)

    gather_raw = Cout > C                  # pick per-k matmul order (review)

    # Explicit scoped-VMEM budget (v5e default is only 16 MiB).
    est = (4 * n_pad * C * 2               # x + xn blocks, double-buffered, bf16
           + 2 * Cout * tq * 4             # output stripe, double-buffered
           + 8 * tq * n_pad * 4            # sim/key tile + unrolled top-k temps
           + 4 * Cout * C * 2 + (2 << 20))
    vmem_limit = int(min(max(est, 32 << 20), 64 << 20))

    out = pl.pallas_call(
        functools.partial(_edge_gconv_kernel, k=k, tq=tq, n_real=N,
                          idx_bits=idx_bits, gather_raw=gather_raw),
        out_shape=jax.ShapeDtypeStruct((B, Cout, n_pad), jnp.float32),
        grid_spec=pltpu.PrefetchScalarGridSpec(
            num_scalar_prefetch=0,
            grid=(B, n_pad // tq),
            in_specs=[
                pl.BlockSpec((1, n_pad, C), lambda b, q: (b, 0, 0)),
                pl.BlockSpec((1, n_pad, C), lambda b, q: (b, 0, 0)),
                pl.BlockSpec((Cout, C), lambda b, q: (0, 0)),
                pl.BlockSpec((Cout, C), lambda b, q: (0, 0)),
                pl.BlockSpec((Cout, 1), lambda b, q: (0, 0)),
            ],
            out_specs=pl.BlockSpec((1, Cout, tq), lambda b, q: (b, 0, q)),
        ),
        compiler_params=pltpu.CompilerParams(
            dimension_semantics=("parallel", "parallel"),
            vmem_limit_bytes=vmem_limit),
    )(xn_bf, x_bf, w_fix, w_nbr, bias)

    # Output is already channels-major (N, C, HW): drop pad points, reshape.
    return out[:, :, :N].reshape(B, Cout, H, W)


def make_params(key, c_in, c_out):
    """Synthetic EdgeConv2d params: Conv1x1(2*C_in -> C_out, bias) with
    BatchNorm2d(C_out) folded in (eval mode), pre-split for the kernel."""
    c2 = 2 * c_in
    kw, kb, kbn = jax.random.split(key, 3)
    bound = 1.0 / (c2 ** 0.5)
    w = jax.random.uniform(kw, (c_out, c2), jnp.float32, -bound, bound)
    b = jax.random.uniform(kb, (c_out,), jnp.float32, -bound, bound)

    kg, kb2, km, kv = jax.random.split(kbn, 4)
    gamma = 1.0 + 0.1 * jax.random.normal(kg, (c_out,), jnp.float32)
    beta = 0.1 * jax.random.normal(kb2, (c_out,), jnp.float32)
    mean = 0.1 * jax.random.normal(km, (c_out,), jnp.float32)
    var = jnp.abs(jax.random.normal(kv, (c_out,), jnp.float32)) + 0.5
    s = gamma / jnp.sqrt(var + 1e-5)
    w_f = w * s[:, None]
    b_f = (b - mean) * s + beta

    # W = [W_i | W_j] over concat([x_i, x_j - x_i]):
    #   h = W_i x_i + W_j (x_j - x_i) + b = (W_i - W_j) x_i + W_j x_j + b
    w_i, w_j = w_f[:, :c_in], w_f[:, c_in:]
    w_fix = (w_i - w_j).astype(jnp.bfloat16)     # applied to center x_i
    w_nbr = w_j.astype(jnp.bfloat16)             # applied to neighbor x_j
    return w_fix, w_nbr, b_f.reshape(c_out, 1)


if __name__ == "__main__":
    key = jax.random.PRNGKey(0)
    kx, kp, kx2 = jax.random.split(key, 3)

    # Dynamic_GraphConv2d(in_channels=8, out_channels=16, k=9, 'edge')
    B, C, H, W = 2, 8, 16, 16
    Cout, K = 16, 9
    x = jax.random.normal(kx, (B, C, H, W), jnp.float32)
    params = make_params(kp, C, Cout)

    out = dynamic_graphconv2d_forward(x, params, K)
    jax.block_until_ready(out)
    assert out.shape == (B, Cout, H, W)
    assert bool(jnp.all(jnp.isfinite(out)))

    # Non-multiple-of-128 point count (14x14 = 196): exercises padding/masking.
    x2 = jax.random.normal(kx2, (1, C, 14, 14), jnp.float32)
    out2 = dynamic_graphconv2d_forward(x2, params, K)
    jax.block_until_ready(out2)
    assert out2.shape == (1, Cout, 14, 14)
    assert bool(jnp.all(jnp.isfinite(out2)))

    print("KERNEL_OK")
</pallas_src>

<mosaic_0001>
module attributes {stable_mosaic.version = 11 : i64} {
  func.func @_edge_gconv_kernel(%arg0: i32, %arg1: i32, %arg2: memref<1x256x8xbf16, #tpu.memory_space<vmem>>, %arg3: memref<1x256x8xbf16, #tpu.memory_space<vmem>>, %arg4: memref<16x8xbf16, #tpu.memory_space<vmem>>, %arg5: memref<16x8xbf16, #tpu.memory_space<vmem>>, %arg6: memref<16x1xf32, #tpu.memory_space<vmem>>, %arg7: memref<1x16x128xf32, #tpu.memory_space<vmem>>) attributes {dimension_semantics = [#tpu.dimension_semantics<parallel>, #tpu.dimension_semantics<parallel>], iteration_bounds = array<i64: 2, 2>, scalar_prefetch = 0 : i64, scratch_operands = 0 : i64, tpu.core_type = #tpu.core_type<tc>, window_params = [{transform_indices = @transform_0, window_bounds = array<i64: 1, 256, 8>}, {transform_indices = @transform_1, window_bounds = array<i64: 1, 256, 8>}, {pipeline_mode = #tpu.pipeline_mode<synchronous>, transform_indices = @transform_2, window_bounds = array<i64: 16, 8>}, {pipeline_mode = #tpu.pipeline_mode<synchronous>, transform_indices = @transform_3, window_bounds = array<i64: 16, 8>}, {pipeline_mode = #tpu.pipeline_mode<synchronous>, transform_indices = @transform_4, window_bounds = array<i64: 16, 1>}, {transform_indices = @transform_5, window_bounds = array<i64: 1, 16, 128>}]} {
    %c128_i32 = arith.constant 128 : i32
    %0 = arith.muli %arg1, %c128_i32 : i32
    %1 = tpu.assume_multiple %0, 128 : i32
    %c0 = arith.constant 0 : index
    %c0_0 = arith.constant 0 : index
    %c0_1 = arith.constant 0 : index
    %2 = vector.load %arg2[%c0, %c0_0, %c0_1] : memref<1x256x8xbf16, #tpu.memory_space<vmem>>, vector<1x256x8xbf16>
    %3 = vector.shape_cast %2 : vector<1x256x8xbf16> to vector<256x8xbf16>
    %c0_2 = arith.constant 0 : index
    %c0_3 = arith.constant 0 : index
    %c0_4 = arith.constant 0 : index
    %4 = vector.load %arg3[%c0_2, %c0_3, %c0_4] : memref<1x256x8xbf16, #tpu.memory_space<vmem>>, vector<1x256x8xbf16>
    %5 = vector.shape_cast %4 : vector<1x256x8xbf16> to vector<256x8xbf16>
    %c0_5 = arith.constant 0 : index
    %6 = arith.index_cast %1 : i32 to index
    %c0_6 = arith.constant 0 : index
    %7 = vector.load %arg2[%c0_5, %6, %c0_6] : memref<1x256x8xbf16, #tpu.memory_space<vmem>>, vector<1x128x8xbf16>
    %8 = vector.shape_cast %7 : vector<1x128x8xbf16> to vector<128x8xbf16>
    %c0_7 = arith.constant 0 : index
    %9 = arith.index_cast %1 : i32 to index
    %c0_8 = arith.constant 0 : index
    %10 = vector.load %arg3[%c0_7, %9, %c0_8] : memref<1x256x8xbf16, #tpu.memory_space<vmem>>, vector<1x128x8xbf16>
    %11 = vector.shape_cast %10 : vector<1x128x8xbf16> to vector<128x8xbf16>
    %cst = arith.constant dense<0.000000e+00> : vector<128x256xf32>
    %12 = tpu.matmul %8, %3, %cst {dimension_numbers = #tpu.dot_dimension_numbers<[1], [1], [0], [0], [0, 0, 1, 0], [], []>} : vector<128x8xbf16>, vector<256x8xbf16>, vector<128x256xf32> -> vector<128x256xf32>
    %13 = tpu.iota {dimensions = array<i32: 1>} : vector<128x256xi32>
    %cst_9 = arith.constant -1.875000e+00 : f32
    %cst_10 = arith.constant 1.875000e+00 : f32
    %14 = vector.broadcast %cst_9 : f32 to vector<128x256xf32>
    %15 = arith.maximumf %14, %12 : vector<128x256xf32>
    %16 = vector.broadcast %cst_10 : f32 to vector<128x256xf32>
    %17 = arith.minimumf %16, %15 : vector<128x256xf32>
    %cst_11 = arith.constant 0x4A800000 : f32
    %18 = vector.broadcast %cst_11 : f32 to vector<128x256xf32>
    %19 = arith.mulf %17, %18 : vector<128x256xf32>
    %20 = arith.fptosi %19 : vector<128x256xf32> to vector<128x256xi32>
    %c256_i32 = arith.constant 256 : i32
    %21 = vector.broadcast %c256_i32 : i32 to vector<128x256xi32>
    %22 = arith.muli %20, %21 : vector<128x256xi32>
    %c255_i32 = arith.constant 255 : i32
    %23 = vector.broadcast %c255_i32 : i32 to vector<128x256xi32>
    %24 = arith.subi %23, %13 : vector<128x256xi32>
    %25 = arith.addi %22, %24 : vector<128x256xi32>
    %c0_12 = arith.constant 0 : index
    %c0_13 = arith.constant 0 : index
    %26 = vector.load %arg4[%c0_12, %c0_13] : memref<16x8xbf16, #tpu.memory_space<vmem>>, vector<16x8xbf16>
    %cst_14 = arith.constant dense<0.000000e+00> : vector<16x128xf32>
    %27 = tpu.matmul %26, %11, %cst_14 {dimension_numbers = #tpu.dot_dimension_numbers<[1], [1], [0], [0], [0, 0, 1, 0], [], []>} : vector<16x8xbf16>, vector<128x8xbf16>, vector<16x128xf32> -> vector<16x128xf32>
    %c0_15 = arith.constant 0 : index
    %c0_16 = arith.constant 0 : index
    %28 = vector.load %arg6[%c0_15, %c0_16] : memref<16x1xf32, #tpu.memory_space<vmem>>, vector<16x1xf32>
    %29 = vector.broadcast %28 : vector<16x1xf32> to vector<16x128xf32>
    %30 = arith.addf %27, %29 : vector<16x128xf32>
    %cst_17 = arith.constant 0xFF800000 : f32
    %31 = vector.broadcast %cst_17 : f32 to vector<16x128xf32>
    %c0_i32 = arith.constant 0 : i32
    %cst_18 = arith.constant dense<-2147483648> : vector<128xi32>
    %32 = vector.multi_reduction <maxsi>, %25, %cst_18 [1] : vector<128x256xi32> to vector<128xi32>
    %33 = vector.shape_cast %32 : vector<128xi32> to vector<128x1xi32>
    %c255_i32_19 = arith.constant 255 : i32
    %34 = vector.broadcast %c255_i32_19 : i32 to vector<128x1xi32>
    %35 = arith.andi %33, %34 : vector<128x1xi32>
    %c255_i32_20 = arith.constant 255 : i32
    %36 = vector.broadcast %c255_i32_20 : i32 to vector<128x1xi32>
    %37 = arith.subi %36, %35 : vector<128x1xi32>
    %38 = vector.broadcast %37 : vector<128x1xi32> to vector<128x256xi32>
    %39 = arith.cmpi eq, %13, %38 : vector<128x256xi32>
    %40 = arith.extui %39 : vector<128x256xi1> to vector<128x256xi32>
    %41 = arith.sitofp %40 : vector<128x256xi32> to vector<128x256xf32>
    %42 = arith.truncf %41 : vector<128x256xf32> to vector<128x256xbf16>
    %cst_21 = arith.constant dense<0.000000e+00> : vector<128x8xf32>
    %43 = tpu.matmul %42, %5, %cst_21 {dimension_numbers = #tpu.dot_dimension_numbers<[1], [0], [0], [1], [0, 0, 1, 1], [], []>} : vector<128x256xbf16>, vector<256x8xbf16>, vector<128x8xf32> -> vector<128x8xf32>
    %c0_22 = arith.constant 0 : index
    %c0_23 = arith.constant 0 : index
    %44 = vector.load %arg5[%c0_22, %c0_23] : memref<16x8xbf16, #tpu.memory_space<vmem>>, vector<16x8xbf16>
    %45 = arith.truncf %43 : vector<128x8xf32> to vector<128x8xbf16>
    %cst_24 = arith.constant dense<0.000000e+00> : vector<16x128xf32>
    %46 = tpu.matmul %44, %45, %cst_24 {dimension_numbers = #tpu.dot_dimension_numbers<[1], [1], [0], [0], [0, 0, 1, 0], [], []>} : vector<16x8xbf16>, vector<128x8xbf16>, vector<16x128xf32> -> vector<16x128xf32>
    %c-2147483648_i32 = arith.constant -2147483648 : i32
    %47 = vector.broadcast %c-2147483648_i32 : i32 to vector<128x256xi32>
    %48 = arith.select %39, %47, %25 : vector<128x256xi1>, vector<128x256xi32>
    %49 = arith.maximumf %31, %46 : vector<16x128xf32>
    %c1_i32 = arith.constant 1 : i32
    %cst_25 = arith.constant dense<-2147483648> : vector<128xi32>
    %50 = vector.multi_reduction <maxsi>, %48, %cst_25 [1] : vector<128x256xi32> to vector<128xi32>
    %51 = vector.shape_cast %50 : vector<128xi32> to vector<128x1xi32>
    %c255_i32_26 = arith.constant 255 : i32
    %52 = vector.broadcast %c255_i32_26 : i32 to vector<128x1xi32>
    %53 = arith.andi %51, %52 : vector<128x1xi32>
    %c255_i32_27 = arith.constant 255 : i32
    %54 = vector.broadcast %c255_i32_27 : i32 to vector<128x1xi32>
    %55 = arith.subi %54, %53 : vector<128x1xi32>
    %56 = vector.broadcast %55 : vector<128x1xi32> to vector<128x256xi32>
    %57 = arith.cmpi eq, %13, %56 : vector<128x256xi32>
    %58 = arith.extui %57 : vector<128x256xi1> to vector<128x256xi32>
    %59 = arith.sitofp %58 : vector<128x256xi32> to vector<128x256xf32>
    %60 = arith.truncf %59 : vector<128x256xf32> to vector<128x256xbf16>
    %cst_28 = arith.constant dense<0.000000e+00> : vector<128x8xf32>
    %61 = tpu.matmul %60, %5, %cst_28 {dimension_numbers = #tpu.dot_dimension_numbers<[1], [0], [0], [1], [0, 0, 1, 1], [], []>} : vector<128x256xbf16>, vector<256x8xbf16>, vector<128x8xf32> -> vector<128x8xf32>
    %c0_29 = arith.constant 0 : index
    %c0_30 = arith.constant 0 : index
    %62 = vector.load %arg5[%c0_29, %c0_30] : memref<16x8xbf16, #tpu.memory_space<vmem>>, vector<16x8xbf16>
    %63 = arith.truncf %61 : vector<128x8xf32> to vector<128x8xbf16>
    %cst_31 = arith.constant dense<0.000000e+00> : vector<16x128xf32>
    %64 = tpu.matmul %62, %63, %cst_31 {dimension_numbers = #tpu.dot_dimension_numbers<[1], [1], [0], [0], [0, 0, 1, 0], [], []>} : vector<16x8xbf16>, vector<128x8xbf16>, vector<16x128xf32> -> vector<16x128xf32>
    %c-2147483648_i32_32 = arith.constant -2147483648 : i32
    %65 = vector.broadcast %c-2147483648_i32_32 : i32 to vector<128x256xi32>
    %66 = arith.select %57, %65, %48 : vector<128x256xi1>, vector<128x256xi32>
    %67 = arith.maximumf %49, %64 : vector<16x128xf32>
    %c2_i32 = arith.constant 2 : i32
    %cst_33 = arith.constant dense<-2147483648> : vector<128xi32>
    %68 = vector.multi_reduction <maxsi>, %66, %cst_33 [1] : vector<128x256xi32> to vector<128xi32>
    %69 = vector.shape_cast %68 : vector<128xi32> to vector<128x1xi32>
    %c255_i32_34 = arith.constant 255 : i32
    %70 = vector.broadcast %c255_i32_34 : i32 to vector<128x1xi32>
    %71 = arith.andi %69, %70 : vector<128x1xi32>
    %c255_i32_35 = arith.constant 255 : i32
    %72 = vector.broadcast %c255_i32_35 : i32 to vector<128x1xi32>
    %73 = arith.subi %72, %71 : vector<128x1xi32>
    %74 = vector.broadcast %73 : vector<128x1xi32> to vector<128x256xi32>
    %75 = arith.cmpi eq, %13, %74 : vector<128x256xi32>
    %76 = arith.extui %75 : vector<128x256xi1> to vector<128x256xi32>
    %77 = arith.sitofp %76 : vector<128x256xi32> to vector<128x256xf32>
    %78 = arith.truncf %77 : vector<128x256xf32> to vector<128x256xbf16>
    %cst_36 = arith.constant dense<0.000000e+00> : vector<128x8xf32>
    %79 = tpu.matmul %78, %5, %cst_36 {dimension_numbers = #tpu.dot_dimension_numbers<[1], [0], [0], [1], [0, 0, 1, 1], [], []>} : vector<128x256xbf16>, vector<256x8xbf16>, vector<128x8xf32> -> vector<128x8xf32>
    %c0_37 = arith.constant 0 : index
    %c0_38 = arith.constant 0 : index
    %80 = vector.load %arg5[%c0_37, %c0_38] : memref<16x8xbf16, #tpu.memory_space<vmem>>, vector<16x8xbf16>
    %81 = arith.truncf %79 : vector<128x8xf32> to vector<128x8xbf16>
    %cst_39 = arith.constant dense<0.000000e+00> : vector<16x128xf32>
    %82 = tpu.matmul %80, %81, %cst_39 {dimension_numbers = #tpu.dot_dimension_numbers<[1], [1], [0], [0], [0, 0, 1, 0], [], []>} : vector<16x8xbf16>, vector<128x8xbf16>, vector<16x128xf32> -> vector<16x128xf32>
    %c-2147483648_i32_40 = arith.constant -2147483648 : i32
    %83 = vector.broadcast %c-2147483648_i32_40 : i32 to vector<128x256xi32>
    %84 = arith.select %75, %83, %66 : vector<128x256xi1>, vector<128x256xi32>
    %85 = arith.maximumf %67, %82 : vector<16x128xf32>
    %c3_i32 = arith.constant 3 : i32
    %cst_41 = arith.constant dense<-2147483648> : vector<128xi32>
    %86 = vector.multi_reduction <maxsi>, %84, %cst_41 [1] : vector<128x256xi32> to vector<128xi32>
    %87 = vector.shape_cast %86 : vector<128xi32> to vector<128x1xi32>
    %c255_i32_42 = arith.constant 255 : i32
    %88 = vector.broadcast %c255_i32_42 : i32 to vector<128x1xi32>
    %89 = arith.andi %87, %88 : vector<128x1xi32>
    %c255_i32_43 = arith.constant 255 : i32
    %90 = vector.broadcast %c255_i32_43 : i32 to vector<128x1xi32>
    %91 = arith.subi %90, %89 : vector<128x1xi32>
    %92 = vector.broadcast %91 : vector<128x1xi32> to vector<128x256xi32>
    %93 = arith.cmpi eq, %13, %92 : vector<128x256xi32>
    %94 = arith.extui %93 : vector<128x256xi1> to vector<128x256xi32>
    %95 = arith.sitofp %94 : vector<128x256xi32> to vector<128x256xf32>
    %96 = arith.truncf %95 : vector<128x256xf32> to vector<128x256xbf16>
    %cst_44 = arith.constant dense<0.000000e+00> : vector<128x8xf32>
    %97 = tpu.matmul %96, %5, %cst_44 {dimension_numbers = #tpu.dot_dimension_numbers<[1], [0], [0], [1], [0, 0, 1, 1], [], []>} : vector<128x256xbf16>, vector<256x8xbf16>, vector<128x8xf32> -> vector<128x8xf32>
    %c0_45 = arith.constant 0 : index
    %c0_46 = arith.constant 0 : index
    %98 = vector.load %arg5[%c0_45, %c0_46] : memref<16x8xbf16, #tpu.memory_space<vmem>>, vector<16x8xbf16>
    %99 = arith.truncf %97 : vector<128x8xf32> to vector<128x8xbf16>
    %cst_47 = arith.constant dense<0.000000e+00> : vector<16x128xf32>
    %100 = tpu.matmul %98, %99, %cst_47 {dimension_numbers = #tpu.dot_dimension_numbers<[1], [1], [0], [0], [0, 0, 1, 0], [], []>} : vector<16x8xbf16>, vector<128x8xbf16>, vector<16x128xf32> -> vector<16x128xf32>
    %c-2147483648_i32_48 = arith.constant -2147483648 : i32
    %101 = vector.broadcast %c-2147483648_i32_48 : i32 to vector<128x256xi32>
    %102 = arith.select %93, %101, %84 : vector<128x256xi1>, vector<128x256xi32>
    %103 = arith.maximumf %85, %100 : vector<16x128xf32>
    %c4_i32 = arith.constant 4 : i32
    %cst_49 = arith.constant dense<-2147483648> : vector<128xi32>
    %104 = vector.multi_reduction <maxsi>, %102, %cst_49 [1] : vector<128x256xi32> to vector<128xi32>
    %105 = vector.shape_cast %104 : vector<128xi32> to vector<128x1xi32>
    %c255_i32_50 = arith.constant 255 : i32
    %106 = vector.broadcast %c255_i32_50 : i32 to vector<128x1xi32>
    %107 = arith.andi %105, %106 : vector<128x1xi32>
    %c255_i32_51 = arith.constant 255 : i32
    %108 = vector.broadcast %c255_i32_51 : i32 to vector<128x1xi32>
    %109 = arith.subi %108, %107 : vector<128x1xi32>
    %110 = vector.broadcast %109 : vector<128x1xi32> to vector<128x256xi32>
    %111 = arith.cmpi eq, %13, %110 : vector<128x256xi32>
    %112 = arith.extui %111 : vector<128x256xi1> to vector<128x256xi32>
    %113 = arith.sitofp %112 : vector<128x256xi32> to vector<128x256xf32>
    %114 = arith.truncf %113 : vector<128x256xf32> to vector<128x256xbf16>
    %cst_52 = arith.constant dense<0.000000e+00> : vector<128x8xf32>
    %115 = tpu.matmul %114, %5, %cst_52 {dimension_numbers = #tpu.dot_dimension_numbers<[1], [0], [0], [1], [0, 0, 1, 1], [], []>} : vector<128x256xbf16>, vector<256x8xbf16>, vector<128x8xf32> -> vector<128x8xf32>
    %c0_53 = arith.constant 0 : index
    %c0_54 = arith.constant 0 : index
    %116 = vector.load %arg5[%c0_53, %c0_54] : memref<16x8xbf16, #tpu.memory_space<vmem>>, vector<16x8xbf16>
    %117 = arith.truncf %115 : vector<128x8xf32> to vector<128x8xbf16>
    %cst_55 = arith.constant dense<0.000000e+00> : vector<16x128xf32>
    %118 = tpu.matmul %116, %117, %cst_55 {dimension_numbers = #tpu.dot_dimension_numbers<[1], [1], [0], [0], [0, 0, 1, 0], [], []>} : vector<16x8xbf16>, vector<128x8xbf16>, vector<16x128xf32> -> vector<16x128xf32>
    %c-2147483648_i32_56 = arith.constant -2147483648 : i32
    %119 = vector.broadcast %c-2147483648_i32_56 : i32 to vector<128x256xi32>
    %120 = arith.select %111, %119, %102 : vector<128x256xi1>, vector<128x256xi32>
    %121 = arith.maximumf %103, %118 : vector<16x128xf32>
    %c5_i32 = arith.constant 5 : i32
    %cst_57 = arith.constant dense<-2147483648> : vector<128xi32>
    %122 = vector.multi_reduction <maxsi>, %120, %cst_57 [1] : vector<128x256xi32> to vector<128xi32>
    %123 = vector.shape_cast %122 : vector<128xi32> to vector<128x1xi32>
    %c255_i32_58 = arith.constant 255 : i32
    %124 = vector.broadcast %c255_i32_58 : i32 to vector<128x1xi32>
    %125 = arith.andi %123, %124 : vector<128x1xi32>
    %c255_i32_59 = arith.constant 255 : i32
    %126 = vector.broadcast %c255_i32_59 : i32 to vector<128x1xi32>
    %127 = arith.subi %126, %125 : vector<128x1xi32>
    %128 = vector.broadcast %127 : vector<128x1xi32> to vector<128x256xi32>
    %129 = arith.cmpi eq, %13, %128 : vector<128x256xi32>
    %130 = arith.extui %129 : vector<128x256xi1> to vector<128x256xi32>
    %131 = arith.sitofp %130 : vector<128x256xi32> to vector<128x256xf32>
    %132 = arith.truncf %131 : vector<128x256xf32> to vector<128x256xbf16>
    %cst_60 = arith.constant dense<0.000000e+00> : vector<128x8xf32>
    %133 = tpu.matmul %132, %5, %cst_60 {dimension_numbers = #tpu.dot_dimension_numbers<[1], [0], [0], [1], [0, 0, 1, 1], [], []>} : vector<128x256xbf16>, vector<256x8xbf16>, vector<128x8xf32> -> vector<128x8xf32>
    %c0_61 = arith.constant 0 : index
    %c0_62 = arith.constant 0 : index
    %134 = vector.load %arg5[%c0_61, %c0_62] : memref<16x8xbf16, #tpu.memory_space<vmem>>, vector<16x8xbf16>
    %135 = arith.truncf %133 : vector<128x8xf32> to vector<128x8xbf16>
    %cst_63 = arith.constant dense<0.000000e+00> : vector<16x128xf32>
    %136 = tpu.matmul %134, %135, %cst_63 {dimension_numbers = #tpu.dot_dimension_numbers<[1], [1], [0], [0], [0, 0, 1, 0], [], []>} : vector<16x8xbf16>, vector<128x8xbf16>, vector<16x128xf32> -> vector<16x128xf32>
    %c-2147483648_i32_64 = arith.constant -2147483648 : i32
    %137 = vector.broadcast %c-2147483648_i32_64 : i32 to vector<128x256xi32>
    %138 = arith.select %129, %137, %120 : vector<128x256xi1>, vector<128x256xi32>
    %139 = arith.maximumf %121, %136 : vector<16x128xf32>
    %c6_i32 = arith.constant 6 : i32
    %cst_65 = arith.constant dense<-2147483648> : vector<128xi32>
    %140 = vector.multi_reduction <maxsi>, %138, %cst_65 [1] : vector<128x256xi32> to vector<128xi32>
    %141 = vector.shape_cast %140 : vector<128xi32> to vector<128x1xi32>
    %c255_i32_66 = arith.constant 255 : i32
    %142 = vector.broadcast %c255_i32_66 : i32 to vector<128x1xi32>
    %143 = arith.andi %141, %142 : vector<128x1xi32>
    %c255_i32_67 = arith.constant 255 : i32
    %144 = vector.broadcast %c255_i32_67 : i32 to vector<128x1xi32>
    %145 = arith.subi %144, %143 : vector<128x1xi32>
    %146 = vector.broadcast %145 : vector<128x1xi32> to vector<128x256xi32>
    %147 = arith.cmpi eq, %13, %146 : vector<128x256xi32>
    %148 = arith.extui %147 : vector<128x256xi1> to vector<128x256xi32>
    %149 = arith.sitofp %148 : vector<128x256xi32> to vector<128x256xf32>
    %150 = arith.truncf %149 : vector<128x256xf32> to vector<128x256xbf16>
    %cst_68 = arith.constant dense<0.000000e+00> : vector<128x8xf32>
    %151 = tpu.matmul %150, %5, %cst_68 {dimension_numbers = #tpu.dot_dimension_numbers<[1], [0], [0], [1], [0, 0, 1, 1], [], []>} : vector<128x256xbf16>, vector<256x8xbf16>, vector<128x8xf32> -> vector<128x8xf32>
    %c0_69 = arith.constant 0 : index
    %c0_70 = arith.constant 0 : index
    %152 = vector.load %arg5[%c0_69, %c0_70] : memref<16x8xbf16, #tpu.memory_space<vmem>>, vector<16x8xbf16>
    %153 = arith.truncf %151 : vector<128x8xf32> to vector<128x8xbf16>
    %cst_71 = arith.constant dense<0.000000e+00> : vector<16x128xf32>
    %154 = tpu.matmul %152, %153, %cst_71 {dimension_numbers = #tpu.dot_dimension_numbers<[1], [1], [0], [0], [0, 0, 1, 0], [], []>} : vector<16x8xbf16>, vector<128x8xbf16>, vector<16x128xf32> -> vector<16x128xf32>
    %c-2147483648_i32_72 = arith.constant -2147483648 : i32
    %155 = vector.broadcast %c-2147483648_i32_72 : i32 to vector<128x256xi32>
    %156 = arith.select %147, %155, %138 : vector<128x256xi1>, vector<128x256xi32>
    %157 = arith.maximumf %139, %154 : vector<16x128xf32>
    %c7_i32 = arith.constant 7 : i32
    %cst_73 = arith.constant dense<-2147483648> : vector<128xi32>
    %158 = vector.multi_reduction <maxsi>, %156, %cst_73 [1] : vector<128x256xi32> to vector<128xi32>
    %159 = vector.shape_cast %158 : vector<128xi32> to vector<128x1xi32>
    %c255_i32_74 = arith.constant 255 : i32
    %160 = vector.broadcast %c255_i32_74 : i32 to vector<128x1xi32>
    %161 = arith.andi %159, %160 : vector<128x1xi32>
    %c255_i32_75 = arith.constant 255 : i32
    %162 = vector.broadcast %c255_i32_75 : i32 to vector<128x1xi32>
    %163 = arith.subi %162, %161 : vector<128x1xi32>
    %164 = vector.broadcast %163 : vector<128x1xi32> to vector<128x256xi32>
    %165 = arith.cmpi eq, %13, %164 : vector<128x256xi32>
    %166 = arith.extui %165 : vector<128x256xi1> to vector<128x256xi32>
    %167 = arith.sitofp %166 : vector<128x256xi32> to vector<128x256xf32>
    %168 = arith.truncf %167 : vector<128x256xf32> to vector<128x256xbf16>
    %cst_76 = arith.constant dense<0.000000e+00> : vector<128x8xf32>
    %169 = tpu.matmul %168, %5, %cst_76 {dimension_numbers = #tpu.dot_dimension_numbers<[1], [0], [0], [1], [0, 0, 1, 1], [], []>} : vector<128x256xbf16>, vector<256x8xbf16>, vector<128x8xf32> -> vector<128x8xf32>
    %c0_77 = arith.constant 0 : index
    %c0_78 = arith.constant 0 : index
    %170 = vector.load %arg5[%c0_77, %c0_78] : memref<16x8xbf16, #tpu.memory_space<vmem>>, vector<16x8xbf16>
    %171 = arith.truncf %169 : vector<128x8xf32> to vector<128x8xbf16>
    %cst_79 = arith.constant dense<0.000000e+00> : vector<16x128xf32>
    %172 = tpu.matmul %170, %171, %cst_79 {dimension_numbers = #tpu.dot_dimension_numbers<[1], [1], [0], [0], [0, 0, 1, 0], [], []>} : vector<16x8xbf16>, vector<128x8xbf16>, vector<16x128xf32> -> vector<16x128xf32>
    %c-2147483648_i32_80 = arith.constant -2147483648 : i32
    %173 = vector.broadcast %c-2147483648_i32_80 : i32 to vector<128x256xi32>
    %174 = arith.select %165, %173, %156 : vector<128x256xi1>, vector<128x256xi32>
    %175 = arith.maximumf %157, %172 : vector<16x128xf32>
    %c8_i32 = arith.constant 8 : i32
    %cst_81 = arith.constant dense<-2147483648> : vector<128xi32>
    %176 = vector.multi_reduction <maxsi>, %174, %cst_81 [1] : vector<128x256xi32> to vector<128xi32>
    %177 = vector.shape_cast %176 : vector<128xi32> to vector<128x1xi32>
    %c255_i32_82 = arith.constant 255 : i32
    %178 = vector.broadcast %c255_i32_82 : i32 to vector<128x1xi32>
    %179 = arith.andi %177, %178 : vector<128x1xi32>
    %c255_i32_83 = arith.constant 255 : i32
    %180 = vector.broadcast %c255_i32_83 : i32 to vector<128x1xi32>
    %181 = arith.subi %180, %179 : vector<128x1xi32>
    %182 = vector.broadcast %181 : vector<128x1xi32> to vector<128x256xi32>
    %183 = arith.cmpi eq, %13, %182 : vector<128x256xi32>
    %184 = arith.extui %183 : vector<128x256xi1> to vector<128x256xi32>
    %185 = arith.sitofp %184 : vector<128x256xi32> to vector<128x256xf32>
    %186 = arith.truncf %185 : vector<128x256xf32> to vector<128x256xbf16>
    %cst_84 = arith.constant dense<0.000000e+00> : vector<128x8xf32>
    %187 = tpu.matmul %186, %5, %cst_84 {dimension_numbers = #tpu.dot_dimension_numbers<[1], [0], [0], [1], [0, 0, 1, 1], [], []>} : vector<128x256xbf16>, vector<256x8xbf16>, vector<128x8xf32> -> vector<128x8xf32>
    %c0_85 = arith.constant 0 : index
    %c0_86 = arith.constant 0 : index
    %188 = vector.load %arg5[%c0_85, %c0_86] : memref<16x8xbf16, #tpu.memory_space<vmem>>, vector<16x8xbf16>
    %189 = arith.truncf %187 : vector<128x8xf32> to vector<128x8xbf16>
    %cst_87 = arith.constant dense<0.000000e+00> : vector<16x128xf32>
    %190 = tpu.matmul %188, %189, %cst_87 {dimension_numbers = #tpu.dot_dimension_numbers<[1], [1], [0], [0], [0, 0, 1, 0], [], []>} : vector<16x8xbf16>, vector<128x8xbf16>, vector<16x128xf32> -> vector<16x128xf32>
    %c-2147483648_i32_88 = arith.constant -2147483648 : i32
    %191 = vector.broadcast %c-2147483648_i32_88 : i32 to vector<128x256xi32>
    %192 = arith.select %183, %191, %174 : vector<128x256xi1>, vector<128x256xi32>
    %193 = arith.maximumf %175, %190 : vector<16x128xf32>
    %194 = arith.addf %30, %193 : vector<16x128xf32>
    %cst_89 = arith.constant 0.000000e+00 : f32
    %195 = vector.broadcast %cst_89 : f32 to vector<16x128xf32>
    %196 = arith.maximumf %194, %195 : vector<16x128xf32>
    %c0_90 = arith.constant 0 : index
    %c0_91 = arith.constant 0 : index
    %c0_92 = arith.constant 0 : index
    %197 = vector.load %arg7[%c0_90, %c0_91, %c0_92] : memref<1x16x128xf32, #tpu.memory_space<vmem>>, vector<1x16x128xf32>
    %198 = vector.shape_cast %197 : vector<1x16x128xf32> to vector<16x128xf32>
    %199 = vector.shape_cast %196 : vector<16x128xf32> to vector<1x16x128xf32>
    tpu.vector_store %arg7[%c0_90, %c0_91, %c0_92], %199 {strides = array<i32>} : memref<1x16x128xf32, #tpu.memory_space<vmem>>, vector<1x16x128xf32>,
    return
  }
  func.func @transform_0(%arg0: i32, %arg1: i32) -> (i32, i32, i32) {
    %c0_i32 = arith.constant 0 : i32
    %c0_i32_0 = arith.constant 0 : i32
    %c0_i32_1 = arith.constant 0 : i32
    return %arg0, %c0_i32, %c0_i32_0 : i32, i32, i32
  }
  func.func @transform_1(%arg0: i32, %arg1: i32) -> (i32, i32, i32) {
    %c0_i32 = arith.constant 0 : i32
    %c0_i32_0 = arith.constant 0 : i32
    %c0_i32_1 = arith.constant 0 : i32
    return %arg0, %c0_i32, %c0_i32_0 : i32, i32, i32
  }
  func.func @transform_2(%arg0: i32, %arg1: i32) -> (i32, i32) {
    %c0_i32 = arith.constant 0 : i32
    %c0_i32_0 = arith.constant 0 : i32
    %c0_i32_1 = arith.constant 0 : i32
    return %c0_i32, %c0_i32_0 : i32, i32
  }
  func.func @transform_3(%arg0: i32, %arg1: i32) -> (i32, i32) {
    %c0_i32 = arith.constant 0 : i32
    %c0_i32_0 = arith.constant 0 : i32
    %c0_i32_1 = arith.constant 0 : i32
    return %c0_i32, %c0_i32_0 : i32, i32
  }
  func.func @transform_4(%arg0: i32, %arg1: i32) -> (i32, i32) {
    %c0_i32 = arith.constant 0 : i32
    %c0_i32_0 = arith.constant 0 : i32
    %c0_i32_1 = arith.constant 0 : i32
    return %c0_i32, %c0_i32_0 : i32, i32
  }
  func.func @transform_5(%arg0: i32, %arg1: i32) -> (i32, i32, i32) {
    %c0_i32 = arith.constant 0 : i32
    %c0_i32_0 = arith.constant 0 : i32
    return %arg0, %c0_i32, %arg1 : i32, i32, i32
  }
}

</mosaic_0001>

<bundles_post_ra>
// kernel: tpu_custom_call.1
= control target key start
LH: loop header
LB: loop body
LE: loop exit
PB: predicated region body
PF: predicated region fallthrough
CT: control target
= control target key end

     0   :  { %10 = vsyncpa [#allocation3], 0  ;;  %s14377_s0 = inlined_call_operand.vmem [shape: bf16[2,256,8], index: 0, kind: input, shape index: {}]   ;;  %s14378_s1 = inlined_call_operand.vmem [shape: bf16[2,256,8], index: 1, kind: input, shape index: {}]   ;;  %s14379_s2 = inlined_call_operand.vmem [shape: bf16[16,8], index: 2, kind: input, shape index: {}]   ;;  %s14380_s3 = inlined_call_operand.vmem [shape: bf16[16,8], index: 3, kind: input, shape index: {}]   ;;  %s14381_s4 = inlined_call_operand.vmem [shape: f32[16,1], index: 4, kind: input, shape index: {}]   ;;  %s14382_s5 = inlined_call_operand.hbm [shape: f32[2,16,256], index: 5, kind: output, shape index: {}]  }
   0x1   :  { %12 = vsyncpa [#allocation3 + $0x1], 0  ;;  %s7676_s18 = smov 0   ;;  %s7678_s19 = smov 0  }
   0x2   :  { %s7680_s20 = smov 0   ;;  %s7682_s21 = smov 0  }
   0x3   :  { %s7684_s22 = smov 0   ;;  %s7686_s23 = smov 0  }
   0x4   :  { %s7688_s24 = smov 0   ;;  %s7690_s25 = smov 0  }
   0x5 LB: > { %s6336_s26 = sadd.s32 4294967295, %s7639_s25   ;;  %s6337_s27 = sadd.s32 4294967294, %s7639_s25   ;;  %s7639_s25 = sphi %s7690_s25, %s18_s25   ;;  %s7635_s24 = sphi %s7688_s24, %s15529_s24   ;;  %s7631_s23 = sphi %s7686_s23, %s15528_s23   ;;  %s7627_s22 = sphi %s7684_s22, %s15527_s22   ;;  %s7623_s21 = sphi %s7682_s21, %s15526_s21   ;;  %s7619_s20 = sphi %s7680_s20, %s15525_s20   ;;  %s7615_s19 = sphi %s7678_s19, %s15524_s19   ;;  %s7611_s18 = sphi %s7676_s18, %s15523_s18  }
   0x6   : > { %s27_s28 = sadd.s32 1, %s7631_s23  ;;  %s30_s29 = sadd.s32 1, %s7635_s24 }
   0x7   : > { %p28_p0 = scmp.ge.s32.totalorder %s27_s28, 2  ;;  %p164_p1 = scmp.ne.s32.totalorder %s7619_s20, %s7615_s19 }
   0x8   : > { %p165_p2 = scmp.eq.s32.totalorder %s6336_s26, 3  ;;  %p170_p5 = scmp.ne.s32.totalorder %s7615_s19, %s7611_s18 }
   0x9   : > { %s15531_s28 = smov (%p28_p0, %s27_s28), 0  ;;  %s15533_s29 = smov (!%p28_p0, %s30_s29), %s7635_s24 }
   0xa   : > { %s150_s30 = ssub.s32 %s7631_s23, %s15531_s28  ;;  %p7727_p3 = por %p165_p2, %p164_p1 }
   0xb   : > { %p32_p4 = scmp.ge.s32.totalorder %s15533_s29, 2  ;;  %p171_p6 = scmp.eq.s32.totalorder %s6337_s27, 3 }
   0xc   : > { %p6340_p7 = scmp.ge.s32.totalorder %s7639_s25, 1  ;;  %p214_p9 = scmp.lt.s32.totalorder %s7639_s25, 5 }
   0xd   : > { %s15535_s29 = smov (%p32_p4, %s15533_s29), 0  ;;  %p7736_p8 = por %p171_p6, %p170_p5 }
   0xe   : > { %s149_s8 = ssub.s32 %s7635_s24, %s15535_s29  ;;  %s154_s9 = sadd.s32 1, %s7619_s20 }
   0xf   : > { %s151_s10 = sor.u32 %s150_s30, %s149_s8  ;;  %p215_p10 = pnand %p6340_p7, %p214_p9 }
  0x10   : > { %p152_p11 = scmp.eq.s32.totalorder %s151_s10, 0 }
  0x11   : > { %218 = sbr.rel (%p215_p10) target bundleno = 3799 (0xed7), region = 40 }
  0x12   : > { %s7745_s11 = scalar_select %p152_p11, %s7619_s20, %s154_s9  }
  0x16   : > { %p247_p12 = scmp.lt.s32.totalorder %s7627_s22, 1  ;;  %vm14436_vm0 = vcmask 64512   ;;  %s6346_s17 = sshll.u32 %s7623_s21, 7  ;;  %v651_v38 = vlaneseq }
  0x17   : > { %s7790_s26 = sshra.s32 %s6346_s17, 3  ;;  %s244_s15 = sand.u32 1, %s7615_s19  }
  0x18   : > { %s7749_s12 = scalar_select %p247_p12, %s7627_s22, 1  ;;  %v7818_v43 = vand.u32 127, %v651_v38 }
  0x19   : > { %s6347_s27 = sshll.u32 %s7790_s26, 2  ;;  %s6341_s17 = sshll.u32 %s244_s15, 4 }
  0x1a   : > { %s7188_s13 = sshll.u32 %s7749_s12, 7  ;;  %v7821_v50 = vadd.s32 128, %v7818_v43  ;;  %v7824_v56 = vsub.s32 255, %v7818_v43 }
  0x1b   : > { %s7757_s16 = scalar_lea.vmem %s14377_s0, %s7188_s13  ;;  %s8022_s10 = scalar_lea.vmem %s14378_s1, %s7188_s13 }
  0x1c   : > { %v7197_v0 = vld [vmem:[%s7757_s16 + $0x38] sm:$0xff]  ;;  %v7196_v4 = vld [vmem:[%s7757_s16 + $0x30] sm:$0xff]  ;;  %v7195_v8 = vld [vmem:[%s7757_s16 + $0x28] sm:$0xff]  ;;  %s7798_s30 = scalar_lea.vmem %s7757_s16, %s6347_s27  ;;  %v7828_v62 = vsub.s32 255, %v7821_v50  ;;  %s8440_s12 = scalar_lea.vmem %s8022_s10, %s6347_s27 }
  0x1d   : > { %v7205_v1 = vld [vmem:[%s7757_s16 + $0x78] sm:$0xff]  ;;  %v527_v2 = vsel %vm14436_vm0, %v7197_v0, 0  ;;  %v7204_v5 = vld [vmem:[%s7757_s16 + $0x70] sm:$0xff]  ;;  %v524_v6 = vsel %vm14436_vm0, %v7196_v4, 0  ;;  %v7203_v9 = vld [vmem:[%s7757_s16 + $0x68] sm:$0xff]  ;;  %v521_v10 = vsel %vm14436_vm0, %v7195_v8, 0 }
  0x1e   : > { %v551_v3 = vsel %vm14436_vm0, %v7205_v1, 0  ;;  %553 = vmatpush.bf16.xpose.msra.mxu0 %v527_v2  ;;  %v548_v7 = vsel %vm14436_vm0, %v7204_v5, 0  ;;  %v545_v11 = vsel %vm14436_vm0, %v7203_v9, 0  ;;  %v7194_v12 = vld [vmem:[%s7757_s16 + $0x20] sm:$0xff]  ;;  %v7193_v16 = vld [vmem:[%s7757_s16 + $0x18] sm:$0xff]  ;;  %v7192_v20 = vld [vmem:[%s7757_s16 + $0x10] sm:$0xff] }
  0x1f   : > { %602 = vmatpush.bf16.xpose.msra.mxu1 %v551_v3  ;;  %v7202_v13 = vld [vmem:[%s7757_s16 + $0x60] sm:$0xff]  ;;  %v518_v14 = vsel %vm14436_vm0, %v7194_v12, 0  ;;  %v7201_v17 = vld [vmem:[%s7757_s16 + $0x58] sm:$0xff]  ;;  %v515_v18 = vsel %vm14436_vm0, %v7193_v16, 0  ;;  %v7200_v21 = vld [vmem:[%s7757_s16 + $0x50] sm:$0xff]  ;;  %v512_v22 = vsel %vm14436_vm0, %v7192_v20, 0 }
  0x20   : > { %v542_v15 = vsel %vm14436_vm0, %v7202_v13, 0  ;;  %v539_v19 = vsel %vm14436_vm0, %v7201_v17, 0  ;;  %v536_v23 = vsel %vm14436_vm0, %v7200_v21, 0  ;;  %v7191_v24 = vld [vmem:[%s7757_s16 + $0x8] sm:$0xff]  ;;  %v7190_v28 = vld [vmem:[%s7757_s16] sm:$0xff]  ;;  %v7224_v34 = vld [vmem:[%s7798_s30 + $0x10] sm:$0xff] }
  0x21   : > { %v7199_v25 = vld [vmem:[%s7757_s16 + $0x48] sm:$0xff]  ;;  %v509_v26 = vsel %vm14436_vm0, %v7191_v24, 0  ;;  %v7198_v29 = vld [vmem:[%s7757_s16 + $0x40] sm:$0xff]  ;;  %v506_v30 = vsel %vm14436_vm0, %v7190_v28, 0  ;;  %v7225_v35 = vld [vmem:[%s7798_s30 + $0x18] sm:$0xff]  ;;  %s7184_s16 = sshll.u32 %s7627_s22, 2 }
  0x22   : > { %v533_v27 = vsel %vm14436_vm0, %v7199_v25, 0  ;;  %v530_v31 = vsel %vm14436_vm0, %v7198_v29, 0  ;;  %v7222_v32 = vld [vmem:[%s7798_s30] sm:$0xff]  ;;  %v7223_v33 = vld [vmem:[%s7798_s30 + $0x8] sm:$0xff]  ;;  %v7228_v60 = vld [vmem:[%s7798_s30 + $0x30] sm:$0xff]  ;;  %s6239_s26 = sadd.s32 %s7623_s21, %s7184_s16 }
  0x23   : > { %v7226_v36 = vld [vmem:[%s7798_s30 + $0x20] sm:$0xff]  ;;  %v7227_v37 = vld [vmem:[%s7798_s30 + $0x28] sm:$0xff]  ;;  %s7185_s27 = sshll.u32 %s6239_s26, 3  ;;  %s7565_s26 = scalar_lea.hbm %s14382_s5, 64 }
  0x26   : > { %554 = vmatpush.bf16.xpose.msra.mxu0 %v524_v6 }
  0x27   : > { %603 = vmatpush.bf16.xpose.msra.mxu1 %v548_v7 }
  0x2e   : > { %555 = vmatpush.bf16.xpose.msra.mxu0 %v521_v10 }
  0x2f   : > { %604 = vmatpush.bf16.xpose.msra.mxu1 %v545_v11 }
  0x36   : > { %556 = vmatpush.bf16.xpose.msra.mxu0 %v518_v14 }
  0x37   : > { %605 = vmatpush.bf16.xpose.msra.mxu1 %v542_v15 }
  0x3e   : > { %557 = vmatpush.bf16.xpose.msra.mxu0 %v515_v18 }
  0x3f   : > { %606 = vmatpush.bf16.xpose.msra.mxu1 %v539_v19 }
  0x46   : > { %558 = vmatpush.bf16.xpose.msra.mxu0 %v512_v22 }
  0x47   : > { %607 = vmatpush.bf16.xpose.msra.mxu1 %v536_v23 }
  0x4e   : > { %559 = vmatpush.bf16.xpose.msra.mxu0 %v509_v26 }
  0x4f   : > { %608 = vmatpush.bf16.xpose.msra.mxu1 %v533_v27 }
  0x56   : > { %560 = vmatpush.bf16.xpose.msra.mxu0 %v506_v30 }
  0x57   : > { %609 = vmatpush.bf16.xpose.msra.mxu1 %v530_v31 }
  0x5d   : > { %6445 = vmatmul.msk.bf16.vlgmr.msra.gmra.mxu0 %vm14436_vm0, %v7222_v32 }
  0x5e   : > { %6453 = vmatmul.msk.bf16.vlgmr.msra.gmra.mxu1 %vm14436_vm0, %v7222_v32 }
  0x6d   : > { %6446 = vmatmul.msk.bf16.gmra.mxu0 %vm14436_vm0, %v7223_v33 }
  0x6e   : > { %6454 = vmatmul.msk.bf16.gmra.mxu1 %vm14436_vm0, %v7223_v33 }
  0x7d   : > { %6447 = vmatmul.msk.bf16.gmra.mxu0 %vm14436_vm0, %v7224_v34 }
  0x7e   : > { %6455 = vmatmul.msk.bf16.gmra.mxu1 %vm14436_vm0, %v7224_v34 }
  0x8d   : > { %6448 = vmatmul.msk.bf16.gmra.mxu0 %vm14436_vm0, %v7225_v35 }
  0x8e   : > { %6456 = vmatmul.msk.bf16.gmra.mxu1 %vm14436_vm0, %v7225_v35 }
  0x9d   : > { %6449 = vmatmul.msk.bf16.gmra.mxu0 %vm14436_vm0, %v7226_v36 }
  0x9e   : > { %6457 = vmatmul.msk.bf16.gmra.mxu1 %vm14436_vm0, %v7226_v36 }
  0xad   : > { %6450 = vmatmul.msk.bf16.gmra.mxu0 %vm14436_vm0, %v7227_v37 }
  0xae   : > { %6458 = vmatmul.msk.bf16.gmra.mxu1 %vm14436_vm0, %v7227_v37 }
  0xbd   : > { %6451 = vmatmul.msk.bf16.gmra.mxu0 %vm14436_vm0, %v7228_v60 }
  0xbe   : > { %6459 = vmatmul.msk.bf16.gmra.mxu1 %vm14436_vm0, %v7228_v60 }
  0xda   : > { %v562_v39 = vpop.f32.mrf.mxu0 }
  0xdb   : > { %v611_v40 = vpop.f32.mrf.mxu1  ;;  %v6461_v41 = vclamps-f32 %v562_v39, 1.875 }
  0xdc   : > { %v6462_v42 = vclamps-f32 %v611_v40, 1.875 }
  0xdd   : > { %v718_v44 = vmul.f32 4194304.0, %v6461_v41 }
  0xde   : > { %v719_v45 = vmul.f32 4194304.0, %v6462_v42 }
  0xdf   : > { %vm7240_vm1 = vcmp.lt.s32.totalorder %v718_v44, 0  ;;  %v7241_v46 = vceil.f32 %v718_v44  ;;  %v7242_v47 = vfloor.f32 %v718_v44 }
  0xe0   : > { %vm7245_vm2 = vcmp.lt.s32.totalorder %v719_v45, 0  ;;  %v7246_v48 = vceil.f32 %v719_v45  ;;  %v7247_v49 = vfloor.f32 %v719_v45 }
  0xe1   : > { %v7243_v51 = vsel %vm7240_vm1, %v7241_v46, %v7242_v47 }
  0xe2   : > { %v7244_v52 = vcvt.f32.s32 %v7243_v51  ;;  %v7248_v53 = vsel %vm7245_vm2, %v7246_v48, %v7247_v49  ;;  %v564_v54 = vpop.f32.mrf.mxu0 }
  0xe3   : > { %v613_v55 = vpop.f32.mrf.mxu1  ;;  %v7249_v57 = vcvt.f32.s32 %v7248_v53  ;;  %v6463_v58 = vclamps-f32 %v564_v54, 1.875 }
  0xe4   : > { %v6464_v59 = vclamps-f32 %v613_v55, 1.875  ;;  %v782_v61 = vmul.u32 256, %v7244_v52 }
  0xe5   : > { %v783_v63 = vmul.u32 256, %v7249_v57  ;;  %v720_v0 = vmul.f32 4194304.0, %v6463_v58 }
  0xe6   : > { %v721_v1 = vmul.f32 4194304.0, %v6464_v59  ;;  %v7833_v2 = vadd.s32 %v7824_v56, %v782_v61 }
  0xe7   : > { %vm7250_vm3 = vcmp.lt.s32.totalorder %v720_v0, 0  ;;  %v7251_v3 = vceil.f32 %v720_v0  ;;  %v7252_v4 = vfloor.f32 %v720_v0  ;;  %v7836_v7 = vadd.s32 %v7828_v62, %v783_v63 }
  0xe8   : > { %vm7255_vm4 = vcmp.lt.s32.totalorder %v721_v1, 0  ;;  %v7256_v5 = vceil.f32 %v721_v1  ;;  %v7257_v6 = vfloor.f32 %v721_v1 }
  0xe9   : > { %v7253_v8 = vsel %vm7250_vm3, %v7251_v3, %v7252_v4  ;;  %vm948_vm5 = vcmp.gt.s32.totalorder %v7833_v2, %v7836_v7 }
  0xea   : > { %v7254_v9 = vcvt.f32.s32 %v7253_v8  ;;  %v7258_v10 = vsel %vm7255_vm4, %v7256_v5, %v7257_v6  ;;  %v567_v11 = vpop.f32.mrf.mxu0  ;;  %v7842_v16 = vsel %vm948_vm5, %v7833_v2, %v7836_v7 }
  0xeb   : > { %v616_v12 = vpop.f32.mrf.mxu1  ;;  %v7259_v13 = vcvt.f32.s32 %v7258_v10  ;;  %v6465_v14 = vclamps-f32 %v567_v11, 1.875  ;;  %v951_v17 = vshra.s32 %v7842_v16, 16 }
  0xec   : > { %v6466_v15 = vclamps-f32 %v616_v12, 1.875  ;;  %v784_v18 = vmul.u32 256, %v7254_v9 }
  0xed   : > { %v722_v19 = vmul.f32 4194304.0, %v6465_v14  ;;  %v785_v21 = vmul.u32 256, %v7259_v13  ;;  %v7845_v22 = vcvt.s32.f32 %v951_v17  ;;  %v7229_v13 = vld [vmem:[%s7798_s30 + $0x38] sm:$0xff]  ;;  %s246_s30 = scalar_lea.vmem [#allocation2], %s6341_s17 }
  0xee   : > { %v723_v20 = vmul.f32 4194304.0, %v6466_v15  ;;  %v7848_v23 = vadd.s32 %v7824_v56, %v784_v18  ;;  %6452 = vmatmul.msk.bf16.gmra.mxu0 %vm14436_vm0, %v7229_v13  ;;  %6460 = vmatmul.msk.bf16.gmra.mxu1 %vm14436_vm0, %v7229_v13  ;;  %s6242_s22 = sshll.u32 %s246_s30, 4  ;;  %s6243_s22 = int_to_ptr.vmem [resolvable:$true] %s6242_s22 }
  0xef   : > { %vm7260_vm6 = vcmp.lt.s32.totalorder %v722_v19, 0  ;;  %v7261_v24 = vceil.f32 %v722_v19  ;;  %v7262_v25 = vfloor.f32 %v722_v19  ;;  %954 = vmax.xlane.f32.xlu0 %v7845_v22  ;;  %v7852_v28 = vadd.s32 %v7828_v62, %v785_v21 }
  0xf0   : > { %vm7265_vm7 = vcmp.lt.s32.totalorder %v723_v20, 0  ;;  %v7266_v26 = vceil.f32 %v723_v20  ;;  %v7267_v27 = vfloor.f32 %v723_v20 }
  0xf1   : > { %v7263_v29 = vsel %vm7260_vm6, %v7261_v24, %v7262_v25  ;;  %vm964_vm8 = vcmp.gt.s32.totalorder %v7848_v23, %v7852_v28 }
  0xf2   : > { %v7264_v30 = vcvt.f32.s32 %v7263_v29  ;;  %v7268_v31 = vsel %vm7265_vm7, %v7266_v26, %v7267_v27  ;;  %v569_v32 = vpop.f32.mrf.mxu0  ;;  %v7858_v37 = vsel %vm964_vm8, %v7848_v23, %v7852_v28 }
  0xf3   : > { %v618_v33 = vpop.f32.mrf.mxu1  ;;  %v7269_v34 = vcvt.f32.s32 %v7268_v31  ;;  %v6467_v35 = vclamps-f32 %v569_v32, 1.875  ;;  %v967_v39 = vshra.s32 %v7858_v37, 16 }
  0xf4   : > { %v6468_v36 = vclamps-f32 %v618_v33, 1.875  ;;  %v786_v38 = vmul.u32 256, %v7264_v30 }
  0xf5   : > { %v787_v40 = vmul.u32 256, %v7269_v34  ;;  %v724_v41 = vmul.f32 4194304.0, %v6467_v35  ;;  %v7861_v44 = vcvt.s32.f32 %v967_v39 }
  0xf6   : > { %v725_v42 = vmul.f32 4194304.0, %v6468_v36  ;;  %v7864_v45 = vadd.s32 %v7824_v56, %v786_v38 }
  0xf7   : > { %vm7270_vm9 = vcmp.lt.s32.totalorder %v724_v41, 0  ;;  %v7271_v46 = vceil.f32 %v724_v41  ;;  %v7272_v47 = vfloor.f32 %v724_v41  ;;  %970 = vmax.xlane.f32.xlu0 %v7861_v44  ;;  %v7868_v51 = vadd.s32 %v7828_v62, %v787_v40 }
  0xf8   : > { %vm7275_vm10 = vcmp.lt.s32.totalorder %v725_v42, 0  ;;  %v7276_v48 = vceil.f32 %v725_v42  ;;  %v7277_v49 = vfloor.f32 %v725_v42 }
  0xf9   : > { %v7273_v52 = vsel %vm7270_vm9, %v7271_v46, %v7272_v47  ;;  %vm980_vm11 = vcmp.gt.s32.totalorder %v7864_v45, %v7868_v51 }
  0xfa   : > { %v7274_v53 = vcvt.f32.s32 %v7273_v52  ;;  %v7278_v54 = vsel %vm7275_vm10, %v7276_v48, %v7277_v49  ;;  %v572_v55 = vpop.f32.mrf.mxu0  ;;  %v7874_v61 = vsel %vm980_vm11, %v7864_v45, %v7868_v51 }
  0xfb   : > { %v621_v57 = vpop.f32.mrf.mxu1  ;;  %v7279_v58 = vcvt.f32.s32 %v7278_v54  ;;  %v6469_v59 = vclamps-f32 %v572_v55, 1.875  ;;  %v983_v63 = vshra.s32 %v7874_v61, 16 }
  0xfc   : > { %v6470_v60 = vclamps-f32 %v621_v57, 1.875  ;;  %v788_v0 = vmul.u32 256, %v7274_v53 }
  0xfd   : > { %v726_v1 = vmul.f32 4194304.0, %v6469_v59  ;;  %v789_v4 = vmul.u32 256, %v7279_v58  ;;  %v7877_v5 = vcvt.s32.f32 %v983_v63 }
  0xfe   : > { %v727_v3 = vmul.f32 4194304.0, %v6470_v60  ;;  %v7880_v6 = vadd.s32 %v7824_v56, %v788_v0 }
  0xff   : > { %vm7280_vm12 = vcmp.lt.s32.totalorder %v726_v1, 0  ;;  %v7281_v8 = vceil.f32 %v726_v1  ;;  %v7282_v9 = vfloor.f32 %v726_v1  ;;  %986 = vmax.xlane.f32.xlu1 %v7877_v5  ;;  %v7884_v12 = vadd.s32 %v7828_v62, %v789_v4 }
 0x100   : > { %vm7285_vm13 = vcmp.lt.s32.totalorder %v727_v3, 0  ;;  %v7286_v10 = vceil.f32 %v727_v3  ;;  %v7287_v11 = vfloor.f32 %v727_v3 }
 0x101   : > { %v7283_v14 = vsel %vm7280_vm12, %v7281_v8, %v7282_v9  ;;  %vm996_vm14 = vcmp.gt.s32.totalorder %v7880_v6, %v7884_v12 }
 0x102   : > { %v7284_v15 = vcvt.f32.s32 %v7283_v14  ;;  %v7288_v17 = vsel %vm7285_vm13, %v7286_v10, %v7287_v11  ;;  %v574_v18 = vpop.f32.mrf.mxu0  ;;  %v7893_v25 = vsel %vm996_vm14, %v7880_v6, %v7884_v12 }
 0x103   : > { %v623_v19 = vpop.f32.mrf.mxu1  ;;  %v7289_v20 = vcvt.f32.s32 %v7288_v17  ;;  %v6471_v21 = vclamps-f32 %v574_v18, 1.875  ;;  %v999_v27 = vshra.s32 %v7893_v25, 16 }
 0x104   : > { %v6472_v24 = vclamps-f32 %v623_v19, 1.875  ;;  %v790_v26 = vmul.u32 256, %v7284_v15 }
 0x105   : > { %v791_v29 = vmul.u32 256, %v7289_v20  ;;  %v728_v30 = vmul.f32 4194304.0, %v6471_v21  ;;  %v7896_v32 = vcvt.s32.f32 %v999_v27 }
 0x106   : > { %v729_v31 = vmul.f32 4194304.0, %v6472_v24  ;;  %v7899_v33 = vadd.s32 %v7824_v56, %v790_v26 }
 0x107   : > { %vm7290_vm15 = vcmp.lt.s32.totalorder %v728_v30, 0  ;;  %v7291_v34 = vceil.f32 %v728_v30  ;;  %v7292_v35 = vfloor.f32 %v728_v30  ;;  %1002 = vmax.xlane.f32.xlu1 %v7896_v32  ;;  %v7903_v39 = vadd.s32 %v7828_v62, %v791_v29 }
 0x108   : > { %vm7295_vm1 = vcmp.lt.s32.totalorder %v729_v31, 0  ;;  %v7296_v36 = vceil.f32 %v729_v31  ;;  %v7297_v38 = vfloor.f32 %v729_v31 }
 0x109   : > { %v7293_v40 = vsel %vm7290_vm15, %v7291_v34, %v7292_v35  ;;  %vm1012_vm2 = vcmp.gt.s32.totalorder %v7899_v33, %v7903_v39 }
 0x10a   : > { %v7294_v41 = vcvt.f32.s32 %v7293_v40  ;;  %v7298_v42 = vsel %vm7295_vm1, %v7296_v36, %v7297_v38  ;;  %v577_v46 = vpop.f32.mrf.mxu0  ;;  %v7909_v53 = vsel %vm1012_vm2, %v7899_v33, %v7903_v39 }
 0x10b   : > { %v626_v47 = vpop.f32.mrf.mxu1  ;;  %v7299_v48 = vcvt.f32.s32 %v7298_v42  ;;  %v6473_v49 = vclamps-f32 %v577_v46, 1.875  ;;  %v1015_v54 = vshra.s32 %v7909_v53, 16 }
 0x10c   : > { %v6474_v52 = vclamps-f32 %v626_v47, 1.875  ;;  %v792_v55 = vmul.u32 256, %v7294_v41 }
 0x10d   : > { %v730_v57 = vmul.f32 4194304.0, %v6473_v49  ;;  %v793_v59 = vmul.u32 256, %v7299_v48  ;;  %v7912_v60 = vcvt.s32.f32 %v1015_v54 }
 0x10e   : > { %v731_v58 = vmul.f32 4194304.0, %v6474_v52  ;;  %v7915_v63 = vadd.s32 %v7824_v56, %v792_v55 }
 0x10f   : > { %vm7300_vm3 = vcmp.lt.s32.totalorder %v730_v57, 0  ;;  %v7301_v0 = vceil.f32 %v730_v57  ;;  %v7302_v1 = vfloor.f32 %v730_v57  ;;  %1018 = vmax.xlane.f32.xlu2 %v7912_v60  ;;  %v7919_v8 = vadd.s32 %v7828_v62, %v793_v59 }
 0x110   : > { %vm7305_vm4 = vcmp.lt.s32.totalorder %v731_v58, 0  ;;  %v7306_v3 = vceil.f32 %v731_v58  ;;  %v7307_v4 = vfloor.f32 %v731_v58 }
 0x111   : > { %v7303_v9 = vsel %vm7300_vm3, %v7301_v0, %v7302_v1  ;;  %vm1028_vm5 = vcmp.gt.s32.totalorder %v7915_v63, %v7919_v8 }
 0x112   : > { %v7304_v10 = vcvt.f32.s32 %v7303_v9  ;;  %v7308_v11 = vsel %vm7305_vm4, %v7306_v3, %v7307_v4  ;;  %v7925_v14 = vsel %vm1028_vm5, %v7915_v63, %v7919_v8  ;;  %v579_v29 = vpop.f32.mrf.mxu0 }
 0x113   : > { %v7309_v13 = vcvt.f32.s32 %v7308_v11  ;;  %v1031_v17 = vshra.s32 %v7925_v14, 16  ;;  %v628_v30 = vpop.f32.mrf.mxu1  ;;  %v6475_v34 = vclamps-f32 %v579_v29, 1.875 }
 0x114   : > { %v794_v15 = vmul.u32 256, %v7304_v10  ;;  %v6476_v36 = vclamps-f32 %v628_v30, 1.875 }
 0x115   : > { %v795_v18 = vmul.u32 256, %v7309_v13  ;;  %v7928_v19 = vcvt.s32.f32 %v1031_v17  ;;  %v732_v38 = vmul.f32 4194304.0, %v6475_v34 }
 0x116   : > { %v7931_v20 = vadd.s32 %v7824_v56, %v794_v15  ;;  %v733_v40 = vmul.f32 4194304.0, %v6476_v36 }
 0x117   : > { %v7934_v21 = vadd.s32 %v7828_v62, %v795_v18  ;;  %1034 = vmax.xlane.f32.xlu2 %v7928_v19  ;;  %v7311_v41 = vceil.f32 %v732_v38  ;;  %v7312_v42 = vfloor.f32 %v732_v38  ;;  %vm7310_vm7 = vcmp.lt.s32.totalorder %v732_v38, 0 }
 0x118   : > { %v7316_v47 = vceil.f32 %v733_v40  ;;  %v7317_v48 = vfloor.f32 %v733_v40  ;;  %vm7315_vm8 = vcmp.lt.s32.totalorder %v733_v40, 0 }
 0x119   : > { %14688 = vst [vmem:[#allocation5_spill] sm:$0xff] %v7934_v21  ;;  %vm1044_vm6 = vcmp.gt.s32.totalorder %v7931_v20, %v7934_v21  ;;  %v7313_v55 = vsel %vm7310_vm7, %v7311_v41, %v7312_v42 }
 0x11a   : > { %v7941_v24 = vsel %vm1044_vm6, %v7931_v20, %v7934_v21  ;;  %v582_v31 = vpop.f32.mrf.mxu0  ;;  %v7318_v58 = vsel %vm7315_vm8, %v7316_v47, %v7317_v48  ;;  %v7314_v0 = vcvt.f32.s32 %v7313_v55 }
 0x11b   : > { %v1047_v26 = vshra.s32 %v7941_v24, 16  ;;  %v631_v35 = vpop.f32.mrf.mxu1  ;;  %v6477_v46 = vclamps-f32 %v582_v31, 1.875  ;;  %v7319_v1 = vcvt.f32.s32 %v7318_v58 }
 0x11c   : > { %v6478_v49 = vclamps-f32 %v631_v35, 1.875  ;;  %v796_v18 = vmul.u32 256, %v7314_v0 }
 0x11d   : > { %v7944_v27 = vcvt.s32.f32 %v1047_v26  ;;  %v734_v57 = vmul.f32 4194304.0, %v6477_v46  ;;  %v797_v29 = vmul.u32 256, %v7319_v1 }
 0x11e   : > { %v735_v59 = vmul.f32 4194304.0, %v6478_v49  ;;  %v7948_v35 = vadd.s32 %v7824_v56, %v796_v18 }
 0x11f   : > { %1050 = vmax.xlane.f32.xlu2 %v7944_v27  ;;  %v7321_v3 = vceil.f32 %v734_v57  ;;  %v7322_v9 = vfloor.f32 %v734_v57  ;;  %vm7320_vm9 = vcmp.lt.s32.totalorder %v734_v57, 0  ;;  %v7951_v41 = vadd.s32 %v7828_v62, %v797_v29 }
 0x120   : > { %v7326_v10 = vceil.f32 %v735_v59  ;;  %v7327_v11 = vfloor.f32 %v735_v59  ;;  %vm7325_vm10 = vcmp.lt.s32.totalorder %v735_v59, 0  ;;  %14689 = vst [vmem:[#allocation6_spill] sm:$0xff] %v7948_v35 }
 0x121   : > { %v7323_v30 = vsel %vm7320_vm9, %v7321_v3, %v7322_v9  ;;  %14690 = vst [vmem:[#allocation7_spill] sm:$0xff] %v7951_v41  ;;  %vm1060_vm13 = vcmp.gt.s32.totalorder %v7948_v35, %v7951_v41 }
 0x122   : > { %v584_v52 = vpop.f32.mrf.mxu0  ;;  %v7328_v31 = vsel %vm7325_vm10, %v7326_v10, %v7327_v11  ;;  %v7324_v36 = vcvt.f32.s32 %v7323_v30  ;;  %v7958_v9 = vsel %vm1060_vm13, %v7948_v35, %v7951_v41 }
 0x123   : > { %v633_v54 = vpop.f32.mrf.mxu1  ;;  %v6479_v4 = vclamps-f32 %v584_v52, 1.875  ;;  %v7329_v38 = vcvt.f32.s32 %v7328_v31  ;;  %v950_v52 = vand.u32 65535, %v7842_v16 }
 0x124   : > { %v6480_v13 = vclamps-f32 %v633_v54, 1.875  ;;  %v798_v55 = vmul.u32 256, %v7324_v36  ;;  %v966_v36 = vand.u32 65535, %v7858_v37 }
 0x125   : > { %v736_v26 = vmul.f32 4194304.0, %v6479_v4  ;;  %v799_v57 = vmul.u32 256, %v7329_v38  ;;  %v952_v4 = vcvt.s32.f32 %v950_v52  ;;  %v1063_v38 = vshra.s32 %v7958_v9, 16 }
 0x126   : > { %v737_v34 = vmul.f32 4194304.0, %v6480_v13  ;;  %v7961_v16 = vadd.s32 %v7824_v56, %v798_v55 }
 0x127   : > { %v7331_v40 = vceil.f32 %v736_v26  ;;  %v7332_v42 = vfloor.f32 %v736_v26  ;;  %vm7330_vm11 = vcmp.lt.s32.totalorder %v736_v26, 0  ;;  %v7964_v13 = vadd.s32 %v7828_v62, %v799_v57 }
 0x128   : > { %v7336_v46 = vceil.f32 %v737_v34  ;;  %v7337_v47 = vfloor.f32 %v737_v34  ;;  %vm7335_vm12 = vcmp.lt.s32.totalorder %v737_v34, 0  ;;  %14691 = vst [vmem:[#allocation8_spill] sm:$0xff] %v7961_v16  ;;  %v7974_v55 = vcvt.s32.f32 %v1063_v38 }
 0x129   : > { %v7333_v59 = vsel %vm7330_vm11, %v7331_v40, %v7332_v42  ;;  %14692 = vst [vmem:[#allocation9_spill] sm:$0xff] %v7964_v13  ;;  %vm1076_vm2 = vcmp.gt.s32.totalorder %v7961_v16, %v7964_v13 }
 0x12a   : > { %v587_v15 = vpop.f32.mrf.mxu0  ;;  %v7338_v0 = vsel %vm7335_vm12, %v7336_v46, %v7337_v47  ;;  %v7334_v10 = vcvt.f32.s32 %v7333_v59  ;;  %v7978_v37 = vsel %vm1076_vm2, %v7961_v16, %v7964_v13  ;;  %v1062_v13 = vand.u32 65535, %v7958_v9 }
 0x12b   : > { %v636_v17 = vpop.f32.mrf.mxu1  ;;  %v6481_v48 = vclamps-f32 %v587_v15, 1.875  ;;  %v7339_v11 = vcvt.f32.s32 %v7338_v0 }
 0x12c   : > { %v6482_v49 = vclamps-f32 %v636_v17, 1.875  ;;  %v800_v40 = vmul.u32 256, %v7334_v10 }
 0x12d   : > { %v738_v1 = vmul.f32 4194304.0, %v6481_v48  ;;  %v801_v47 = vmul.u32 256, %v7339_v11 }
 0x12e   : > { %v739_v3 = vmul.f32 4194304.0, %v6482_v49 }
 0x12f   : > { %vm7340_vm14 = vcmp.lt.s32.totalorder %v738_v1, 0  ;;  %v7341_v17 = vceil.f32 %v738_v1  ;;  %v7342_v18 = vfloor.f32 %v738_v1 }
 0x130   : > { %v7346_v29 = vceil.f32 %v739_v3  ;;  %v7347_v30 = vfloor.f32 %v739_v3  ;;  %vm7345_vm1 = vcmp.lt.s32.totalorder %v739_v3, 0  ;;  %v7986_v3 = vadd.s32 %v7828_v62, %v801_v47 }
 0x131   : > { %v7343_v42 = vsel %vm7340_vm14, %v7341_v17, %v7342_v18 }
 0x132   : > { %v589_v54 = vpop.f32.mrf.mxu0  ;;  %v7348_v49 = vsel %vm7345_vm1, %v7346_v29, %v7347_v30  ;;  %v7344_v57 = vcvt.f32.s32 %v7343_v42  ;;  %14694 = vst [vmem:[#allocation11_spill] sm:$0xff] %v7986_v3  ;;  %v982_v30 = vand.u32 65535, %v7874_v61 }
 0x133   : > { %v638_v58 = vpop.f32.mrf.mxu1  ;;  %v6483_v26 = vclamps-f32 %v589_v54, 1.875  ;;  %v968_v54 = vcvt.s32.f32 %v966_v36  ;;  %v7349_v0 = vcvt.f32.s32 %v7348_v49 }
 0x134   : > { %v6484_v31 = vclamps-f32 %v638_v58, 1.875  ;;  %v7981_v58 = vadd.s32 %v7824_v56, %v800_v40  ;;  %v802_v29 = vmul.u32 256, %v7344_v57 }
 0x135   : > { %v740_v46 = vmul.f32 4194304.0, %v6483_v26 }
 0x136   : > { %14693 = vst [vmem:[#allocation10_spill] sm:$0xff] %v7981_v58  ;;  %vm1092_vm6 = vcmp.gt.s32.totalorder %v7981_v58, %v7986_v3  ;;  %v8002_v61 = vadd.s32 %v7824_v56, %v802_v29 }
 0x137   : > { %v7351_v1 = vceil.f32 %v740_v46  ;;  %v7352_v10 = vfloor.f32 %v740_v46  ;;  %vm7350_vm4 = vcmp.lt.s32.totalorder %v740_v46, 0  ;;  %v984_v46 = vcvt.s32.f32 %v982_v30 }
 0x138   : > { %14695 = vst [vmem:[#allocation12_spill] sm:$0xff] %v8002_v61 }
 0x139   : > { %v7353_v36 = vsel %vm7350_vm4, %v7351_v1, %v7352_v10 }
 0x13a   : > { %v592_v48 = vpop.f32.mrf.mxu0 }
 0x13b   : > { %v641_v52 = vpop.f32.mrf.mxu1 }
 0x13c   : > { %v6486_v26 = vclamps-f32 %v641_v52, 1.875  ;;  %v7354_v52 = vcvt.f32.s32 %v7353_v36 }
 0x13e   : > { %v743_v40 = vmul.f32 4194304.0, %v6486_v26  ;;  %v998_v26 = vand.u32 65535, %v7893_v25  ;;  %v804_v30 = vmul.u32 256, %v7354_v52 }
 0x140   : > { %vm7365_vm9 = vcmp.lt.s32.totalorder %v743_v40, 0 }
 0x142   : > { %v594_v42 = vpop.f32.mrf.mxu0 }
 0x143   : > { %v643_v49 = vpop.f32.mrf.mxu1 }
 0x162   : > { %v7966_v15 = vpop.xlane.xlu0 %954 }
 0x163   : > { %vm956_vm15 = vcmp.eq.f32.partialorder %v7845_v22, %v7966_v15  ;;  %v741_v22 = vmul.f32 4194304.0, %v6484_v31  ;;  %v1079_v31 = vshra.s32 %v7978_v37, 16 }
 0x164   : > { %v957_v34 = vsel %vm956_vm15, %v952_v4, -inf  ;;  %v6485_v4 = vclamps-f32 %v592_v48, 1.875  ;;  %v7999_v48 = vsel %vm1092_vm6, %v7981_v58, %v7986_v3 }
 0x165   : > { %958 = vmax.xlane.f32.xlu0 %v957_v34  ;;  %v7356_v11 = vceil.f32 %v741_v22  ;;  %v7357_v17 = vfloor.f32 %v741_v22  ;;  %vm7355_vm5 = vcmp.lt.s32.totalorder %v741_v22, 0  ;;  %v803_v34 = vmul.u32 256, %v7349_v0 }
 0x166   : > { %v7995_v47 = vcvt.s32.f32 %v1079_v31  ;;  %v1095_v29 = vshra.s32 %v7999_v48, 16 }
 0x167   : > { %v7358_v38 = vsel %vm7355_vm5, %v7356_v11, %v7357_v17  ;;  %v8007_v57 = vadd.s32 %v7828_v62, %v803_v34  ;;  %v7366_v11 = vceil.f32 %v743_v40  ;;  %v7367_v17 = vfloor.f32 %v743_v40 }
 0x168   : > { %v8026_v40 = vcvt.s32.f32 %v1095_v29  ;;  %v1014_v29 = vand.u32 65535, %v7909_v53 }
 0x169   : > { %14696 = vst [vmem:[#allocation13_spill] sm:$0xff] %v8007_v57  ;;  %vm1108_vm10 = vcmp.gt.s32.totalorder %v8002_v61, %v8007_v57  ;;  %v7368_v36 = vsel %vm7365_vm9, %v7366_v11, %v7367_v17 }
 0x16a   : > { %v7983_v59 = vpop.xlane.xlu0 %970  ;;  %v7369_v52 = vcvt.f32.s32 %v7368_v36 }
 0x16b   : > { %vm972_vm3 = vcmp.eq.f32.partialorder %v7861_v44, %v7983_v59  ;;  %v742_v44 = vmul.f32 4194304.0, %v6485_v4  ;;  %v6487_v4 = vclamps-f32 %v594_v42, 1.875  ;;  %v1000_v42 = vcvt.s32.f32 %v998_v26 }
 0x16c   : > { %v973_v18 = vsel %vm972_vm3, %v968_v54, -inf  ;;  %v7359_v54 = vcvt.f32.s32 %v7358_v38 }
 0x16d   : > { %974 = vmax.xlane.f32.xlu1 %v973_v18  ;;  %1066 = vmax.xlane.f32.xlu0 %v7974_v55  ;;  %vm7360_vm7 = vcmp.lt.s32.totalorder %v742_v44, 0  ;;  %v7361_v0 = vceil.f32 %v742_v44  ;;  %v7362_v1 = vfloor.f32 %v742_v44  ;;  %v6488_v18 = vclamps-f32 %v643_v49, 1.875 }
 0x16e   : > { %v805_v34 = vmul.u32 256, %v7359_v54  ;;  %v8033_v49 = vadd.s32 %v7824_v56, %v804_v30  ;;  %v807_v30 = vmul.u32 256, %v7369_v52 }
 0x16f   : > { %v7363_v31 = vsel %vm7360_vm7, %v7361_v0, %v7362_v1  ;;  %v745_v38 = vmul.f32 4194304.0, %v6488_v18  ;;  %v7213_v18 = vld [vmem:[%s8022_s10 + $0x38] sm:$0xff] }
 0x170   : > { %v7364_v44 = vcvt.f32.s32 %v7363_v31  ;;  %14697 = vst [vmem:[#allocation14_spill] sm:$0xff] %v8033_v49  ;;  %v8038_v0 = vadd.s32 %v7828_v62, %v805_v34  ;;  %1444 = vmatpush.bf16.msra.mxu3 %v7213_v18  ;;  %v7212_v31 = vld [vmem:[%s8022_s10 + $0x30] sm:$0xff]  ;;  %2030 = vmatpush.bf16.msrb.mxu0 %v7213_v18 }
 0x171   : > { %v7377_v11 = vfloor.f32 %v745_v38  ;;  %vm7375_vm13 = vcmp.lt.s32.totalorder %v745_v38, 0  ;;  %v7220_v34 = vld [vmem:[%s8022_s10 + $0x70] sm:$0xff] }
 0x172   : > { %v8004_v22 = vpop.xlane.xlu1 %986  ;;  %14698 = vst [vmem:[#allocation15_spill] sm:$0xff] %v8038_v0  ;;  %v806_v26 = vmul.u32 256, %v7364_v44  ;;  %vm1124_vm14 = vcmp.gt.s32.totalorder %v8033_v49, %v8038_v0  ;;  %v1016_v44 = vcvt.s32.f32 %v1014_v29  ;;  %v8076_v29 = vld [vmem:[%s8022_s10 + $0x20] sm:$0xff] }
 0x173   : > { %vm988_vm8 = vcmp.eq.f32.partialorder %v7877_v5, %v8004_v22  ;;  %v744_v5 = vmul.f32 4194304.0, %v6487_v4  ;;  %v8055_v53 = vsel %vm1124_vm14, %v8033_v49, %v8038_v0  ;;  %14702 = vst [vmem:[#allocation19_spill] sm:$0xff] %v8076_v29 }
 0x174   : > { %v989_v10 = vsel %vm988_vm8, %v984_v46, -inf  ;;  %v8030_v46 = vsel %vm1108_vm10, %v8002_v61, %v8007_v57  ;;  %v8058_v52 = vadd.s32 %v7824_v56, %v806_v26  ;;  %1445 = vmatpush.bf16.msra.mxu3 %v7212_v31  ;;  %2031 = vmatpush.bf16.msrb.mxu0 %v7212_v31 }
 0x175   : > { %990 = vmax.xlane.f32.xlu1 %v989_v10  ;;  %1082 = vmax.xlane.f32.xlu0 %v7995_v47  ;;  %v7371_v54 = vceil.f32 %v744_v5  ;;  %v7372_v4 = vfloor.f32 %v744_v5  ;;  %v7376_v10 = vceil.f32 %v745_v38  ;;  %v1111_v17 = vshra.s32 %v8030_v46, 16 }
 0x176   : > { %vm7370_vm12 = vcmp.lt.s32.totalorder %v744_v5, 0  ;;  %14699 = vst [vmem:[#allocation16_spill] sm:$0xff] %v8058_v52 }
 0x177   : > { %v7373_v36 = vsel %vm7370_vm12, %v7371_v54, %v7372_v4  ;;  %v8049_v5 = vcvt.s32.f32 %v1111_v17  ;;  %v8063_v54 = vadd.s32 %v7828_v62, %v807_v30  ;;  %v7211_v4 = vld [vmem:[%s8022_s10 + $0x28] sm:$0xff]  ;;  %v1127_v17 = vshra.s32 %v8055_v53, 16  ;;  %v8079_v30 = vld [vmem:[%s8022_s10 + $0x60] sm:$0xff] }
 0x178   : > { %1446 = vmatpush.bf16.msra.mxu3 %v7211_v4  ;;  %14703 = vst [vmem:[#allocation20_spill] sm:$0xff] %v8079_v30  ;;  %2032 = vmatpush.bf16.msrb.mxu0 %v7211_v4 }
 0x179   : > { %14700 = vst [vmem:[#allocation17_spill] sm:$0xff] %v8063_v54  ;;  %vm1140_vm1 = vcmp.gt.s32.totalorder %v8058_v52, %v8063_v54  ;;  %v8081_v31 = vcvt.s32.f32 %v1127_v17 }
 0x17a   : > { %v8024_v25 = vpop.xlane.xlu1 %1002 }
 0x17b   : > { %vm1004_vm11 = vcmp.eq.f32.partialorder %v7896_v32, %v8024_v25  ;;  %v7221_v32 = vld [vmem:[%s8022_s10 + $0x78] sm:$0xff] }
 0x17c   : > { %v1005_v1 = vsel %vm1004_vm11, %v1000_v42, -inf  ;;  %1493 = vmatpush.bf16.msra.mxu2 %v7221_v32  ;;  %v7378_v42 = vsel %vm7375_vm13, %v7376_v10, %v7377_v11  ;;  %v8067_v10 = vld [vmem:[%s8022_s10 + $0x68] sm:$0xff]  ;;  %1447 = vmatpush.bf16.msra.mxu3 %v8076_v29 }
 0x17d   : > { %1006 = vmax.xlane.f32.xlu2 %v1005_v1  ;;  %1098 = vmax.xlane.f32.xlu1 %v8026_v40  ;;  %v7374_v1 = vcvt.f32.s32 %v7373_v36  ;;  %v7379_v32 = vcvt.f32.s32 %v7378_v42  ;;  %14701 = vst [vmem:[#allocation18_spill] sm:$0xff] %v8067_v10 }
 0x17e   : > { %2033 = vmatpush.bf16.msrb.mxu0 %v8076_v29  ;;  %v8147_v29 = vld [vmem:[%s8022_s10] sm:$0xff] }
 0x17f   : > { %v808_v18 = vmul.u32 256, %v7374_v1  ;;  %v809_v26 = vmul.u32 256, %v7379_v32  ;;  %v1046_v32 = vand.u32 65535, %v7941_v24  ;;  %14712 = vst [vmem:[#allocation29_spill] sm:$0xff] %v8147_v29 }
 0x180   : > { %1494 = vmatpush.bf16.msra.mxu2 %v7220_v34 }
 0x181   : > { %v8092_v42 = vadd.s32 %v7824_v56, %v808_v18  ;;  %v1048_v17 = vcvt.s32.f32 %v1046_v32  ;;  %v597_v32 = vpop.f32.mrf.mxu0 }
 0x182   : > { %v8051_v38 = vpop.xlane.xlu2 %1018 }
 0x183   : > { %vm1020_vm15 = vcmp.eq.f32.partialorder %v7912_v60, %v8051_v38  ;;  %v1030_v60 = vand.u32 65535, %v7925_v14  ;;  %v8087_v14 = vsel %vm1140_vm1, %v8058_v52, %v8063_v54  ;;  %14704 = vst [vmem:[#allocation21_spill] sm:$0xff] %v8092_v42  ;;  %v961_v54 = vcvt.f32.s32 %v7966_v15 }
 0x184   : > { %v1021_v11 = vsel %vm1020_vm15, %v1016_v44, -inf  ;;  %1495 = vmatpush.bf16.msra.mxu2 %v8067_v10  ;;  %v8095_v44 = vadd.s32 %v7828_v62, %v809_v26  ;;  %v6489_v10 = vclamps-f32 %v597_v32, 1.875 }
 0x185   : > { %1022 = vmax.xlane.f32.xlu2 %v1021_v11  ;;  %1114 = vmax.xlane.f32.xlu1 %v8049_v5  ;;  %v1032_v36 = vcvt.s32.f32 %v1030_v60 }
 0x186   : > { %14705 = vst [vmem:[#allocation22_spill] sm:$0xff] %v8095_v44  ;;  %vm1156_vm3 = vcmp.gt.s32.totalorder %v8092_v42, %v8095_v44  ;;  %v746_v52 = vmul.f32 4194304.0, %v6489_v10 }
 0x187   : > { %v8111_v60 = vsel %vm1156_vm3, %v8092_v42, %v8095_v44 }
 0x188   : > { %1496 = vmatpush.bf16.msra.mxu2 %v8079_v30  ;;  %v1159_v24 = vshra.s32 %v8111_v60, 16  ;;  %vm7380_vm7 = vcmp.lt.s32.totalorder %v746_v52, 0  ;;  %v7382_v3 = vfloor.f32 %v746_v52 }
 0x18a   : > { %v8083_v34 = vpop.xlane.xlu2 %1034  ;;  %v8117_v26 = vcvt.s32.f32 %v1159_v24  ;;  %v8142_v24 = vld [vmem:[%s8022_s10 + $0x48] sm:$0xff] }
 0x18b   : > { %vm1036_vm2 = vcmp.eq.f32.partialorder %v7928_v19, %v8083_v34  ;;  %v1143_v19 = vshra.s32 %v8087_v14, 16  ;;  %14711 = vst [vmem:[#allocation28_spill] sm:$0xff] %v8142_v24 }
 0x18c   : > { %v1037_v1 = vsel %vm1036_vm2, %v1032_v36, -inf  ;;  %v8121_v36 = vld [vmem:[%s8022_s10 + $0x18] sm:$0xff] }
 0x18d   : > { %1038 = vmax.xlane.f32.xlu0 %v1037_v1  ;;  %1130 = vmax.xlane.f32.xlu2 %v8081_v31  ;;  %v8105_v4 = vcvt.s32.f32 %v1143_v19  ;;  %14706 = vst [vmem:[#allocation23_spill] sm:$0xff] %v8121_v36  ;;  %v8124_v1 = vld [vmem:[%s8022_s10 + $0x58] sm:$0xff]  ;;  %v8132_v19 = vld [vmem:[%s8022_s10 + $0x50] sm:$0xff] }
 0x18e   : > { %14707 = vst [vmem:[#allocation24_spill] sm:$0xff] %v8124_v1  ;;  %1448 = vmatpush.bf16.msra.mxu3 %v8121_v36  ;;  %1497 = vmatpush.bf16.msra.mxu2 %v8124_v1  ;;  %v8150_v1 = vld [vmem:[%s8022_s10 + $0x40] sm:$0xff] }
 0x18f   : > { %14709 = vst [vmem:[#allocation26_spill] sm:$0xff] %v8132_v19  ;;  %2034 = vmatpush.bf16.msrb.mxu0 %v8121_v36 }
 0x190   : > { %14713 = vst [vmem:[#allocation30_spill] sm:$0xff] %v8150_v1 }
 0x192   : > { %v8107_v11 = vpop.xlane.xlu2 %1050  ;;  %1498 = vmatpush.bf16.msra.mxu2 %v8132_v19 }
 0x193   : > { %vm1052_vm4 = vcmp.eq.f32.partialorder %v7944_v27, %v8107_v11  ;;  %v8129_v27 = vld [vmem:[%s8022_s10 + $0x10] sm:$0xff] }
 0x194   : > { %v1053_v18 = vsel %vm1052_vm4, %v1048_v17, -inf  ;;  %14708 = vst [vmem:[#allocation25_spill] sm:$0xff] %v8129_v27  ;;  %v646_v17 = vpop.f32.mrf.mxu1  ;;  %1449 = vmatpush.bf16.msra.mxu3 %v8129_v27  ;;  %2035 = vmatpush.bf16.msrb.mxu0 %v8129_v27  ;;  %v599_v27 = vpop.f32.mrf.mxu0 }
 0x195   : > { %1054 = vmax.xlane.f32.xlu0 %v1053_v18  ;;  %1146 = vmax.xlane.f32.xlu2 %v8105_v4  ;;  %v8139_v18 = vld [vmem:[%s8022_s10 + $0x8] sm:$0xff]  ;;  %v6491_v19 = vclamps-f32 %v599_v27, 1.875  ;;  %v6490_v44 = vclamps-f32 %v646_v17, 1.875 }
 0x196   : > { %14710 = vst [vmem:[#allocation27_spill] sm:$0xff] %v8139_v18  ;;  %1499 = vmatpush.bf16.msra.mxu2 %v8142_v24 }
 0x197   : > { %v748_v42 = vmul.f32 4194304.0, %v6491_v19  ;;  %v747_v49 = vmul.f32 4194304.0, %v6490_v44 }
 0x198   : > { %1450 = vmatpush.bf16.msra.mxu3 %v8139_v18  ;;  %2036 = vmatpush.bf16.msrb.mxu0 %v8139_v18 }
 0x199   : > { %v7391_v0 = vceil.f32 %v748_v42  ;;  %v7392_v18 = vfloor.f32 %v748_v42  ;;  %vm7390_vm5 = vcmp.lt.s32.totalorder %v748_v42, 0  ;;  %v7386_v27 = vceil.f32 %v747_v49 }
 0x19a   : > { %1500 = vmatpush.bf16.msra.mxu2 %v8150_v1  ;;  %v962_v1 = vshll.u32 %v961_v54, 16  ;;  %v7387_v32 = vfloor.f32 %v747_v49  ;;  %vm7385_vm8 = vcmp.lt.s32.totalorder %v747_v49, 0  ;;  %v977_v42 = vcvt.f32.s32 %v7983_v59 }
 0x19b   : > { %v7393_v19 = vsel %vm7390_vm5, %v7391_v0, %v7392_v18 }
 0x19c   : > { %1451 = vmatpush.bf16.msra.mxu3 %v8147_v29  ;;  %2037 = vmatpush.bf16.msrb.mxu0 %v8147_v29  ;;  %v648_v36 = vpop.f32.mrf.mxu1  ;;  %v7381_v29 = vceil.f32 %v746_v52  ;;  %v7394_v44 = vcvt.f32.s32 %v7393_v19 }
 0x19d   : > { %1162 = vmax.xlane.f32.xlu0 %v8117_v26  ;;  %v6492_v30 = vclamps-f32 %v648_v36, 1.875 }
 0x19e   : > { %v7383_v10 = vsel %vm7380_vm7, %v7381_v29, %v7382_v3  ;;  %v812_v0 = vmul.u32 256, %v7394_v44  ;;  %v1078_v3 = vand.u32 65535, %v7978_v37 }
 0x19f   : > { %v749_v24 = vmul.f32 4194304.0, %v6492_v30  ;;  %v7384_v16 = vcvt.f32.s32 %v7383_v10 }
 0x1a1   : > { %v7396_v61 = vceil.f32 %v749_v24  ;;  %v7397_v57 = vfloor.f32 %v749_v24  ;;  %vm7395_vm6 = vcmp.lt.s32.totalorder %v749_v24, 0  ;;  %v7388_v24 = vsel %vm7385_vm8, %v7386_v27, %v7387_v32 }
 0x1a2   : > { %v7389_v52 = vcvt.f32.s32 %v7388_v24  ;;  %v1080_v27 = vcvt.s32.f32 %v1078_v3 }
 0x1a3   : > { %v7398_v30 = vsel %vm7395_vm6, %v7396_v61, %v7397_v57  ;;  %v978_v57 = vshll.u32 %v977_v42, 16 }
 0x1a4   : > { %v7399_v58 = vcvt.f32.s32 %v7398_v30 }
 0x1a6   : > { %v813_v61 = vmul.u32 256, %v7399_v58  ;;  %v810_v58 = vmul.u32 256, %v7384_v16 }
 0x1a8   : > { %v8195_v19 = vadd.s32 %v7824_v56, %v810_v58 }
 0x1d8   : > { %v959_v36 = vpop.xlane.xlu0 %958 }
 0x1d9   : > { %v960_v17 = vcvt.f32.s32 %v959_v36  ;;  %v1064_v36 = vcvt.s32.f32 %v1062_v13  ;;  %v993_v13 = vcvt.f32.s32 %v8004_v22 }
 0x1db   : > { %v963_v15 = vadd.s32 %v962_v1, %v960_v17  ;;  %v8183_v1 = vadd.s32 %v7828_v62, %v813_v61  ;;  %v994_v18 = vshll.u32 %v993_v13, 16 }
 0x1dd   : > { %v1204_v54 = vand.u32 255, %v963_v15 }
 0x1df   : > { %v1220_v41 = vsub.s32 255, %v1204_v54 }
 0x1e0   : > { %v975_v35 = vpop.xlane.xlu1 %974  ;;  %v8159_v21 = vpop.xlane.xlu0 %1066 }
 0x1e1   : > { %v976_v49 = vcvt.f32.s32 %v975_v35  ;;  %vm1068_vm9 = vcmp.eq.f32.partialorder %v7974_v55, %v8159_v21  ;;  %vm1236_vm10 = vcmp.eq.s32.totalorder %v7818_v43, %v1220_v41  ;;  %vm1237_vm11 = vcmp.eq.s32.totalorder %v7821_v50, %v1220_v41 }
 0x1e2   : > { %v1069_v9 = vsel %vm1068_vm9, %v1064_v36, -inf  ;;  %v8167_v59 = vsel %vm1236_vm10, 2147483648, %v7833_v2  ;;  %v8175_v35 = vsel %vm1237_vm11, 2147483648, %v7836_v7  ;;  %v811_v55 = vmul.u32 256, %v7389_v52 }
 0x1e3   : > { %v979_v29 = vadd.s32 %v978_v57, %v976_v49  ;;  %1070 = vmax.xlane.f32.xlu1 %v1069_v9  ;;  %vm1630_vm12 = vcmp.gt.s32.totalorder %v8167_v59, %v8175_v35  ;;  %v8180_v2 = vadd.s32 %v7824_v56, %v812_v0  ;;  %v1094_v41 = vand.u32 65535, %v7999_v48 }
 0x1e4   : > { %v8187_v16 = vsel %vm1630_vm12, %v8167_v59, %v8175_v35  ;;  %v8198_v30 = vadd.s32 %v7828_v62, %v811_v55  ;;  %v14409_v62 = vmov 1.0|1.0  }
 0x1e5   : > { %v1205_v37 = vand.u32 255, %v979_v29  ;;  %v1633_v22 = vshra.s32 %v8187_v16, 16  ;;  %vm1188_vm13 = vcmp.gt.s32.totalorder %v8180_v2, %v8183_v1  ;;  %v1096_v9 = vcvt.s32.f32 %v1094_v41 }
 0x1e6   : > { %vm1172_vm5 = vcmp.gt.s32.totalorder %v8195_v19, %v8198_v30 }
 0x1e7   : > { %v1221_v7 = vsub.s32 255, %v1205_v37  ;;  %v8202_v10 = vcvt.s32.f32 %v1633_v22  ;;  %v8244_v48 = vsel %vm1172_vm5, %v8195_v19, %v8198_v30  ;;  %v1025_v22 = vcvt.f32.s32 %v8051_v38 }
 0x1e8   : > { %v991_v32 = vpop.xlane.xlu1 %990  ;;  %v8190_v17 = vpop.xlane.xlu0 %1082  ;;  %v1175_v37 = vshra.s32 %v8244_v48, 16 }
 0x1e9   : > { %v992_v15 = vcvt.f32.s32 %v991_v32  ;;  %vm1238_vm14 = vcmp.eq.s32.totalorder %v7818_v43, %v1221_v7  ;;  %vm1239_vm15 = vcmp.eq.s32.totalorder %v7821_v50, %v1221_v7  ;;  %vm1084_vm2 = vcmp.eq.f32.partialorder %v7995_v47, %v8190_v17 }
 0x1ea   : > { %vm6626_vm1 = vmpackc.low %vm1238_vm14, %vm1236_vm10  ;;  %v8207_v44 = vsel %vm1238_vm14, 2147483648, %v7848_v23  ;;  %v8210_v42 = vsel %vm1239_vm15, 2147483648, %v7852_v28  ;;  %v1085_v24 = vsel %vm1084_vm2, %v1080_v27, -inf  ;;  %v8225_v23 = vsel %vm1188_vm13, %v8180_v2, %v8183_v1 }
 0x1eb   : > { %v995_v56 = vadd.s32 %v994_v18, %v992_v15  ;;  %6627 = vmatmul.msk.bf16.vlgmr.msra.gmra.mxu3 %vm6626_vm1, %v14409_v62  ;;  %vm6642_vm3 = vmpackc.low %vm1239_vm15, %vm1237_vm11  ;;  %1636 = vmax.xlane.f32.xlu1 %v8202_v10  ;;  %vm1646_vm4 = vcmp.gt.s32.totalorder %v8207_v44, %v8210_v42  ;;  %v1009_v47 = vcvt.f32.s32 %v8024_v25  ;;  %v1191_v36 = vshra.s32 %v8225_v23, 16 }
 0x1ec   : > { %6643 = vmatmul.msk.bf16.vlgmr.msra.gmra.mxu2 %vm6642_vm3, %v14409_v62  ;;  %1086 = vmax.xlane.f32.xlu0 %v1085_v24  ;;  %v8230_v28 = vsel %vm1646_vm4, %v8207_v44, %v8210_v42  ;;  %v8274_v32 = vcvt.s32.f32 %v1175_v37  ;;  %v1026_v15 = vshll.u32 %v1025_v22, 16 }
 0x1ed   : > { %v1206_v54 = vand.u32 255, %v995_v56  ;;  %v1649_v52 = vshra.s32 %v8230_v28, 16  ;;  %v1010_v25 = vshll.u32 %v1009_v47, 16  ;;  %v8250_v58 = vcvt.s32.f32 %v1191_v36 }
 0x1ef   : > { %v8238_v0 = vcvt.s32.f32 %v1649_v52  ;;  %v1222_v61 = vsub.s32 255, %v1206_v54 }
 0x1f0   : > { %v1007_v57 = vpop.xlane.xlu2 %1006  ;;  %v8240_v49 = vpop.xlane.xlu1 %1098 }
 0x1f1   : > { %v1008_v3 = vcvt.f32.s32 %v1007_v57  ;;  %1652 = vmax.xlane.f32.xlu2 %v8238_v0  ;;  %vm1100_vm6 = vcmp.eq.f32.partialorder %v8026_v40, %v8240_v49  ;;  %vm1240_vm7 = vcmp.eq.s32.totalorder %v7818_v43, %v1222_v61  ;;  %vm1241_vm8 = vcmp.eq.s32.totalorder %v7821_v50, %v1222_v61 }
 0x1f2   : > { %v1101_v13 = vsel %vm1100_vm6, %v1096_v9, -inf  ;;  %v8255_v29 = vsel %vm1240_vm7, 2147483648, %v7864_v45  ;;  %v8262_v40 = vsel %vm1241_vm8, 2147483648, %v7868_v51  ;;  %v1110_v45 = vand.u32 65535, %v8030_v46 }
 0x1f3   : > { %v1011_v55 = vadd.s32 %v1010_v25, %v1008_v3  ;;  %1102 = vmax.xlane.f32.xlu1 %v1101_v13  ;;  %vm1662_vm9 = vcmp.gt.s32.totalorder %v8255_v29, %v8262_v40 }
 0x1f4   : > { %1194 = vmax.xlane.f32.xlu0 %v8250_v58  ;;  %v8271_v7 = vsel %vm1662_vm9, %v8255_v29, %v8262_v40  ;;  %v1112_v24 = vcvt.s32.f32 %v1110_v45 }
 0x1f5   : > { %v1207_v18 = vand.u32 255, %v1011_v55  ;;  %v1665_v27 = vshra.s32 %v8271_v7, 16 }
 0x1f7   : > { %v1223_v51 = vsub.s32 255, %v1207_v18  ;;  %v8281_v46 = vcvt.s32.f32 %v1665_v27  ;;  %v1057_v27 = vcvt.f32.s32 %v8107_v11 }
 0x1f8   : > { %v1023_v56 = vpop.xlane.xlu2 %1022  ;;  %v8276_v38 = vpop.xlane.xlu1 %1114 }
 0x1f9   : > { %v1024_v41 = vcvt.f32.s32 %v1023_v56  ;;  %1178 = vmax.xlane.f32.xlu2 %v8274_v32  ;;  %vm1242_vm10 = vcmp.eq.s32.totalorder %v7818_v43, %v1223_v51  ;;  %vm1243_vm11 = vcmp.eq.s32.totalorder %v7821_v50, %v1223_v51  ;;  %vm1116_vm13 = vcmp.eq.f32.partialorder %v8049_v5, %v8276_v38 }
 0x1fa   : > { %vm6628_vm12 = vmpackc.low %vm1242_vm10, %vm1240_vm7  ;;  %v8286_v47 = vsel %vm1242_vm10, 2147483648, %v7880_v6  ;;  %v8289_v54 = vsel %vm1243_vm11, 2147483648, %v7884_v12  ;;  %v1117_v36 = vsel %vm1116_vm13, %v1112_v24, -inf  ;;  %v1126_v12 = vand.u32 65535, %v8055_v53 }
 0x1fb   : > { %v1027_v52 = vadd.s32 %v1026_v15, %v1024_v41  ;;  %6629 = vmatmul.msk.bf16.gmra.mxu3 %vm6628_vm12, %v14409_v62  ;;  %vm6644_vm14 = vmpackc.low %vm1243_vm11, %vm1241_vm8  ;;  %1668 = vmax.xlane.f32.xlu1 %v8281_v46  ;;  %vm1678_vm15 = vcmp.gt.s32.totalorder %v8286_v47, %v8289_v54  ;;  %v1041_v5 = vcvt.f32.s32 %v8083_v34  ;;  %v1058_v24 = vshll.u32 %v1057_v27, 16 }
 0x1fc   : > { %6645 = vmatmul.msk.bf16.gmra.mxu2 %vm6644_vm14, %v14409_v62  ;;  %1118 = vmax.xlane.f32.xlu0 %v1117_v36  ;;  %v8302_v6 = vsel %vm1678_vm15, %v8286_v47, %v8289_v54  ;;  %v1128_v55 = vcvt.s32.f32 %v1126_v12 }
 0x1fd   : > { %v1208_v57 = vand.u32 255, %v1027_v52  ;;  %v1681_v61 = vshra.s32 %v8302_v6, 16  ;;  %v1042_v37 = vshll.u32 %v1041_v5, 16 }
 0x1ff   : > { %v1224_v9 = vsub.s32 255, %v1208_v57  ;;  %v8307_v25 = vcvt.s32.f32 %v1681_v61 }
 0x200   : > { %v1039_v3 = vpop.xlane.xlu0 %1038  ;;  %v8309_v13 = vpop.xlane.xlu2 %1130 }
 0x201   : > { %v1040_v22 = vcvt.f32.s32 %v1039_v3  ;;  %1684 = vmax.xlane.f32.xlu2 %v8307_v25  ;;  %vm1132_vm1 = vcmp.eq.f32.partialorder %v8081_v31, %v8309_v13  ;;  %vm1244_vm2 = vcmp.eq.s32.totalorder %v7818_v43, %v1224_v9  ;;  %vm1245_vm3 = vcmp.eq.s32.totalorder %v7821_v50, %v1224_v9 }
 0x202   : > { %v1133_v53 = vsel %vm1132_vm1, %v1128_v55, -inf  ;;  %v8319_v34 = vsel %vm1244_vm2, 2147483648, %v7899_v33  ;;  %v8324_v18 = vsel %vm1245_vm3, 2147483648, %v7903_v39  ;;  %v1142_v33 = vand.u32 65535, %v8087_v14 }
 0x203   : > { %v1043_v45 = vadd.s32 %v1042_v37, %v1040_v22  ;;  %1134 = vmax.xlane.f32.xlu1 %v1133_v53  ;;  %vm1694_vm4 = vcmp.gt.s32.totalorder %v8319_v34, %v8324_v18  ;;  %v14714_v53 = vld [vmem:[#allocation5_spill] sm:$0xff] }
 0x204   : > { %v8331_v51 = vsel %vm1694_vm4, %v8319_v34, %v8324_v18  ;;  %v1144_v36 = vcvt.s32.f32 %v1142_v33 }
 0x205   : > { %v1209_v31 = vand.u32 255, %v1043_v45  ;;  %v1697_v15 = vshra.s32 %v8331_v51, 16 }
 0x207   : > { %v1225_v56 = vsub.s32 255, %v1209_v31  ;;  %v8337_v39 = vcvt.s32.f32 %v1697_v15 }
 0x208   : > { %v1055_v41 = vpop.xlane.xlu0 %1054  ;;  %v8335_v52 = vpop.xlane.xlu2 %1146 }
 0x209   : > { %v1056_v11 = vcvt.f32.s32 %v1055_v41  ;;  %vm1246_vm5 = vcmp.eq.s32.totalorder %v7818_v43, %v1225_v56  ;;  %vm1247_vm6 = vcmp.eq.s32.totalorder %v7821_v50, %v1225_v56  ;;  %1700 = vmax.xlane.f32.xlu2 %v8337_v39  ;;  %vm1148_vm8 = vcmp.eq.f32.partialorder %v8105_v4, %v8335_v52 }
 0x20a   : > { %vm6630_vm7 = vmpackc.low %vm1246_vm5, %vm1244_vm2  ;;  %v8345_v14 = vsel %vm1246_vm5, 2147483648, %v7915_v63  ;;  %v8348_v12 = vsel %vm1247_vm6, 2147483648, %v7919_v8  ;;  %v1149_v57 = vsel %vm1148_vm8, %v1144_v36, -inf  ;;  %v1158_v8 = vand.u32 65535, %v8111_v60 }
 0x20b   : > { %v1059_v5 = vadd.s32 %v1058_v24, %v1056_v11  ;;  %6631 = vmatmul.msk.bf16.gmra.mxu3 %vm6630_vm7, %v14409_v62  ;;  %vm6646_vm9 = vmpackc.low %vm1247_vm6, %vm1245_vm3  ;;  %vm1710_vm10 = vcmp.gt.s32.totalorder %v8345_v14, %v8348_v12  ;;  %1150 = vmax.xlane.f32.xlu1 %v1149_v57  ;;  %v1089_v41 = vcvt.f32.s32 %v8190_v17  ;;  %v1632_v11 = vand.u32 65535, %v8187_v16  ;;  %v14715_v16 = vld [vmem:[#allocation6_spill] sm:$0xff] }
 0x20c   : > { %6647 = vmatmul.msk.bf16.gmra.mxu2 %vm6646_vm9, %v14409_v62  ;;  %v8360_v63 = vsel %vm1710_vm10, %v8345_v14, %v8348_v12  ;;  %v1160_v37 = vcvt.s32.f32 %v1158_v8 }
 0x20d   : > { %v1210_v4 = vand.u32 255, %v1059_v5  ;;  %v1713_v61 = vshra.s32 %v8360_v63, 16  ;;  %v1090_v57 = vshll.u32 %v1089_v41, 16 }
 0x20f   : > { %v1226_v3 = vsub.s32 255, %v1210_v4  ;;  %v8364_v55 = vcvt.s32.f32 %v1713_v61  ;;  %v1634_v4 = vcvt.s32.f32 %v1632_v11 }
 0x210   : > { %v8366_v9 = vpop.xlane.xlu0 %1162 }
 0x211   : > { %1716 = vmax.xlane.f32.xlu0 %v8364_v55  ;;  %vm1164_vm11 = vcmp.eq.f32.partialorder %v8117_v26, %v8366_v9  ;;  %vm1248_vm12 = vcmp.eq.s32.totalorder %v7818_v43, %v1226_v3  ;;  %vm1249_vm13 = vcmp.eq.s32.totalorder %v7821_v50, %v1226_v3 }
 0x212   : > { %v1165_v22 = vsel %vm1164_vm11, %v1160_v37, -inf  ;;  %v8376_v60 = vsel %vm1248_vm12, 2147483648, %v7931_v20  ;;  %v8381_v45 = vsel %vm1249_vm13, 2147483648, %v14714_v53  ;;  %v1073_v20 = vcvt.f32.s32 %v8159_v21 }
 0x213   : > { %1166 = vmax.xlane.f32.xlu2 %v1165_v22  ;;  %vm1726_vm14 = vcmp.gt.s32.totalorder %v8376_v60, %v8381_v45  ;;  %v1648_v21 = vand.u32 65535, %v8230_v28  ;;  %v14716_v22 = vld [vmem:[#allocation7_spill] sm:$0xff] }
 0x214   : > { %v8387_v26 = vsel %vm1726_vm14, %v8376_v60, %v8381_v45  ;;  %v1074_v15 = vshll.u32 %v1073_v20, 16  ;;  %v1105_v20 = vcvt.f32.s32 %v8240_v49 }
 0x215   : > { %v1729_v27 = vshra.s32 %v8387_v26, 16 }
 0x217   : > { %v8390_v31 = vcvt.s32.f32 %v1729_v27 }
 0x21b   : > { %1732 = vmax.xlane.f32.xlu2 %v8390_v31 }
 0x256   : > { %v1071_v33 = vpop.xlane.xlu1 %1070 }
 0x257   : > { %v1072_v56 = vcvt.f32.s32 %v1071_v33 }
 0x259   : > { %v1075_v24 = vadd.s32 %v1074_v15, %v1072_v56  ;;  %v1190_v15 = vand.u32 65535, %v8225_v23 }
 0x25b   : > { %v1211_v36 = vand.u32 255, %v1075_v24  ;;  %v1650_v24 = vcvt.s32.f32 %v1648_v21  ;;  %v1192_v23 = vcvt.s32.f32 %v1190_v15 }
 0x25d   : > { %v1227_v5 = vsub.s32 255, %v1211_v36 }
 0x25e   : > { %v8396_v8 = vpop.xlane.xlu1 %1636 }
 0x25f   : > { %v1087_v61 = vpop.xlane.xlu0 %1086  ;;  %vm1250_vm15 = vcmp.eq.s32.totalorder %v7818_v43, %v1227_v5  ;;  %vm1251_vm1 = vcmp.eq.s32.totalorder %v7821_v50, %v1227_v5  ;;  %vm1638_vm2 = vcmp.eq.f32.partialorder %v8202_v10, %v8396_v8  ;;  %v1106_v5 = vshll.u32 %v1105_v20, 16 }
 0x260   : > { %v1088_v37 = vcvt.f32.s32 %v1087_v61  ;;  %vm6632_vm3 = vmpackc.low %vm1250_vm15, %vm1248_vm12  ;;  %v8406_v17 = vsel %vm1250_vm15, 2147483648, %v14715_v16  ;;  %v8409_v53 = vsel %vm1251_vm1, 2147483648, %v14716_v22  ;;  %v1639_v27 = vsel %vm1638_vm2, %v1634_v4, -inf }
 0x261   : > { %6633 = vmatmul.msk.bf16.gmra.mxu3 %vm6632_vm3, %v14409_v62  ;;  %vm6648_vm4 = vmpackc.low %vm1251_vm1, %vm1249_vm13  ;;  %1640 = vmax.xlane.f32.xlu0 %v1639_v27  ;;  %vm1742_vm5 = vcmp.gt.s32.totalorder %v8406_v17, %v8409_v53  ;;  %v1174_v61 = vand.u32 65535, %v8244_v48  ;;  %v1121_v22 = vcvt.f32.s32 %v8276_v38  ;;  %v1664_v27 = vand.u32 65535, %v8271_v7 }
 0x262   : > { %v1091_v10 = vadd.s32 %v1090_v57, %v1088_v37  ;;  %6649 = vmatmul.msk.bf16.gmra.mxu2 %vm6648_vm4, %v14409_v62  ;;  %v8419_v28 = vsel %vm1742_vm5, %v8406_v17, %v8409_v53  ;;  %v14717_v37 = vld [vmem:[#allocation8_spill] sm:$0xff] }
 0x263   : > { %v1745_v33 = vshra.s32 %v8419_v28, 16 }
 0x264   : > { %v1212_v56 = vand.u32 255, %v1091_v10  ;;  %v8424_v3 = vpop.xlane.xlu2 %1652 }
 0x265   : > { %vm1654_vm6 = vcmp.eq.f32.partialorder %v8238_v0, %v8424_v3  ;;  %v8430_v49 = vcvt.s32.f32 %v1745_v33  ;;  %v7237_v33 = vld [vmem:[%s8440_s12 + $0x38] sm:$0xff] }
 0x266   : > { %v1103_v41 = vpop.xlane.xlu1 %1102  ;;  %v1655_v11 = vsel %vm1654_vm6, %v1650_v24, -inf  ;;  %v1228_v36 = vsub.s32 255, %v1212_v56  ;;  %v1176_v56 = vcvt.s32.f32 %v1174_v61  ;;  %v932_v7 = vsel %vm14436_vm0, %v7237_v33, 0 }
 0x267   : > { %v1104_v57 = vcvt.f32.s32 %v1103_v41  ;;  %v8428_v4 = vpop.xlane.xlu0 %1194  ;;  %1656 = vmax.xlane.f32.xlu1 %v1655_v11  ;;  %v1122_v41 = vshll.u32 %v1121_v22, 16  ;;  %934 = vmatpush.bf16.xpose.msrb.mxu1 %v932_v7  ;;  %v14720_v22 = vld [vmem:[#allocation10_spill] sm:$0xff] }
 0x268   : > { %vm1196_vm7 = vcmp.eq.f32.partialorder %v8250_v58, %v8428_v4  ;;  %vm1252_vm8 = vcmp.eq.s32.totalorder %v7818_v43, %v1228_v36  ;;  %vm1253_vm9 = vcmp.eq.s32.totalorder %v7821_v50, %v1228_v36  ;;  %v14718_v58 = vld [vmem:[#allocation9_spill] sm:$0xff]  ;;  %v1137_v36 = vcvt.f32.s32 %v8309_v13 }
 0x269   : > { %v1107_v0 = vadd.s32 %v1106_v5, %v1104_v57  ;;  %1748 = vmax.xlane.f32.xlu0 %v8430_v49  ;;  %v1197_v21 = vsel %vm1196_vm7, %v1192_v23, -inf  ;;  %v8446_v16 = vsel %vm1252_vm8, 2147483648, %v14717_v37  ;;  %v8451_v48 = vsel %vm1253_vm9, 2147483648, %v14718_v58 }
 0x26a   : > { %1198 = vmax.xlane.f32.xlu2 %v1197_v21  ;;  %vm1758_vm10 = vcmp.gt.s32.totalorder %v8446_v16, %v8451_v48  ;;  %v1666_v23 = vcvt.s32.f32 %v1664_v27  ;;  %v1138_v13 = vshll.u32 %v1137_v36, 16 }
 0x26b   : > { %v1213_v10 = vand.u32 255, %v1107_v0  ;;  %v8459_v20 = vsel %vm1758_vm10, %v8446_v16, %v8451_v48 }
 0x26c   : > { %v8462_v15 = vpop.xlane.xlu2 %1178  ;;  %v1761_v24 = vshra.s32 %v8459_v20, 16 }
 0x26d   : > { %vm1180_vm11 = vcmp.eq.f32.partialorder %v8274_v32, %v8462_v15  ;;  %v1229_v38 = vsub.s32 255, %v1213_v10  ;;  %v1680_v32 = vand.u32 65535, %v8302_v6  ;;  %v14722_v10 = vld [vmem:[#allocation11_spill] sm:$0xff] }
 0x26e   : > { %v1453_v11 = vpop.f32.mrf.mxu3  ;;  %v8468_v5 = vpop.xlane.xlu1 %1668  ;;  %v1181_v57 = vsel %vm1180_vm11, %v1176_v56, -inf  ;;  %v8472_v61 = vcvt.s32.f32 %v1761_v24 }
 0x26f   : > { %v1502_v0 = vpop.f32.mrf.mxu2  ;;  %v1119_v21 = vpop.xlane.xlu0 %1118  ;;  %1182 = vmax.xlane.f32.xlu1 %v1181_v57  ;;  %vm1254_vm12 = vcmp.eq.s32.totalorder %v7818_v43, %v1229_v38  ;;  %vm1255_vm13 = vcmp.eq.s32.totalorder %v7821_v50, %v1229_v38  ;;  %vm1670_vm1 = vcmp.eq.f32.partialorder %v8281_v46, %v8468_v5  ;;  %v7236_v38 = vld [vmem:[%s8440_s12 + $0x30] sm:$0xff]  ;;  %v1682_v46 = vcvt.s32.f32 %v1680_v32 }
 0x270   : > { %v8475_v37 = vadd.f32 %v1502_v0, %v1453_v11  ;;  %v1120_v58 = vcvt.f32.s32 %v1119_v21  ;;  %vm6634_vm14 = vmpackc.low %vm1254_vm12, %vm1252_vm8  ;;  %v8480_v27 = vsel %vm1254_vm12, 2147483648, %v14720_v22  ;;  %v8483_v33 = vsel %vm1255_vm13, 2147483648, %v14722_v10 }
 0x271   : > { %14721 = vst [vmem:[#allocation6_spill] sm:$0xff] %v8480_v27  ;;  %6635 = vmatmul.msk.bf16.gmra.mxu3 %vm6634_vm14, %v14409_v62  ;;  %vm6650_vm15 = vmpackc.low %vm1255_vm13, %vm1253_vm9  ;;  %vm1774_vm2 = vcmp.gt.s32.totalorder %v8480_v27, %v8483_v33  ;;  %v1671_v56 = vsel %vm1670_vm1, %v1666_v23, -inf  ;;  %v929_v57 = vsel %vm14436_vm0, %v7236_v38, 0  ;;  %v1696_v32 = vand.u32 65535, %v8331_v51 }
 0x272   : > { %14719 = vst [vmem:[#allocation5_spill] sm:$0xff] %v8475_v37  ;;  %v1123_v6 = vadd.s32 %v1122_v41, %v1120_v58  ;;  %6651 = vmatmul.msk.bf16.gmra.mxu2 %vm6650_vm15, %v14409_v62  ;;  %1764 = vmax.xlane.f32.xlu2 %v8472_v61  ;;  %v8496_v24 = vsel %vm1774_vm2, %v8480_v27, %v8483_v33  ;;  %v1153_v51 = vcvt.f32.s32 %v8335_v52  ;;  %v7233_v27 = vld [vmem:[%s8440_s12 + $0x18] sm:$0xff] }
 0x273   : > { %14723 = vst [vmem:[#allocation7_spill] sm:$0xff] %v8483_v33  ;;  %1672 = vmax.xlane.f32.xlu0 %v1671_v56  ;;  %v1777_v41 = vshra.s32 %v8496_v24, 16  ;;  %935 = vmatpush.bf16.xpose.msrb.mxu1 %v929_v57  ;;  %v14726_v56 = vld [vmem:[#allocation13_spill] sm:$0xff] }
 0x274   : > { %v1214_v7 = vand.u32 255, %v1123_v6  ;;  %v8500_v11 = vpop.xlane.xlu2 %1684  ;;  %v1154_v52 = vshll.u32 %v1153_v51, 16 }
 0x275   : > { %vm1686_vm3 = vcmp.eq.f32.partialorder %v8307_v25, %v8500_v11  ;;  %v8513_v6 = vcvt.s32.f32 %v1777_v41 }
 0x276   : > { %v8506_v23 = vpop.f32.mrf.mxu3  ;;  %v1135_v0 = vpop.xlane.xlu1 %1134  ;;  %v1687_v21 = vsel %vm1686_vm3, %v1682_v46, -inf  ;;  %v1230_v58 = vsub.s32 255, %v1214_v7  ;;  %v14728_v7 = vld [vmem:[#allocation12_spill] sm:$0xff]  ;;  %v7235_v46 = vld [vmem:[%s8440_s12 + $0x28] sm:$0xff] }
 0x277   : > { %14724 = vst [vmem:[#allocation8_spill] sm:$0xff] %v8506_v23  ;;  %v8508_v22 = vpop.f32.mrf.mxu2  ;;  %v1136_v10 = vcvt.f32.s32 %v1135_v0  ;;  %1688 = vmax.xlane.f32.xlu1 %v1687_v21  ;;  %v926_v0 = vsel %vm14436_vm0, %v7235_v46, 0  ;;  %v7234_v46 = vld [vmem:[%s8440_s12 + $0x20] sm:$0xff] }
 0x278   : > { %14725 = vst [vmem:[#allocation9_spill] sm:$0xff] %v8508_v22  ;;  %vm1257_vm4 = vcmp.eq.s32.totalorder %v7821_v50, %v1230_v58  ;;  %vm1256_vm5 = vcmp.eq.s32.totalorder %v7818_v43, %v1230_v58 }
 0x279   : > { %v1139_v25 = vadd.s32 %v1138_v13, %v1136_v10  ;;  %v8518_v38 = vsel %vm1257_vm4, 2147483648, %v14726_v56  ;;  %v8523_v36 = vsel %vm1256_vm5, 2147483648, %v14728_v7  ;;  %v1698_v13 = vcvt.s32.f32 %v1696_v32 }
 0x27a   : > { %14727 = vst [vmem:[#allocation10_spill] sm:$0xff] %v8518_v38  ;;  %vm1790_vm6 = vcmp.gt.s32.totalorder %v8523_v36, %v8518_v38 }
 0x27b   : > { %14729 = vst [vmem:[#allocation11_spill] sm:$0xff] %v8523_v36  ;;  %v1215_v57 = vand.u32 255, %v1139_v25  ;;  %1780 = vmax.xlane.f32.xlu0 %v8513_v6  ;;  %v8532_v41 = vsel %vm1790_vm6, %v8523_v36, %v8518_v38  ;;  %936 = vmatpush.bf16.xpose.msrb.mxu1 %v926_v0  ;;  %v14733_v0 = vld [vmem:[#allocation14_spill] sm:$0xff] }
 0x27c   : > { %v8535_v21 = vpop.xlane.xlu2 %1700  ;;  %v1793_v56 = vshra.s32 %v8532_v41, 16 }
 0x27d   : > { %v1231_v10 = vsub.s32 255, %v1215_v57  ;;  %vm1702_vm7 = vcmp.eq.f32.partialorder %v8337_v39, %v8535_v21  ;;  %v14731_v57 = vld [vmem:[#allocation15_spill] sm:$0xff]  ;;  %v1712_v39 = vand.u32 65535, %v8360_v63 }
 0x27e   : > { %v1458_v7 = vpop.f32.mrf.mxu3  ;;  %v1151_v62 = vpop.xlane.xlu1 %1150  ;;  %v1703_v33 = vsel %vm1702_vm7, %v1698_v13, -inf  ;;  %v8551_v51 = vcvt.s32.f32 %v1793_v56 }
 0x27f   : > { %v1507_v25 = vpop.f32.mrf.mxu2  ;;  %vm1259_vm8 = vcmp.eq.s32.totalorder %v7821_v50, %v1231_v10  ;;  %vm1258_vm9 = vcmp.eq.s32.totalorder %v7818_v43, %v1231_v10  ;;  %v1152_v32 = vcvt.f32.s32 %v1151_v62  ;;  %1704 = vmax.xlane.f32.xlu1 %v1703_v33  ;;  %v1169_v62 = vcvt.f32.s32 %v8366_v9 }
 0x280   : > { %v8543_v38 = vadd.f32 %v1507_v25, %v1458_v7  ;;  %vm6652_vm10 = vmpackc.low %vm1259_vm8, %vm1257_vm4  ;;  %v8548_v36 = vsel %vm1259_vm8, 2147483648, %v14731_v57  ;;  %v8556_v13 = vsel %vm1258_vm9, 2147483648, %v14733_v0  ;;  %v14735_v7 = vmov 1.0|1.0  }
 0x281   : > { %14732 = vst [vmem:[#allocation12_spill] sm:$0xff] %v8548_v36  ;;  %vm6636_vm11 = vmpackc.low %vm1258_vm9, %vm1256_vm5  ;;  %v1155_v10 = vadd.s32 %v1154_v52, %v1152_v32  ;;  %vm1806_vm12 = vcmp.gt.s32.totalorder %v8556_v13, %v8548_v36  ;;  %v923_v33 = vsel %vm14436_vm0, %v7234_v46, 0  ;;  %v1714_v25 = vcvt.s32.f32 %v1712_v39  ;;  %v14738_v39 = vld [vmem:[#allocation16_spill] sm:$0xff] }
 0x282   : > { %14730 = vst [vmem:[#allocation13_spill] sm:$0xff] %v8543_v38  ;;  %6653 = vmatmul.msk.bf16.gmra.mxu2 %vm6652_vm10, %v14735_v7  ;;  %6637 = vmatmul.msk.bf16.gmra.mxu3 %vm6636_vm11, %v14735_v7  ;;  %v8566_v63 = vsel %vm1806_vm12, %v8556_v13, %v8548_v36 }
 0x283   : > { %14734 = vst [vmem:[#allocation15_spill] sm:$0xff] %v8556_v13  ;;  %1796 = vmax.xlane.f32.xlu0 %v8551_v51  ;;  %v1216_v58 = vand.u32 255, %v1155_v10  ;;  %v1809_v52 = vshra.s32 %v8566_v63, 16  ;;  %937 = vmatpush.bf16.xpose.msrb.mxu1 %v923_v33  ;;  %v1170_v13 = vshll.u32 %v1169_v62, 16 }
 0x284   : > { %v8569_v56 = vpop.xlane.xlu0 %1716 }
 0x285   : > { %vm1718_vm13 = vcmp.eq.f32.partialorder %v8364_v55, %v8569_v56  ;;  %v1232_v32 = vsub.s32 255, %v1216_v58  ;;  %v8576_v0 = vcvt.s32.f32 %v1809_v52  ;;  %v14740_v52 = vld [vmem:[#allocation17_spill] sm:$0xff] }
 0x286   : > { %v8574_v9 = vpop.f32.mrf.mxu3  ;;  %v1167_v57 = vpop.xlane.xlu2 %1166  ;;  %v1719_v36 = vsel %vm1718_vm13, %v1714_v25, -inf  ;;  %v920_v25 = vsel %vm14436_vm0, %v7233_v27, 0 }
 0x287   : > { %14736 = vst [vmem:[#allocation14_spill] sm:$0xff] %v8574_v9  ;;  %v8578_v46 = vpop.f32.mrf.mxu2  ;;  %v1168_v10 = vcvt.f32.s32 %v1167_v57  ;;  %1720 = vmax.xlane.f32.xlu2 %v1719_v36  ;;  %1812 = vmax.xlane.f32.xlu1 %v8576_v0  ;;  %vm1260_vm14 = vcmp.eq.s32.totalorder %v7818_v43, %v1232_v32  ;;  %vm1261_vm15 = vcmp.eq.s32.totalorder %v7821_v50, %v1232_v32  ;;  %v1728_v36 = vand.u32 65535, %v8387_v26  ;;  %v7232_v26 = vld [vmem:[%s8440_s12 + $0x10] sm:$0xff] }
 0x288   : > { %14737 = vst [vmem:[#allocation31_spill] sm:$0xff] %v8578_v46  ;;  %v8587_v58 = vsel %vm1260_vm14, 2147483648, %v14738_v39  ;;  %v8592_v62 = vsel %vm1261_vm15, 2147483648, %v14740_v52 }
 0x289   : > { %v1171_v55 = vadd.s32 %v1170_v13, %v1168_v10  ;;  %14739 = vst [vmem:[#allocation16_spill] sm:$0xff] %v8587_v58  ;;  %vm1822_vm1 = vcmp.gt.s32.totalorder %v8587_v58, %v8592_v62  ;;  %v1730_v22 = vcvt.s32.f32 %v1728_v36 }
 0x28a   : > { %14741 = vst [vmem:[#allocation17_spill] sm:$0xff] %v8592_v62  ;;  %v8599_v13 = vsel %vm1822_vm1, %v8587_v58, %v8592_v62  ;;  %v7479_v62 = vld [vmem:[%s8022_s10 + $0x70] sm:$0xff]  ;;  %v1659_v58 = vcvt.f32.s32 %v8424_v3 }
 0x28b   : > { %v1217_v33 = vand.u32 255, %v1171_v55  ;;  %v1825_v57 = vshra.s32 %v8599_v13, 16  ;;  %938 = vmatpush.bf16.xpose.msrb.mxu1 %v920_v25  ;;  %v14743_v55 = vld [vmem:[#allocation21_spill] sm:$0xff] }
 0x28d   : > { %v1233_v10 = vsub.s32 255, %v1217_v33  ;;  %v8605_v52 = vcvt.s32.f32 %v1825_v57  ;;  %v14745_v33 = vld [vmem:[#allocation22_spill] sm:$0xff] }
 0x28e   : > { %v1463_v39 = vpop.f32.mrf.mxu3  ;;  %v8603_v37 = vpop.xlane.xlu2 %1732 }
 0x28f   : > { %v1512_v23 = vpop.f32.mrf.mxu2  ;;  %vm1262_vm2 = vcmp.eq.s32.totalorder %v7818_v43, %v1233_v10  ;;  %vm1263_vm3 = vcmp.eq.s32.totalorder %v7821_v50, %v1233_v10  ;;  %vm1734_vm4 = vcmp.eq.f32.partialorder %v8390_v31, %v8603_v37  ;;  %1828 = vmax.xlane.f32.xlu1 %v8605_v52  ;;  %v7231_v10 = vld [vmem:[%s8440_s12 + $0x8] sm:$0xff] }
 0x290   : > { %v8612_v27 = vadd.f32 %v1512_v23, %v1463_v39  ;;  %vm6638_vm5 = vmpackc.low %vm1262_vm2, %vm1260_vm14  ;;  %v8618_v36 = vsel %vm1262_vm2, 2147483648, %v14743_v55  ;;  %v8621_v25 = vsel %vm1263_vm3, 2147483648, %v14745_v33  ;;  %v1735_v57 = vsel %vm1734_vm4, %v1730_v22, -inf  ;;  %v7230_v55 = vld [vmem:[%s8440_s12] sm:$0xff]  ;;  %s6229_s12 = scalar_lea.sflag [#allocation3], %s244_s15 }
 0x291   : > { %14744 = vst [vmem:[#allocation21_spill] sm:$0xff] %v8618_v36  ;;  %vm6654_vm6 = vmpackc.low %vm1263_vm3, %vm1261_vm15  ;;  %1736 = vmax.xlane.f32.xlu2 %v1735_v57  ;;  %vm1838_vm7 = vcmp.gt.s32.totalorder %v8618_v36, %v8621_v25  ;;  %v917_v22 = vsel %vm14436_vm0, %v7232_v26, 0  ;;  %v914_v39 = vsel %vm14436_vm0, %v7231_v10, 0  ;;  %v911_v33 = vsel %vm14436_vm0, %v7230_v55, 0  ;;  %v7478_v57 = vld [vmem:[%s8022_s10 + $0x78] sm:$0xff]  ;;  %v14747_v26 = vld [vmem:[#allocation18_spill] sm:$0xff] }
 0x292   : > { %14742 = vst [vmem:[#allocation32_spill] sm:$0xff] %v8612_v27  ;;  %6639 = vmatmul.msk.bf16.gmra.mxu3 %vm6638_vm5, %v14735_v7  ;;  %6655 = vmatmul.msk.bf16.gmra.mxu2 %vm6654_vm6, %v14735_v7  ;;  %v8631_v31 = vsel %vm1838_vm7, %v8618_v36, %v8621_v25  ;;  %v14749_v10 = vld [vmem:[#allocation24_spill] sm:$0xff]  ;;  %v1744_v36 = vand.u32 65535, %v8419_v28  ;;  %v14760_v28 = vld [vmem:[#allocation27_spill] sm:$0xff] }
 0x293   : > { %14746 = vst [vmem:[#allocation22_spill] sm:$0xff] %v8621_v25  ;;  %v1841_v23 = vshra.s32 %v8631_v31, 16  ;;  %939 = vmatpush.bf16.xpose.msrb.mxu1 %v917_v22  ;;  %v7238_v22 = vld [vmem:[%s14379_s2] sm:$0xff]  ;;  %v14751_v55 = vld [vmem:[#allocation28_spill] sm:$0xff] }
 0x295   : > { %v8635_v32 = vcvt.s32.f32 %v1841_v23  ;;  %v14748_v23 = vld [vmem:[#allocation20_spill] sm:$0xff] }
 0x296   : > { %v8673_v9 = vpop.f32.mrf.mxu3 }
 0x299   : > { %1844 = vmax.xlane.f32.xlu2 %v8635_v32 }
 0x29b   : > { %940 = vmatpush.bf16.xpose.msrb.mxu1 %v914_v39  ;;  %v14750_v39 = vld [vmem:[#allocation26_spill] sm:$0xff] }
 0x2a3   : > { %941 = vmatpush.bf16.xpose.msrb.mxu1 %v911_v33  ;;  %v14752_v33 = vld [vmem:[#allocation30_spill] sm:$0xff] }
 0x2aa   : > { %6529 = vmatmul.msk.bf16.vlgmr.msrb.gmra.mxu1 %vm14436_vm0, %v7238_v22  ;;  %v14756_v22 = vld [vmem:[#allocation19_spill] sm:$0xff] }
 0x2ab   : > { %2079 = vmatpush.bf16.msra.mxu1 %v7478_v57  ;;  %v8655_v57 = vld [vmem:[%s8022_s10 + $0x38] sm:$0xff] }
 0x2ac   : > { %14753 = vst [vmem:[#allocation18_spill] sm:$0xff] %v8655_v57 }
 0x2af   : > { %2080 = vmatpush.bf16.msra.mxu1 %v7479_v62  ;;  %v8659_v62 = vld [vmem:[%s8022_s10 + $0x30] sm:$0xff] }
 0x2b0   : > { %14754 = vst [vmem:[#allocation20_spill] sm:$0xff] %v8659_v62 }
 0x2b3   : > { %2081 = vmatpush.bf16.msra.mxu1 %v14747_v26  ;;  %v8663_v26 = vld [vmem:[%s8022_s10 + $0x28] sm:$0xff] }
 0x2b4   : > { %14755 = vst [vmem:[#allocation24_spill] sm:$0xff] %v8663_v26 }
 0x2b7   : > { %2082 = vmatpush.bf16.msra.mxu1 %v14748_v23  ;;  %v1643_v23 = vcvt.f32.s32 %v8396_v8 }
 0x2bb   : > { %2083 = vmatpush.bf16.msra.mxu1 %v14749_v10 }
 0x2bf   : > { %2084 = vmatpush.bf16.msra.mxu1 %v14750_v39  ;;  %v1644_v39 = vshll.u32 %v1643_v23, 16  ;;  %v1746_v23 = vcvt.s32.f32 %v1744_v36  ;;  %v1675_v36 = vcvt.f32.s32 %v8468_v5 }
 0x2c1   : > { %v1676_v5 = vshll.u32 %v1675_v36, 16 }
 0x2c3   : > { %2085 = vmatpush.bf16.msra.mxu1 %v14751_v55 }
 0x2c7   : > { %2086 = vmatpush.bf16.msra.mxu1 %v14752_v33  ;;  %v14757_v33 = vld [vmem:[#allocation23_spill] sm:$0xff] }
 0x2cb   : > { %3186 = vmatpush.bf16.msrb.mxu1 %v8655_v57  ;;  %v14758_v57 = vld [vmem:[#allocation25_spill] sm:$0xff] }
 0x2cf   : > { %3187 = vmatpush.bf16.msrb.mxu1 %v8659_v62  ;;  %v1201_v62 = vcvt.f32.s32 %v8428_v4  ;;  %v1185_v4 = vcvt.f32.s32 %v8462_v15 }
 0x2d3   : > { %3188 = vmatpush.bf16.msrb.mxu1 %v8663_v26  ;;  %v1660_v26 = vshll.u32 %v1659_v58, 16 }
 0x2d4   : > { %v1641_v10 = vpop.xlane.xlu0 %1640 }
 0x2d5   : > { %v1642_v55 = vcvt.f32.s32 %v1641_v10  ;;  %v8677_v10 = vpop.f32.mrf.mxu2 }
 0x2d6   : > { %14759 = vst [vmem:[#allocation26_spill] sm:$0xff] %v8677_v10 }
 0x2d7   : > { %3189 = vmatpush.bf16.msrb.mxu1 %v14756_v22  ;;  %v1645_v25 = vadd.s32 %v1644_v39, %v1642_v55 }
 0x2d9   : > { %v1886_v46 = vand.u32 255, %v1645_v25 }
 0x2da   : > { %v1657_v38 = vpop.xlane.xlu1 %1656 }
 0x2db   : > { %3190 = vmatpush.bf16.msrb.mxu1 %v14757_v33  ;;  %v1658_v8 = vcvt.f32.s32 %v1657_v38  ;;  %v8683_v38 = vsub.s32 255, %v1886_v46 }
 0x2dc   : > { %v8675_v22 = vpop.xlane.xlu0 %1748 }
 0x2dd   : > { %v1661_v33 = vadd.s32 %v1660_v26, %v1658_v8  ;;  %v1199_v3 = vpop.xlane.xlu2 %1198  ;;  %vm1750_vm8 = vcmp.eq.f32.partialorder %v8430_v49, %v8675_v22  ;;  %v1760_v26 = vand.u32 65535, %v8459_v20  ;;  %v14761_v8 = vld [vmem:[#allocation29_spill] sm:$0xff]  ;;  %v1186_v49 = vshll.u32 %v1185_v4, 16 }
 0x2de   : > { %v1200_v58 = vcvt.f32.s32 %v1199_v3  ;;  %v1751_v25 = vsel %vm1750_vm8, %v1746_v23, -inf  ;;  %vm1918_vm9 = vcmp.eq.s32.totalorder %v7818_v43, %v8683_v38  ;;  %vm1919_vm13 = vcmp.eq.s32.totalorder %v7821_v50, %v8683_v38 }
 0x2df   : > { %3191 = vmatpush.bf16.msrb.mxu1 %v14758_v57  ;;  %v1202_v57 = vshll.u32 %v1201_v62, 16  ;;  %v1887_v39 = vand.u32 255, %v1661_v33  ;;  %1752 = vmax.xlane.f32.xlu0 %v1751_v25  ;;  %v1762_v3 = vcvt.s32.f32 %v1760_v26 }
 0x2e1   : > { %v1203_v55 = vadd.s32 %v1202_v57, %v1200_v58  ;;  %v8686_v27 = vsub.s32 255, %v1887_v39  ;;  %v1691_v57 = vcvt.f32.s32 %v8500_v11 }
 0x2e2   : > { %v1183_v62 = vpop.xlane.xlu1 %1182 }
 0x2e3   : > { %3192 = vmatpush.bf16.msrb.mxu1 %v14760_v28  ;;  %v1219_v28 = vand.u32 255, %v1203_v55  ;;  %v1184_v10 = vcvt.f32.s32 %v1183_v62  ;;  %vm1920_vm10 = vcmp.eq.s32.totalorder %v7818_v43, %v8686_v27  ;;  %vm1921_vm11 = vcmp.eq.s32.totalorder %v7821_v50, %v8686_v27 }
 0x2e4   : > { %v1468_v15 = vpop.f32.mrf.mxu3  ;;  %vm6695_vm12 = vmpackc.low %vm1920_vm10, %vm1918_vm9 }
 0x2e5   : > { %v1235_v20 = vsub.s32 255, %v1219_v28  ;;  %v1187_v46 = vadd.s32 %v1186_v49, %v1184_v10  ;;  %v1517_v23 = vpop.f32.mrf.mxu2  ;;  %v8704_v33 = vpop.xlane.xlu2 %1764  ;;  %6696 = vmatmul.msk.bf16.vlgmr.msrb.gmra.mxu0 %vm6695_vm12, %v14735_v7  ;;  %vm6711_vm14 = vmpackc.low %vm1921_vm11, %vm1919_vm13  ;;  %v1776_v49 = vand.u32 65535, %v8496_v24 }
 0x2e6   : > { %v8714_v4 = vadd.f32 %v1517_v23, %v1468_v15  ;;  %v1673_v58 = vpop.xlane.xlu0 %1672  ;;  %6712 = vmatmul.msk.bf16.vlgmr.msra.gmra.mxu1 %vm6711_vm14, %v14735_v7  ;;  %vm1766_vm15 = vcmp.eq.f32.partialorder %v8472_v61, %v8704_v33  ;;  %v1692_v61 = vshll.u32 %v1691_v57, 16 }
 0x2e7   : > { %3193 = vmatpush.bf16.msrb.mxu1 %v14761_v8  ;;  %vm1266_vm1 = vcmp.eq.s32.totalorder %v7818_v43, %v1235_v20  ;;  %v1218_v10 = vand.u32 255, %v1187_v46  ;;  %v1674_v25 = vcvt.f32.s32 %v1673_v58  ;;  %v1767_v39 = vsel %vm1766_vm15, %v1762_v3, -inf }
 0x2e8   : > { %v8723_v55 = vsel %vm1266_vm1, 2147483648, %v8180_v2  ;;  %1768 = vmax.xlane.f32.xlu0 %v1767_v39  ;;  %vm1267_vm2 = vcmp.eq.s32.totalorder %v7821_v50, %v1235_v20  ;;  %v1707_v39 = vcvt.f32.s32 %v8535_v21 }
 0x2e9   : > { %14762 = vst [vmem:[#allocation28_spill] sm:$0xff] %v8723_v55  ;;  %v1677_v11 = vadd.s32 %v1676_v5, %v1674_v25  ;;  %v1234_v36 = vsub.s32 255, %v1218_v10  ;;  %v8729_v26 = vsel %vm1267_vm2, 2147483648, %v8183_v1 }
 0x2ea   : > { %14763 = vst [vmem:[#allocation30_spill] sm:$0xff] %v8729_v26  ;;  %v1689_v8 = vpop.xlane.xlu1 %1688  ;;  %vm1870_vm3 = vcmp.gt.s32.totalorder %v8723_v55, %v8729_v26 }
 0x2eb   : > { %v1888_v28 = vand.u32 255, %v1677_v11  ;;  %v1690_v2 = vcvt.f32.s32 %v1689_v8  ;;  %vm1264_vm4 = vcmp.eq.s32.totalorder %v7818_v43, %v1234_v36  ;;  %vm1265_vm5 = vcmp.eq.s32.totalorder %v7821_v50, %v1234_v36 }
 0x2ec   : > { %v8736_v62 = vpop.f32.mrf.mxu3  ;;  %vm6640_vm6 = vmpackc.low %vm1266_vm1, %vm1264_vm4  ;;  %v8741_v1 = vsel %vm1264_vm4, 2147483648, %v8195_v19  ;;  %v8744_v15 = vsel %vm1265_vm5, 2147483648, %v8198_v30  ;;  %v8748_v24 = vsel %vm1870_vm3, %v8723_v55, %v8729_v26  ;;  %v1778_v30 = vcvt.s32.f32 %v1776_v49 }
 0x2ed   : > { %v1693_v5 = vadd.s32 %v1692_v61, %v1690_v2  ;;  %v8750_v46 = vpop.f32.mrf.mxu2  ;;  %6641 = vmatmul.msk.bf16.gmra.mxu3 %vm6640_vm6, %v14735_v7  ;;  %vm6656_vm7 = vmpackc.low %vm1267_vm2, %vm1265_vm5  ;;  %v1873_v23 = vshra.s32 %v8748_v24, 16  ;;  %vm1854_vm8 = vcmp.gt.s32.totalorder %v8741_v1, %v8744_v15  ;;  %v8769_v58 = vsub.s32 255, %v1888_v28 }
 0x2ee   : > { %v8758_v19 = vpop.xlane.xlu0 %1780  ;;  %6657 = vmatmul.msk.bf16.gmra.mxu2 %vm6656_vm7, %v14735_v7  ;;  %v8763_v3 = vsel %vm1854_vm8, %v8741_v1, %v8744_v15  ;;  %v1792_v61 = vand.u32 65535, %v8532_v41  ;;  %v1708_v41 = vshll.u32 %v1707_v39, 16 }
 0x2ef   : > { %v1889_v57 = vand.u32 255, %v1693_v5  ;;  %vm1782_vm12 = vcmp.eq.f32.partialorder %v8513_v6, %v8758_v19  ;;  %v8767_v20 = vcvt.s32.f32 %v1873_v23  ;;  %v1857_v25 = vshra.s32 %v8763_v3, 16 }
 0x2f0   : > { %v1783_v10 = vsel %vm1782_vm12, %v1778_v30, -inf  ;;  %vm1922_vm14 = vcmp.eq.s32.totalorder %v7818_v43, %v8769_v58  ;;  %vm1923_vm3 = vcmp.eq.s32.totalorder %v7821_v50, %v8769_v58  ;;  %v1794_v5 = vcvt.s32.f32 %v1792_v61 }
 0x2f1   : > { %1784 = vmax.xlane.f32.xlu1 %v1783_v10  ;;  %1876 = vmax.xlane.f32.xlu0 %v8767_v20  ;;  %v8774_v11 = vsub.s32 255, %v1889_v57  ;;  %v8776_v36 = vcvt.s32.f32 %v1857_v25  ;;  %v1723_v23 = vcvt.f32.s32 %v8569_v56  ;;  %v1808_v57 = vand.u32 65535, %v8566_v63 }
 0x2f2   : > { %v1705_v8 = vpop.xlane.xlu1 %1704 }
 0x2f3   : > { %vm1924_vm15 = vcmp.eq.s32.totalorder %v7818_v43, %v8774_v11  ;;  %vm1925_vm1 = vcmp.eq.s32.totalorder %v7821_v50, %v8774_v11  ;;  %v1706_v6 = vcvt.f32.s32 %v1705_v8  ;;  %1860 = vmax.xlane.f32.xlu2 %v8776_v36  ;;  %v1724_v39 = vshll.u32 %v1723_v23, 16 }
 0x2f4   : > { %v1473_v21 = vpop.f32.mrf.mxu3  ;;  %vm6697_vm2 = vmpackc.low %vm1924_vm15, %vm1922_vm14  ;;  %v1810_v26 = vcvt.s32.f32 %v1808_v57  ;;  %v8878_v38 = vsel %vm1925_vm1, 2147483648, %v8289_v54 }
 0x2f5   : > { %v1522_v49 = vpop.f32.mrf.mxu2  ;;  %6698 = vmatmul.msk.bf16.gmra.mxu0 %vm6697_vm2, %v14735_v7  ;;  %vm6713_vm4 = vmpackc.low %vm1925_vm1, %vm1923_vm3  ;;  %v1709_v30 = vadd.s32 %v1708_v41, %v1706_v6  ;;  %14767 = vst [vmem:[#allocation27_spill] sm:$0xff] %v8878_v38 }
 0x2f6   : > { %v8801_v28 = vadd.f32 %v1522_v49, %v1473_v21  ;;  %v8803_v2 = vpop.xlane.xlu0 %1796  ;;  %6714 = vmatmul.msk.bf16.gmra.mxu1 %vm6713_vm4, %v14735_v7 }
 0x2f7   : > { %vm1798_vm5 = vcmp.eq.f32.partialorder %v8551_v51, %v8803_v2  ;;  %v1890_v8 = vand.u32 255, %v1709_v30  ;;  %v1824_v51 = vand.u32 65535, %v8599_v13  ;;  %v8856_v30 = vsel %vm1919_vm13, 2147483648, %v8175_v35 }
 0x2f8   : > { %v1799_v10 = vsel %vm1798_vm5, %v1794_v5, -inf  ;;  %14765 = vst [vmem:[#allocation23_spill] sm:$0xff] %v8856_v30  ;;  %v8872_v35 = vsel %vm1924_vm15, 2147483648, %v8286_v47 }
 0x2f9   : > { %1800 = vmax.xlane.f32.xlu1 %v1799_v10  ;;  %v8815_v41 = vsub.s32 255, %v1890_v8  ;;  %v1826_v23 = vcvt.s32.f32 %v1824_v51  ;;  %14766 = vst [vmem:[#allocation25_spill] sm:$0xff] %v8872_v35 }
 0x2fa   : > { %v1721_v25 = vpop.xlane.xlu2 %1720  ;;  %v8810_v21 = vpop.xlane.xlu1 %1812 }
 0x2fb   : > { %v1722_v49 = vcvt.f32.s32 %v1721_v25  ;;  %vm1814_vm6 = vcmp.eq.f32.partialorder %v8576_v0, %v8810_v21  ;;  %vm1926_vm7 = vcmp.eq.s32.totalorder %v7818_v43, %v8815_v41  ;;  %vm1927_vm5 = vcmp.eq.s32.totalorder %v7821_v50, %v8815_v41 }
 0x2fc   : > { %v1815_v56 = vsel %vm1814_vm6, %v1810_v26, -inf  ;;  %v8850_v26 = vsel %vm1918_vm9, 2147483648, %v8167_v59  ;;  %vm2256_vm9 = vcmp.gt.s32.totalorder %v8872_v35, %v8878_v38  ;;  %v8894_v54 = vpop.f32.mrf.mxu3 }
 0x2fd   : > { %v1725_v61 = vadd.s32 %v1724_v39, %v1722_v49  ;;  %1816 = vmax.xlane.f32.xlu2 %v1815_v56  ;;  %14764 = vst [vmem:[#allocation19_spill] sm:$0xff] %v8850_v26  ;;  %v8887_v39 = vsel %vm2256_vm9, %v8872_v35, %v8878_v38  ;;  %v8896_v11 = vpop.f32.mrf.mxu2  ;;  %v1739_v49 = vcvt.f32.s32 %v8603_v37 }
 0x2fe   : > { %v2259_v47 = vshra.s32 %v8887_v39, 16 }
 0x2ff   : > { %v1891_v6 = vand.u32 255, %v1725_v61  ;;  %v1740_v51 = vshll.u32 %v1739_v49, 16 }
 0x300   : > { %v8891_v8 = vcvt.s32.f32 %v2259_v47 }
 0x301   : > { %v8817_v63 = vsub.s32 255, %v1891_v6 }
 0x302   : > { %v8819_v5 = vpop.xlane.xlu1 %1828 }
 0x303   : > { %vm1928_vm8 = vcmp.eq.s32.totalorder %v7818_v43, %v8817_v63  ;;  %vm1929_vm12 = vcmp.eq.s32.totalorder %v7821_v50, %v8817_v63  ;;  %vm1830_vm2 = vcmp.eq.f32.partialorder %v8605_v52, %v8819_v5  ;;  %v1840_v52 = vand.u32 65535, %v8631_v31 }
 0x304   : > { %v1737_v0 = vpop.xlane.xlu2 %1736  ;;  %vm6699_vm4 = vmpackc.low %vm1928_vm8, %vm1926_vm7  ;;  %v1831_v13 = vsel %vm1830_vm2, %v1826_v23, -inf  ;;  %vm2208_vm2 = vcmp.gt.s32.totalorder %v8850_v26, %v8856_v30  ;;  %v1755_v23 = vcvt.f32.s32 %v8675_v22  ;;  %v1771_v22 = vcvt.f32.s32 %v8704_v33 }
 0x305   : > { %6700 = vmatmul.msk.bf16.gmra.mxu0 %vm6699_vm4, %v14735_v7  ;;  %vm6715_vm6 = vmpackc.low %vm1929_vm12, %vm1927_vm5  ;;  %1832 = vmax.xlane.f32.xlu0 %v1831_v13  ;;  %v1842_v10 = vcvt.s32.f32 %v1840_v52  ;;  %v8866_v59 = vsel %vm2208_vm2, %v8850_v26, %v8856_v30  ;;  %v8899_v61 = vpop.f32.mrf.mxu3  ;;  %v8901_v56 = vpop.f32.mrf.mxu2  ;;  %v1738_v6 = vcvt.f32.s32 %v1737_v0 }
 0x306   : > { %6716 = vmatmul.msk.bf16.gmra.mxu1 %vm6715_vm6, %v14735_v7 }
 0x307   : > { %v1741_v13 = vadd.s32 %v1740_v51, %v1738_v6  ;;  %v1772_v6 = vshll.u32 %v1771_v22, 16  ;;  %v8945_v51 = vsel %vm1922_vm14, 2147483648, %v8255_v29  ;;  %v1856_v29 = vand.u32 65535, %v8763_v3 }
 0x308   : > { %14770 = vst [vmem:[#allocation34_spill] sm:$0xff] %v8945_v51 }
 0x30c   : > { %v8860_v57 = vpop.xlane.xlu2 %1844 }
 0x30d   : > { %vm1846_vm4 = vcmp.eq.f32.partialorder %v8635_v32, %v8860_v57  ;;  %v2211_v32 = vshra.s32 %v8866_v59, 16  ;;  %v8906_v38 = vpop.f32.mrf.mxu3  ;;  %v8908_v35 = vpop.f32.mrf.mxu2 }
 0x30e   : > { %v1847_v31 = vsel %vm1846_vm4, %v1842_v10, -inf }
 0x30f   : > { %1848 = vmax.xlane.f32.xlu1 %v1847_v31  ;;  %v8883_v25 = vcvt.s32.f32 %v2211_v32  ;;  %v1756_v31 = vshll.u32 %v1755_v23, 16  ;;  %v1892_v32 = vand.u32 255, %v1741_v13  ;;  %v8951_v23 = vsel %vm1923_vm3, 2147483648, %v8262_v40 }
 0x310   : > { %14771 = vst [vmem:[#allocation35_spill] sm:$0xff] %v8951_v23  ;;  %vm2240_vm9 = vcmp.gt.s32.totalorder %v8945_v51, %v8951_v23  ;;  %v8964_v40 = vsel %vm1920_vm10, 2147483648, %v8207_v44 }
 0x311   : > { %v8910_v26 = vsub.s32 255, %v1892_v32  ;;  %v8980_v44 = vsel %vm2240_vm9, %v8945_v51, %v8951_v23 }
 0x313   : > { %vm1930_vm13 = vcmp.eq.s32.totalorder %v7818_v43, %v8910_v26  ;;  %vm1931_vm2 = vcmp.eq.s32.totalorder %v7821_v50, %v8910_v26 }
 0x315   : > { %v8953_v13 = vpop.f32.mrf.mxu2 }
 0x317   : > { %2214 = vmax.xlane.f32.xlu1 %v8883_v25 }
 0x31f   : > { %2262 = vmax.xlane.f32.xlu1 %v8891_v8 }
 0x327   : > { %v8904_v52 = vpop.f32.mrf.mxu1 }
 0x328   : > { %14768 = vst [vmem:[#allocation29_spill] sm:$0xff] %v8904_v52 }
 0x32f   : > { %v8912_v55 = vpop.f32.mrf.mxu1 }
 0x330   : > { %14769 = vst [vmem:[#allocation33_spill] sm:$0xff] %v8912_v55 }
 0x352   : > { %v1753_v10 = vpop.xlane.xlu0 %1752 }
 0x353   : > { %v1754_v47 = vcvt.f32.s32 %v1753_v10  ;;  %v1787_v10 = vcvt.f32.s32 %v8758_v19  ;;  %v8970_v19 = vsel %vm1921_vm11, 2147483648, %v8210_v42 }
 0x354   : > { %vm2224_vm10 = vcmp.gt.s32.totalorder %v8964_v40, %v8970_v19 }
 0x355   : > { %v1757_v37 = vadd.s32 %v1756_v31, %v1754_v47  ;;  %v1872_v31 = vand.u32 65535, %v8748_v24  ;;  %v1788_v24 = vshll.u32 %v1787_v10, 16  ;;  %v1858_v10 = vcvt.s32.f32 %v1856_v29 }
 0x357   : > { %v1893_v30 = vand.u32 255, %v1757_v37 }
 0x359   : > { %v8914_v0 = vsub.s32 255, %v1893_v30  ;;  %v8938_v30 = vpop.f32.mrf.mxu3 }
 0x35b   : > { %v1769_v49 = vpop.xlane.xlu0 %1768  ;;  %vm1932_vm15 = vcmp.eq.s32.totalorder %v7818_v43, %v8914_v0  ;;  %vm1933_vm1 = vcmp.eq.s32.totalorder %v7821_v50, %v8914_v0 }
 0x35c   : > { %vm6701_vm6 = vmpackc.low %vm1932_vm15, %vm1930_vm13  ;;  %v1770_v33 = vcvt.f32.s32 %v1769_v49 }
 0x35d   : > { %6702 = vmatmul.msk.bf16.gmra.mxu0 %vm6701_vm6, %v14735_v7  ;;  %vm6717_vm4 = vmpackc.low %vm1933_vm1, %vm1931_vm2 }
 0x35e   : > { %6718 = vmatmul.msk.bf16.gmra.mxu1 %vm6717_vm4, %v14735_v7  ;;  %v1773_v32 = vadd.s32 %v1772_v6, %v1770_v33  ;;  %v1874_v33 = vcvt.s32.f32 %v1872_v31  ;;  %v8990_v31 = vsel %vm1928_vm8, 2147483648, %v8345_v14 }
 0x35f   : > { %14773 = vst [vmem:[#allocation37_spill] sm:$0xff] %v8990_v31 }
 0x360   : > { %v1894_v3 = vand.u32 255, %v1773_v32 }
 0x361   : > { %v8998_v32 = vpop.f32.mrf.mxu3 }
 0x362   : > { %v2039_v47 = vpop.f32.mrf.mxu0 }
 0x363   : > { %v2088_v37 = vpop.f32.mrf.mxu1 }
 0x364   : > { %v8972_v58 = vadd.f32 %v2088_v37, %v2039_v47  ;;  %v1785_v22 = vpop.xlane.xlu1 %1784  ;;  %v8974_v49 = vpop.xlane.xlu0 %1876  ;;  %v9005_v37 = vsub.s32 255, %v1894_v3 }
 0x365   : > { %v1786_v6 = vcvt.f32.s32 %v1785_v22  ;;  %vm1878_vm14 = vcmp.eq.f32.partialorder %v8767_v20, %v8974_v49  ;;  %v8996_v20 = vsel %vm1929_vm12, 2147483648, %v8348_v12  ;;  %v9003_v47 = vpop.f32.mrf.mxu2  ;;  %v1803_v12 = vcvt.f32.s32 %v8803_v2 }
 0x366   : > { %14772 = vst [vmem:[#allocation36_spill] sm:$0xff] %v8972_v58  ;;  %v1879_v55 = vsel %vm1878_vm14, %v1874_v33, -inf  ;;  %v8984_v27 = vpop.xlane.xlu2 %1860  ;;  %v9024_v22 = vsel %vm1927_vm5, 2147483648, %v8324_v18  ;;  %vm2288_vm3 = vcmp.gt.s32.totalorder %v8990_v31, %v8996_v20  ;;  %v1819_v18 = vcvt.f32.s32 %v8810_v21 }
 0x367   : > { %v1789_v42 = vadd.s32 %v1788_v24, %v1786_v6  ;;  %1880 = vmax.xlane.f32.xlu0 %v1879_v55  ;;  %14774 = vst [vmem:[#allocation38_spill] sm:$0xff] %v8996_v20  ;;  %vm1862_vm11 = vcmp.eq.f32.partialorder %v8776_v36, %v8984_v27  ;;  %v2243_v55 = vshra.s32 %v8980_v44, 16  ;;  %v9009_v24 = vsel %vm2224_vm10, %v8964_v40, %v8970_v19 }
 0x368   : > { %v1863_v14 = vsel %vm1862_vm11, %v1858_v10, -inf  ;;  %v9018_v36 = vsel %vm1926_vm7, 2147483648, %v8319_v34  ;;  %14776 = vst [vmem:[#allocation40_spill] sm:$0xff] %v9024_v22  ;;  %vm1934_vm7 = vcmp.eq.s32.totalorder %v7818_v43, %v9005_v37  ;;  %vm1935_vm6 = vcmp.eq.s32.totalorder %v7821_v50, %v9005_v37 }
 0x369   : > { %v1895_v29 = vand.u32 255, %v1789_v42  ;;  %1864 = vmax.xlane.f32.xlu2 %v1863_v14  ;;  %v9032_v6 = vcvt.s32.f32 %v2243_v55  ;;  %v2227_v42 = vshra.s32 %v9009_v24, 16  ;;  %v9052_v41 = vsel %vm2288_vm3, %v8990_v31, %v8996_v20 }
 0x36a   : > { %v9012_v63 = vpop.f32.mrf.mxu0  ;;  %vm2272_vm4 = vcmp.gt.s32.totalorder %v9018_v36, %v9024_v22  ;;  %v1804_v10 = vshll.u32 %v1803_v12, 16  ;;  %v9068_v21 = vsel %vm1930_vm13, 2147483648, %v8376_v60  ;;  %v9077_v14 = vsel %vm1931_vm2, 2147483648, %v8381_v45 }
 0x36b   : > { %14775 = vst [vmem:[#allocation39_spill] sm:$0xff] %v9012_v63  ;;  %v9026_v33 = vsub.s32 255, %v1895_v29  ;;  %v9028_v3 = vpop.f32.mrf.mxu1  ;;  %v9071_v29 = vcvt.s32.f32 %v2227_v42  ;;  %v2291_v58 = vshra.s32 %v9052_v41, 16  ;;  %v9082_v60 = vsel %vm2272_vm4, %v9018_v36, %v9024_v22 }
 0x36c   : > { %14777 = vst [vmem:[#allocation41_spill] sm:$0xff] %v9028_v3  ;;  %v1801_v2 = vpop.xlane.xlu1 %1800  ;;  %v1820_v3 = vshll.u32 %v1819_v18, 16  ;;  %vm2304_vm13 = vcmp.gt.s32.totalorder %v9068_v21, %v9077_v14 }
 0x36d   : > { %v1802_v34 = vcvt.f32.s32 %v1801_v2  ;;  %vm1936_vm8 = vcmp.eq.s32.totalorder %v7818_v43, %v9026_v33  ;;  %vm1937_vm12 = vcmp.eq.s32.totalorder %v7821_v50, %v9026_v33  ;;  %14778 = vst [vmem:[#allocation42_spill] sm:$0xff] %v9077_v14  ;;  %v9090_v31 = vcvt.s32.f32 %v2291_v58 }
 0x36e   : > { %vm6703_vm5 = vmpackc.low %vm1936_vm8, %vm1934_vm7  ;;  %v9094_v18 = vsel %vm2304_vm13, %v9068_v21, %v9077_v14 }
 0x36f   : > { %2246 = vmax.xlane.f32.xlu0 %v9032_v6  ;;  %6704 = vmatmul.msk.bf16.gmra.mxu0 %vm6703_vm5, %v14735_v7  ;;  %vm6719_vm9 = vmpackc.low %vm1937_vm12, %vm1935_vm6  ;;  %v1805_v12 = vadd.s32 %v1804_v10, %v1802_v34  ;;  %v2275_v34 = vshra.s32 %v9082_v60, 16  ;;  %v2307_v58 = vshra.s32 %v9094_v18, 16 }
 0x370   : > { %6720 = vmatmul.msk.bf16.gmra.mxu1 %vm6719_vm9, %v14735_v7  ;;  %v1488_v55 = vpop.f32.mrf.mxu3  ;;  %v1817_v52 = vpop.xlane.xlu2 %1816 }
 0x371   : > { %v1537_v2 = vpop.f32.mrf.mxu2  ;;  %v1818_v63 = vcvt.f32.s32 %v1817_v52  ;;  %2230 = vmax.xlane.f32.xlu2 %v9071_v29  ;;  %v1896_v10 = vand.u32 255, %v1805_v12  ;;  %v9099_v22 = vcvt.s32.f32 %v2275_v34 }
 0x372   : > { %v2044_v42 = vpop.f32.mrf.mxu0 }
 0x373   : > { %v2093_v20 = vpop.f32.mrf.mxu1  ;;  %v1821_v45 = vadd.s32 %v1820_v3, %v1818_v63  ;;  %v9102_v63 = vsub.s32 255, %v1896_v10  ;;  %v9114_v10 = vcvt.s32.f32 %v2307_v58 }
 0x374   : > { %v9087_v26 = vadd.f32 %v2093_v20, %v2044_v42  ;;  %v1835_v20 = vcvt.f32.s32 %v8819_v5  ;;  %v1538_v42 = vadd.f32 %v1537_v2, %v1488_v55  ;;  %v1851_v55 = vcvt.f32.s32 %v8860_v57 }
 0x375   : > { %v1897_v23 = vand.u32 255, %v1821_v45  ;;  %vm1938_vm10 = vcmp.eq.s32.totalorder %v7818_v43, %v9102_v63  ;;  %vm1939_vm3 = vcmp.eq.s32.totalorder %v7821_v50, %v9102_v63  ;;  %v1535_v2 = vadd.f32 %v9003_v47, %v8998_v32 }
 0x376   : > { %14779 = vst [vmem:[#allocation43_spill] sm:$0xff] %v9087_v26  ;;  %v1836_v34 = vshll.u32 %v1835_v20, 16  ;;  %v1533_v57 = vadd.f32 %v8953_v13, %v8938_v30  ;;  %v1852_v47 = vshll.u32 %v1851_v55, 16  ;;  %v2210_v30 = vand.u32 65535, %v8866_v59 }
 0x377   : > { %2294 = vmax.xlane.f32.xlu0 %v9090_v31  ;;  %v9097_v52 = vsub.s32 255, %v1897_v23  ;;  %v9156_v13 = vsel %vm1933_vm1, 2147483648, %v8409_v53 }
 0x378   : > { %v1490_v51 = vpop.f32.mrf.mxu3  ;;  %v1833_v12 = vpop.xlane.xlu0 %1832  ;;  %14783 = vst [vmem:[#allocation47_spill] sm:$0xff] %v9156_v13  ;;  %v2212_v59 = vcvt.s32.f32 %v2210_v30  ;;  %v14787_v30 = vld [vmem:[#allocation32_spill] sm:$0xff] }
 0x379   : > { %v1539_v3 = vpop.f32.mrf.mxu2  ;;  %2278 = vmax.xlane.f32.xlu2 %v9099_v22  ;;  %v1834_v14 = vcvt.f32.s32 %v1833_v12  ;;  %vm1940_vm2 = vcmp.eq.s32.totalorder %v7818_v43, %v9097_v52  ;;  %vm1941_vm14 = vcmp.eq.s32.totalorder %v7821_v50, %v9097_v52 }
 0x37a   : > { %v1540_v45 = vadd.f32 %v1539_v3, %v1490_v51  ;;  %v9106_v26 = vpop.f32.mrf.mxu0  ;;  %vm6705_vm11 = vmpackc.low %vm1940_vm2, %vm1938_vm10 }
 0x37b   : > { %14780 = vst [vmem:[#allocation44_spill] sm:$0xff] %v9106_v26  ;;  %v9108_v23 = vpop.f32.mrf.mxu1  ;;  %v1837_v20 = vadd.s32 %v1836_v34, %v1834_v14  ;;  %vm6721_vm5 = vmpackc.low %vm1941_vm14, %vm1939_vm3  ;;  %v1530_v34 = vadd.f32 %v8908_v35, %v8906_v38  ;;  %v1528_v35 = vadd.f32 %v8901_v56, %v8899_v61  ;;  %v2258_v61 = vand.u32 65535, %v8887_v39 }
 0x37c   : > { %14781 = vst [vmem:[#allocation45_spill] sm:$0xff] %v9108_v23  ;;  %v1551_v5 = vpack.c.bf16 %v1540_v45, %v1538_v42  ;;  %v1550_v42 = vpack.c.bf16 %v1535_v2, %v1533_v57  ;;  %v9200_v56 = vsel %vm1934_vm7, 2147483648, %v8446_v16  ;;  %v9206_v57 = vsel %vm1935_vm6, 2147483648, %v8451_v48 }
 0x37d   : > { %v1898_v14 = vand.u32 255, %v1837_v20  ;;  %v1549_v0 = vpack.c.bf16 %v1530_v34, %v1528_v35  ;;  %14784 = vst [vmem:[#allocation48_spill] sm:$0xff] %v9200_v56  ;;  %vm2336_vm7 = vcmp.gt.s32.totalorder %v9200_v56, %v9206_v57  ;;  %v2260_v37 = vcvt.s32.f32 %v2258_v61 }
 0x37e   : > { %v1582_v51 = vsel %vm14436_vm0, %v1551_v5, 0  ;;  %v1579_v20 = vsel %vm14436_vm0, %v1550_v42, 0  ;;  %14785 = vst [vmem:[#allocation49_spill] sm:$0xff] %v9206_v57 }
 0x37f   : > { %2310 = vmax.xlane.f32.xlu0 %v9114_v10  ;;  %6706 = vmatmul.msk.bf16.gmra.mxu0 %vm6705_vm11, %v14735_v7  ;;  %v9158_v55 = vsub.s32 255, %v1898_v14  ;;  %v1520_v14 = vadd.f32 %v8750_v46, %v8736_v62  ;;  %v14788_v46 = vld [vmem:[#allocation14_spill] sm:$0xff] }
 0x380   : > { %6722 = vmatmul.msk.bf16.gmra.mxu1 %vm6721_vm5, %v14735_v7  ;;  %1584 = vmatpush.bf16.xpose.msrb.mxu3 %v1582_v51  ;;  %v9149_v51 = vsel %vm1932_vm15, 2147483648, %v8406_v17 }
 0x381   : > { %14782 = vst [vmem:[#allocation46_spill] sm:$0xff] %v9149_v51  ;;  %vm2320_vm15 = vcmp.gt.s32.totalorder %v9149_v51, %v9156_v13  ;;  %vm1942_vm4 = vcmp.eq.s32.totalorder %v7818_v43, %v9158_v55  ;;  %vm14437_vm5 = vcmp.eq.s32.totalorder %v7821_v50, %v9158_v55 }
 0x382   : > { %v2049_v3 = vpop.f32.mrf.mxu0  ;;  %v1849_v32 = vpop.xlane.xlu1 %1848 }
 0x383   : > { %v2098_v12 = vpop.f32.mrf.mxu1  ;;  %v1850_v58 = vcvt.f32.s32 %v1849_v32  ;;  %v1576_v32 = vsel %vm14436_vm0, %v1549_v0, 0  ;;  %v14791_v0 = vld [vmem:[#allocation8_spill] sm:$0xff] }
 0x384   : > { %v9141_v45 = vadd.f32 %v2098_v12, %v2049_v3  ;;  %v1525_v3 = vadd.f32 %v8896_v11, %v8894_v54 }
 0x385   : > { %v1853_v5 = vadd.s32 %v1852_v47, %v1850_v58  ;;  %v9225_v47 = vsel %vm2336_vm7, %v9200_v56, %v9206_v57 }
 0x386   : > { %v1548_v54 = vpack.c.bf16 %v1525_v3, %v8801_v28  ;;  %v2339_v58 = vshra.s32 %v9225_v47, 16  ;;  %v1547_v28 = vpack.c.bf16 %v1520_v14, %v8714_v4  ;;  %v14790_v4 = vld [vmem:[#allocation13_spill] sm:$0xff] }
 0x387   : > { %v1899_v2 = vand.u32 255, %v1853_v5  ;;  %v14793_v3 = vld [vmem:[#allocation5_spill] sm:$0xff] }
 0x388   : > { %1585 = vmatpush.bf16.xpose.msrb.mxu3 %v1579_v20  ;;  %v1573_v12 = vsel %vm14436_vm0, %v1548_v54, 0  ;;  %v9232_v42 = vcvt.s32.f32 %v2339_v58  ;;  %v1570_v34 = vsel %vm14436_vm0, %v1547_v28, 0  ;;  %v14795_v54 = vld [vmem:[#allocation20_spill] sm:$0xff]  ;;  %v9253_v14 = vld [vmem:[%s8022_s10 + $0x20] sm:$0xff]  ;;  %v9261_v58 = vld [vmem:[%s8022_s10 + $0x10] sm:$0xff] }
 0x389   : > { %v9163_v38 = vsub.s32 255, %v1899_v2  ;;  %v14789_v2 = vld [vmem:[#allocation31_spill] sm:$0xff]  ;;  %14799 = vst [vmem:[#allocation14_spill] sm:$0xff] %v9261_v58  ;;  %v9265_v28 = vld [vmem:[%s8022_s10 + $0x8] sm:$0xff] }
 0x38a   : > { %v9167_v17 = vpop.xlane.xlu1 %2214  ;;  %v1510_v20 = vadd.f32 %v14789_v2, %v14788_v46  ;;  %14800 = vst [vmem:[#allocation31_spill] sm:$0xff] %v9265_v28 }
 0x38b   : > { %vm2216_vm1 = vcmp.eq.f32.partialorder %v8883_v25, %v9167_v17  ;;  %vm1944_vm9 = vcmp.eq.s32.totalorder %v7818_v43, %v9163_v38  ;;  %vm1945_vm13 = vcmp.eq.s32.totalorder %v7821_v50, %v9163_v38  ;;  %v9187_v25 = vsel %vm2320_vm15, %v9149_v51, %v9156_v13  ;;  %v14816_v38 = vld [vmem:[#allocation10_spill] sm:$0xff] }
 0x38c   : > { %v2217_v53 = vsel %vm2216_vm1, %v2212_v59, -inf  ;;  %vm6707_vm11 = vmpackc.low %vm1944_vm9, %vm1942_vm4  ;;  %v2323_v39 = vshra.s32 %v9187_v25, 16  ;;  %v1545_v59 = vpack.c.bf16 %v1510_v20, %v14790_v4 }
 0x38d   : > { %2218 = vmax.xlane.f32.xlu1 %v2217_v53  ;;  %vm6723_vm1 = vmpackc.low %vm1945_vm13, %vm14437_vm5  ;;  %v14792_v53 = vld [vmem:[#allocation9_spill] sm:$0xff] }
 0x38e   : > { %v9218_v48 = vcvt.s32.f32 %v2323_v39  ;;  %v1564_v61 = vsel %vm14436_vm0, %v1545_v59, 0 }
 0x38f   : > { %6708 = vmatmul.msk.bf16.gmra.mxu0 %vm6707_vm11, %v14735_v7 }
 0x390   : > { %6724 = vmatmul.msk.bf16.gmra.mxu1 %vm6723_vm1, %v14735_v7  ;;  %1586 = vmatpush.bf16.xpose.msrb.mxu3 %v1576_v32 }
 0x392   : > { %v9216_v16 = vpop.xlane.xlu1 %2262 }
 0x393   : > { %vm2264_vm6 = vcmp.eq.f32.partialorder %v8891_v8, %v9216_v16  ;;  %v14786_v8 = vld [vmem:[#allocation26_spill] sm:$0xff] }
 0x394   : > { %v2265_v11 = vsel %vm2264_vm6, %v2260_v37, -inf  ;;  %v1515_v5 = vadd.f32 %v14786_v8, %v8673_v9  ;;  %v1505_v9 = vadd.f32 %v14792_v53, %v14791_v0  ;;  %v14794_v37 = vld [vmem:[#allocation18_spill] sm:$0xff]  ;;  %14797 = vst [vmem:[#allocation26_spill] sm:$0xff] %v9253_v14  ;;  %v9268_v8 = vpop.f32.mrf.mxu0 }
 0x395   : > { %2326 = vmax.xlane.f32.xlu1 %v9218_v48  ;;  %2266 = vmax.xlane.f32.xlu0 %v2265_v11  ;;  %v14796_v11 = vld [vmem:[#allocation24_spill] sm:$0xff] }
 0x396   : > { %v1546_v62 = vpack.c.bf16 %v1515_v5, %v14787_v30  ;;  %v1544_v32 = vpack.c.bf16 %v1505_v9, %v14793_v3  ;;  %v9270_v5 = vpop.f32.mrf.mxu1  ;;  %v1883_v30 = vcvt.f32.s32 %v8974_v49 }
 0x398   : > { %1587 = vmatpush.bf16.xpose.msrb.mxu3 %v1573_v12  ;;  %v1567_v35 = vsel %vm14436_vm0, %v1546_v62, 0  ;;  %v1561_v39 = vsel %vm14436_vm0, %v1544_v32, 0  ;;  %v9257_v12 = vld [vmem:[%s8022_s10 + $0x18] sm:$0xff]  ;;  %v1867_v62 = vcvt.f32.s32 %v8984_v27  ;;  %v1884_v20 = vshll.u32 %v1883_v30, 16 }
 0x399   : > { %14798 = vst [vmem:[#allocation32_spill] sm:$0xff] %v9257_v12 }
 0x39a   : > { %v1868_v9 = vshll.u32 %v1867_v62, 16  ;;  %v2290_v62 = vand.u32 65535, %v9052_v41  ;;  %v2242_v41 = vand.u32 65535, %v8980_v44 }
 0x39d   : > { %2342 = vmax.xlane.f32.xlu1 %v9232_v42 }
 0x3a0   : > { %1588 = vmatpush.bf16.xpose.msrb.mxu3 %v1570_v34  ;;  %v9273_v34 = vld [vmem:[%s8022_s10] sm:$0xff] }
 0x3a1   : > { %14801 = vst [vmem:[#allocation13_spill] sm:$0xff] %v9273_v34 }
 0x3a8   : > { %1589 = vmatpush.bf16.xpose.msrb.mxu3 %v1567_v35 }
 0x3b0   : > { %1590 = vmatpush.bf16.xpose.msrb.mxu3 %v1564_v61 }
 0x3b8   : > { %1591 = vmatpush.bf16.xpose.msrb.mxu3 %v1561_v39  ;;  %v2226_v39 = vand.u32 65535, %v9009_v24 }
 0x3c0   : > { %2608 = vmatpush.bf16.msra.mxu3 %v14794_v37 }
 0x3c4   : > { %2609 = vmatpush.bf16.msra.mxu3 %v14795_v54 }
 0x3c8   : > { %2610 = vmatpush.bf16.msra.mxu3 %v14796_v11 }
 0x3cc   : > { %2611 = vmatpush.bf16.msra.mxu3 %v9253_v14 }
 0x3d0   : > { %2612 = vmatpush.bf16.msra.mxu3 %v9257_v12 }
 0x3d4   : > { %2613 = vmatpush.bf16.msra.mxu3 %v9261_v58 }
 0x3d8   : > { %2614 = vmatpush.bf16.msra.mxu3 %v9265_v28 }
 0x3da   : > { %v1881_v46 = vpop.xlane.xlu0 %1880  ;;  %v2054_v2 = vpop.f32.mrf.mxu0 }
 0x3db   : > { %v1882_v35 = vcvt.f32.s32 %v1881_v46  ;;  %v2103_v4 = vpop.f32.mrf.mxu1 }
 0x3dc   : > { %2615 = vmatpush.bf16.msra.mxu3 %v9273_v34  ;;  %v9278_v59 = vadd.f32 %v2103_v4, %v2054_v2  ;;  %v1865_v53 = vpop.xlane.xlu2 %1864  ;;  %v2228_v2 = vcvt.s32.f32 %v2226_v39  ;;  %v14804_v4 = vld [vmem:[#allocation7_spill] sm:$0xff] }
 0x3dd   : > { %v1885_v0 = vadd.s32 %v1884_v20, %v1882_v35  ;;  %v1866_v61 = vcvt.f32.s32 %v1865_v53  ;;  %v14802_v20 = vld [vmem:[#allocation6_spill] sm:$0xff]  ;;  %v14806_v53 = vld [vmem:[#allocation15_spill] sm:$0xff] }
 0x3de   : > { %v9324_v35 = vsel %vm1936_vm8, 2147483648, %v14802_v20  ;;  %v9336_v44 = vsel %vm1940_vm2, 2147483648, %v14806_v53  ;;  %v14812_v20 = vld [vmem:[#allocation22_spill] sm:$0xff]  ;;  %v14814_v53 = vld [vmem:[#allocation11_spill] sm:$0xff] }
 0x3df   : > { %v1901_v3 = vand.u32 255, %v1885_v0  ;;  %v1869_v32 = vadd.s32 %v1868_v9, %v1866_v61  ;;  %14803 = vst [vmem:[#allocation8_spill] sm:$0xff] %v9324_v35  ;;  %v9330_v0 = vsel %vm1937_vm12, 2147483648, %v14804_v4  ;;  %v9371_v4 = vsel %vm1945_vm13, 2147483648, %v14812_v20 }
 0x3e0   : > { %14805 = vst [vmem:[#allocation9_spill] sm:$0xff] %v9330_v0  ;;  %vm2352_vm2 = vcmp.gt.s32.totalorder %v9324_v35, %v9330_v0 }
 0x3e1   : > { %v9281_v37 = vsub.s32 255, %v1901_v3  ;;  %v1900_v49 = vand.u32 255, %v1869_v32  ;;  %14807 = vst [vmem:[#allocation5_spill] sm:$0xff] %v9336_v44  ;;  %v2292_v3 = vcvt.s32.f32 %v2290_v62  ;;  %v2306_v62 = vand.u32 65535, %v9094_v18 }
 0x3e2   : > { %v9283_v54 = vpop.xlane.xlu0 %2246  ;;  %v9285_v27 = vpop.f32.mrf.mxu0  ;;  %14813 = vst [vmem:[#allocation24_spill] sm:$0xff] %v9371_v4  ;;  %v9375_v18 = vsel %vm2352_vm2, %v9324_v35, %v9330_v0 }
 0x3e3   : > { %v9287_v11 = vpop.f32.mrf.mxu1  ;;  %v9289_v30 = vsub.s32 255, %v1900_v49  ;;  %vm1948_vm11 = vcmp.eq.s32.totalorder %v7818_v43, %v9281_v37  ;;  %vm1949_vm0 = vcmp.eq.s32.totalorder %v7821_v50, %v9281_v37  ;;  %vm2248_vm12 = vcmp.eq.f32.partialorder %v9032_v6, %v9283_v54  ;;  %v14810_v6 = vld [vmem:[#allocation21_spill] sm:$0xff] }
 0x3e4   : > { %v9291_v46 = vpop.xlane.xlu2 %2230  ;;  %v2244_v49 = vcvt.s32.f32 %v2242_v41  ;;  %v2355_v20 = vshra.s32 %v9375_v18, 16  ;;  %v2253_v12 = vcvt.f32.s32 %v9283_v54 }
 0x3e5   : > { %vm1946_vm15 = vcmp.eq.s32.totalorder %v7818_v43, %v9289_v30  ;;  %vm1947_vm1 = vcmp.eq.s32.totalorder %v7821_v50, %v9289_v30  ;;  %vm2232_vm7 = vcmp.eq.f32.partialorder %v9071_v29, %v9291_v46  ;;  %v2274_v29 = vand.u32 65535, %v9082_v60  ;;  %v14808_v60 = vld [vmem:[#allocation12_spill] sm:$0xff] }
 0x3e6   : > { %vm6709_vm6 = vmpackc.low %vm1948_vm11, %vm1946_vm15  ;;  %v2233_v24 = vsel %vm2232_vm7, %v2228_v2, -inf  ;;  %v9342_v9 = vsel %vm1941_vm14, 2147483648, %v14808_v60  ;;  %v2249_v41 = vsel %vm2248_vm12, %v2244_v49, -inf  ;;  %v9385_v60 = vsel %vm1938_vm10, 2147483648, %v14814_v53 }
 0x3e7   : > { %6710 = vmatmul.msk.bf16.gmra.mxu0 %vm6709_vm6, %v14735_v7  ;;  %vm6725_vm5 = vmpackc.low %vm1949_vm0, %vm1947_vm1  ;;  %2234 = vmax.xlane.f32.xlu2 %v2233_v24  ;;  %14809 = vst [vmem:[#allocation18_spill] sm:$0xff] %v9342_v9  ;;  %v2276_v2 = vcvt.s32.f32 %v2274_v29  ;;  %v9365_v24 = vsel %vm1944_vm9, 2147483648, %v14810_v6  ;;  %vm14821_vm10 = vcmp.eq.s32.totalorder %v7821_v50, %v9158_v55  ;;  %v2308_v6 = vcvt.s32.f32 %v2306_v62 }
 0x3e8   : > { %6726 = vmatmul.msk.bf16.gmra.mxu1 %vm6725_vm5, %v14735_v7  ;;  %vm2384_vm5 = vcmp.gt.s32.totalorder %v9336_v44, %v9342_v9  ;;  %14811 = vst [vmem:[#allocation20_spill] sm:$0xff] %v9365_v24  ;;  %vm2416_vm9 = vcmp.gt.s32.totalorder %v9365_v24, %v9371_v4  ;;  %v9421_v55 = vcvt.s32.f32 %v2355_v20  ;;  %v9435_v53 = vsel %vm1947_vm1, 2147483648, %v8744_v15 }
 0x3e9   : > { %14815 = vst [vmem:[#allocation6_spill] sm:$0xff] %v9385_v60  ;;  %vm14826_vm1 = vcmask 64512   ;;  %v2237_v35 = vcvt.f32.s32 %v9291_v46  ;;  %v2254_v14 = vshll.u32 %v2253_v12, 16 }
 0x3ea   : > { %v9344_v61 = vpop.xlane.xlu0 %2294  ;;  %14824 = vst [vmem:[#allocation22_spill] sm:$0xff] %v9435_v53 }
 0x3eb   : > { %vm2296_vm8 = vcmp.eq.f32.partialorder %v9090_v31, %v9344_v61  ;;  %v2238_v56 = vshll.u32 %v2237_v35, 16  ;;  %v2301_v34 = vcvt.f32.s32 %v9344_v61 }
 0x3ec   : > { %v2059_v33 = vpop.f32.mrf.mxu0  ;;  %v2297_v32 = vsel %vm2296_vm8, %v2292_v3, -inf  ;;  %v9354_v39 = vpop.xlane.xlu2 %2278  ;;  %v9393_v3 = vsel %vm1939_vm3, 2147483648, %v14816_v38 }
 0x3ed   : > { %v2108_v52 = vpop.f32.mrf.mxu1  ;;  %2298 = vmax.xlane.f32.xlu1 %v2297_v32  ;;  %vm2280_vm14 = vcmp.eq.f32.partialorder %v9099_v22, %v9354_v39  ;;  %v9379_v22 = vsel %vm2384_vm5, %v9336_v44, %v9342_v9  ;;  %14817 = vst [vmem:[#allocation7_spill] sm:$0xff] %v9393_v3  ;;  %v2302_v35 = vshll.u32 %v2301_v34, 16 }
 0x3ee   : > { %v9357_v31 = vadd.f32 %v2108_v52, %v2059_v33  ;;  %v2281_v29 = vsel %vm2280_vm14, %v2276_v2, -inf  ;;  %v14818_v33 = vld [vmem:[#allocation16_spill] sm:$0xff]  ;;  %v14820_v52 = vld [vmem:[#allocation17_spill] sm:$0xff]  ;;  %v2387_v63 = vshra.s32 %v9379_v22, 16 }
 0x3ef   : > { %2250 = vmax.xlane.f32.xlu2 %v2249_v41  ;;  %2282 = vmax.xlane.f32.xlu0 %v2281_v29  ;;  %v9399_v32 = vsel %vm1942_vm4, 2147483648, %v14818_v33  ;;  %v9405_v49 = vsel %vm14821_vm10, 2147483648, %v14820_v52  ;;  %v9415_v29 = vsel %vm2416_vm9, %v9365_v24, %v9371_v4  ;;  %vm2368_vm4 = vcmp.gt.s32.totalorder %v9385_v60, %v9393_v3 }
 0x3f0   : > { %14819 = vst [vmem:[#allocation15_spill] sm:$0xff] %v9399_v32  ;;  %vm2400_vm13 = vcmp.gt.s32.totalorder %v9399_v32, %v9405_v49  ;;  %v9423_v62 = vcvt.s32.f32 %v2387_v63  ;;  %v2419_v38 = vshra.s32 %v9415_v29, 16  ;;  %v9440_v33 = vsel %vm2368_vm4, %v9385_v60, %v9393_v3  ;;  %v14827_v60 = vld [vmem:[#allocation28_spill] sm:$0xff] }
 0x3f1   : > { %14822 = vst [vmem:[#allocation12_spill] sm:$0xff] %v9405_v49  ;;  %v9444_v52 = vsel %vm2400_vm13, %v9399_v32, %v9405_v49  ;;  %v14829_v49 = vld [vmem:[#allocation30_spill] sm:$0xff]  ;;  %vm14834_vm13 = vmmov %vm14826_vm1 }
 0x3f2   : > { %v9407_v2 = vpop.xlane.xlu0 %2310  ;;  %v2403_v15 = vshra.s32 %v9444_v52, 16  ;;  %v9452_v30 = vcvt.s32.f32 %v2419_v38 }
 0x3f3   : > { %vm2312_vm3 = vcmp.eq.f32.partialorder %v9114_v10, %v9407_v2  ;;  %v9429_v10 = vsel %vm1946_vm15, 2147483648, %v8741_v1  ;;  %v2371_v1 = vshra.s32 %v9440_v33, 16 }
 0x3f4   : > { %v2313_v41 = vsel %vm2312_vm3, %v2308_v6, -inf  ;;  %14823 = vst [vmem:[#allocation21_spill] sm:$0xff] %v9429_v10  ;;  %vm2432_vm15 = vcmp.gt.s32.totalorder %v9429_v10, %v9435_v53  ;;  %v9457_v6 = vld [vmem:[%s14380_s3] sm:$0xff] }
 0x3f5   : > { %2314 = vmax.xlane.f32.xlu1 %v2313_v41  ;;  %14825 = vst [vmem:[#allocation11_spill] sm:$0xff] %v9457_v6  ;;  %v9461_v20 = vsel %vm2432_vm15, %v9429_v10, %v9435_v53  ;;  %6662 = vmatmul.msk.bf16.vlgmr.msrb.gmra.mxu3 %vm14826_vm1, %v9457_v6  ;;  %v9466_v63 = vcvt.s32.f32 %v2371_v1  ;;  %v9468_v41 = vcvt.s32.f32 %v2403_v15  ;;  %v2322_v53 = vand.u32 65535, %v9187_v25 }
 0x3f6   : > { %v2435_v38 = vshra.s32 %v9461_v20, 16  ;;  %v2338_v15 = vand.u32 65535, %v9225_v47  ;;  %v9492_v25 = vsel %vm1949_vm0, 2147483648, %v14829_v49  ;;  %v9508_v49 = vpop.f32.mrf.mxu0 }
 0x3f7   : > { %2358 = vmax.xlane.f32.xlu2 %v9421_v55  ;;  %2390 = vmax.xlane.f32.xlu0 %v9423_v62  ;;  %v2324_v3 = vcvt.s32.f32 %v2322_v53  ;;  %14830 = vst [vmem:[#allocation16_spill] sm:$0xff] %v9492_v25 }
 0x3f8   : > { %v9473_v24 = vcvt.s32.f32 %v2435_v38  ;;  %v9486_v38 = vsel %vm1948_vm11, 2147483648, %v14827_v60 }
 0x3f9   : > { %14828 = vst [vmem:[#allocation10_spill] sm:$0xff] %v9486_v38  ;;  %vm2448_vm6 = vcmp.gt.s32.totalorder %v9486_v38, %v9492_v25 }
 0x3fa   : > { %v9502_v60 = vsel %vm2448_vm6, %v9486_v38, %v9492_v25 }
 0x3fb   : > { %v2451_v53 = vshra.s32 %v9502_v60, 16 }
 0x3fd   : > { %2422 = vmax.xlane.f32.xlu1 %v9452_v30  ;;  %v9505_v37 = vcvt.s32.f32 %v2451_v53 }
 0x3ff   : > { %2374 = vmax.xlane.f32.xlu2 %v9466_v63  ;;  %2406 = vmax.xlane.f32.xlu0 %v9468_v41 }
 0x400   : > { %v2219_v4 = vpop.xlane.xlu1 %2218 }
 0x401   : > { %v2220_v53 = vcvt.f32.s32 %v2219_v4  ;;  %v2269_v4 = vcvt.f32.s32 %v9216_v16 }
 0x403   : > { %v2270_v61 = vshll.u32 %v2269_v4, 16  ;;  %v2354_v4 = vand.u32 65535, %v9375_v18 }
 0x405   : > { %2438 = vmax.xlane.f32.xlu1 %v9473_v24 }
 0x408   : > { %v9477_v10 = vpop.xlane.xlu1 %2326  ;;  %v2267_v44 = vpop.xlane.xlu0 %2266 }
 0x409   : > { %vm2328_vm7 = vcmp.eq.f32.partialorder %v9218_v48, %v9477_v10 }
 0x40a   : > { %v2329_v1 = vsel %vm2328_vm7, %v2324_v3, -inf  ;;  %v2340_v3 = vcvt.s32.f32 %v2338_v15  ;;  %v9512_v15 = vpop.f32.mrf.mxu0 }
 0x40b   : > { %2330 = vmax.xlane.f32.xlu2 %v2329_v1  ;;  %v9510_v1 = vpop.f32.mrf.mxu1 }
 0x410   : > { %v9496_v48 = vpop.xlane.xlu1 %2342 }
 0x411   : > { %14831 = vst [vmem:[#allocation17_spill] sm:$0xff] %v9496_v48  ;;  %vm2344_vm8 = vcmp.eq.f32.partialorder %v9232_v42, %v9496_v48 }
 0x412   : > { %v2345_v47 = vsel %vm2344_vm8, %v2340_v3, -inf  ;;  %v9516_v42 = vpop.f32.mrf.mxu0 }
 0x413   : > { %2346 = vmax.xlane.f32.xlu2 %v2345_v47  ;;  %v9514_v32 = vpop.f32.mrf.mxu1  ;;  %v2221_v47 = vcvt.f32.s32 %v9167_v17 }
 0x415   : > { %v2222_v0 = vshll.u32 %v2221_v47, 16  ;;  %v2285_v47 = vcvt.f32.s32 %v9354_v39 }
 0x417   : > { %v2223_v9 = vadd.s32 %v2222_v0, %v2220_v53  ;;  %v2286_v6 = vshll.u32 %v2285_v47, 16 }
 0x419   : > { %v2464_v13 = vand.u32 255, %v2223_v9 }
 0x41a   : > { %v9521_v25 = vpop.f32.mrf.mxu0 }
 0x41b   : > { %2454 = vmax.xlane.f32.xlu2 %v9505_v37  ;;  %v9518_v3 = vpop.f32.mrf.mxu1  ;;  %v9534_v46 = vsub.s32 255, %v2464_v13 }
 0x41d   : > { %vm2496_vm0 = vcmp.eq.s32.totalorder %v7818_v43, %v9534_v46  ;;  %vm2497_vm8 = vcmp.eq.s32.totalorder %v7821_v50, %v9534_v46 }
 0x422   : > { %v9527_v28 = vpop.f32.mrf.mxu0 }
 0x423   : > { %v9523_v38 = vpop.f32.mrf.mxu1 }
 0x42b   : > { %v9529_v58 = vpop.f32.mrf.mxu1 }
 0x45a   : > { %v2235_v57 = vpop.xlane.xlu2 %2234 }
 0x45b   : > { %v2236_v51 = vcvt.f32.s32 %v2235_v57  ;;  %v2268_v57 = vcvt.f32.s32 %v2267_v44 }
 0x45d   : > { %v2239_v17 = vadd.s32 %v2238_v56, %v2236_v51  ;;  %v2271_v12 = vadd.s32 %v2270_v61, %v2268_v57 }
 0x45f   : > { %v2465_v0 = vand.u32 255, %v2239_v17  ;;  %v2386_v17 = vand.u32 65535, %v9379_v22 }
 0x460   : > { %v2299_v53 = vpop.xlane.xlu1 %2298 }
 0x461   : > { %v2300_v9 = vcvt.f32.s32 %v2299_v53  ;;  %v9536_v48 = vsub.s32 255, %v2465_v0  ;;  %v2467_v53 = vand.u32 255, %v2271_v12  ;;  %v2388_v57 = vcvt.s32.f32 %v2386_v17 }
 0x462   : > { %v2283_v51 = vpop.xlane.xlu0 %2282  ;;  %v2251_v56 = vpop.xlane.xlu2 %2250 }
 0x463   : > { %v2303_v23 = vadd.s32 %v2302_v35, %v2300_v9  ;;  %v2284_v16 = vcvt.f32.s32 %v2283_v51  ;;  %v2252_v26 = vcvt.f32.s32 %v2251_v56  ;;  %vm2498_vm11 = vcmp.eq.s32.totalorder %v7818_v43, %v9536_v48 }
 0x464   : > { %v2074_v13 = vpop.f32.mrf.mxu0  ;;  %vm6760_vm12 = vmpackc.low %vm2498_vm11, %vm2496_vm0  ;;  %v2402_v56 = vand.u32 65535, %v9444_v52  ;;  %v9568_v12 = vsub.s32 255, %v2467_v53  ;;  %vm2499_vm3 = vcmp.eq.s32.totalorder %v7821_v50, %v9536_v48  ;;  %v2434_v53 = vand.u32 65535, %v9461_v20 }
 0x465   : > { %v2287_v34 = vadd.s32 %v2286_v6, %v2284_v16  ;;  %v2255_v54 = vadd.s32 %v2254_v14, %v2252_v26  ;;  %v2123_v44 = vpop.f32.mrf.mxu1  ;;  %6761 = vmatmul.msk.bf16.vlgmr.msra.gmra.mxu3 %vm6760_vm12, %v14735_v7  ;;  %v2469_v39 = vand.u32 255, %v2303_v23  ;;  %v2356_v6 = vcvt.s32.f32 %v2354_v4 }
 0x466   : > { %v2404_v52 = vcvt.s32.f32 %v2402_v56  ;;  %vm2502_vm15 = vcmp.eq.s32.totalorder %v7818_v43, %v9568_v12  ;;  %v2119_v20 = vadd.f32 %v9523_v38, %v9521_v25  ;;  %v2333_v56 = vcvt.f32.s32 %v9477_v10 }
 0x467   : > { %v2468_v47 = vand.u32 255, %v2287_v34  ;;  %v2466_v35 = vand.u32 255, %v2255_v54  ;;  %v9559_v14 = vsub.s32 255, %v2469_v39  ;;  %v2370_v34 = vand.u32 65535, %v9440_v33 }
 0x468   : > { %v9551_v0 = vpop.xlane.xlu1 %2314  ;;  %v2124_v54 = vadd.f32 %v2123_v44, %v2074_v13  ;;  %v2121_v44 = vadd.f32 %v9529_v58, %v9527_v28  ;;  %v9609_v58 = vsel %vm2498_vm11, 2147483648, %v8964_v40  ;;  %v9615_v28 = vsel %vm2499_vm3, 2147483648, %v8970_v19 }
 0x469   : > { %v9557_v26 = vsub.s32 255, %v2468_v47  ;;  %v9566_v16 = vsub.s32 255, %v2466_v35  ;;  %vm2507_vm9 = vcmp.eq.s32.totalorder %v7821_v50, %v9559_v14  ;;  %v2372_v13 = vcvt.s32.f32 %v2370_v34 }
 0x46a   : > { %v9553_v9 = vpop.xlane.xlu0 %2390  ;;  %v9555_v51 = vpop.xlane.xlu2 %2358  ;;  %v2317_v40 = vcvt.f32.s32 %v9407_v2  ;;  %v2134_v19 = vpack.c.bf16 %v2121_v44, %v2119_v20  ;;  %vm2802_vm11 = vcmp.gt.s32.totalorder %v9609_v58, %v9615_v28  ;;  %v2316_v38 = vcvt.f32.s32 %v9551_v0  ;;  %v14840_v20 = vld [vmem:[#allocation27_spill] sm:$0xff] }
 0x46b   : > { %vm2392_vm2 = vcmp.eq.f32.partialorder %v9423_v62, %v9553_v9  ;;  %vm2360_vm5 = vcmp.eq.f32.partialorder %v9421_v55, %v9555_v51  ;;  %vm2505_vm14 = vcmp.eq.s32.totalorder %v7821_v50, %v9557_v26  ;;  %vm2500_vm4 = vcmp.eq.s32.totalorder %v7818_v43, %v9566_v16 }
 0x46c   : > { %v2076_v23 = vpop.f32.mrf.mxu0  ;;  %v2393_v18 = vsel %vm2392_vm2, %v2388_v57, -inf  ;;  %v2361_v22 = vsel %vm2360_vm5, %v2356_v6, -inf  ;;  %vm9583_vm10 = vmpackc.low %vm2507_vm9, %vm2505_vm14  ;;  %v2436_v57 = vcvt.s32.f32 %v2434_v53  ;;  %v14835_v6 = vld [vmem:[#allocation19_spill] sm:$0xff]  ;;  %vm2504_vm2 = vcmp.eq.s32.totalorder %v7818_v43, %v9557_v26 }
 0x46d   : > { %v2125_v61 = vpop.f32.mrf.mxu1  ;;  %2394 = vmax.xlane.f32.xlu1 %v2393_v18  ;;  %2362 = vmax.xlane.f32.xlu0 %v2361_v22  ;;  %vm6762_vm6 = vmpackc.low %vm2502_vm15, %vm2500_vm4  ;;  %v9639_v2 = vsel %vm2496_vm0, 2147483648, %v14835_v6  ;;  %v2116_v0 = vadd.f32 %v9518_v3, %v9516_v42  ;;  %v9667_v42 = vsel %vm2504_vm2, 2147483648, %v9018_v36  ;;  %v14838_v3 = vld [vmem:[#allocation40_spill] sm:$0xff]  ;;  %v2365_v46 = vcvt.f32.s32 %v9555_v51 }
 0x46e   : > { %v2126_v39 = vadd.f32 %v2125_v61, %v2076_v23  ;;  %v14836_v23 = vld [vmem:[#allocation23_spill] sm:$0xff]  ;;  %v9655_v61 = vsel %vm2802_vm11, %v9609_v58, %v9615_v28  ;;  %vm14837_vm0 = vmmov %vm14834_vm13  ;;  %v9673_v10 = vsel %vm2505_vm14, 2147483648, %v14838_v3  ;;  %v2450_v3 = vand.u32 65535, %v9502_v60 }
 0x46f   : > { %v9645_v18 = vsel %vm2497_vm8, 2147483648, %v14836_v23  ;;  %v2155_v34 = vsel %vm14837_vm0, %v2134_v19, 0  ;;  %vm2850_vm14 = vcmp.gt.s32.totalorder %v9667_v42, %v9673_v10  ;;  %v2397_v51 = vcvt.f32.s32 %v9553_v9 }
 0x470   : > { %v9575_v55 = vpop.xlane.xlu1 %2422  ;;  %v2135_v33 = vpack.c.bf16 %v2126_v39, %v2124_v54  ;;  %v2805_v39 = vshra.s32 %v9655_v61, 16 }
 0x471   : > { %vm2424_vm5 = vcmp.eq.f32.partialorder %v9452_v30, %v9575_v55  ;;  %v2114_v30 = vadd.f32 %v9514_v32, %v9512_v15  ;;  %v14839_v32 = vld [vmem:[#allocation25_spill] sm:$0xff]  ;;  %v2398_v9 = vshll.u32 %v2397_v51, 16 }
 0x472   : > { %v2158_v17 = vsel %vm14834_vm13, %v2135_v33, 0  ;;  %v9594_v4 = vpop.xlane.xlu0 %2406  ;;  %v9596_v47 = vpop.xlane.xlu2 %2374  ;;  %vm2786_vm13 = vcmp.gt.s32.totalorder %v9639_v2, %v9645_v18  ;;  %v9690_v15 = vsel %vm2502_vm15, 2147483648, %v14839_v32  ;;  %vm14841_vm15 = vmmov %vm14837_vm0 }
 0x473   : > { %2160 = vmatpush.bf16.xpose.msrb.mxu2 %v2158_v17  ;;  %vm2408_vm1 = vcmp.eq.f32.partialorder %v9468_v41, %v9594_v4  ;;  %vm2376_vm7 = vcmp.eq.f32.partialorder %v9466_v63, %v9596_v47  ;;  %v2418_v41 = vand.u32 65535, %v9415_v29  ;;  %v2318_v29 = vshll.u32 %v2317_v40, 16 }
 0x474   : > { %v2409_v35 = vsel %vm2408_vm1, %v2404_v52, -inf  ;;  %v2377_v63 = vsel %vm2376_vm7, %v2372_v13, -inf  ;;  %vm2503_vm1 = vcmp.eq.s32.totalorder %v7821_v50, %v9568_v12  ;;  %v9682_v36 = vsel %vm2786_vm13, %v9639_v2, %v9645_v18  ;;  %vm14846_vm13 = vmmov %vm14841_vm15 }
 0x475   : > { %2410 = vmax.xlane.f32.xlu2 %v2409_v35  ;;  %6763 = vmatmul.msk.bf16.gmra.mxu3 %vm6762_vm6, %v14735_v7  ;;  %v2420_v54 = vcvt.s32.f32 %v2418_v41  ;;  %v2334_v13 = vshll.u32 %v2333_v56, 16  ;;  %v2133_v17 = vpack.c.bf16 %v2116_v0, %v2114_v30  ;;  %v9696_v35 = vsel %vm2503_vm1, 2147483648, %v14840_v20  ;;  %v14845_v30 = vld [vmem:[#allocation35_spill] sm:$0xff]  ;;  %v14849_v20 = vld [vmem:[#allocation38_spill] sm:$0xff] }
 0x476   : > { %2378 = vmax.xlane.f32.xlu0 %v2377_v63  ;;  %v9698_v40 = vcvt.s32.f32 %v2805_v39  ;;  %v2789_v19 = vshra.s32 %v9682_v36, 16  ;;  %v9703_v41 = vsel %vm2850_vm14, %v9667_v42, %v9673_v10  ;;  %vm2834_vm7 = vcmp.gt.s32.totalorder %v9690_v15, %v9696_v35 }
 0x477   : > { %v2425_v33 = vsel %vm2424_vm5, %v2420_v54, -inf  ;;  %v2152_v6 = vsel %vm14841_vm15, %v2133_v17, 0  ;;  %vm2506_vm6 = vcmp.eq.s32.totalorder %v7818_v43, %v9559_v14 }
 0x478   : > { %v9633_v25 = vpop.xlane.xlu1 %2438  ;;  %vm6764_vm11 = vmpackc.low %vm2506_vm6, %vm2504_vm2 }
 0x479   : > { %vm2440_vm12 = vcmp.eq.f32.partialorder %v9473_v24, %v9633_v25  ;;  %v2319_v24 = vadd.s32 %v2318_v29, %v2316_v38  ;;  %v2111_v38 = vadd.f32 %v9510_v1, %v9508_v49  ;;  %v9721_v49 = vcvt.s32.f32 %v2789_v19 }
 0x47a   : > { %v2441_v22 = vsel %vm2440_vm12, %v2436_v57, -inf  ;;  %v2853_v1 = vshra.s32 %v9703_v41, 16  ;;  %vm2501_vm12 = vcmp.eq.s32.totalorder %v7821_v50, %v9566_v16 }
 0x47b   : > { %2442 = vmax.xlane.f32.xlu1 %v2441_v22  ;;  %2161 = vmatpush.bf16.xpose.msrb.mxu2 %v2155_v34  ;;  %v2470_v53 = vand.u32 255, %v2319_v24  ;;  %v9729_v22 = vsel %vm2834_vm7, %v9690_v15, %v9696_v35  ;;  %v2132_v26 = vpack.c.bf16 %v2111_v38, %v9357_v31  ;;  %v14844_v31 = vld [vmem:[#allocation34_spill] sm:$0xff]  ;;  %v9761_v39 = vsel %vm2501_vm12, 2147483648, %v14845_v30  ;;  %vm14851_vm7 = vmmov %vm14846_vm13 }
 0x47c   : > { %v9738_v56 = vcvt.s32.f32 %v2853_v1  ;;  %v2837_v34 = vshra.s32 %v9729_v22, 16  ;;  %v9754_v54 = vsel %vm2500_vm4, 2147483648, %v14844_v31  ;;  %v14855_v1 = vld [vmem:[#allocation44_spill] sm:$0xff] }
 0x47d   : > { %v2486_v23 = vsub.s32 255, %v2470_v53  ;;  %vm2818_vm4 = vcmp.gt.s32.totalorder %v9754_v54, %v9761_v39  ;;  %v14847_v53 = vld [vmem:[#allocation37_spill] sm:$0xff] }
 0x47e   : > { %v2331_v52 = vpop.xlane.xlu2 %2330  ;;  %2426 = vmax.xlane.f32.xlu0 %v2425_v33  ;;  %v2106_v33 = vadd.f32 %v9287_v11, %v9285_v27  ;;  %v9779_v17 = vsel %vm2818_vm4, %v9754_v54, %v9761_v39  ;;  %v9785_v32 = vsel %vm2506_vm6, 2147483648, %v14847_v53 }
 0x47f   : > { %v2332_v44 = vcvt.f32.s32 %v2331_v52  ;;  %vm2509_vm0 = vcmp.eq.s32.totalorder %v7821_v50, %v2486_v23  ;;  %v2149_v52 = vsel %vm14846_vm13, %v2132_v26, 0  ;;  %14848 = vst [vmem:[#allocation28_spill] sm:$0xff] %v9785_v32  ;;  %v2821_v19 = vshra.s32 %v9779_v17, 16  ;;  %v14856_v26 = vld [vmem:[#allocation45_spill] sm:$0xff] }
 0x480   : > { %v2131_v27 = vpack.c.bf16 %v2106_v33, %v9278_v59  ;;  %v9793_v59 = vsel %vm2507_vm9, 2147483648, %v14849_v20  ;;  %vm2508_vm6 = vcmp.eq.s32.totalorder %v7818_v43, %v2486_v23  ;;  %vm14857_vm9 = vmmov %vm14851_vm7  ;;  %v14859_v33 = vld [vmem:[#allocation39_spill] sm:$0xff]  ;;  %v14862_v20 = vld [vmem:[#allocation36_spill] sm:$0xff] }
 0x481   : > { %v2335_v63 = vadd.s32 %v2334_v13, %v2332_v44  ;;  %v9767_v13 = vcvt.s32.f32 %v2837_v34  ;;  %v2452_v44 = vcvt.s32.f32 %v2450_v3  ;;  %14850 = vst [vmem:[#allocation30_spill] sm:$0xff] %v9793_v59  ;;  %vm2866_vm13 = vcmp.gt.s32.totalorder %v9785_v32, %v9793_v59  ;;  %v14858_v3 = vld [vmem:[#allocation43_spill] sm:$0xff] }
 0x482   : > { %v9806_v14 = vcvt.s32.f32 %v2821_v19  ;;  %v9815_v38 = vsel %vm2508_vm6, 2147483648, %v9068_v21  ;;  %v2096_v34 = vadd.f32 %v14856_v26, %v14855_v1  ;;  %v9846_v19 = vld [vmem:[%s8022_s10 + $0x78] sm:$0xff]  ;;  %v9856_v1 = vld [vmem:[%s8022_s10 + $0x68] sm:$0xff]  ;;  %v7491_v26 = vld [vmem:[%s8022_s10 + $0x60] sm:$0xff] }
 0x483   : > { %v2471_v57 = vand.u32 255, %v2335_v63  ;;  %2808 = vmax.xlane.f32.xlu1 %v9698_v40  ;;  %2162 = vmatpush.bf16.xpose.msrb.mxu2 %v2152_v6  ;;  %v2146_v63 = vsel %vm14851_vm7, %v2131_v27, 0  ;;  %14852 = vst [vmem:[#allocation19_spill] sm:$0xff] %v9815_v38 }
 0x484   : > { %v2129_v30 = vpack.c.bf16 %v2096_v34, %v14858_v3  ;;  %14864 = vst [vmem:[#allocation40_spill] sm:$0xff] %v9846_v19  ;;  %v7492_v34 = vld [vmem:[%s8022_s10 + $0x58] sm:$0xff]  ;;  %v7495_v3 = vld [vmem:[%s8022_s10 + $0x40] sm:$0xff] }
 0x485   : > { %v9713_v29 = vsub.s32 255, %v2471_v57  ;;  %6765 = vmatmul.msk.bf16.gmra.mxu3 %vm6764_vm11, %v14735_v7  ;;  %v14853_v57 = vld [vmem:[#allocation42_spill] sm:$0xff]  ;;  %14868 = vst [vmem:[#allocation27_spill] sm:$0xff] %v9856_v1 }
 0x486   : > { %v9725_v0 = vpop.xlane.xlu2 %2346  ;;  %2792 = vmax.xlane.f32.xlu0 %v9721_v49  ;;  %v9820_v6 = vsel %vm2509_vm0, 2147483648, %v14853_v57  ;;  %v14866_v57 = vld [vmem:[#allocation11_spill] sm:$0xff] }
 0x487   : > { %vm2511_vm2 = vcmp.eq.s32.totalorder %v7821_v50, %v9713_v29  ;;  %vm2510_vm15 = vcmp.eq.s32.totalorder %v7818_v43, %v9713_v29  ;;  %14854 = vst [vmem:[#allocation23_spill] sm:$0xff] %v9820_v6  ;;  %vm2882_vm4 = vcmp.gt.s32.totalorder %v9815_v38, %v9820_v6 }
 0x488   : > { %vm9746_vm5 = vmpackc.low %vm2511_vm2, %vm2509_vm0  ;;  %v9833_v23 = vsel %vm2882_vm4, %v9815_v38, %v9820_v6 }
 0x489   : > { %vm6766_vm11 = vmpackc.low %vm2510_vm15, %vm2508_vm6 }
 0x48a   : > { %vm14861_vm0 = vmmov %vm14851_vm7 }
 0x48b   : > { %2856 = vmax.xlane.f32.xlu1 %v9738_v56  ;;  %2163 = vmatpush.bf16.xpose.msrb.mxu2 %v2149_v52  ;;  %v14860_v52 = vld [vmem:[#allocation41_spill] sm:$0xff]  ;;  %v2140_v27 = vsel %vm14861_vm0, %v2129_v30, 0  ;;  %vm14867_vm7 = vmmov %vm14861_vm0  ;;  %v7496_v30 = vld [vmem:[%s8022_s10 + $0x38] sm:$0xff] }
 0x48c   : > { %vm6776_vm6 = vmpackc.low %vm2499_vm3, %vm2497_vm8 }
 0x48d   : > { %vm6778_vm3 = vmpackc.low %vm2503_vm1, %vm2501_vm12 }
 0x48e   : > { %v9771_v60 = vpop.xlane.xlu2 %2454  ;;  %2840 = vmax.xlane.f32.xlu0 %v9767_v13 }
 0x48f   : > { %vm2456_vm14 = vcmp.eq.f32.partialorder %v9505_v37, %v9771_v60  ;;  %v2101_v37 = vadd.f32 %v9270_v5, %v9268_v8  ;;  %v9811_v5 = vsel %vm2866_vm13, %v9785_v32, %v9793_v59 }
 0x490   : > { %v2457_v11 = vsel %vm2456_vm14, %v2452_v44, -inf  ;;  %v2091_v44 = vadd.f32 %v14860_v52, %v14859_v33  ;;  %vm14863_vm14 = vmmov %vm14861_vm0  ;;  %v7497_v33 = vld [vmem:[%s8022_s10 + $0x30] sm:$0xff]  ;;  %v7498_v52 = vld [vmem:[%s8022_s10 + $0x28] sm:$0xff] }
 0x491   : > { %2458 = vmax.xlane.f32.xlu2 %v2457_v11  ;;  %v2130_v8 = vpack.c.bf16 %v2101_v37, %v9141_v45  ;;  %v2869_v45 = vshra.s32 %v9811_v5, 16  ;;  %v2885_v11 = vshra.s32 %v9833_v23, 16 }
 0x492   : > { %v2128_v37 = vpack.c.bf16 %v2091_v44, %v14862_v20  ;;  %v14869_v44 = vld [vmem:[#allocation26_spill] sm:$0xff]  ;;  %v2348_v20 = vcvt.f32.s32 %v9725_v0 }
 0x493   : > { %2164 = vmatpush.bf16.xpose.msrb.mxu2 %v2146_v63  ;;  %v2143_v31 = vsel %vm14857_vm9, %v2130_v8, 0  ;;  %v9828_v21 = vcvt.s32.f32 %v2869_v45  ;;  %v9840_v53 = vcvt.s32.f32 %v2885_v11  ;;  %v9850_v8 = vld [vmem:[%s8022_s10 + $0x70] sm:$0xff]  ;;  %v7494_v45 = vld [vmem:[%s8022_s10 + $0x48] sm:$0xff] }
 0x494   : > { %v2137_v63 = vsel %vm14863_vm14, %v2128_v37, 0  ;;  %14865 = vst [vmem:[#allocation25_spill] sm:$0xff] %v9850_v8  ;;  %v14871_v37 = vld [vmem:[#allocation32_spill] sm:$0xff] }
 0x495   : > { %6767 = vmatmul.msk.bf16.gmra.mxu3 %vm6766_vm11, %v14735_v7 }
 0x499   : > { %2824 = vmax.xlane.f32.xlu2 %v9806_v14 }
 0x49b   : > { %2165 = vmatpush.bf16.xpose.msrb.mxu2 %v2143_v31  ;;  %v7493_v31 = vld [vmem:[%s8022_s10 + $0x50] sm:$0xff] }
 0x4a1   : > { %2872 = vmax.xlane.f32.xlu2 %v9828_v21 }
 0x4a3   : > { %2166 = vmatpush.bf16.xpose.msrb.mxu2 %v2140_v27  ;;  %v14870_v27 = vld [vmem:[#allocation17_spill] sm:$0xff] }
 0x4a4   : > { %v2349_v11 = vcvt.f32.s32 %v14870_v27 }
 0x4a6   : > { %v2350_v48 = vshll.u32 %v2349_v11, 16 }
 0x4a9   : > { %2888 = vmax.xlane.f32.xlu2 %v9840_v53 }
 0x4ab   : > { %2167 = vmatpush.bf16.xpose.msrb.mxu2 %v2137_v63  ;;  %v2351_v63 = vadd.s32 %v2350_v48, %v2348_v20 }
 0x4ad   : > { %v2472_v0 = vand.u32 255, %v2351_v63 }
 0x4af   : > { %v9888_v16 = vsub.s32 255, %v2472_v0 }
 0x4b1   : > { %vm2512_vm8 = vcmp.eq.s32.totalorder %v7818_v43, %v9888_v16  ;;  %vm2513_vm4 = vcmp.eq.s32.totalorder %v7821_v50, %v9888_v16 }
 0x4b2   : > { %6727 = vmatmul.msk.bf16.vlgmr.msrb.gmra.mxu2 %vm14867_vm7, %v14866_v57  ;;  %v14872_v57 = vld [vmem:[#allocation14_spill] sm:$0xff] }
 0x4b3   : > { %2657 = vmatpush.bf16.msra.mxu2 %v9846_v19 }
 0x4b7   : > { %2658 = vmatpush.bf16.msra.mxu2 %v9850_v8 }
 0x4bb   : > { %2659 = vmatpush.bf16.msra.mxu2 %v9856_v1 }
 0x4bf   : > { %2660 = vmatpush.bf16.msra.mxu2 %v7491_v26 }
 0x4c3   : > { %2661 = vmatpush.bf16.msra.mxu2 %v7492_v34  ;;  %v2366_v34 = vshll.u32 %v2365_v46, 16 }
 0x4c7   : > { %2662 = vmatpush.bf16.msra.mxu2 %v7493_v31 }
 0x4cb   : > { %2663 = vmatpush.bf16.msra.mxu2 %v7494_v45  ;;  %v14873_v45 = vld [vmem:[#allocation31_spill] sm:$0xff] }
 0x4cf   : > { %2664 = vmatpush.bf16.msra.mxu2 %v7495_v3 }
 0x4d2   : > { %6777 = vmatmul.msk.bf16.vlgmr.msra.gmra.mxu2 %vm6776_vm6, %v14735_v7 }
 0x4d3   : > { %3764 = vmatpush.bf16.msrb.mxu2 %v7496_v30 }
 0x4d7   : > { %3765 = vmatpush.bf16.msrb.mxu2 %v7497_v33  ;;  %v14874_v33 = vld [vmem:[#allocation13_spill] sm:$0xff] }
 0x4db   : > { %3766 = vmatpush.bf16.msrb.mxu2 %v7498_v52  ;;  %v2381_v52 = vcvt.f32.s32 %v9596_v47 }
 0x4dd   : > { %v2382_v20 = vshll.u32 %v2381_v52, 16 }
 0x4df   : > { %3767 = vmatpush.bf16.msrb.mxu2 %v14869_v44 }
 0x4e0   : > { %v2363_v26 = vpop.xlane.xlu0 %2362  ;;  %v2395_v30 = vpop.xlane.xlu1 %2394 }
 0x4e1   : > { %v2364_v31 = vcvt.f32.s32 %v2363_v26  ;;  %v2396_v27 = vcvt.f32.s32 %v2395_v30 }
 0x4e2   : > { %6779 = vmatmul.msk.bf16.gmra.mxu2 %vm6778_vm3, %v14735_v7 }
 0x4e3   : > { %3768 = vmatpush.bf16.msrb.mxu2 %v14871_v37  ;;  %v2367_v3 = vadd.s32 %v2366_v34, %v2364_v31  ;;  %v2399_v48 = vadd.s32 %v2398_v9, %v2396_v27 }
 0x4e5   : > { %v2473_v12 = vand.u32 255, %v2367_v3  ;;  %v2475_v26 = vand.u32 255, %v2399_v48  ;;  %v2429_v3 = vcvt.f32.s32 %v9575_v55  ;;  %v2413_v55 = vcvt.f32.s32 %v9594_v4 }
 0x4e6   : > { %v2836_v48 = vand.u32 65535, %v9729_v22 }
 0x4e7   : > { %3769 = vmatpush.bf16.msrb.mxu2 %v14872_v57  ;;  %v9893_v44 = vsub.s32 255, %v2473_v12  ;;  %v2804_v57 = vand.u32 65535, %v9655_v61  ;;  %v9916_v62 = vsub.s32 255, %v2475_v26  ;;  %v14875_v12 = vld [vmem:[#allocation46_spill] sm:$0xff]  ;;  %v14877_v61 = vld [vmem:[#allocation47_spill] sm:$0xff]  ;;  %v2414_v4 = vshll.u32 %v2413_v55, 16 }
 0x4e8   : > { %v9930_v52 = vsel %vm2511_vm2, 2147483648, %v14877_v61  ;;  %v2411_v51 = vpop.xlane.xlu2 %2410  ;;  %v14881_v26 = vld [vmem:[#allocation49_spill] sm:$0xff] }
 0x4e9   : > { %v2379_v11 = vpop.xlane.xlu0 %2378  ;;  %vm2514_vm1 = vcmp.eq.s32.totalorder %v7818_v43, %v9893_v44  ;;  %v2806_v31 = vcvt.s32.f32 %v2804_v57  ;;  %14878 = vst [vmem:[#allocation35_spill] sm:$0xff] %v9930_v52  ;;  %vm2518_vm2 = vcmp.eq.s32.totalorder %v7818_v43, %v9916_v62  ;;  %v9972_v24 = vsel %vm2513_vm4, 2147483648, %v14881_v26 }
 0x4ea   : > { %v2380_v37 = vcvt.f32.s32 %v2379_v11  ;;  %vm6768_vm12 = vmpackc.low %vm2514_vm1, %vm2512_vm8  ;;  %v2430_v11 = vshll.u32 %v2429_v3, 16  ;;  %14882 = vst [vmem:[#allocation38_spill] sm:$0xff] %v9972_v24  ;;  %v2838_v3 = vcvt.s32.f32 %v2836_v48  ;;  %vm2519_vm14 = vcmp.eq.s32.totalorder %v7821_v50, %v9916_v62 }
 0x4eb   : > { %3770 = vmatpush.bf16.msrb.mxu2 %v14873_v45  ;;  %6769 = vmatmul.msk.bf16.gmra.mxu3 %vm6768_vm12, %v14735_v7  ;;  %v2788_v45 = vand.u32 65535, %v9682_v36  ;;  %vm2515_vm7 = vcmp.eq.s32.totalorder %v7821_v50, %v9893_v44 }
 0x4ec   : > { %v2383_v47 = vadd.s32 %v2382_v20, %v2380_v37  ;;  %v2412_v20 = vcvt.f32.s32 %v2411_v51 }
 0x4ed   : > { %v2790_v37 = vcvt.s32.f32 %v2788_v45 }
 0x4ee   : > { %v9909_v46 = vpop.xlane.xlu1 %2442  ;;  %v2474_v63 = vand.u32 255, %v2383_v47  ;;  %v2415_v47 = vadd.s32 %v2414_v4, %v2412_v20 }
 0x4ef   : > { %3771 = vmatpush.bf16.msrb.mxu2 %v14874_v33  ;;  %v9924_v33 = vsel %vm2510_vm15, 2147483648, %v14875_v12 }
 0x4f0   : > { %v9912_v0 = vsub.s32 255, %v2474_v63  ;;  %14876 = vst [vmem:[#allocation34_spill] sm:$0xff] %v9924_v33  ;;  %vm2898_vm15 = vcmp.gt.s32.totalorder %v9924_v33, %v9930_v52  ;;  %v14879_v63 = vld [vmem:[#allocation48_spill] sm:$0xff]  ;;  %v2476_v45 = vand.u32 255, %v2415_v47 }
 0x4f1   : > { %v2427_v34 = vpop.xlane.xlu0 %2426  ;;  %v9966_v57 = vsel %vm2512_vm8, 2147483648, %v14879_v63  ;;  %v14887_v47 = vld [vmem:[#allocation8_spill] sm:$0xff]  ;;  %v14889_v63 = vld [vmem:[#allocation9_spill] sm:$0xff] }
 0x4f2   : > { %6781 = vmatmul.msk.bf16.gmra.mxu2 %vm9583_vm10, %v14735_v7  ;;  %v2428_v36 = vcvt.f32.s32 %v2427_v34  ;;  %vm2516_vm11 = vcmp.eq.s32.totalorder %v7818_v43, %v9912_v0  ;;  %14880 = vst [vmem:[#allocation37_spill] sm:$0xff] %v9966_v57  ;;  %v10018_v48 = vsel %vm2514_vm1, 2147483648, %v14887_v47  ;;  %v10024_v26 = vsel %vm2515_vm7, 2147483648, %v14889_v63  ;;  %vm6784_vm1 = vmpackc.low %vm2515_vm7, %vm2513_vm4 }
 0x4f3   : > { %vm6770_vm9 = vmpackc.low %vm2518_vm2, %vm2516_vm11  ;;  %14888 = vst [vmem:[#allocation45_spill] sm:$0xff] %v10018_v48 }
 0x4f4   : > { %14890 = vst [vmem:[#allocation43_spill] sm:$0xff] %v10024_v26 }
 0x4f6   : > { %v9918_v30 = vpop.xlane.xlu1 %2808 }
 0x4f7   : > { %vm2810_vm10 = vcmp.eq.f32.partialorder %v9698_v40, %v9918_v30  ;;  %v2431_v40 = vadd.s32 %v2430_v11, %v2428_v36  ;;  %v9996_v11 = vsub.s32 255, %v2476_v45 }
 0x4f8   : > { %v2811_v27 = vsel %vm2810_vm10, %v2806_v31, -inf  ;;  %vm2930_vm10 = vcmp.gt.s32.totalorder %v10018_v48, %v10024_v26 }
 0x4f9   : > { %2812 = vmax.xlane.f32.xlu1 %v2811_v27  ;;  %v9939_v29 = vpop.xlane.xlu0 %2792  ;;  %v2477_v31 = vand.u32 255, %v2431_v40  ;;  %v2852_v27 = vand.u32 65535, %v9703_v41  ;;  %v14885_v40 = vld [vmem:[#allocation18_spill] sm:$0xff]  ;;  %vm2520_vm12 = vcmp.eq.s32.totalorder %v7818_v43, %v9996_v11 }
 0x4fa   : > { %vm2794_vm13 = vcmp.eq.f32.partialorder %v9721_v49, %v9939_v29  ;;  %v9959_v49 = vsel %vm2898_vm15, %v9924_v33, %v9930_v52 }
 0x4fb   : > { %v2795_v9 = vsel %vm2794_vm13, %v2790_v37, -inf  ;;  %6771 = vmatmul.msk.bf16.gmra.mxu3 %vm6770_vm9, %v14735_v7  ;;  %v2901_v34 = vshra.s32 %v9959_v49, 16  ;;  %v9985_v61 = vsub.s32 255, %v2477_v31  ;;  %v14883_v37 = vld [vmem:[#allocation5_spill] sm:$0xff]  ;;  %v2854_v45 = vcvt.s32.f32 %v2852_v27 }
 0x4fc   : > { %2796 = vmax.xlane.f32.xlu0 %v2795_v9  ;;  %v10004_v4 = vsel %vm2518_vm2, 2147483648, %v14883_v37  ;;  %v10010_v9 = vsel %vm2519_vm14, 2147483648, %v14885_v40  ;;  %vm2521_vm2 = vcmp.eq.s32.totalorder %v7821_v50, %v9996_v11  ;;  %v10070_v27 = vsel %vm2930_vm10, %v10018_v48, %v10024_v26  ;;  %v14891_v40 = vld [vmem:[#allocation15_spill] sm:$0xff] }
 0x4fd   : > { %v9979_v12 = vcvt.s32.f32 %v2901_v34  ;;  %14884 = vst [vmem:[#allocation42_spill] sm:$0xff] %v10004_v4  ;;  %v2445_v34 = vcvt.f32.s32 %v9633_v25  ;;  %vm2522_vm6 = vcmp.eq.s32.totalorder %v7818_v43, %v9985_v61  ;;  %vm2962_vm8 = vcmp.gt.s32.totalorder %v10004_v4, %v10010_v9 }
 0x4fe   : > { %v9998_v20 = vpop.xlane.xlu1 %2856  ;;  %14886 = vst [vmem:[#allocation44_spill] sm:$0xff] %v10010_v9  ;;  %vm6772_vm15 = vmpackc.low %vm2522_vm6, %vm2520_vm12  ;;  %vm2517_vm9 = vcmp.eq.s32.totalorder %v7821_v50, %v9912_v0  ;;  %v2900_v38 = vand.u32 65535, %v9959_v49 }
 0x4ff   : > { %vm2858_vm3 = vcmp.eq.f32.partialorder %v9738_v56, %v9998_v20  ;;  %v2446_v16 = vshll.u32 %v2445_v34, 16  ;;  %v2868_v34 = vand.u32 65535, %v9811_v5 }
 0x501   : > { %v9977_v22 = vpop.xlane.xlu0 %2840 }
 0x502   : > { %6783 = vmatmul.msk.bf16.gmra.mxu2 %vm9746_vm5, %v14735_v7  ;;  %vm2914_vm5 = vcmp.gt.s32.totalorder %v9966_v57, %v9972_v24  ;;  %vm2842_vm0 = vcmp.eq.f32.partialorder %v9767_v13, %v9977_v22  ;;  %v2461_v13 = vcvt.f32.s32 %v9771_v60  ;;  %v2820_v60 = vand.u32 65535, %v9779_v17 }
 0x503   : > { %v2843_v51 = vsel %vm2842_vm0, %v2838_v3, -inf  ;;  %v9991_v36 = vsel %vm2914_vm5, %v9966_v57, %v9972_v24  ;;  %v2444_v3 = vcvt.f32.s32 %v9909_v46  ;;  %v2859_v46 = vsel %vm2858_vm3, %v2854_v45, -inf  ;;  %vm6786_vm3 = vmpackc.low %vm2519_vm14, %vm2517_vm9 }
 0x504   : > { %v2459_v55 = vpop.xlane.xlu2 %2458  ;;  %2904 = vmax.xlane.f32.xlu0 %v9979_v12  ;;  %2844 = vmax.xlane.f32.xlu2 %v2843_v51  ;;  %v2917_v41 = vshra.s32 %v9991_v36, 16  ;;  %v2462_v17 = vshll.u32 %v2461_v13, 16  ;;  %v2822_v56 = vcvt.s32.f32 %v2820_v60  ;;  %v14893_v60 = vld [vmem:[#allocation12_spill] sm:$0xff]  ;;  %vm2523_vm0 = vcmp.eq.s32.totalorder %v7821_v50, %v9985_v61 }
 0x505   : > { %v2460_v31 = vcvt.f32.s32 %v2459_v55  ;;  %v10063_v55 = vsel %vm2962_vm8, %v10004_v4, %v10010_v9  ;;  %v2447_v13 = vadd.s32 %v2446_v16, %v2444_v3 }
 0x506   : > { %v10044_v25 = vcvt.s32.f32 %v2917_v41  ;;  %v10078_v41 = vsel %vm2520_vm12, 2147483648, %v14891_v40  ;;  %v2965_v47 = vshra.s32 %v10063_v55, 16 }
 0x507   : > { %v2463_v44 = vadd.s32 %v2462_v17, %v2460_v31  ;;  %14892 = vst [vmem:[#allocation39_spill] sm:$0xff] %v10078_v41  ;;  %v14895_v31 = vld [vmem:[#allocation6_spill] sm:$0xff]  ;;  %v14897_v17 = vld [vmem:[#allocation7_spill] sm:$0xff]  ;;  %v2478_v16 = vand.u32 255, %v2447_v13 }
 0x508   : > { %v10092_v45 = vsel %vm2516_vm11, 2147483648, %v14895_v31  ;;  %v10098_v3 = vsel %vm2517_vm9, 2147483648, %v14897_v17  ;;  %v2884_v31 = vand.u32 65535, %v9833_v23 }
 0x509   : > { %v2479_v63 = vand.u32 255, %v2463_v44  ;;  %14896 = vst [vmem:[#allocation36_spill] sm:$0xff] %v10092_v45  ;;  %v10103_v44 = vcvt.s32.f32 %v2965_v47  ;;  %vm2946_vm5 = vcmp.gt.s32.totalorder %v10092_v45, %v10098_v3  ;;  %v2494_v13 = vsub.s32 255, %v2478_v16 }
 0x50a   : > { %14898 = vst [vmem:[#allocation11_spill] sm:$0xff] %v10098_v3  ;;  %v2886_v62 = vcvt.s32.f32 %v2884_v31  ;;  %v14904_v31 = vld [vmem:[#allocation21_spill] sm:$0xff] }
 0x50b   : > { %6773 = vmatmul.msk.bf16.gmra.mxu3 %vm6772_vm15, %v14735_v7  ;;  %v10107_v5 = vsub.s32 255, %v2479_v63  ;;  %v10124_v63 = vsel %vm2946_vm5, %v10092_v45, %v10098_v3  ;;  %vm2524_vm8 = vcmp.eq.s32.totalorder %v7818_v43, %v2494_v13  ;;  %vm2525_vm12 = vcmp.eq.s32.totalorder %v7821_v50, %v2494_v13  ;;  %v14906_v3 = vld [vmem:[#allocation22_spill] sm:$0xff]  ;;  %vm6788_vm15 = vmpackc.low %vm2523_vm0, %vm2521_vm2 }
 0x50c   : > { %v10056_v51 = vpop.xlane.xlu2 %2824  ;;  %2920 = vmax.xlane.f32.xlu0 %v10044_v25  ;;  %2860 = vmax.xlane.f32.xlu2 %v2859_v46 }
 0x50d   : > { %vm2826_vm13 = vcmp.eq.f32.partialorder %v9806_v14, %v10056_v51  ;;  %v10084_v14 = vsel %vm2521_vm2, 2147483648, %v14893_v60  ;;  %vm2526_vm7 = vcmp.eq.s32.totalorder %v7818_v43, %v10107_v5 }
 0x50e   : > { %v2827_v37 = vsel %vm2826_vm13, %v2822_v56, -inf  ;;  %14894 = vst [vmem:[#allocation41_spill] sm:$0xff] %v10084_v14  ;;  %v2933_v56 = vshra.s32 %v10070_v27, 16  ;;  %vm2978_vm4 = vcmp.gt.s32.totalorder %v10078_v41, %v10084_v14  ;;  %vm2527_vm13 = vcmp.eq.s32.totalorder %v7821_v50, %v10107_v5 }
 0x50f   : > { %2828 = vmax.xlane.f32.xlu1 %v2827_v37  ;;  %v2870_v37 = vcvt.s32.f32 %v2868_v34  ;;  %v10113_v40 = vsel %vm2978_vm4, %v10078_v41, %v10084_v14  ;;  %vm6790_vm9 = vmpackc.low %vm2527_vm13, %vm2525_vm12 }
 0x510   : > { %v10116_v60 = vcvt.s32.f32 %v2933_v56  ;;  %v2981_v34 = vshra.s32 %v10113_v40, 16  ;;  %v14901_v56 = vld [vmem:[#allocation24_spill] sm:$0xff] }
 0x511   : > { %v10141_v16 = vsel %vm2523_vm0, 2147483648, %v14901_v56  ;;  %v10174_v56 = vpop.f32.mrf.mxu3 }
 0x512   : > { %6785 = vmatmul.msk.bf16.gmra.mxu2 %vm6784_vm1, %v14735_v7  ;;  %14902 = vst [vmem:[#allocation17_spill] sm:$0xff] %v10141_v16  ;;  %v10151_v23 = vcvt.s32.f32 %v2981_v34 }
 0x513   : > { %14903 = vst [vmem:[#allocation32_spill] sm:$0xff] %v10174_v56 }
 0x514   : > { %v10109_v46 = vpop.xlane.xlu2 %2872  ;;  %2968 = vmax.xlane.f32.xlu2 %v10103_v44 }
 0x515   : > { %vm2874_vm11 = vcmp.eq.f32.partialorder %v9828_v21, %v10109_v46  ;;  %v14899_v21 = vld [vmem:[#allocation20_spill] sm:$0xff] }
 0x516   : > { %v2875_v47 = vsel %vm2874_vm11, %v2870_v37, -inf  ;;  %v10135_v17 = vsel %vm2522_vm6, 2147483648, %v14899_v21  ;;  %v2949_v37 = vshra.s32 %v10124_v63, 16  ;;  %vm6774_vm6 = vmpackc.low %vm2526_vm7, %vm2524_vm8 }
 0x517   : > { %2936 = vmax.xlane.f32.xlu1 %v10116_v60  ;;  %2876 = vmax.xlane.f32.xlu0 %v2875_v47  ;;  %14900 = vst [vmem:[#allocation26_spill] sm:$0xff] %v10135_v17  ;;  %vm2994_vm1 = vcmp.gt.s32.totalorder %v10135_v17, %v10141_v16 }
 0x518   : > { %v10165_v47 = vcvt.s32.f32 %v2949_v37  ;;  %v10172_v21 = vsel %vm2994_vm1, %v10135_v17, %v10141_v16  ;;  %v10180_v37 = vsel %vm2524_vm8, 2147483648, %v14904_v31 }
 0x519   : > { %14905 = vst [vmem:[#allocation14_spill] sm:$0xff] %v10180_v37  ;;  %v10197_v31 = vpop.f32.mrf.mxu3 }
 0x51a   : > { %14908 = vst [vmem:[#allocation13_spill] sm:$0xff] %v10197_v31 }
 0x51b   : > { %6775 = vmatmul.msk.bf16.gmra.mxu3 %vm6774_vm6, %v14735_v7 }
 0x51c   : > { %v10162_v0 = vpop.xlane.xlu2 %2888  ;;  %2984 = vmax.xlane.f32.xlu2 %v10151_v23 }
 0x51d   : > { %vm2890_vm14 = vcmp.eq.f32.partialorder %v9840_v53, %v10162_v0  ;;  %v10185_v53 = vsel %vm2525_vm12, 2147483648, %v14906_v3 }
 0x51e   : > { %v2891_v34 = vsel %vm2890_vm14, %v2886_v62, -inf  ;;  %14907 = vst [vmem:[#allocation31_spill] sm:$0xff] %v10185_v53  ;;  %v2997_v62 = vshra.s32 %v10172_v21, 16  ;;  %vm3010_vm10 = vcmp.gt.s32.totalorder %v10180_v37, %v10185_v53 }
 0x51f   : > { %2952 = vmax.xlane.f32.xlu1 %v10165_v47  ;;  %2892 = vmax.xlane.f32.xlu0 %v2891_v34  ;;  %v10194_v34 = vsel %vm3010_vm10, %v10180_v37, %v10185_v53 }
 0x520   : > { %v10190_v16 = vcvt.s32.f32 %v2997_v62  ;;  %v3013_v56 = vshra.s32 %v10194_v34, 16 }
 0x521   : > { %v10210_v62 = vpop.f32.mrf.mxu3 }
 0x522   : > { %6787 = vmatmul.msk.bf16.gmra.mxu2 %vm6786_vm3, %v14735_v7  ;;  %v10207_v3 = vcvt.s32.f32 %v3013_v56  ;;  %14909 = vst [vmem:[#allocation46_spill] sm:$0xff] %v10210_v62 }
 0x527   : > { %3000 = vmax.xlane.f32.xlu0 %v10190_v16 }
 0x529   : > { %v10220_v61 = vpop.f32.mrf.mxu3 }
 0x52a   : > { %14910 = vst [vmem:[#allocation47_spill] sm:$0xff] %v10220_v61 }
 0x52f   : > { %3016 = vmax.xlane.f32.xlu0 %v10207_v3 }
 0x531   : > { %v10224_v56 = vpop.f32.mrf.mxu3 }
 0x532   : > { %6789 = vmatmul.msk.bf16.gmra.mxu2 %vm6788_vm15, %v14735_v7 }
 0x535   : > { %v10222_v11 = vpop.f32.mrf.mxu2 }
 0x536   : > { %14911 = vst [vmem:[#allocation48_spill] sm:$0xff] %v10222_v11  ;;  %v2815_v11 = vcvt.f32.s32 %v9918_v30 }
 0x538   : > { %v2816_v41 = vshll.u32 %v2815_v11, 16 }
 0x539   : > { %v10230_v37 = vpop.f32.mrf.mxu3 }
 0x53d   : > { %v10226_v31 = vpop.f32.mrf.mxu2 }
 0x53e   : > { %14912 = vst [vmem:[#allocation49_spill] sm:$0xff] %v10226_v31  ;;  %v2799_v31 = vcvt.f32.s32 %v9939_v29 }
 0x540   : > { %v2800_v33 = vshll.u32 %v2799_v31, 16  ;;  %v2831_v31 = vcvt.f32.s32 %v10056_v51  ;;  %v2863_v51 = vcvt.f32.s32 %v9998_v20 }
 0x541   : > { %v10234_v13 = vpop.f32.mrf.mxu3 }
 0x542   : > { %6791 = vmatmul.msk.bf16.gmra.mxu2 %vm6790_vm9, %v14735_v7 }
 0x549   : > { %v10238_v26 = vpop.f32.mrf.mxu3 }
 0x551   : > { %v10244_v4 = vpop.f32.mrf.mxu3 }
 0x555   : > { %v10228_v53 = vpop.f32.mrf.mxu2 }
 0x556   : > { %14913 = vst [vmem:[#allocation5_spill] sm:$0xff] %v10228_v53 }
 0x55d   : > { %v10232_v17 = vpop.f32.mrf.mxu2 }
 0x55e   : > { %14914 = vst [vmem:[#allocation18_spill] sm:$0xff] %v10232_v17  ;;  %v2879_v17 = vcvt.f32.s32 %v10109_v46 }
 0x565   : > { %v10236_v45 = vpop.f32.mrf.mxu2 }
 0x56c   : > { %v2813_v14 = vpop.xlane.xlu1 %2812 }
 0x56d   : > { %v10240_v48 = vpop.f32.mrf.mxu2  ;;  %v2814_v9 = vcvt.f32.s32 %v2813_v14 }
 0x56f   : > { %v2817_v24 = vadd.s32 %v2816_v41, %v2814_v9  ;;  %v2797_v52 = vpop.xlane.xlu0 %2796  ;;  %v2902_v9 = vcvt.s32.f32 %v2900_v38  ;;  %v10257_v41 = vpop.f32.mrf.mxu3 }
 0x570   : > { %v2798_v8 = vcvt.f32.s32 %v2797_v52  ;;  %v14918_v52 = vld [vmem:[#allocation10_spill] sm:$0xff] }
 0x571   : > { %v3043_v1 = vand.u32 255, %v2817_v24  ;;  %v10292_v49 = vsel %vm2526_vm7, 2147483648, %v14918_v52  ;;  %v14920_v24 = vld [vmem:[#allocation16_spill] sm:$0xff] }
 0x572   : > { %v2801_v6 = vadd.s32 %v2800_v33, %v2798_v8  ;;  %v14915_v8 = vmov 0  ;;  %v2916_v33 = vand.u32 65535, %v9991_v36  ;;  %14919 = vst [vmem:[#allocation9_spill] sm:$0xff] %v10292_v49 }
 0x573   : > { %v10249_v19 = vsub.s32 255, %v3043_v1 }
 0x574   : > { %v3042_v30 = vand.u32 255, %v2801_v6  ;;  %v2847_v6 = vcvt.f32.s32 %v9977_v22  ;;  %v10298_v22 = vsel %vm2527_vm13, 2147483648, %v14920_v24 }
 0x575   : > { %v10246_v57 = vpop.f32.mrf.mxu2  ;;  %vm3076_vm2 = vcmp.eq.s32.totalorder %v7818_v43, %v10249_v19  ;;  %vm3077_vm3 = vcmp.eq.s32.totalorder %v7821_v50, %v10249_v19  ;;  %14921 = vst [vmem:[#allocation15_spill] sm:$0xff] %v10298_v22  ;;  %vm3026_vm6 = vcmp.gt.s32.totalorder %v10292_v49, %v10298_v22 }
 0x576   : > { %v10251_v59 = vsub.s32 255, %v3042_v30 }
 0x577   : > { %v10255_v29 = vpop.xlane.xlu0 %2904  ;;  %v2845_v14 = vpop.xlane.xlu2 %2844 }
 0x578   : > { %vm3074_vm4 = vcmp.eq.s32.totalorder %v7818_v43, %v10251_v59  ;;  %vm2906_vm5 = vcmp.eq.f32.partialorder %v9979_v12, %v10255_v29  ;;  %vm3075_vm0 = vcmp.eq.s32.totalorder %v7821_v50, %v10251_v59  ;;  %v2846_v1 = vcvt.f32.s32 %v2845_v14  ;;  %v2637_v52 = vpop.f32.mrf.mxu3 }
 0x579   : > { %vm6825_vm11 = vmpackc.low %vm3076_vm2, %vm3074_vm4  ;;  %v2907_v38 = vsel %vm2906_vm5, %v2902_v9, -inf  ;;  %v2848_v12 = vshll.u32 %v2847_v6, 16  ;;  %v10311_v6 = vsel %vm3026_vm6, %v10292_v49, %v10298_v22 }
 0x57a   : > { %6826 = vmatmul.msk.bf16.vlgmr.msrb.gmra.mxu1 %vm6825_vm11, %v14735_v7  ;;  %2908 = vmax.xlane.f32.xlu1 %v2907_v38  ;;  %vm10283_vm8 = vmpackc.low %vm3077_vm3, %vm3075_vm0  ;;  %v2918_v38 = vcvt.s32.f32 %v2916_v33  ;;  %v3029_v62 = vshra.s32 %v10311_v6, 16 }
 0x57b   : > { %v14916_v8 = vsel %vm10283_vm8, 4294967295, %v14915_v8  ;;  %v2849_v36 = vadd.s32 %v2848_v12, %v2846_v1  ;;  %v2964_v12 = vand.u32 65535, %v10063_v55 }
 0x57c   : > { %14917 = vst [vmem:[#allocation8_spill] sm:$0xff] %v14916_v8  ;;  %v2832_v8 = vshll.u32 %v2831_v31, 16  ;;  %v10326_v55 = vcvt.s32.f32 %v3029_v62 }
 0x57d   : > { %v10253_v11 = vpop.f32.mrf.mxu2  ;;  %v3045_v1 = vand.u32 255, %v2849_v36  ;;  %v2966_v31 = vcvt.s32.f32 %v2964_v12 }
 0x57f   : > { %v10305_v14 = vpop.xlane.xlu0 %2920  ;;  %v2861_v9 = vpop.xlane.xlu2 %2860  ;;  %v10320_v49 = vsub.s32 255, %v3045_v1 }
 0x580   : > { %vm2922_vm7 = vcmp.eq.f32.partialorder %v10044_v25, %v10305_v14  ;;  %v2862_v53 = vcvt.f32.s32 %v2861_v9  ;;  %v2932_v25 = vand.u32 65535, %v10070_v27  ;;  %v2880_v9 = vshll.u32 %v2879_v17, 16 }
 0x581   : > { %v2923_v5 = vsel %vm2922_vm7, %v2918_v38, -inf  ;;  %v2864_v38 = vshll.u32 %v2863_v51, 16  ;;  %vm3080_vm10 = vcmp.eq.s32.totalorder %v7818_v43, %v10320_v49  ;;  %vm3081_vm13 = vcmp.eq.s32.totalorder %v7821_v50, %v10320_v49 }
 0x582   : > { %v2829_v24 = vpop.xlane.xlu1 %2828  ;;  %2924 = vmax.xlane.f32.xlu1 %v2923_v5 }
 0x583   : > { %v2830_v32 = vcvt.f32.s32 %v2829_v24  ;;  %v2865_v36 = vadd.s32 %v2864_v38, %v2862_v53  ;;  %v10332_v24 = vpop.f32.mrf.mxu3 }
 0x585   : > { %v10301_v30 = vpop.f32.mrf.mxu2  ;;  %v2833_v33 = vadd.s32 %v2832_v8, %v2830_v32  ;;  %v2934_v8 = vcvt.s32.f32 %v2932_v25  ;;  %v3046_v62 = vand.u32 255, %v2865_v36 }
 0x587   : > { %v3044_v61 = vand.u32 255, %v2833_v33  ;;  %v10322_v20 = vpop.xlane.xlu2 %2968  ;;  %v3062_v38 = vsub.s32 255, %v3046_v62  ;;  %v10437_v62 = vsel %vm3081_vm13, 2147483648, %v9696_v35 }
 0x588   : > { %vm2970_vm1 = vcmp.eq.f32.partialorder %v10103_v44, %v10322_v20  ;;  %v2980_v44 = vand.u32 65535, %v10113_v40  ;;  %v2948_v40 = vand.u32 65535, %v10124_v63  ;;  %14931 = vst [vmem:[#allocation21_spill] sm:$0xff] %v10437_v62 }
 0x589   : > { %v10324_v5 = vsub.s32 255, %v3044_v61  ;;  %v2971_v32 = vsel %vm2970_vm1, %v2966_v31, -inf  ;;  %vm3083_vm1 = vcmp.eq.s32.totalorder %v7821_v50, %v3062_v38 }
 0x58a   : > { %v10330_v27 = vpop.xlane.xlu1 %2936  ;;  %v2877_v46 = vpop.xlane.xlu0 %2876  ;;  %3032 = vmax.xlane.f32.xlu1 %v10326_v55  ;;  %2972 = vmax.xlane.f32.xlu0 %v2971_v32  ;;  %v2982_v25 = vcvt.s32.f32 %v2980_v44  ;;  %v3012_v44 = vand.u32 65535, %v10194_v34  ;;  %v10449_v34 = vsel %vm3077_vm3, 2147483648, %v9615_v28 }
 0x58b   : > { %v2878_v51 = vcvt.f32.s32 %v2877_v46  ;;  %vm2938_vm14 = vcmp.eq.f32.partialorder %v10116_v60, %v10330_v27  ;;  %vm3078_vm12 = vcmp.eq.s32.totalorder %v7818_v43, %v10324_v5  ;;  %vm3079_vm9 = vcmp.eq.s32.totalorder %v7821_v50, %v10324_v5  ;;  %14933 = vst [vmem:[#allocation10_spill] sm:$0xff] %v10449_v34 }
 0x58c   : > { %v2939_v53 = vsel %vm2938_vm14, %v2934_v8, -inf  ;;  %vm6827_vm15 = vmpackc.low %vm3080_vm10, %vm3078_vm12  ;;  %v14922_v60 = vmov 0  ;;  %v2950_v46 = vcvt.s32.f32 %v2948_v40  ;;  %v10380_v8 = vpop.f32.mrf.mxu3 }
 0x58d   : > { %v10318_v22 = vpop.f32.mrf.mxu2  ;;  %v2881_v17 = vadd.s32 %v2880_v9, %v2878_v51  ;;  %2940 = vmax.xlane.f32.xlu2 %v2939_v53  ;;  %6828 = vmatmul.msk.bf16.gmra.mxu1 %vm6827_vm15, %v14735_v7  ;;  %vm10360_vm5 = vmpackc.low %vm3081_vm13, %vm3079_vm9  ;;  %v10388_v9 = vsel %vm3074_vm4, 2147483648, %v9639_v2  ;;  %v14927_v51 = vmov 0 }
 0x58e   : > { %v14923_v60 = vsel %vm10360_vm5, 4294967295, %v14922_v60  ;;  %14925 = vst [vmem:[#allocation6_spill] sm:$0xff] %v10388_v9 }
 0x58f   : > { %14924 = vst [vmem:[#allocation12_spill] sm:$0xff] %v14923_v60  ;;  %v3047_v61 = vand.u32 255, %v2881_v17  ;;  %v10366_v33 = vpop.xlane.xlu2 %2984  ;;  %v10443_v17 = vsel %vm3076_vm2, 2147483648, %v9609_v58  ;;  %v3014_v58 = vcvt.s32.f32 %v3012_v44 }
 0x590   : > { %vm2986_vm11 = vcmp.eq.f32.partialorder %v10151_v23, %v10366_v33  ;;  %v2996_v23 = vand.u32 65535, %v10172_v21  ;;  %14932 = vst [vmem:[#allocation22_spill] sm:$0xff] %v10443_v17  ;;  %vm3380_vm13 = vcmp.gt.s32.totalorder %v10443_v17, %v10449_v34 }
 0x591   : > { %v10368_v31 = vsub.s32 255, %v3047_v61  ;;  %v2987_v63 = vsel %vm2986_vm11, %v2982_v25, -inf  ;;  %vm3082_vm11 = vcmp.eq.s32.totalorder %v7818_v43, %v3062_v38 }
 0x592   : > { %v10372_v36 = vpop.xlane.xlu1 %2952  ;;  %v10374_v32 = vpop.xlane.xlu0 %2892  ;;  %2988 = vmax.xlane.f32.xlu1 %v2987_v63  ;;  %v2998_v53 = vcvt.s32.f32 %v2996_v23  ;;  %v10474_v25 = vsel %vm3082_vm11, 2147483648, %v9667_v42 }
 0x593   : > { %vm2954_vm6 = vcmp.eq.f32.partialorder %v10165_v47, %v10372_v36  ;;  %vm3085_vm7 = vcmp.eq.s32.totalorder %v7821_v50, %v10368_v31  ;;  %v10394_v47 = vsel %vm3075_vm0, 2147483648, %v9645_v18  ;;  %vm3084_vm0 = vcmp.eq.s32.totalorder %v7818_v43, %v10368_v31  ;;  %14935 = vst [vmem:[#allocation50_spill] sm:$0xff] %v10474_v25 }
 0x594   : > { %14926 = vst [vmem:[#allocation7_spill] sm:$0xff] %v10394_v47  ;;  %vm10401_vm14 = vmpackc.low %vm3085_vm7, %vm3083_vm1  ;;  %vm3364_vm4 = vcmp.gt.s32.totalorder %v10388_v9, %v10394_v47 }
 0x595   : > { %v2686_v1 = vpop.f32.mrf.mxu2  ;;  %v14928_v51 = vsel %vm10401_vm14, 4294967295, %v14927_v51  ;;  %v10418_v59 = vsel %vm3364_vm4, %v10388_v9, %v10394_v47 }
 0x596   : > { %v10364_v12 = vadd.f32 %v2686_v1, %v2637_v52  ;;  %v2955_v52 = vsel %vm2954_vm6, %v2950_v46, -inf  ;;  %14929 = vst [vmem:[#allocation20_spill] sm:$0xff] %v14928_v51  ;;  %vm6829_vm6 = vmpackc.low %vm3084_vm0, %vm3082_vm11  ;;  %v3367_v61 = vshra.s32 %v10418_v59, 16  ;;  %v10468_v1 = vsel %vm3380_vm13, %v10443_v17, %v10449_v34 }
 0x597   : > { %2956 = vmax.xlane.f32.xlu2 %v2955_v52  ;;  %v3383_v52 = vshra.s32 %v10468_v1, 16 }
 0x598   : > { %v10458_v49 = vcvt.s32.f32 %v3367_v61 }
 0x59a   : > { %v10409_v2 = vpop.xlane.xlu0 %3000 }
 0x59b   : > { %vm3002_vm15 = vcmp.eq.f32.partialorder %v10190_v16, %v10409_v2  ;;  %v10431_v16 = vsel %vm3080_vm10, 2147483648, %v9690_v15  ;;  %v2644_v15 = vpop.f32.mrf.mxu3 }
 0x59c   : > { %v3003_v18 = vsel %vm3002_vm15, %v2998_v53, -inf  ;;  %14930 = vst [vmem:[#allocation24_spill] sm:$0xff] %v10431_v16  ;;  %vm3412_vm10 = vcmp.gt.s32.totalorder %v10431_v16, %v10437_v62 }
 0x59d   : > { %v10405_v21 = vpop.f32.mrf.mxu2  ;;  %6830 = vmatmul.msk.bf16.gmra.mxu1 %vm6829_vm6, %v14735_v7  ;;  %v10464_v19 = vsel %vm3412_vm10, %v10431_v16, %v10437_v62 }
 0x59e   : > { %v3415_v46 = vshra.s32 %v10464_v19, 16 }
 0x59f   : > { %3004 = vmax.xlane.f32.xlu2 %v3003_v18  ;;  %v10487_v18 = vcvt.s32.f32 %v3383_v52 }
 0x5a0   : > { %v10485_v53 = vcvt.s32.f32 %v3415_v46 }
 0x5a2   : > { %v10456_v35 = vpop.xlane.xlu0 %3016 }
 0x5a3   : > { %14934 = vst [vmem:[#allocation16_spill] sm:$0xff] %v10456_v35  ;;  %vm3018_vm2 = vcmp.eq.f32.partialorder %v10207_v3, %v10456_v35  ;;  %v10479_v3 = vsel %vm3083_vm1, 2147483648, %v9673_v10  ;;  %v2647_v23 = vpop.f32.mrf.mxu3  ;;  %vm14938_vm1 = vcmask 64512  }
 0x5a4   : > { %v3019_v28 = vsel %vm3018_vm2, %v3014_v58, -inf  ;;  %14936 = vst [vmem:[#allocation51_spill] sm:$0xff] %v10479_v3  ;;  %vm3428_vm3 = vcmp.gt.s32.totalorder %v10474_v25, %v10479_v3  ;;  %vm14939_vm4 = vmmov %vm14938_vm1 }
 0x5a5   : > { %v2691_v40 = vpop.f32.mrf.mxu2  ;;  %3020 = vmax.xlane.f32.xlu0 %v3019_v28  ;;  %v10491_v42 = vsel %vm3428_vm3, %v10474_v25, %v10479_v3  ;;  %vm14940_vm15 = vmmov %vm14938_vm1 }
 0x5a6   : > { %v3431_v38 = vshra.s32 %v10491_v42, 16  ;;  %v2692_v51 = vadd.f32 %v2691_v40, %v10380_v8  ;;  %vm14941_vm11 = vmmov %vm14938_vm1  ;;  %v2682_v8 = vadd.f32 %v10301_v30, %v10244_v4 }
 0x5a7   : > { %3370 = vmax.xlane.f32.xlu2 %v10458_v49  ;;  %vm14942_vm6 = vmmov %vm14938_vm1 }
 0x5a8   : > { %v10496_v61 = vcvt.s32.f32 %v3431_v38  ;;  %vm14943_vm10 = vmmov %vm14938_vm1 }
 0x5aa   : > { %14937 = vst [vmem:[#allocation52_spill] sm:$0xff] %v10496_v61 }
 0x5ab   : > { %v2649_v44 = vpop.f32.mrf.mxu3 }
 0x5ad   : > { %v2693_v63 = vpop.f32.mrf.mxu2  ;;  %3386 = vmax.xlane.f32.xlu0 %v10487_v18 }
 0x5ae   : > { %v2694_v35 = vadd.f32 %v2693_v63, %v2644_v15  ;;  %v14944_v63 = vld [vmem:[#allocation47_spill] sm:$0xff] }
 0x5af   : > { %3418 = vmax.xlane.f32.xlu2 %v10485_v53 }
 0x5b0   : > { %v2711_v60 = vpack.c.bf16 %v2694_v35, %v2692_v51 }
 0x5b3   : > { %v2652_v28 = vpop.f32.mrf.mxu3 }
 0x5b5   : > { %v2696_v10 = vpop.f32.mrf.mxu2  ;;  %3434 = vmax.xlane.f32.xlu0 %v10496_v61  ;;  %v2689_v61 = vadd.f32 %v10405_v21, %v10332_v24 }
 0x5b6   : > { %v2697_v47 = vadd.f32 %v2696_v10, %v2647_v23  ;;  %v14945_v23 = vld [vmem:[#allocation18_spill] sm:$0xff] }
 0x5b7   : > { %v2669_v10 = vadd.f32 %v14945_v23, %v14944_v63 }
 0x5bb   : > { %v2654_v52 = vpop.f32.mrf.mxu3 }
 0x5bd   : > { %v2698_v58 = vpop.f32.mrf.mxu2 }
 0x5be   : > { %v2699_v62 = vadd.f32 %v2698_v58, %v2649_v44  ;;  %v14947_v58 = vld [vmem:[#allocation5_spill] sm:$0xff] }
 0x5c0   : > { %v2712_v9 = vpack.c.bf16 %v2699_v62, %v2697_v47  ;;  %v2895_v62 = vcvt.f32.s32 %v10162_v0  ;;  %v2677_v0 = vadd.f32 %v10246_v57, %v10234_v13  ;;  %v2672_v57 = vadd.f32 %v10236_v45, %v10224_v56 }
 0x5c1   : > { %v3028_v45 = vand.u32 65535, %v10311_v6  ;;  %v10545_v56 = vsel %vm3078_vm12, 2147483648, %v9754_v54  ;;  %v2943_v6 = vcvt.f32.s32 %v10330_v27  ;;  %v14946_v54 = vld [vmem:[#allocation46_spill] sm:$0xff] }
 0x5c2   : > { %v2733_v38 = vsel %vm14939_vm4, %v2712_v9, 0  ;;  %v2894_v9 = vcvt.f32.s32 %v10374_v32  ;;  %v2896_v24 = vshll.u32 %v2895_v62, 16  ;;  %vm14950_vm4 = vmmov %vm14938_vm1 }
 0x5c4   : > { %v2897_v21 = vadd.s32 %v2896_v24, %v2894_v9 }
 0x5c5   : > { %v2701_v46 = vpop.f32.mrf.mxu2 }
 0x5c6   : > { %v2702_v17 = vadd.f32 %v2701_v46, %v2652_v28  ;;  %v2730_v28 = vsel %vm14940_vm15, %v2711_v60, 0  ;;  %v2911_v60 = vcvt.f32.s32 %v10255_v29  ;;  %v3048_v15 = vand.u32 255, %v2897_v21 }
 0x5c7   : > { %v2674_v29 = vadd.f32 %v10240_v48, %v10230_v37  ;;  %v2667_v46 = vadd.f32 %v14947_v58, %v14946_v54 }
 0x5c8   : > { %v10519_v40 = vsub.s32 255, %v3048_v15 }
 0x5c9   : > { %v2707_v48 = vpack.c.bf16 %v2674_v29, %v2672_v57  ;;  %v2706_v27 = vpack.c.bf16 %v2669_v10, %v2667_v46  ;;  %v14952_v57 = vld [vmem:[#allocation19_spill] sm:$0xff] }
 0x5ca   : > { %vm3086_vm13 = vcmp.eq.s32.totalorder %v7818_v43, %v10519_v40 }
 0x5cb   : > { %v2718_v44 = vsel %vm14938_vm1, %v2707_v48, 0 }
 0x5cd   : > { %v2703_v34 = vpop.f32.mrf.mxu2 }
 0x5ce   : > { %v2704_v3 = vadd.f32 %v2703_v34, %v2654_v52  ;;  %v2912_v34 = vshll.u32 %v2911_v60, 16 }
 0x5d0   : > { %v2713_v25 = vpack.c.bf16 %v2704_v3, %v2702_v17  ;;  %v2710_v17 = vpack.c.bf16 %v2689_v61, %v10364_v12  ;;  %v2679_v12 = vadd.f32 %v10253_v11, %v10238_v26 }
 0x5d2   : > { %v2736_v16 = vsel %vm14938_vm1, %v2713_v25, 0  ;;  %v2727_v47 = vsel %vm14941_vm11, %v2710_v17, 0  ;;  %v2708_v30 = vpack.c.bf16 %v2679_v12, %v2677_v0  ;;  %v2927_v25 = vcvt.f32.s32 %v10305_v14 }
 0x5d3   : > { %2738 = vmatpush.bf16.xpose.msrb.mxu3 %v2736_v16  ;;  %v2684_v16 = vadd.f32 %v10318_v22, %v10257_v41  ;;  %v10551_v14 = vsel %vm3079_vm9, 2147483648, %v9761_v39  ;;  %v3030_v39 = vcvt.s32.f32 %v3028_v45  ;;  %v2715_v0 = vsel %vm14950_vm4, %v2706_v27, 0 }
 0x5d4   : > { %v2721_v26 = vsel %vm14943_vm10, %v2708_v30, 0  ;;  %v2928_v3 = vshll.u32 %v2927_v25, 16  ;;  %vm3396_vm12 = vcmp.gt.s32.totalorder %v10545_v56, %v10551_v14 }
 0x5d5   : > { %v2709_v51 = vpack.c.bf16 %v2684_v16, %v2682_v8  ;;  %v10568_v16 = vsel %vm3396_vm12, %v10545_v56, %v10551_v14 }
 0x5d6   : > { %v3399_v21 = vshra.s32 %v10568_v16, 16  ;;  %v3398_v10 = vand.u32 65535, %v10568_v16 }
 0x5d7   : > { %v2724_v41 = vsel %vm14942_vm6, %v2709_v51, 0  ;;  %v14948_v51 = vld [vmem:[#allocation28_spill] sm:$0xff] }
 0x5d8   : > { %v10574_v24 = vsel %vm3084_vm0, 2147483648, %v14948_v51  ;;  %v3400_v51 = vcvt.s32.f32 %v3398_v10 }
 0x5db   : > { %2739 = vmatpush.bf16.xpose.msrb.mxu3 %v2733_v38  ;;  %v2975_v38 = vcvt.f32.s32 %v10322_v20 }
 0x5dd   : > { %v2976_v12 = vshll.u32 %v2975_v38, 16 }
 0x5e3   : > { %2740 = vmatpush.bf16.xpose.msrb.mxu3 %v2730_v28 }
 0x5eb   : > { %2741 = vmatpush.bf16.xpose.msrb.mxu3 %v2727_v47  ;;  %v2944_v47 = vshll.u32 %v2943_v6, 16  ;;  %v10644_v6 = vld [vmem:[%s14380_s3] sm:$0xff] }
 0x5ed   : > { %v2909_v22 = vpop.xlane.xlu1 %2908 }
 0x5ee   : > { %v2910_v4 = vcvt.f32.s32 %v2909_v22 }
 0x5f0   : > { %v2913_v32 = vadd.s32 %v2912_v34, %v2910_v4  ;;  %v14951_v4 = vld [vmem:[#allocation40_spill] sm:$0xff] }
 0x5f2   : > { %v3049_v35 = vand.u32 255, %v2913_v32  ;;  %v10594_v32 = vcvt.s32.f32 %v3399_v21 }
 0x5f3   : > { %2742 = vmatpush.bf16.xpose.msrb.mxu3 %v2724_v41  ;;  %v2959_v41 = vcvt.f32.s32 %v10372_v36  ;;  %v2991_v36 = vcvt.f32.s32 %v10366_v33  ;;  %v14953_v33 = vld [vmem:[#allocation23_spill] sm:$0xff] }
 0x5f4   : > { %v10524_v11 = vsub.s32 255, %v3049_v35 }
 0x5f5   : > { %v2925_v13 = vpop.xlane.xlu1 %2924  ;;  %v2960_v35 = vshll.u32 %v2959_v41, 16 }
 0x5f6   : > { %vm3088_vm2 = vcmp.eq.s32.totalorder %v7818_v43, %v10524_v11  ;;  %v2926_v37 = vcvt.f32.s32 %v2925_v13  ;;  %v10605_v13 = vsel %vm3086_vm13, 2147483648, %v14952_v57 }
 0x5f7   : > { %vm6831_vm3 = vmpackc.low %vm3088_vm2, %vm3086_vm13 }
 0x5f8   : > { %6832 = vmatmul.msk.bf16.gmra.mxu1 %vm6831_vm3, %v14735_v7  ;;  %v2929_v61 = vadd.s32 %v2928_v3, %v2926_v37  ;;  %v14954_v3 = vld [vmem:[#allocation25_spill] sm:$0xff] }
 0x5fa   : > { %v3050_v62 = vand.u32 255, %v2929_v61  ;;  %v3007_v61 = vcvt.f32.s32 %v10409_v2 }
 0x5fb   : > { %2743 = vmatpush.bf16.xpose.msrb.mxu3 %v2721_v26 }
 0x5fc   : > { %v10585_v22 = vsub.s32 255, %v3050_v62  ;;  %v3008_v2 = vshll.u32 %v3007_v61, 16  ;;  %v10668_v62 = vld [vmem:[%s8022_s10 + $0x60] sm:$0xff]  ;;  %v10765_v61 = vld [vmem:[%s8022_s10 + $0x48] sm:$0xff] }
 0x5fd   : > { %v10561_v52 = vpop.xlane.xlu1 %3032  ;;  %v2973_v5 = vpop.xlane.xlu0 %2972  ;;  %14958 = vst [vmem:[#allocation47_spill] sm:$0xff] %v10668_v62 }
 0x5fe   : > { %vm3034_vm9 = vcmp.eq.f32.partialorder %v10326_v55, %v10561_v52  ;;  %v2974_v9 = vcvt.f32.s32 %v2973_v5  ;;  %v14949_v55 = vld [vmem:[#allocation30_spill] sm:$0xff]  ;;  %vm3090_vm15 = vcmp.eq.s32.totalorder %v7818_v43, %v10585_v22  ;;  %vm3091_vm10 = vcmp.eq.s32.totalorder %v7821_v50, %v10585_v22  ;;  %14973 = vst [vmem:[#allocation19_spill] sm:$0xff] %v10765_v61 }
 0x5ff   : > { %v3035_v28 = vsel %vm3034_vm9, %v3030_v39, -inf  ;;  %v10580_v20 = vsel %vm3085_vm7, 2147483648, %v14949_v55  ;;  %vm14505_vm7 = vcmp.eq.s32.totalorder %v7821_v50, %v10519_v40  ;;  %v14957_v39 = vld [vmem:[#allocation27_spill] sm:$0xff]  ;;  %vm14504_vm9 = vcmp.eq.s32.totalorder %v7821_v50, %v10524_v11 }
 0x600   : > { %v2941_v17 = vpop.xlane.xlu2 %2940  ;;  %3036 = vmax.xlane.f32.xlu1 %v3035_v28  ;;  %vm3444_vm0 = vcmp.gt.s32.totalorder %v10574_v24, %v10580_v20  ;;  %v2977_v15 = vadd.s32 %v2976_v12, %v2974_v9  ;;  %v10616_v48 = vsel %vm14505_vm7, 2147483648, %v14953_v33  ;;  %v3366_v55 = vand.u32 65535, %v10418_v59  ;;  %v14963_v12 = vld [vmem:[#allocation35_spill] sm:$0xff] }
 0x601   : > { %v2942_v8 = vcvt.f32.s32 %v2941_v17  ;;  %v10599_v26 = vsel %vm3444_vm0, %v10574_v24, %v10580_v20  ;;  %vm3460_vm12 = vcmp.gt.s32.totalorder %v10605_v13, %v10616_v48  ;;  %v10695_v41 = vsel %vm14504_vm9, 2147483648, %v14963_v12 }
 0x602   : > { %v3053_v37 = vand.u32 255, %v2977_v15  ;;  %v3447_v23 = vshra.s32 %v10599_v26, 16  ;;  %v10660_v17 = vsel %vm3460_vm12, %v10605_v13, %v10616_v48  ;;  %14964 = vst [vmem:[#allocation46_spill] sm:$0xff] %v10695_v41  ;;  %v10700_v15 = vld [vmem:[%s8022_s10 + $0x58] sm:$0xff]  ;;  %v3382_v33 = vand.u32 65535, %v10468_v1 }
 0x603   : > { %2744 = vmatpush.bf16.xpose.msrb.mxu3 %v2718_v44  ;;  %v2945_v60 = vadd.s32 %v2944_v47, %v2942_v8  ;;  %v2992_v44 = vshll.u32 %v2991_v36, 16  ;;  %v3463_v9 = vshra.s32 %v10660_v17, 16  ;;  %14965 = vst [vmem:[#allocation5_spill] sm:$0xff] %v10700_v15 }
 0x604   : > { %v10651_v58 = vsub.s32 255, %v3053_v37  ;;  %v10656_v38 = vcvt.s32.f32 %v3447_v23  ;;  %v3414_v37 = vand.u32 65535, %v10464_v19 }
 0x605   : > { %v3051_v34 = vand.u32 255, %v2945_v60  ;;  %v2989_v30 = vpop.xlane.xlu1 %2988  ;;  %v14961_v60 = vld [vmem:[#allocation34_spill] sm:$0xff] }
 0x606   : > { %v2990_v45 = vcvt.f32.s32 %v2989_v30  ;;  %vm3097_vm0 = vcmp.eq.s32.totalorder %v7821_v50, %v10651_v58  ;;  %v10689_v21 = vsel %vm3088_vm2, 2147483648, %v14961_v60  ;;  %vm3096_vm12 = vcmp.eq.s32.totalorder %v7818_v43, %v10651_v58  ;;  %v14979_v60 = vld [vmem:[#allocation44_spill] sm:$0xff] }
 0x607   : > { %v10592_v31 = vsub.s32 255, %v3051_v34  ;;  %14962 = vst [vmem:[#allocation18_spill] sm:$0xff] %v10689_v21 }
 0x608   : > { %3402 = vmax.xlane.f32.xlu1 %v10594_v32  ;;  %v2993_v46 = vadd.s32 %v2992_v44, %v2990_v45  ;;  %v14969_v45 = vld [vmem:[#allocation37_spill] sm:$0xff] }
 0x609   : > { %vm14503_vm11 = vcmp.eq.s32.totalorder %v7818_v43, %v10592_v31  ;;  %vm14502_vm13 = vcmp.eq.s32.totalorder %v7821_v50, %v10592_v31 }
 0x60a   : > { %v2957_v29 = vpop.xlane.xlu2 %2956  ;;  %vm6833_vm6 = vmpackc.low %vm14503_vm11, %vm3090_vm15  ;;  %v3054_v47 = vand.u32 255, %v2993_v46  ;;  %v3416_v46 = vcvt.s32.f32 %v3414_v37 }
 0x60b   : > { %2745 = vmatpush.bf16.xpose.msrb.mxu3 %v2715_v0  ;;  %v2958_v25 = vcvt.f32.s32 %v2957_v29  ;;  %6834 = vmatmul.msk.bf16.gmra.mxu1 %vm6833_vm6, %v14735_v7  ;;  %vm10637_vm3 = vmpackc.low %vm14502_vm13, %vm3091_vm10  ;;  %v10723_v29 = vld [vmem:[%s8022_s10 + $0x50] sm:$0xff] }
 0x60c   : > { %v10697_v34 = vsub.s32 255, %v3054_v47  ;;  %14966 = vst [vmem:[#allocation28_spill] sm:$0xff] %v10723_v29  ;;  %v10791_v47 = vld [vmem:[%s8022_s10 + $0x38] sm:$0xff] }
 0x60d   : > { %v2961_v63 = vadd.s32 %v2960_v35, %v2958_v25  ;;  %v3368_v35 = vcvt.s32.f32 %v3366_v55  ;;  %14975 = vst [vmem:[#allocation25_spill] sm:$0xff] %v10791_v47 }
 0x60e   : > { %vm3099_vm13 = vcmp.eq.s32.totalorder %v7821_v50, %v10697_v34 }
 0x60f   : > { %v3052_v54 = vand.u32 255, %v2961_v63  ;;  %v14971_v63 = vld [vmem:[#allocation38_spill] sm:$0xff] }
 0x610   : > { %3450 = vmax.xlane.f32.xlu1 %v10656_v38  ;;  %v10761_v23 = vsel %vm3091_vm10, 2147483648, %v14971_v63  ;;  %v14984_v63 = vld [vmem:[#allocation39_spill] sm:$0xff] }
 0x611   : > { %v10654_v5 = vsub.s32 255, %v3052_v54  ;;  %14972 = vst [vmem:[#allocation40_spill] sm:$0xff] %v10761_v23  ;;  %v3384_v54 = vcvt.s32.f32 %v3382_v33 }
 0x612   : > { %6792 = vmatmul.msk.bf16.vlgmr.msrb.gmra.mxu3 %vm14938_vm1, %v10644_v6  ;;  %v3005_v28 = vpop.xlane.xlu2 %3004  ;;  %vm3476_vm1 = vcmp.gt.s32.totalorder %v10689_v21, %v10695_v41 }
 0x613   : > { %3235 = vmatpush.bf16.msra.mxu3 %v14951_v4  ;;  %v3006_v27 = vcvt.f32.s32 %v3005_v28  ;;  %vm14501_vm4 = vcmp.eq.s32.totalorder %v7821_v50, %v10654_v5  ;;  %v10705_v4 = vcvt.s32.f32 %v3463_v9  ;;  %vm3094_vm2 = vcmp.eq.s32.totalorder %v7818_v43, %v10654_v5  ;;  %v14977_v9 = vld [vmem:[#allocation42_spill] sm:$0xff] }
 0x614   : > { %vm10680_vm6 = vmpackc.low %vm3097_vm0, %vm14501_vm4  ;;  %v10734_v25 = vsel %vm3476_vm1, %v10689_v21, %v10695_v41  ;;  %v10802_v55 = vsel %vm3096_vm12, 2147483648, %v14977_v9  ;;  %vm3098_vm1 = vcmp.eq.s32.totalorder %v7818_v43, %v10697_v34  ;;  %v10863_v34 = vld [vmem:[%s8022_s10 + $0x18] sm:$0xff] }
 0x615   : > { %v3009_v8 = vadd.s32 %v3008_v2, %v3006_v27  ;;  %vm6835_vm11 = vmpackc.low %vm3096_vm12, %vm3094_vm2  ;;  %v3479_v44 = vshra.s32 %v10734_v25, 16  ;;  %14978 = vst [vmem:[#allocation27_spill] sm:$0xff] %v10802_v55 }
 0x616   : > { %14989 = vst [vmem:[#allocation44_spill] sm:$0xff] %v10863_v34 }
 0x617   : > { %3236 = vmatpush.bf16.msra.mxu3 %v14954_v3  ;;  %v3055_v0 = vand.u32 255, %v3009_v8  ;;  %v10755_v3 = vsel %vm3090_vm15, 2147483648, %v14969_v45  ;;  %v10776_v22 = vcvt.s32.f32 %v3479_v44  ;;  %v10836_v45 = vld [vmem:[%s8022_s10 + $0x28] sm:$0xff]  ;;  %v10840_v44 = vsel %vm3098_vm1, 2147483648, %v14984_v63 }
 0x618   : > { %v10711_v30 = vpop.xlane.xlu0 %3020  ;;  %3466 = vmax.xlane.f32.xlu1 %v10705_v4  ;;  %14970 = vst [vmem:[#allocation30_spill] sm:$0xff] %v10755_v3  ;;  %v3039_v63 = vcvt.f32.s32 %v10561_v52 }
 0x619   : > { %v10703_v59 = vsub.s32 255, %v3055_v0  ;;  %14983 = vst [vmem:[#allocation37_spill] sm:$0xff] %v10836_v45 }
 0x61a   : > { %v10713_v36 = vpop.xlane.xlu2 %3370  ;;  %14985 = vst [vmem:[#allocation38_spill] sm:$0xff] %v10840_v44 }
 0x61b   : > { %3237 = vmatpush.bf16.msra.mxu3 %v14957_v39  ;;  %vm3372_vm4 = vcmp.eq.f32.partialorder %v10458_v49, %v10713_v36  ;;  %vm3101_vm9 = vcmp.eq.s32.totalorder %v7821_v50, %v10703_v59  ;;  %6836 = vmatmul.msk.bf16.gmra.mxu1 %vm6835_vm11, %v14735_v7  ;;  %vm3492_vm11 = vcmp.gt.s32.totalorder %v10755_v3, %v10761_v23  ;;  %v10781_v39 = vld [vmem:[%s8022_s10 + $0x40] sm:$0xff] }
 0x61c   : > { %v3373_v57 = vsel %vm3372_vm4, %v3368_v35, -inf  ;;  %vm10745_vm7 = vmpackc.low %vm3101_vm9, %vm3099_vm13  ;;  %14974 = vst [vmem:[#allocation23_spill] sm:$0xff] %v10781_v39  ;;  %v10786_v27 = vsel %vm3492_vm11, %v10755_v3, %v10761_v23  ;;  %vm3100_vm4 = vcmp.eq.s32.totalorder %v7818_v43, %v10703_v59  ;;  %v10817_v35 = vld [vmem:[%s8022_s10 + $0x30] sm:$0xff]  ;;  %v15011_v49 = vld [vmem:[#allocation17_spill] sm:$0xff] }
 0x61d   : > { %3374 = vmax.xlane.f32.xlu2 %v3373_v57  ;;  %v3495_v8 = vshra.s32 %v10786_v27, 16  ;;  %14981 = vst [vmem:[#allocation35_spill] sm:$0xff] %v10817_v35  ;;  %v14982_v57 = vld [vmem:[#allocation52_spill] sm:$0xff]  ;;  %vm6837_vm12 = vmpackc.low %vm3100_vm4, %vm3098_vm1 }
 0x61e   : > { %v15013_v59 = vld [vmem:[#allocation48_spill] sm:$0xff] }
 0x61f   : > { %3238 = vmatpush.bf16.msra.mxu3 %v10668_v62  ;;  %v10822_v58 = vcvt.s32.f32 %v3495_v8  ;;  %v3022_v8 = vcvt.f32.s32 %v10711_v30 }
 0x620   : > { %v10770_v19 = vpop.xlane.xlu0 %3386 }
 0x621   : > { %vm3388_vm15 = vcmp.eq.f32.partialorder %v10487_v18, %v10770_v19  ;;  %v3430_v18 = vand.u32 65535, %v10491_v42  ;;  %v10808_v42 = vsel %vm3097_vm0, 2147483648, %v14979_v60  ;;  %v10871_v60 = vld [vmem:[%s8022_s10 + $0x10] sm:$0xff] }
 0x622   : > { %v10772_v1 = vpop.xlane.xlu2 %3418  ;;  %v3389_v28 = vsel %vm3388_vm15, %v3384_v54, -inf  ;;  %14980 = vst [vmem:[#allocation34_spill] sm:$0xff] %v10808_v42  ;;  %v14986_v54 = vld [vmem:[#allocation41_spill] sm:$0xff] }
 0x623   : > { %3239 = vmatpush.bf16.msra.mxu3 %v10700_v15  ;;  %vm3420_vm10 = vcmp.eq.f32.partialorder %v10485_v53, %v10772_v1  ;;  %3390 = vmax.xlane.f32.xlu0 %v3389_v28  ;;  %v3432_v0 = vcvt.s32.f32 %v3430_v18  ;;  %14991 = vst [vmem:[#allocation52_spill] sm:$0xff] %v10871_v60 }
 0x624   : > { %v3421_v2 = vsel %vm3420_vm10, %v3416_v46, -inf  ;;  %v10846_v46 = vsel %vm3099_vm13, 2147483648, %v14986_v54  ;;  %vm14996_vm13 = vcmp.eq.s32.totalorder %v7821_v50, %v10524_v11  ;;  %v14997_v54 = vld [vmem:[#allocation16_spill] sm:$0xff] }
 0x625   : > { %3482 = vmax.xlane.f32.xlu2 %v10776_v22  ;;  %3422 = vmax.xlane.f32.xlu1 %v3421_v2  ;;  %14987 = vst [vmem:[#allocation8_spill] sm:$0xff] %v10846_v46  ;;  %vm3556_vm11 = vcmp.gt.s32.totalorder %v10840_v44, %v10846_v46  ;;  %v10852_v2 = vld [vmem:[%s8022_s10 + $0x20] sm:$0xff] }
 0x626   : > { %14988 = vst [vmem:[#allocation42_spill] sm:$0xff] %v10852_v2  ;;  %v10859_v53 = vsel %vm3556_vm11, %v10840_v44, %v10846_v46 }
 0x627   : > { %3240 = vmatpush.bf16.msra.mxu3 %v10723_v29  ;;  %v3559_v9 = vshra.s32 %v10859_v53, 16 }
 0x628   : > { %v10812_v12 = vpop.xlane.xlu0 %3434 }
 0x629   : > { %vm3436_vm0 = vcmp.eq.f32.partialorder %v14982_v57, %v10812_v12  ;;  %v10878_v57 = vld [vmem:[%s8022_s10 + $0x8] sm:$0xff] }
 0x62a   : > { %v3437_v33 = vsel %vm3436_vm0, %v3432_v0, -inf  ;;  %v10874_v0 = vcvt.s32.f32 %v3559_v9  ;;  %14992 = vst [vmem:[#allocation39_spill] sm:$0xff] %v10878_v57 }
 0x62b   : > { %3241 = vmatpush.bf16.msra.mxu3 %v10765_v61  ;;  %6838 = vmatmul.msk.bf16.gmra.mxu1 %vm6837_vm12, %v14735_v7  ;;  %vm15007_vm12 = vcmp.eq.s32.totalorder %v7821_v50, %v10654_v5 }
 0x62d   : > { %3498 = vmax.xlane.f32.xlu2 %v10822_v58  ;;  %3438 = vmax.xlane.f32.xlu1 %v3437_v33  ;;  %v10882_v33 = vld [vmem:[%s8022_s10] sm:$0xff] }
 0x62e   : > { %14993 = vst [vmem:[#allocation41_spill] sm:$0xff] %v10882_v33 }
 0x62f   : > { %3242 = vmatpush.bf16.msra.mxu3 %v10781_v39 }
 0x632   : > { %6842 = vmatmul.msk.bf16.vlgmr.msra.gmra.mxu3 %vm10283_vm8, %v14735_v7  ;;  %vm3540_vm8 = vcmp.gt.s32.totalorder %v10802_v55, %v10808_v42 }
 0x633   : > { %4342 = vmatpush.bf16.msrb.mxu3 %v10791_v47  ;;  %v10833_v37 = vsel %vm3540_vm8, %v10802_v55, %v10808_v42  ;;  %v14998_v42 = vld [vmem:[#allocation45_spill] sm:$0xff] }
 0x634   : > { %v3543_v28 = vshra.s32 %v10833_v37, 16 }
 0x636   : > { %v10855_v18 = vcvt.s32.f32 %v3543_v28  ;;  %v3023_v28 = vcvt.f32.s32 %v14997_v54  ;;  %v15001_v54 = vld [vmem:[#allocation43_spill] sm:$0xff] }
 0x637   : > { %4343 = vmatpush.bf16.msrb.mxu3 %v10817_v35 }
 0x638   : > { %3546 = vmax.xlane.f32.xlu1 %v10855_v18  ;;  %v3024_v9 = vshll.u32 %v3023_v28, 16 }
 0x63a   : > { %v3025_v44 = vadd.s32 %v3024_v9, %v3022_v8  ;;  %v15006_v8 = vld [vmem:[#allocation11_spill] sm:$0xff] }
 0x63b   : > { %4344 = vmatpush.bf16.msrb.mxu3 %v10836_v45  ;;  %v10949_v9 = vsel %vm15007_vm12, 2147483648, %v15006_v8  ;;  %v3377_v8 = vcvt.f32.s32 %v10713_v36 }
 0x63c   : > { %15008 = vst [vmem:[#allocation45_spill] sm:$0xff] %v10949_v9 }
 0x63f   : > { %4345 = vmatpush.bf16.msrb.mxu3 %v10852_v2  ;;  %v3425_v2 = vcvt.f32.s32 %v10772_v1 }
 0x640   : > { %3562 = vmax.xlane.f32.xlu1 %v10874_v0 }
 0x641   : > { %v3426_v45 = vshll.u32 %v3425_v2, 16 }
 0x642   : > { %6844 = vmatmul.msk.bf16.gmra.mxu3 %vm10360_vm5, %v14735_v7  ;;  %vm14995_vm5 = vcmp.eq.s32.totalorder %v7821_v50, %v10519_v40  ;;  %v3040_v40 = vshll.u32 %v3039_v63, 16 }
 0x643   : > { %4346 = vmatpush.bf16.msrb.mxu3 %v10863_v34  ;;  %vm6847_vm15 = vmpackc.low %vm14996_vm13, %vm14995_vm5 }
 0x647   : > { %4347 = vmatpush.bf16.msrb.mxu3 %v10871_v60 }
 0x64b   : > { %4348 = vmatpush.bf16.msrb.mxu3 %v10878_v57 }
 0x64f   : > { %4349 = vmatpush.bf16.msrb.mxu3 %v10882_v33  ;;  %v3056_v33 = vand.u32 255, %v3025_v44 }
 0x651   : > { %v3072_v44 = vsub.s32 255, %v3056_v33 }
 0x652   : > { %6846 = vmatmul.msk.bf16.gmra.mxu3 %vm10401_vm14, %v14735_v7  ;;  %vm14999_vm14 = vcmp.eq.s32.totalorder %v7818_v43, %v10592_v31 }
 0x653   : > { %v10909_v30 = vsel %vm14999_vm14, 2147483648, %v14998_v42  ;;  %vm3102_vm8 = vcmp.eq.s32.totalorder %v7818_v43, %v3072_v44  ;;  %v15004_v42 = vld [vmem:[#allocation36_spill] sm:$0xff] }
 0x654   : > { %15000 = vst [vmem:[#allocation12_spill] sm:$0xff] %v10909_v30  ;;  %v10943_v33 = vsel %vm3094_vm2, 2147483648, %v15004_v42 }
 0x655   : > { %15005 = vst [vmem:[#allocation16_spill] sm:$0xff] %v10943_v33  ;;  %vm3524_vm11 = vcmp.gt.s32.totalorder %v10943_v33, %v10949_v9 }
 0x656   : > { %v10965_v10 = vsel %vm3524_vm11, %v10943_v33, %v10949_v9  ;;  %v15018_v9 = vld [vmem:[#allocation31_spill] sm:$0xff] }
 0x662   : > { %6848 = vmatmul.msk.bf16.gmra.mxu3 %vm6847_vm15, %v14735_v7 }
 0x672   : > { %6850 = vmatmul.msk.bf16.gmra.mxu3 %vm10637_vm3, %v14735_v7  ;;  %vm15002_vm3 = vcmp.eq.s32.totalorder %v7821_v50, %v10592_v31 }
 0x673   : > { %v3037_v46 = vpop.xlane.xlu1 %3036  ;;  %v10915_v52 = vsel %vm15002_vm3, 2147483648, %v15001_v54  ;;  %v15009_v54 = vld [vmem:[#allocation26_spill] sm:$0xff] }
 0x674   : > { %v3038_v55 = vcvt.f32.s32 %v3037_v46  ;;  %15003 = vst [vmem:[#allocation20_spill] sm:$0xff] %v10915_v52 }
 0x676   : > { %v3041_v11 = vadd.s32 %v3040_v40, %v3038_v55 }
 0x678   : > { %v3057_v46 = vand.u32 255, %v3041_v11 }
 0x67a   : > { %v10917_v28 = vsub.s32 255, %v3057_v46  ;;  %v10972_v46 = vsel %vm3100_vm4, 2147483648, %v15009_v54 }
 0x67b   : > { %v10921_v16 = vpop.xlane.xlu1 %3402  ;;  %15010 = vst [vmem:[#allocation43_spill] sm:$0xff] %v10972_v46 }
 0x67c   : > { %vm3404_vm10 = vcmp.eq.f32.partialorder %v10594_v32, %v10921_v16  ;;  %vm3104_vm1 = vcmp.eq.s32.totalorder %v7818_v43, %v10917_v28  ;;  %v3446_v32 = vand.u32 65535, %v10599_v26  ;;  %vm3105_vm5 = vcmp.eq.s32.totalorder %v7821_v50, %v10917_v28 }
 0x67d   : > { %v3405_v31 = vsel %vm3404_vm10, %v3400_v51, -inf  ;;  %vm6839_vm0 = vmpackc.low %vm3104_vm1, %vm3102_vm8  ;;  %v10978_v51 = vsel %vm3101_vm9, 2147483648, %v15011_v49  ;;  %vm3103_vm9 = vcmp.eq.s32.totalorder %v7821_v50, %v3072_v44  ;;  %v3409_v21 = vcvt.f32.s32 %v10921_v16 }
 0x67e   : > { %3406 = vmax.xlane.f32.xlu0 %v3405_v31  ;;  %6840 = vmatmul.msk.bf16.gmra.mxu1 %vm6839_vm0, %v14735_v7  ;;  %v3448_v26 = vcvt.s32.f32 %v3446_v32  ;;  %15012 = vst [vmem:[#allocation36_spill] sm:$0xff] %v10978_v51  ;;  %v3527_v31 = vshra.s32 %v10965_v10, 16  ;;  %vm6855_vm15 = vmpackc.low %vm3105_vm5, %vm3103_vm9 }
 0x67f   : > { %v3410_v39 = vshll.u32 %v3409_v21, 16 }
 0x682   : > { %6852 = vmatmul.msk.bf16.gmra.mxu3 %vm10680_vm6, %v14735_v7  ;;  %vm3508_vm6 = vcmp.gt.s32.totalorder %v10909_v30, %v10915_v52 }
 0x683   : > { %v10935_v55 = vsel %vm3508_vm6, %v10909_v30, %v10915_v52  ;;  %v10954_v40 = vpop.xlane.xlu1 %3450  ;;  %v3494_v30 = vand.u32 65535, %v10786_v27 }
 0x684   : > { %v3511_v63 = vshra.s32 %v10935_v55, 16  ;;  %vm3452_vm2 = vcmp.eq.f32.partialorder %v10656_v38, %v10954_v40  ;;  %v3462_v38 = vand.u32 65535, %v10660_v17  ;;  %v3457_v62 = vcvt.f32.s32 %v10954_v40 }
 0x685   : > { %v3453_v5 = vsel %vm3452_vm2, %v3448_v26, -inf  ;;  %v15014_v26 = vld [vmem:[#allocation32_spill] sm:$0xff] }
 0x686   : > { %v10959_v11 = vcvt.s32.f32 %v3511_v63  ;;  %3454 = vmax.xlane.f32.xlu2 %v3453_v5  ;;  %v3464_v42 = vcvt.s32.f32 %v3462_v38  ;;  %v10987_v63 = vcvt.s32.f32 %v3527_v31  ;;  %v2206_v17 = vmax.f32 %v15014_v26, %v15013_v59  ;;  %v15015_v38 = vld [vmem:[#allocation14_spill] sm:$0xff]  ;;  %v11011_v59 = vpop.f32.mrf.mxu1 }
 0x687   : > { %v3378_v26 = vshll.u32 %v3377_v8, 16 }
 0x688   : > { %3514 = vmax.xlane.f32.xlu0 %v10959_v11 }
 0x68b   : > { %v10984_v32 = vpop.xlane.xlu1 %3466 }
 0x68c   : > { %vm3468_vm4 = vcmp.eq.f32.partialorder %v10705_v4, %v10984_v32  ;;  %v11002_v4 = vsel %vm3102_vm8, 2147483648, %v15015_v38  ;;  %v3478_v38 = vand.u32 65535, %v10734_v25 }
 0x68d   : > { %v3469_v5 = vsel %vm3468_vm4, %v3464_v42, -inf  ;;  %15016 = vst [vmem:[#allocation11_spill] sm:$0xff] %v11002_v4  ;;  %v11009_v42 = vsel %vm3103_vm9, 2147483648, %v15018_v9 }
 0x68e   : > { %3470 = vmax.xlane.f32.xlu2 %v3469_v5  ;;  %15019 = vst [vmem:[#allocation17_spill] sm:$0xff] %v11009_v42  ;;  %vm3588_vm13 = vcmp.gt.s32.totalorder %v11002_v4, %v11009_v42 }
 0x68f   : > { %v11032_v25 = vsel %vm3588_vm13, %v11002_v4, %v11009_v42  ;;  %v11041_v4 = vpop.f32.mrf.mxu1 }
 0x690   : > { %v3375_v54 = vpop.xlane.xlu2 %3374  ;;  %3530 = vmax.xlane.f32.xlu0 %v10987_v63 }
 0x691   : > { %v3376_v36 = vcvt.f32.s32 %v3375_v54  ;;  %v3393_v54 = vcvt.f32.s32 %v10770_v19 }
 0x692   : > { %6854 = vmatmul.msk.bf16.gmra.mxu3 %vm10745_vm7, %v14735_v7  ;;  %vm3572_vm7 = vcmp.gt.s32.totalorder %v10972_v46, %v10978_v51 }
 0x693   : > { %v10996_v49 = vsel %vm3572_vm7, %v10972_v46, %v10978_v51  ;;  %v3379_v46 = vadd.s32 %v3378_v26, %v3376_v36  ;;  %v3394_v19 = vshll.u32 %v3393_v54, 16  ;;  %v3480_v26 = vcvt.s32.f32 %v3478_v38  ;;  %v15020_v54 = vld [vmem:[#allocation9_spill] sm:$0xff]  ;;  %v15022_v38 = vld [vmem:[#allocation15_spill] sm:$0xff] }
 0x694   : > { %v3575_v5 = vshra.s32 %v10996_v49, 16  ;;  %v3591_v51 = vshra.s32 %v11032_v25, 16 }
 0x695   : > { %v2747_v33 = vpop.f32.mrf.mxu3 }
 0x696   : > { %v11004_v31 = vmax.f32 %v2206_v17, %v2747_v33  ;;  %v11026_v33 = vcvt.s32.f32 %v3575_v5  ;;  %v3391_v9 = vpop.xlane.xlu0 %3390  ;;  %v3620_v17 = vand.u32 255, %v3379_v46  ;;  %v11047_v46 = vsel %vm3104_vm1, 2147483648, %v15020_v54 }
 0x697   : > { %v3392_v44 = vcvt.f32.s32 %v3391_v9  ;;  %15021 = vst [vmem:[#allocation48_spill] sm:$0xff] %v11047_v46  ;;  %v11059_v27 = vcvt.s32.f32 %v3591_v51  ;;  %v3542_v54 = vand.u32 65535, %v10833_v37 }
 0x698   : > { %15017 = vst [vmem:[#allocation26_spill] sm:$0xff] %v11004_v31  ;;  %v11028_v8 = vpop.xlane.xlu2 %3482  ;;  %3578 = vmax.xlane.f32.xlu2 %v11026_v33  ;;  %v11035_v36 = vpop.xlane.xlu1 %3422  ;;  %v11049_v9 = vsub.s32 255, %v3620_v17 }
 0x699   : > { %vm3484_vm14 = vcmp.eq.f32.partialorder %v10776_v22, %v11028_v8  ;;  %v3395_v5 = vadd.s32 %v3394_v19, %v3392_v44  ;;  %v11055_v22 = vsel %vm3105_vm5, 2147483648, %v15022_v38 }
 0x69a   : > { %v3485_v31 = vsel %vm3484_vm14, %v3480_v26, -inf  ;;  %15023 = vst [vmem:[#allocation32_spill] sm:$0xff] %v11055_v22  ;;  %v3496_v26 = vcvt.s32.f32 %v3494_v30  ;;  %vm3604_vm3 = vcmp.gt.s32.totalorder %v11047_v46, %v11055_v22  ;;  %vm3652_vm6 = vcmp.eq.s32.totalorder %v7818_v43, %v11049_v9 }
 0x69b   : > { %3486 = vmax.xlane.f32.xlu0 %v3485_v31  ;;  %v3621_v19 = vand.u32 255, %v3395_v5  ;;  %vm3653_vm0 = vcmp.eq.s32.totalorder %v7821_v50, %v11049_v9  ;;  %v11099_v17 = vsel %vm3604_vm3, %v11047_v46, %v11055_v22  ;;  %v11101_v5 = vpop.f32.mrf.mxu1 }
 0x69c   : > { %v3607_v38 = vshra.s32 %v11099_v17, 16 }
 0x69d   : > { %v11057_v44 = vsub.s32 255, %v3621_v19  ;;  %v11078_v30 = vpop.f32.mrf.mxu3 }
 0x69e   : > { %15025 = vst [vmem:[#allocation31_spill] sm:$0xff] %v11078_v30  ;;  %v11111_v42 = vcvt.s32.f32 %v3607_v38 }
 0x69f   : > { %vm3654_vm10 = vcmp.eq.s32.totalorder %v7818_v43, %v11057_v44  ;;  %vm3655_vm8 = vcmp.eq.s32.totalorder %v7821_v50, %v11057_v44 }
 0x6a0   : > { %v11061_v31 = vpop.xlane.xlu2 %3498  ;;  %3594 = vmax.xlane.f32.xlu2 %v11059_v27  ;;  %v11072_v28 = vpop.xlane.xlu1 %3438  ;;  %vm6890_vm12 = vmpackc.low %vm3654_vm10, %vm3652_vm6 }
 0x6a1   : > { %15024 = vst [vmem:[#allocation14_spill] sm:$0xff] %v11061_v31  ;;  %vm3500_vm1 = vcmp.eq.f32.partialorder %v10822_v58, %v11061_v31  ;;  %vm11092_vm11 = vmpackc.low %vm3655_vm8, %vm3653_vm0  ;;  %v15026_v58 = vmov 0  ;;  %6891 = vmatmul.msk.bf16.vlgmr.msrb.gmra.mxu2 %vm6890_vm12, %v14735_v7 }
 0x6a2   : > { %6856 = vmatmul.msk.bf16.gmra.mxu3 %vm6855_vm15, %v14735_v7  ;;  %v3501_v51 = vsel %vm3500_vm1, %v3496_v26, -inf  ;;  %v15027_v58 = vsel %vm11092_vm11, 4294967295, %v15026_v58  ;;  %v3544_v26 = vcvt.s32.f32 %v3542_v54 }
 0x6a3   : > { %15028 = vst [vmem:[#allocation9_spill] sm:$0xff] %v15027_v58  ;;  %3502 = vmax.xlane.f32.xlu0 %v3501_v51  ;;  %v3558_v51 = vand.u32 65535, %v10859_v53  ;;  %v11115_v22 = vpop.f32.mrf.mxu1 }
 0x6a5   : > { %v3560_v46 = vcvt.s32.f32 %v3558_v51 }
 0x6ab   : > { %v11105_v19 = vpop.xlane.xlu1 %3546  ;;  %3610 = vmax.xlane.f32.xlu0 %v11111_v42 }
 0x6ac   : > { %15029 = vst [vmem:[#allocation15_spill] sm:$0xff] %v11105_v19  ;;  %vm3548_vm2 = vcmp.eq.f32.partialorder %v10855_v18, %v11105_v19  ;;  %v11123_v18 = vpop.f32.mrf.mxu1  ;;  %v3510_v19 = vand.u32 65535, %v10935_v55 }
 0x6ad   : > { %v3549_v52 = vsel %vm3548_vm2, %v3544_v26, -inf }
 0x6ae   : > { %3550 = vmax.xlane.f32.xlu2 %v3549_v52 }
 0x6b3   : > { %v11117_v37 = vpop.xlane.xlu1 %3562 }
 0x6b4   : > { %15030 = vst [vmem:[#allocation53_spill] sm:$0xff] %v11117_v37  ;;  %vm3564_vm7 = vcmp.eq.f32.partialorder %v10874_v0, %v11117_v37  ;;  %v11129_v26 = vpop.f32.mrf.mxu1  ;;  %v3424_v37 = vcvt.f32.s32 %v11035_v36 }
 0x6b5   : > { %v11107_v30 = vpop.f32.mrf.mxu3  ;;  %v3565_v54 = vsel %vm3564_vm7, %v3560_v46, -inf }
 0x6b6   : > { %3566 = vmax.xlane.f32.xlu0 %v3565_v54  ;;  %v3427_v35 = vadd.s32 %v3426_v45, %v3424_v37  ;;  %v3441_v45 = vcvt.f32.s32 %v10812_v12  ;;  %v3526_v12 = vand.u32 65535, %v10965_v10  ;;  %v3473_v10 = vcvt.f32.s32 %v10984_v32 }
 0x6b8   : > { %v3623_v29 = vand.u32 255, %v3427_v35 }
 0x6ba   : > { %v11158_v31 = vsub.s32 255, %v3623_v29 }
 0x6bc   : > { %v11133_v60 = vpop.f32.mrf.mxu1  ;;  %15031 = vst [vmem:[#allocation54_spill] sm:$0xff] %v11158_v31  ;;  %vm3658_vm5 = vcmp.eq.s32.totalorder %v7818_v43, %v11158_v31 }
 0x6bd   : > { %v11119_v57 = vpop.f32.mrf.mxu3 }
 0x6c4   : > { %v11137_v34 = vpop.f32.mrf.mxu1 }
 0x6c5   : > { %v11125_v38 = vpop.f32.mrf.mxu3 }
 0x6cc   : > { %v11141_v0 = vpop.f32.mrf.mxu1 }
 0x6cd   : > { %v11127_v52 = vpop.f32.mrf.mxu3 }
 0x6d4   : > { %v11145_v54 = vpop.f32.mrf.mxu1 }
 0x6d5   : > { %v11131_v53 = vpop.f32.mrf.mxu3 }
 0x6dc   : > { %v11152_v41 = vpop.f32.mrf.mxu1 }
 0x6dd   : > { %v11135_v51 = vpop.f32.mrf.mxu3 }
 0x6e4   : > { %v11162_v16 = vpop.f32.mrf.mxu1 }
 0x6e5   : > { %v11139_v3 = vpop.f32.mrf.mxu3 }
 0x6ed   : > { %v11143_v46 = vpop.f32.mrf.mxu3 }
 0x6f1   : > { %v3407_v47 = vpop.xlane.xlu0 %3406 }
 0x6f2   : > { %v3408_v61 = vcvt.f32.s32 %v3407_v47  ;;  %v3512_v47 = vcvt.s32.f32 %v3510_v19 }
 0x6f4   : > { %v3411_v15 = vadd.s32 %v3410_v39, %v3408_v61  ;;  %v3458_v61 = vshll.u32 %v3457_v62, 16  ;;  %v3442_v62 = vshll.u32 %v3441_v45, 16 }
 0x6f5   : > { %v11147_v23 = vpop.f32.mrf.mxu3 }
 0x6f6   : > { %v3622_v1 = vand.u32 255, %v3411_v15  ;;  %v3440_v15 = vcvt.f32.s32 %v11072_v28 }
 0x6f8   : > { %v11164_v36 = vsub.s32 255, %v3622_v1  ;;  %v3443_v55 = vadd.s32 %v3442_v62, %v3440_v15  ;;  %v3528_v1 = vcvt.s32.f32 %v3526_v12  ;;  %v15033_v15 = vld [vmem:[#allocation6_spill] sm:$0xff]  ;;  %v15035_v62 = vld [vmem:[#allocation7_spill] sm:$0xff] }
 0x6f9   : > { %v3455_v21 = vpop.xlane.xlu2 %3454 }
 0x6fa   : > { %v3456_v39 = vcvt.f32.s32 %v3455_v21  ;;  %vm3656_vm9 = vcmp.eq.s32.totalorder %v7818_v43, %v11164_v36  ;;  %v3624_v21 = vand.u32 255, %v3443_v55  ;;  %v3474_v55 = vshll.u32 %v3473_v10, 16 }
 0x6fb   : > { %v11167_v37 = vpop.xlane.xlu0 %3514  ;;  %vm6892_vm13 = vmpackc.low %vm3658_vm5, %vm3656_vm9 }
 0x6fc   : > { %vm3516_vm4 = vcmp.eq.f32.partialorder %v10959_v11, %v11167_v37  ;;  %v3459_v35 = vadd.s32 %v3458_v61, %v3456_v39  ;;  %6893 = vmatmul.msk.bf16.gmra.mxu2 %vm6892_vm13, %v14735_v7  ;;  %v3574_v39 = vand.u32 65535, %v10996_v49  ;;  %v3489_v49 = vcvt.f32.s32 %v11028_v8 }
 0x6fd   : > { %v11154_v58 = vpop.f32.mrf.mxu3  ;;  %v3517_v29 = vsel %vm3516_vm4, %v3512_v47, -inf  ;;  %v11190_v47 = vpop.f32.mrf.mxu1  ;;  %vm3657_vm4 = vcmp.eq.s32.totalorder %v7821_v50, %v11164_v36 }
 0x6fe   : > { %3518 = vmax.xlane.f32.xlu1 %v3517_v29  ;;  %v3625_v11 = vand.u32 255, %v3459_v35  ;;  %v11200_v29 = vsel %vm3652_vm6, 2147483648, %v15033_v15  ;;  %v11208_v35 = vsub.s32 255, %v3624_v21  ;;  %vm3659_vm6 = vcmp.eq.s32.totalorder %v7821_v50, %v11158_v31 }
 0x6ff   : > { %15034 = vst [vmem:[#allocation6_spill] sm:$0xff] %v11200_v29  ;;  %v3490_v21 = vshll.u32 %v3489_v49, 16  ;;  %v15042_v49 = vld [vmem:[#allocation22_spill] sm:$0xff] }
 0x700   : > { %v11193_v61 = vsub.s32 255, %v3625_v11  ;;  %15037 = vst [vmem:[#allocation56_spill] sm:$0xff] %v11208_v35 }
 0x701   : > { %v3471_v19 = vpop.xlane.xlu2 %3470 }
 0x702   : > { %15032 = vst [vmem:[#allocation55_spill] sm:$0xff] %v11193_v61  ;;  %v3472_v12 = vcvt.f32.s32 %v3471_v19  ;;  %vm3662_vm3 = vcmp.eq.s32.totalorder %v7818_v43, %v11193_v61 }
 0x703   : > { %v11186_v28 = vpop.xlane.xlu0 %3530 }
 0x704   : > { %vm3532_vm15 = vcmp.eq.f32.partialorder %v10987_v63, %v11186_v28  ;;  %v11206_v63 = vsel %vm3653_vm0, 2147483648, %v15035_v62  ;;  %v3475_v9 = vadd.s32 %v3474_v55, %v3472_v12  ;;  %vm3660_vm0 = vcmp.eq.s32.totalorder %v7818_v43, %v11208_v35  ;;  %v15040_v12 = vld [vmem:[#allocation21_spill] sm:$0xff] }
 0x705   : > { %v11160_v2 = vpop.f32.mrf.mxu3  ;;  %v3533_v45 = vsel %vm3532_vm15, %v3528_v1, -inf  ;;  %15036 = vst [vmem:[#allocation7_spill] sm:$0xff] %v11206_v63  ;;  %vm3942_vm14 = vcmp.gt.s32.totalorder %v11200_v29, %v11206_v63  ;;  %v3576_v1 = vcvt.s32.f32 %v3574_v39  ;;  %vm6894_vm12 = vmpackc.low %vm3662_vm3, %vm3660_vm0  ;;  %v3590_v39 = vand.u32 65535, %v11032_v25  ;;  %v11242_v15 = vpop.f32.mrf.mxu1 }
 0x706   : > { %3534 = vmax.xlane.f32.xlu1 %v3533_v45  ;;  %v11227_v19 = vsel %vm3942_vm14, %v11200_v29, %v11206_v63  ;;  %v15038_v45 = vld [vmem:[#allocation24_spill] sm:$0xff]  ;;  %v11249_v55 = vsel %vm3659_vm6, 2147483648, %v15040_v12 }
 0x707   : > { %v11233_v10 = vsel %vm3658_vm5, 2147483648, %v15038_v45  ;;  %15041 = vst [vmem:[#allocation21_spill] sm:$0xff] %v11249_v55  ;;  %v3626_v45 = vand.u32 255, %v3475_v9  ;;  %v3592_v31 = vcvt.s32.f32 %v3590_v39 }
 0x708   : > { %15039 = vst [vmem:[#allocation24_spill] sm:$0xff] %v11233_v10  ;;  %vm3990_vm2 = vcmp.gt.s32.totalorder %v11233_v10, %v11249_v55 }
 0x709   : > { %v3642_v44 = vsub.s32 255, %v3626_v45  ;;  %v15046_v45 = vld [vmem:[#allocation50_spill] sm:$0xff] }
 0x70b   : > { %v11215_v11 = vpop.xlane.xlu2 %3578  ;;  %vm3665_vm13 = vcmp.eq.s32.totalorder %v7821_v50, %v3642_v44 }
 0x70c   : > { %vm3580_vm1 = vcmp.eq.f32.partialorder %v11026_v33, %v11215_v11  ;;  %6895 = vmatmul.msk.bf16.gmra.mxu2 %vm6894_vm12, %v14735_v7 }
 0x70d   : > { %v11184_v40 = vpop.f32.mrf.mxu3  ;;  %v3581_v8 = vsel %vm3580_vm1, %v3576_v1, -inf  ;;  %v11255_v1 = vsel %vm3654_vm10, 2147483648, %v15042_v49  ;;  %vm3661_vm10 = vcmp.eq.s32.totalorder %v7821_v50, %v11208_v35 }
 0x70e   : > { %3582 = vmax.xlane.f32.xlu1 %v3581_v8  ;;  %v3487_v33 = vpop.xlane.xlu0 %3486  ;;  %15043 = vst [vmem:[#allocation22_spill] sm:$0xff] %v11255_v1  ;;  %v15044_v8 = vld [vmem:[#allocation10_spill] sm:$0xff] }
 0x70f   : > { %v3488_v62 = vcvt.f32.s32 %v3487_v33  ;;  %v11261_v25 = vsel %vm3655_vm8, 2147483648, %v15044_v8  ;;  %v3945_v33 = vshra.s32 %v11227_v19, 16  ;;  %v11280_v8 = vsel %vm3990_vm2, %v11233_v10, %v11249_v55 }
 0x710   : > { %15045 = vst [vmem:[#allocation10_spill] sm:$0xff] %v11261_v25  ;;  %vm3958_vm7 = vcmp.gt.s32.totalorder %v11255_v1, %v11261_v25  ;;  %vm3663_vm2 = vcmp.eq.s32.totalorder %v7821_v50, %v11193_v61 }
 0x711   : > { %v3491_v63 = vadd.s32 %v3490_v21, %v3488_v62  ;;  %v11274_v9 = vcvt.s32.f32 %v3945_v33  ;;  %v15048_v33 = vld [vmem:[#allocation51_spill] sm:$0xff] }
 0x713   : > { %v3627_v12 = vand.u32 255, %v3491_v63  ;;  %v11268_v49 = vpop.xlane.xlu2 %3594  ;;  %v11284_v63 = vsel %vm3958_vm7, %v11255_v1, %v11261_v25  ;;  %v3606_v25 = vand.u32 65535, %v11099_v17  ;;  %v11330_v1 = vsel %vm3657_vm4, 2147483648, %v10551_v14 }
 0x714   : > { %vm3596_vm8 = vcmp.eq.f32.partialorder %v11059_v27, %v11268_v49  ;;  %v3230_v27 = vpop.f32.mrf.mxu1  ;;  %v3961_v10 = vshra.s32 %v11284_v63, 16  ;;  %15054 = vst [vmem:[#allocation59_spill] sm:$0xff] %v11330_v1 }
 0x715   : > { %v11210_v32 = vpop.f32.mrf.mxu3  ;;  %v11276_v21 = vsub.s32 255, %v3627_v12  ;;  %v3597_v62 = vsel %vm3596_vm8, %v3592_v31, -inf  ;;  %v11295_v31 = vsel %vm3660_vm0, 2147483648, %v15046_v45  ;;  %v11303_v12 = vsel %vm3661_vm10, 2147483648, %v15048_v33 }
 0x716   : > { %3948 = vmax.xlane.f32.xlu1 %v11274_v9  ;;  %3598 = vmax.xlane.f32.xlu2 %v3597_v62  ;;  %v11287_v39 = vpop.xlane.xlu0 %3502  ;;  %15047 = vst [vmem:[#allocation50_spill] sm:$0xff] %v11295_v31  ;;  %v3993_v62 = vshra.s32 %v11280_v8, 16  ;;  %v15050_v45 = vmov 0  ;;  %v11321_v33 = vsel %vm3656_vm9, 2147483648, %v10545_v56  ;;  %vm4006_vm14 = vcmp.gt.s32.totalorder %v11295_v31, %v11303_v12 }
 0x717   : > { %vm3667_vm5 = vcmp.eq.s32.totalorder %v7821_v50, %v11276_v21  ;;  %15049 = vst [vmem:[#allocation51_spill] sm:$0xff] %v11303_v12  ;;  %vm3666_vm1 = vcmp.eq.s32.totalorder %v7818_v43, %v11276_v21  ;;  %v11336_v35 = vcvt.s32.f32 %v3961_v10  ;;  %vm3664_vm9 = vcmp.eq.s32.totalorder %v7818_v43, %v3642_v44 }
 0x718   : > { %vm11313_vm15 = vmpackc.low %vm3667_vm5, %vm3665_vm13  ;;  %15053 = vst [vmem:[#allocation58_spill] sm:$0xff] %v11321_v33  ;;  %v11341_v56 = vsel %vm4006_vm14, %v11295_v31, %v11303_v12  ;;  %vm3974_vm0 = vcmp.gt.s32.totalorder %v11321_v33, %v11330_v1  ;;  %v3608_v17 = vcvt.s32.f32 %v3606_v25  ;;  %v11368_v25 = vsel %vm3663_vm2, 2147483648, %v10580_v20 }
 0x719   : > { %v15051_v45 = vsel %vm11313_vm15, 4294967295, %v15050_v45  ;;  %15056 = vst [vmem:[#allocation61_spill] sm:$0xff] %v11336_v35  ;;  %vm6896_vm12 = vmpackc.low %vm3666_vm1, %vm3664_vm9  ;;  %v11362_v31 = vsel %vm3974_vm0, %v11321_v33, %v11330_v1  ;;  %vm15058_vm14 = vcmask 64512  }
 0x71a   : > { %15052 = vst [vmem:[#allocation57_spill] sm:$0xff] %v15051_v45  ;;  %v11334_v45 = vcvt.s32.f32 %v3993_v62  ;;  %v4009_v62 = vshra.s32 %v11341_v56, 16  ;;  %v3977_v33 = vshra.s32 %v11362_v31, 16  ;;  %vm15059_vm0 = vmmov %vm15058_vm14 }
 0x71b   : > { %15057 = vst [vmem:[#allocation62_spill] sm:$0xff] %v11341_v56 }
 0x71c   : > { %15055 = vst [vmem:[#allocation60_spill] sm:$0xff] %v11334_v45  ;;  %6897 = vmatmul.msk.bf16.gmra.mxu2 %vm6896_vm12, %v14735_v7  ;;  %v3232_v12 = vpop.f32.mrf.mxu1  ;;  %v11384_v61 = vcvt.s32.f32 %v3977_v33  ;;  %vm15062_vm12 = vmmov %vm15059_vm0 }
 0x71d   : > { %v3276_v29 = vpop.f32.mrf.mxu3 }
 0x71e   : > { %3996 = vmax.xlane.f32.xlu1 %v11334_v45  ;;  %3964 = vmax.xlane.f32.xlu2 %v11336_v35  ;;  %v11352_v14 = vpop.xlane.xlu0 %3610  ;;  %v11377_v45 = vcvt.s32.f32 %v4009_v62 }
 0x71f   : > { %vm3612_vm7 = vcmp.eq.f32.partialorder %v11111_v42, %v11352_v14  ;;  %v11374_v42 = vsel %vm3662_vm3, 2147483648, %v10574_v24  ;;  %v3275_v24 = vadd.f32 %v11210_v32, %v11190_v47  ;;  %v3272_v47 = vadd.f32 %v11184_v40, %v11162_v16 }
 0x720   : > { %v3613_v10 = vsel %vm3612_vm7, %v3608_v17, -inf  ;;  %vm4022_vm8 = vcmp.gt.s32.totalorder %v11374_v42, %v11368_v25  ;;  %v3267_v16 = vadd.f32 %v11154_v58, %v11145_v54  ;;  %v3260_v58 = vadd.f32 %v11139_v3, %v11133_v60  ;;  %vm15063_vm7 = vmmov %vm15059_vm0 }
 0x721   : > { %3614 = vmax.xlane.f32.xlu0 %v3613_v10  ;;  %v3277_v10 = vadd.f32 %v3276_v29, %v11242_v15  ;;  %v11396_v29 = vsel %vm3665_vm13, 2147483648, %v10616_v48  ;;  %v11401_v15 = vsel %vm3664_vm9, 2147483648, %v10605_v13  ;;  %v3270_v48 = vadd.f32 %v11160_v2, %v11152_v41  ;;  %vm15060_vm13 = vmmov %vm15059_vm0 }
 0x722   : > { %vm4038_vm3 = vcmp.gt.s32.totalorder %v11401_v15, %v11396_v29  ;;  %v3265_v41 = vadd.f32 %v11147_v23, %v11141_v0  ;;  %vm15061_vm9 = vmmov %vm15059_vm0  ;;  %v3255_v23 = vadd.f32 %v11131_v53, %v11123_v18  ;;  %v3250_v3 = vadd.f32 %v11125_v38, %v11101_v5  ;;  %v15067_v5 = vld [vmem:[#allocation14_spill] sm:$0xff] }
 0x723   : > { %v11415_v13 = vsel %vm4038_vm3, %v11401_v15, %v11396_v29  ;;  %v3289_v44 = vpack.c.bf16 %v3272_v47, %v3270_v48  ;;  %v3245_v18 = vadd.f32 %v11107_v30, %v11011_v59  ;;  %vm15066_vm3 = vmmov %vm15059_vm0  ;;  %v3505_v38 = vcvt.f32.s32 %v15067_v5  ;;  %v15069_v47 = vld [vmem:[#allocation15_spill] sm:$0xff]  ;;  %v15070_v48 = vld [vmem:[#allocation5_spill] sm:$0xff] }
 0x724   : > { %v3288_v2 = vpack.c.bf16 %v3267_v16, %v3265_v41  ;;  %v3521_v59 = vcvt.f32.s32 %v11167_v37  ;;  %v15081_v5 = vld [vmem:[#allocation46_spill] sm:$0xff] }
 0x725   : > { %v3279_v55 = vpop.f32.mrf.mxu3  ;;  %v3308_v40 = vsel %vm15060_vm13, %v3289_v44, 0 }
 0x726   : > { %v3280_v17 = vadd.f32 %v3279_v55, %v3230_v27  ;;  %4012 = vmax.xlane.f32.xlu2 %v11377_v45  ;;  %v3290_v55 = vpack.c.bf16 %v3277_v10, %v3275_v24  ;;  %v3305_v62 = vsel %vm15061_vm9, %v3288_v2, 0  ;;  %v3506_v24 = vshll.u32 %v3505_v38, 16 }
 0x727   : > { %v11519_v38 = vsel %vm3667_vm5, 2147483648, %v15081_v5  ;;  %v15095_v5 = vld [vmem:[#allocation61_spill] sm:$0xff] }
 0x728   : > { %v3311_v32 = vsel %vm15059_vm0, %v3290_v55, 0  ;;  %v15068_v55 = vld [vmem:[#allocation47_spill] sm:$0xff] }
 0x729   : > { %3980 = vmax.xlane.f32.xlu0 %v11384_v61 }
 0x72d   : > { %v3281_v35 = vpop.f32.mrf.mxu3 }
 0x72e   : > { %v3282_v56 = vadd.f32 %v3281_v35, %v3232_v12  ;;  %v11390_v35 = vsel %vm4022_vm8, %v11374_v42, %v11368_v25  ;;  %v4041_v12 = vshra.s32 %v11415_v13, 16  ;;  %vm15064_vm8 = vmmov %vm15059_vm0 }
 0x730   : > { %v3291_v1 = vpack.c.bf16 %v3282_v56, %v3280_v17  ;;  %v11422_v33 = vcvt.s32.f32 %v4041_v12  ;;  %v3262_v56 = vadd.f32 %v11143_v46, %v11137_v34  ;;  %v3257_v17 = vadd.f32 %v11135_v51, %v11129_v26 }
 0x731   : > { %v3252_v34 = vadd.f32 %v11127_v52, %v11115_v22  ;;  %v3247_v26 = vadd.f32 %v11119_v57, %v11041_v4  ;;  %v7513_v52 = vld [vmem:[%s8022_s10 + $0x78] sm:$0xff]  ;;  %v7515_v57 = vld [vmem:[%s8022_s10 + $0x68] sm:$0xff]  ;;  %v3504_v4 = vcvt.f32.s32 %v11287_v39  ;;  %v3522_v12 = vshll.u32 %v3521_v59, 16 }
 0x732   : > { %v3314_v20 = vsel %vm15058_vm14, %v3291_v1, 0  ;;  %v4025_v1 = vshra.s32 %v11390_v35, 16  ;;  %v3287_v54 = vpack.c.bf16 %v3262_v56, %v3260_v58  ;;  %v3286_v0 = vpack.c.bf16 %v3257_v17, %v3255_v23  ;;  %vm15065_vm14 = vmmov %vm15059_vm0  ;;  %v15071_v56 = vld [vmem:[#allocation28_spill] sm:$0xff]  ;;  %v15072_v17 = vld [vmem:[#allocation19_spill] sm:$0xff] }
 0x733   : > { %3316 = vmatpush.bf16.xpose.msra.mxu0 %v3314_v20  ;;  %v3285_v60 = vpack.c.bf16 %v3252_v34, %v3250_v3  ;;  %v3284_v53 = vpack.c.bf16 %v3247_v26, %v3245_v18  ;;  %v7514_v20 = vld [vmem:[%s8022_s10 + $0x70] sm:$0xff]  ;;  %v3507_v30 = vadd.s32 %v3506_v24, %v3504_v4  ;;  %v3537_v39 = vcvt.f32.s32 %v11186_v28  ;;  %v15074_v3 = vld [vmem:[#allocation25_spill] sm:$0xff] }
 0x734   : > { %v11409_v27 = vcvt.s32.f32 %v4025_v1  ;;  %v3302_v10 = vsel %vm15062_vm12, %v3287_v54, 0  ;;  %v3299_v46 = vsel %vm15063_vm7, %v3286_v0, 0  ;;  %v3551_v1 = vpop.xlane.xlu2 %3550  ;;  %v3944_v24 = vand.u32 65535, %v11227_v19 }
 0x735   : > { %v3296_v51 = vsel %vm15064_vm8, %v3285_v60, 0  ;;  %v3293_v22 = vsel %vm15065_vm14, %v3284_v53, 0  ;;  %v3552_v16 = vcvt.f32.s32 %v3551_v1  ;;  %v3585_v59 = vcvt.f32.s32 %v11215_v11  ;;  %v15085_v1 = vld [vmem:[#allocation53_spill] sm:$0xff] }
 0x736   : > { %4028 = vmax.xlane.f32.xlu0 %v11409_v27  ;;  %v3946_v21 = vcvt.s32.f32 %v3944_v24  ;;  %v3601_v19 = vcvt.f32.s32 %v11268_v49 }
 0x73b   : > { %3317 = vmatpush.bf16.xpose.msra.mxu0 %v3311_v32  ;;  %v3553_v32 = vcvt.f32.s32 %v15069_v47  ;;  %v3569_v47 = vcvt.f32.s32 %v15085_v1 }
 0x73d   : > { %v3554_v41 = vshll.u32 %v3553_v32, 16  ;;  %v3570_v11 = vshll.u32 %v3569_v47, 16 }
 0x73e   : > { %4044 = vmax.xlane.f32.xlu0 %v11422_v33 }
 0x73f   : > { %v3555_v37 = vadd.s32 %v3554_v41, %v3552_v16  ;;  %v3586_v16 = vshll.u32 %v3585_v59, 16  ;;  %v15096_v59 = vld [vmem:[#allocation62_spill] sm:$0xff] }
 0x741   : > { %v3631_v0 = vand.u32 255, %v3555_v37  ;;  %v15087_v37 = vld [vmem:[#allocation40_spill] sm:$0xff] }
 0x743   : > { %3318 = vmatpush.bf16.xpose.msra.mxu0 %v3308_v40  ;;  %v11479_v60 = vsub.s32 255, %v3631_v0  ;;  %v3602_v0 = vshll.u32 %v3601_v19, 16  ;;  %v15100_v19 = vld [vmem:[#allocation27_spill] sm:$0xff] }
 0x745   : > { %vm3674_vm8 = vcmp.eq.s32.totalorder %v7818_v43, %v11479_v60  ;;  %vm3675_vm14 = vcmp.eq.s32.totalorder %v7821_v50, %v11479_v60  ;;  %v3976_v60 = vand.u32 65535, %v11362_v31 }
 0x74b   : > { %3319 = vmatpush.bf16.xpose.msra.mxu0 %v3305_v62 }
 0x753   : > { %3320 = vmatpush.bf16.xpose.msra.mxu0 %v3302_v10  ;;  %v3538_v10 = vshll.u32 %v3537_v39, 16  ;;  %v3960_v39 = vand.u32 65535, %v11284_v63 }
 0x75b   : > { %3321 = vmatpush.bf16.xpose.msra.mxu0 %v3299_v46  ;;  %v15073_v46 = vld [vmem:[#allocation23_spill] sm:$0xff] }
 0x763   : > { %3322 = vmatpush.bf16.xpose.msra.mxu0 %v3296_v51 }
 0x76b   : > { %3323 = vmatpush.bf16.xpose.msra.mxu0 %v3293_v22  ;;  %v15076_v22 = vld [vmem:[#allocation35_spill] sm:$0xff] }
 0x771   : > { %v3519_v44 = vpop.xlane.xlu1 %3518 }
 0x772   : > { %6857 = vmatmul.msk.bf16.vlgmr.msra.gmra.mxu0 %vm15066_vm3, %v10644_v6  ;;  %v3628_v6 = vand.u32 255, %v3507_v30  ;;  %v3520_v40 = vcvt.f32.s32 %v3519_v44  ;;  %v3567_v30 = vpop.xlane.xlu0 %3566 }
 0x773   : > { %3813 = vmatpush.bf16.msrb.mxu0 %v7513_v52  ;;  %v15094_v52 = vld [vmem:[#allocation60_spill] sm:$0xff] }
 0x774   : > { %v3523_v2 = vadd.s32 %v3522_v12, %v3520_v40  ;;  %v11461_v62 = vsub.s32 255, %v3628_v6  ;;  %v15086_v6 = vld [vmem:[#allocation42_spill] sm:$0xff] }
 0x776   : > { %v3629_v58 = vand.u32 255, %v3523_v2  ;;  %vm3668_vm0 = vcmp.eq.s32.totalorder %v7818_v43, %v11461_v62 }
 0x777   : > { %3814 = vmatpush.bf16.msrb.mxu0 %v7514_v20 }
 0x778   : > { %v11463_v54 = vsub.s32 255, %v3629_v58  ;;  %v15089_v58 = vld [vmem:[#allocation30_spill] sm:$0xff] }
 0x779   : > { %v3535_v23 = vpop.xlane.xlu1 %3534 }
 0x77a   : > { %v3536_v34 = vcvt.f32.s32 %v3535_v23  ;;  %vm3670_vm13 = vcmp.eq.s32.totalorder %v7818_v43, %v11463_v54  ;;  %v15091_v23 = vld [vmem:[#allocation44_spill] sm:$0xff] }
 0x77b   : > { %3815 = vmatpush.bf16.msrb.mxu0 %v7515_v57  ;;  %vm6898_vm9 = vmpackc.low %vm3670_vm13, %vm3668_vm0  ;;  %v15082_v57 = vld [vmem:[#allocation18_spill] sm:$0xff] }
 0x77c   : > { %v3539_v28 = vadd.s32 %v3538_v10, %v3536_v34  ;;  %6899 = vmatmul.msk.bf16.gmra.mxu2 %vm6898_vm9, %v14735_v7  ;;  %v11525_v4 = vsel %vm3666_vm1, 2147483648, %v15082_v57  ;;  %vm3669_vm1 = vcmp.eq.s32.totalorder %v7821_v50, %v11461_v62  ;;  %v3617_v34 = vcvt.f32.s32 %v11352_v14  ;;  %v11834_v62 = vpop.f32.mrf.mxu2 }
 0x77d   : > { %15083 = vst [vmem:[#allocation14_spill] sm:$0xff] %v11525_v4  ;;  %vm4054_vm5 = vcmp.gt.s32.totalorder %v11525_v4, %v11519_v38  ;;  %v11554_v49 = vsel %vm3669_vm1, 2147483648, %v15087_v37  ;;  %v15102_v37 = vld [vmem:[#allocation20_spill] sm:$0xff] }
 0x77e   : > { %v3630_v26 = vand.u32 255, %v3539_v28  ;;  %v11543_v41 = vsel %vm4054_vm5, %v11525_v4, %v11519_v38  ;;  %15088 = vst [vmem:[#allocation47_spill] sm:$0xff] %v11554_v49  ;;  %v3618_v1 = vshll.u32 %v3617_v34, 16  ;;  %vm14560_vm5 = vcmp.eq.s32.totalorder %v7821_v50, %v11463_v54 }
 0x77f   : > { %3816 = vmatpush.bf16.msrb.mxu0 %v15068_v55  ;;  %v15084_v55 = vld [vmem:[#allocation37_spill] sm:$0xff]  ;;  %v4057_v63 = vshra.s32 %v11543_v41, 16  ;;  %15132 = vst [vmem:[#allocation40_spill] sm:$0xff] %v11834_v62 }
 0x780   : > { %v11484_v18 = vsub.s32 255, %v3630_v26 }
 0x781   : > { %v3583_v53 = vpop.xlane.xlu1 %3582  ;;  %v11583_v14 = vcvt.s32.f32 %v4057_v63 }
 0x782   : > { %vm3673_vm12 = vcmp.eq.s32.totalorder %v7821_v50, %v11484_v18  ;;  %vm3672_vm7 = vcmp.eq.s32.totalorder %v7818_v43, %v11484_v18  ;;  %v3584_v32 = vcvt.f32.s32 %v3583_v53  ;;  %v3962_v53 = vcvt.s32.f32 %v3960_v39 }
 0x783   : > { %3817 = vmatpush.bf16.msrb.mxu0 %v15070_v48  ;;  %vm11511_vm3 = vmpackc.low %vm3675_vm14, %vm3673_vm12  ;;  %v3568_v48 = vcvt.f32.s32 %v3567_v30  ;;  %v4008_v30 = vand.u32 65535, %v15096_v59  ;;  %v15126_v59 = vld [vmem:[#allocation17_spill] sm:$0xff] }
 0x784   : > { %v3587_v2 = vadd.s32 %v3586_v16, %v3584_v32  ;;  %v15098_v16 = vld [vmem:[#allocation34_spill] sm:$0xff] }
 0x785   : > { %v4010_v39 = vcvt.s32.f32 %v4008_v30 }
 0x786   : > { %v3633_v28 = vand.u32 255, %v3587_v2 }
 0x787   : > { %3818 = vmatpush.bf16.msrb.mxu0 %v15071_v56  ;;  %v3992_v56 = vand.u32 65535, %v11280_v8 }
 0x788   : > { %v11590_v47 = vsub.s32 255, %v3633_v28 }
 0x789   : > { %v11533_v44 = vpop.xlane.xlu1 %3948  ;;  %v3599_v12 = vpop.xlane.xlu2 %3598  ;;  %v3994_v51 = vcvt.s32.f32 %v3992_v56 }
 0x78a   : > { %vm3950_vm9 = vcmp.eq.f32.partialorder %v11274_v9, %v11533_v44  ;;  %v3571_v9 = vadd.s32 %v3570_v11, %v3568_v48  ;;  %v3600_v10 = vcvt.f32.s32 %v3599_v12  ;;  %v11602_v11 = vsel %vm3675_vm14, 2147483648, %v15098_v16 }
 0x78b   : > { %3819 = vmatpush.bf16.msrb.mxu0 %v15072_v17  ;;  %v3951_v40 = vsel %vm3950_vm9, %v3946_v21, -inf  ;;  %v11560_v17 = vsel %vm3668_vm0, 2147483648, %v15089_v58  ;;  %15099 = vst [vmem:[#allocation5_spill] sm:$0xff] %v11602_v11  ;;  %v15104_v58 = vld [vmem:[#allocation12_spill] sm:$0xff] }
 0x78c   : > { %3952 = vmax.xlane.f32.xlu1 %v3951_v40  ;;  %15090 = vst [vmem:[#allocation15_spill] sm:$0xff] %v11560_v17  ;;  %vm4070_vm0 = vcmp.gt.s32.totalorder %v11560_v17, %v11554_v49  ;;  %v11608_v40 = vsel %vm3674_vm8, 2147483648, %v15100_v19 }
 0x78d   : > { %15101 = vst [vmem:[#allocation28_spill] sm:$0xff] %v11608_v40  ;;  %vm4118_vm9 = vcmp.gt.s32.totalorder %v11608_v40, %v11602_v11 }
 0x78f   : > { %3820 = vmatpush.bf16.msrb.mxu0 %v15073_v46  ;;  %v3632_v46 = vand.u32 255, %v3571_v9  ;;  %v11615_v9 = vsel %vm14560_vm5, 2147483648, %v15102_v37 }
 0x790   : > { %15103 = vst [vmem:[#allocation19_spill] sm:$0xff] %v11615_v9 }
 0x791   : > { %v11574_v26 = vpop.xlane.xlu1 %3996  ;;  %v11576_v36 = vpop.xlane.xlu2 %3964  ;;  %v11593_v48 = vsub.s32 255, %v3632_v46  ;;  %v15107_v46 = vld [vmem:[#allocation8_spill] sm:$0xff] }
 0x792   : > { %6907 = vmatmul.msk.bf16.vlgmr.msrb.gmra.mxu0 %vm11092_vm11, %v14735_v7  ;;  %vm11501_vm11 = vmpackc.low %vm3674_vm8, %vm3672_vm7  ;;  %vm3678_vm8 = vcmp.eq.s32.totalorder %v7818_v43, %v11590_v47 }
 0x793   : > { %4920 = vmatpush.bf16.msra.mxu0 %v15074_v3  ;;  %6901 = vmatmul.msk.bf16.gmra.mxu2 %vm11501_vm11, %v14735_v7  ;;  %vm6908_vm11 = vmpackc.low %vm3659_vm6, %vm3657_vm4  ;;  %v3603_v3 = vadd.s32 %v3602_v0, %v3600_v10  ;;  %vm3998_vm6 = vcmp.eq.f32.partialorder %v15094_v52, %v11574_v26  ;;  %vm3966_vm4 = vcmp.eq.f32.partialorder %v15095_v5, %v11576_v36  ;;  %v11621_v10 = vsel %vm3670_vm13, 2147483648, %v15104_v58  ;;  %v15106_v0 = vld [vmem:[#allocation41_spill] sm:$0xff] }
 0x794   : > { %v3999_v57 = vsel %vm3998_vm6, %v3994_v51, -inf  ;;  %v3967_v24 = vsel %vm3966_vm4, %v3962_v53, -inf  ;;  %4060 = vmax.xlane.f32.xlu1 %v11583_v14  ;;  %v3615_v32 = vpop.xlane.xlu0 %3614  ;;  %15105 = vst [vmem:[#allocation23_spill] sm:$0xff] %v11621_v10  ;;  %vm14559_vm14 = vcmp.eq.s32.totalorder %v7821_v50, %v11593_v48  ;;  %vm4086_vm6 = vcmp.gt.s32.totalorder %v11621_v10, %v11615_v9 }
 0x795   : > { %4000 = vmax.xlane.f32.xlu0 %v3999_v57  ;;  %v3634_v12 = vand.u32 255, %v3603_v3  ;;  %3968 = vmax.xlane.f32.xlu2 %v3967_v24  ;;  %v3616_v21 = vcvt.f32.s32 %v3615_v32  ;;  %v3978_v51 = vcvt.s32.f32 %v3976_v60  ;;  %v11663_v53 = vsel %vm4118_vm9, %v11608_v40, %v11602_v11 }
 0x796   : > { %v11692_v24 = vsel %vm4086_vm6, %v11621_v10, %v11615_v9  ;;  %v4121_v30 = vshra.s32 %v11663_v53, 16  ;;  %v4024_v32 = vand.u32 65535, %v11390_v35  ;;  %v15171_v10 = vld [vmem:[#allocation50_spill] sm:$0xff] }
 0x797   : > { %4921 = vmatpush.bf16.msra.mxu0 %v15076_v22  ;;  %v15093_v22 = vld [vmem:[#allocation52_spill] sm:$0xff]  ;;  %v3619_v56 = vadd.s32 %v3618_v1, %v3616_v21  ;;  %v4089_v19 = vshra.s32 %v11692_v24, 16  ;;  %v3971_v1 = vcvt.f32.s32 %v11576_v36 }
 0x799   : > { %v3635_v8 = vand.u32 255, %v3619_v56  ;;  %v11630_v63 = vpop.xlane.xlu2 %4012  ;;  %v4026_v56 = vcvt.s32.f32 %v4024_v32  ;;  %v11747_v18 = vcvt.s32.f32 %v4089_v19 }
 0x79a   : > { %vm4014_vm13 = vcmp.eq.f32.partialorder %v11377_v45, %v11630_v63  ;;  %v11655_v45 = vsel %vm14559_vm14, 2147483648, %v15107_v46  ;;  %v4040_v46 = vand.u32 65535, %v11415_v13 }
 0x79b   : > { %4922 = vmatpush.bf16.msra.mxu0 %v15084_v55  ;;  %v11587_v55 = vsel %vm4070_vm0, %v11560_v17, %v11554_v49  ;;  %v11641_v31 = vsub.s32 255, %v3635_v8  ;;  %v4015_v28 = vsel %vm4014_vm13, %v4010_v39, -inf  ;;  %15108 = vst [vmem:[#allocation25_spill] sm:$0xff] %v11655_v45  ;;  %vm6910_vm13 = vmpackc.low %vm3663_vm2, %vm3661_vm10  ;;  %v15121_v8 = vld [vmem:[#allocation36_spill] sm:$0xff] }
 0x79c   : > { %v4073_v2 = vshra.s32 %v11587_v55, 16  ;;  %v11659_v3 = vpop.xlane.xlu0 %3980 }
 0x79d   : > { %4016 = vmax.xlane.f32.xlu0 %v4015_v28  ;;  %vm3982_vm4 = vcmp.eq.f32.partialorder %v11384_v61, %v11659_v3  ;;  %vm3682_vm14 = vcmp.eq.s32.totalorder %v7818_v43, %v11641_v31  ;;  %vm3683_vm9 = vcmp.eq.s32.totalorder %v7821_v50, %v11641_v31  ;;  %v15111_v61 = vld [vmem:[#allocation38_spill] sm:$0xff]  ;;  %v15123_v28 = vld [vmem:[#allocation43_spill] sm:$0xff] }
 0x79e   : > { %v11637_v34 = vcvt.s32.f32 %v4073_v2  ;;  %v3983_v57 = vsel %vm3982_vm4, %v3978_v51, -inf  ;;  %v11732_v2 = vcvt.s32.f32 %v4121_v30 }
 0x79f   : > { %4923 = vmatpush.bf16.msra.mxu0 %v15086_v6  ;;  %v15097_v6 = vld [vmem:[#allocation39_spill] sm:$0xff]  ;;  %3984 = vmax.xlane.f32.xlu2 %v3983_v57 }
 0x7a0   : > { %4076 = vmax.xlane.f32.xlu1 %v11637_v34 }
 0x7a2   : > { %6909 = vmatmul.msk.bf16.gmra.mxu0 %vm6908_vm11, %v14735_v7  ;;  %vm3676_vm11 = vcmp.eq.s32.totalorder %v7818_v43, %v11593_v48 }
 0x7a3   : > { %4924 = vmatpush.bf16.msra.mxu0 %v15091_v23  ;;  %v11628_v23 = vsub.s32 255, %v3634_v12  ;;  %vm6902_vm0 = vmpackc.low %vm3678_vm8, %vm3676_vm11  ;;  %v11685_v5 = vsel %vm3676_vm11, 2147483648, %v15111_v61  ;;  %v15117_v12 = vld [vmem:[#allocation45_spill] sm:$0xff]  ;;  %v4042_v61 = vcvt.s32.f32 %v4040_v46  ;;  %v11840_v46 = vpop.f32.mrf.mxu2 }
 0x7a4   : > { %6903 = vmatmul.msk.bf16.gmra.mxu2 %vm6902_vm0, %v14735_v7  ;;  %15112 = vst [vmem:[#allocation9_spill] sm:$0xff] %v11685_v5  ;;  %v11721_v21 = vsel %vm3673_vm12, 2147483648, %v15117_v12  ;;  %vm4134_vm11 = vcmp.gt.s32.totalorder %v11685_v5, %v11655_v45 }
 0x7a5   : > { %vm3680_vm0 = vcmp.eq.s32.totalorder %v7818_v43, %v11628_v23  ;;  %vm3681_vm5 = vcmp.eq.s32.totalorder %v7821_v50, %v11628_v23  ;;  %15118 = vst [vmem:[#allocation35_spill] sm:$0xff] %v11721_v21  ;;  %v11738_v39 = vsel %vm4134_vm11, %v11685_v5, %v11655_v45  ;;  %4124 = vmax.xlane.f32.xlu0 %v11732_v2 }
 0x7a6   : > { %vm11700_vm10 = vmpackc.low %vm3682_vm14, %vm3680_vm0  ;;  %v4137_v58 = vshra.s32 %v11738_v39, 16  ;;  %v11794_v12 = vsel %vm3681_vm5, 2147483648, %v15126_v59  ;;  %15135 = vst [vmem:[#allocation44_spill] sm:$0xff] %v11840_v46 }
 0x7a7   : > { %4925 = vmatpush.bf16.msra.mxu0 %v15093_v22  ;;  %vm11712_vm2 = vmpackc.low %vm3683_vm9, %vm3681_vm5  ;;  %4092 = vmax.xlane.f32.xlu2 %v11747_v18  ;;  %15127 = vst [vmem:[#allocation53_spill] sm:$0xff] %v11794_v12  ;;  %vm15130_vm5 = vcmp.eq.s32.totalorder %v7821_v50, %v11463_v54 }
 0x7a8   : > { %v11769_v22 = vcvt.s32.f32 %v4137_v58 }
 0x7a9   : > { %v11734_v35 = vpop.xlane.xlu0 %4028 }
 0x7aa   : > { %vm4030_vm6 = vcmp.eq.f32.partialorder %v11409_v27, %v11734_v35  ;;  %v11765_v27 = vsel %vm3678_vm8, 2147483648, %v15123_v28 }
 0x7ab   : > { %4926 = vmatpush.bf16.msra.mxu0 %v15097_v6  ;;  %v15119_v6 = vld [vmem:[#allocation16_spill] sm:$0xff]  ;;  %v4031_v37 = vsel %vm4030_vm6, %v4026_v56, -inf  ;;  %15124 = vst [vmem:[#allocation37_spill] sm:$0xff] %v11765_v27  ;;  %v11845_v20 = vpop.f32.mrf.mxu2 }
 0x7ac   : > { %v11727_v16 = vsel %vm3672_vm7, 2147483648, %v15119_v6  ;;  %vm3679_vm7 = vcmp.eq.s32.totalorder %v7821_v50, %v11590_v47  ;;  %4032 = vmax.xlane.f32.xlu1 %v4031_v37  ;;  %v15128_v6 = vld [vmem:[#allocation11_spill] sm:$0xff] }
 0x7ad   : > { %15120 = vst [vmem:[#allocation46_spill] sm:$0xff] %v11727_v16  ;;  %vm4102_vm12 = vcmp.gt.s32.totalorder %v11727_v16, %v11721_v21  ;;  %4140 = vmax.xlane.f32.xlu0 %v11769_v22 }
 0x7ae   : > { %v11753_v60 = vsel %vm4102_vm12, %v11727_v16, %v11721_v21 }
 0x7af   : > { %4927 = vmatpush.bf16.msra.mxu0 %v15106_v0  ;;  %v11759_v0 = vsel %vm3679_vm7, 2147483648, %v15121_v8  ;;  %v4105_v51 = vshra.s32 %v11753_v60, 16 }
 0x7b0   : > { %15122 = vst [vmem:[#allocation18_spill] sm:$0xff] %v11759_v0  ;;  %vm4150_vm4 = vcmp.gt.s32.totalorder %v11765_v27, %v11759_v0 }
 0x7b1   : > { %v11776_v52 = vpop.xlane.xlu0 %4044  ;;  %v11781_v57 = vcvt.s32.f32 %v4105_v51  ;;  %v11785_v30 = vsel %vm4150_vm4, %v11765_v27, %v11759_v0  ;;  %v4003_v27 = vcvt.f32.s32 %v11574_v26 }
 0x7b2   : > { %6911 = vmatmul.msk.bf16.gmra.mxu0 %vm6910_vm13, %v14735_v7  ;;  %vm4046_vm8 = vcmp.eq.f32.partialorder %v11422_v33, %v11776_v52  ;;  %v11800_v33 = vsel %vm3680_vm0, 2147483648, %v15128_v6  ;;  %v4153_v19 = vshra.s32 %v11785_v30, 16  ;;  %vm6914_vm13 = vmpackc.low %vm15130_vm5, %vm3669_vm1  ;;  %vm15131_vm0 = vcmp.eq.s32.totalorder %v7821_v50, %v11593_v48 }
 0x7b3   : > { %v4047_v13 = vsel %vm4046_vm8, %v4042_v61, -inf  ;;  %15129 = vst [vmem:[#allocation42_spill] sm:$0xff] %v11800_v33  ;;  %4108 = vmax.xlane.f32.xlu2 %v11781_v57  ;;  %v11851_v51 = vpop.f32.mrf.mxu2 }
 0x7b4   : > { %6905 = vmatmul.msk.bf16.gmra.mxu2 %vm11700_vm10, %v14735_v7  ;;  %4048 = vmax.xlane.f32.xlu1 %v4047_v13  ;;  %v11806_v56 = vcvt.s32.f32 %v4153_v19  ;;  %vm6918_vm10 = vmpackc.low %vm3679_vm7, %vm15131_vm0  ;;  %v3955_v13 = vcvt.f32.s32 %v11533_v44  ;;  %v4056_v19 = vand.u32 65535, %v11543_v41  ;;  %v3972_v44 = vshll.u32 %v3971_v1, 16  ;;  %v15139_v41 = vld [vmem:[#allocation48_spill] sm:$0xff] }
 0x7b5   : > { %v11869_v36 = vsel %vm3682_vm14, 2147483648, %v15139_v41  ;;  %v3987_v41 = vcvt.f32.s32 %v11659_v3 }
 0x7b6   : > { %v3956_v59 = vshll.u32 %v3955_v13, 16  ;;  %15140 = vst [vmem:[#allocation61_spill] sm:$0xff] %v11869_v36 }
 0x7bb   : > { %v11858_v28 = vpop.f32.mrf.mxu2 }
 0x7bc   : > { %4156 = vmax.xlane.f32.xlu1 %v11806_v56 }
 0x7c2   : > { %6913 = vmatmul.msk.bf16.gmra.mxu0 %vm11313_vm15, %v14735_v7  ;;  %vm4166_vm15 = vcmp.gt.s32.totalorder %v11800_v33, %v11794_v12 }
 0x7c3   : > { %v11810_v37 = vsel %vm4166_vm15, %v11800_v33, %v11794_v12  ;;  %v4058_v33 = vcvt.s32.f32 %v4056_v19 }
 0x7c4   : > { %v4169_v58 = vshra.s32 %v11810_v37, 16 }
 0x7c6   : > { %v11814_v23 = vcvt.s32.f32 %v4169_v58 }
 0x7c8   : > { %4172 = vmax.xlane.f32.xlu1 %v11814_v23 }
 0x7d2   : > { %6915 = vmatmul.msk.bf16.gmra.mxu0 %vm6914_vm13, %v14735_v7 }
 0x7e2   : > { %6917 = vmatmul.msk.bf16.gmra.mxu0 %vm11511_vm3, %v14735_v7 }
 0x7ef   : > { %v11836_v54 = vpop.f32.mrf.mxu0 }
 0x7f0   : > { %15133 = vst [vmem:[#allocation30_spill] sm:$0xff] %v11836_v54 }
 0x7f2   : > { %6919 = vmatmul.msk.bf16.gmra.mxu0 %vm6918_vm10, %v14735_v7 }
 0x7f7   : > { %v11847_v48 = vpop.f32.mrf.mxu0 }
 0x7f8   : > { %15136 = vst [vmem:[#allocation54_spill] sm:$0xff] %v11847_v48 }
 0x7ff   : > { %v3953_v61 = vpop.xlane.xlu1 %3952 }
 0x800   : > { %v3954_v32 = vcvt.f32.s32 %v3953_v61 }
 0x802   : > { %6921 = vmatmul.msk.bf16.gmra.mxu0 %vm11712_vm2, %v14735_v7  ;;  %v3957_v58 = vadd.s32 %v3956_v59, %v3954_v32  ;;  %v15141_v32 = vld [vmem:[#allocation32_spill] sm:$0xff] }
 0x803   : > { %v11875_v59 = vsel %vm3683_vm9, 2147483648, %v15141_v32 }
 0x804   : > { %v4198_v61 = vand.u32 255, %v3957_v58  ;;  %15142 = vst [vmem:[#allocation62_spill] sm:$0xff] %v11875_v59  ;;  %vm4182_vm1 = vcmp.gt.s32.totalorder %v11869_v36, %v11875_v59  ;;  %v4004_v58 = vshll.u32 %v4003_v27, 16  ;;  %v15143_v27 = vmov 0 }
 0x806   : > { %v11880_v26 = vsub.s32 255, %v4198_v61 }
 0x807   : > { %v11860_v48 = vpop.xlane.xlu1 %4060 }
 0x808   : > { %v4001_v54 = vpop.xlane.xlu0 %4000  ;;  %v3969_v8 = vpop.xlane.xlu2 %3968  ;;  %vm4062_vm3 = vcmp.eq.f32.partialorder %v11583_v14, %v11860_v48  ;;  %vm4230_vm9 = vcmp.eq.s32.totalorder %v7818_v43, %v11880_v26  ;;  %vm4231_vm12 = vcmp.eq.s32.totalorder %v7821_v50, %v11880_v26  ;;  %v15157_v26 = vld [vmem:[#allocation22_spill] sm:$0xff] }
 0x809   : > { %v3970_v13 = vcvt.f32.s32 %v3969_v8  ;;  %v4063_v12 = vsel %vm4062_vm3, %v4058_v33, -inf  ;;  %v4072_v33 = vand.u32 65535, %v11587_v55  ;;  %v4002_v8 = vcvt.f32.s32 %v4001_v54  ;;  %v11896_v54 = vpop.f32.mrf.mxu2 }
 0x80a   : > { %4064 = vmax.xlane.f32.xlu2 %v4063_v12  ;;  %v11894_v55 = vsel %vm4182_vm1, %v11869_v36, %v11875_v59  ;;  %v4035_v36 = vcvt.f32.s32 %v11734_v35 }
 0x80b   : > { %v3973_v14 = vadd.s32 %v3972_v44, %v3970_v13  ;;  %v4074_v44 = vcvt.s32.f32 %v4072_v33  ;;  %v4019_v13 = vcvt.f32.s32 %v11630_v63  ;;  %v4005_v32 = vadd.s32 %v4004_v58, %v4002_v8 }
 0x80c   : > { %v4120_v8 = vand.u32 65535, %v11663_v53  ;;  %v4185_v58 = vshra.s32 %v11894_v55, 16  ;;  %v4036_v35 = vshll.u32 %v4035_v36, 16 }
 0x80d   : > { %v4199_v1 = vand.u32 255, %v3973_v14 }
 0x80e   : > { %v11935_v53 = vcvt.s32.f32 %v4185_v58  ;;  %v4104_v58 = vand.u32 65535, %v11753_v60 }
 0x80f   : > { %v11849_v47 = vpop.f32.mrf.mxu0  ;;  %v11885_v0 = vsub.s32 255, %v4199_v1  ;;  %v4201_v1 = vand.u32 255, %v4005_v32 }
 0x810   : > { %15137 = vst [vmem:[#allocation52_spill] sm:$0xff] %v11849_v47  ;;  %v4017_v12 = vpop.xlane.xlu0 %4016 }
 0x811   : > { %vm4232_vm2 = vcmp.eq.s32.totalorder %v7818_v43, %v11885_v0  ;;  %vm4233_vm11 = vcmp.eq.s32.totalorder %v7821_v50, %v11885_v0  ;;  %v4018_v61 = vcvt.f32.s32 %v4017_v12  ;;  %v4122_v12 = vcvt.s32.f32 %v4120_v8 }
 0x812   : > { %v3985_v3 = vpop.xlane.xlu2 %3984  ;;  %vm6955_vm7 = vmpackc.low %vm4232_vm2, %vm4230_vm9  ;;  %v11931_v9 = vsub.s32 255, %v4201_v1  ;;  %v4136_v1 = vand.u32 65535, %v11738_v39 }
 0x813   : > { %v11887_v31 = vpop.xlane.xlu1 %4076  ;;  %vm11918_vm6 = vmpackc.low %vm4233_vm11, %vm4231_vm12  ;;  %6956 = vmatmul.msk.bf16.vlgmr.msrb.gmra.mxu3 %vm6955_vm7, %v14735_v7  ;;  %v3986_v14 = vcvt.f32.s32 %v3985_v3 }
 0x814   : > { %vm4078_vm14 = vcmp.eq.f32.partialorder %v11637_v34, %v11887_v31  ;;  %v3988_v34 = vshll.u32 %v3987_v41, 16  ;;  %v15144_v27 = vsel %vm11918_vm6, 4294967295, %v15143_v27  ;;  %v4020_v41 = vshll.u32 %v4019_v13, 16 }
 0x815   : > { %v4079_v63 = vsel %vm4078_vm14, %v4074_v44, -inf  ;;  %15145 = vst [vmem:[#allocation39_spill] sm:$0xff] %v15144_v27  ;;  %vm4237_vm5 = vcmp.eq.s32.totalorder %v7821_v50, %v11931_v9  ;;  %vm4236_vm3 = vcmp.eq.s32.totalorder %v7818_v43, %v11931_v9 }
 0x816   : > { %4080 = vmax.xlane.f32.xlu2 %v4079_v63  ;;  %v3989_v44 = vadd.s32 %v3988_v34, %v3986_v14  ;;  %v4088_v63 = vand.u32 65535, %v11692_v24  ;;  %v4021_v59 = vadd.s32 %v4020_v41, %v4018_v61  ;;  %v11944_v14 = vpop.f32.mrf.mxu2 }
 0x817   : > { %v11854_v6 = vpop.f32.mrf.mxu0 }
 0x818   : > { %15138 = vst [vmem:[#allocation60_spill] sm:$0xff] %v11854_v6  ;;  %v4200_v16 = vand.u32 255, %v3989_v44  ;;  %v11929_v21 = vpop.xlane.xlu0 %4124  ;;  %v4090_v24 = vcvt.s32.f32 %v4088_v63  ;;  %v4138_v44 = vcvt.s32.f32 %v4136_v1  ;;  %v15154_v1 = vld [vmem:[#allocation7_spill] sm:$0xff] }
 0x819   : > { %vm4126_vm4 = vcmp.eq.f32.partialorder %v11732_v2, %v11929_v21  ;;  %v4202_v2 = vand.u32 255, %v4021_v59 }
 0x81a   : > { %v11937_v32 = vsub.s32 255, %v4200_v16  ;;  %v4127_v13 = vsel %vm4126_vm4, %v4122_v12, -inf  ;;  %v11939_v34 = vpop.xlane.xlu2 %4092 }
 0x81b   : > { %4128 = vmax.xlane.f32.xlu1 %v4127_v13  ;;  %vm4094_vm8 = vcmp.eq.f32.partialorder %v11747_v18, %v11939_v34  ;;  %v15146_v18 = vmov 0  ;;  %v4218_v41 = vsub.s32 255, %v4202_v2  ;;  %v4152_v2 = vand.u32 65535, %v11785_v30 }
 0x81c   : > { %vm4235_vm15 = vcmp.eq.s32.totalorder %v7821_v50, %v11937_v32  ;;  %v4095_v8 = vsel %vm4094_vm8, %v4090_v24, -inf  ;;  %vm4234_vm0 = vcmp.eq.s32.totalorder %v7818_v43, %v11937_v32  ;;  %v4131_v32 = vcvt.f32.s32 %v11929_v21 }
 0x81d   : > { %4096 = vmax.xlane.f32.xlu0 %v4095_v8  ;;  %vm11959_vm13 = vmpackc.low %vm4237_vm5, %vm4235_vm15  ;;  %vm4239_vm7 = vcmp.eq.s32.totalorder %v7821_v50, %v4218_v41  ;;  %v15152_v8 = vld [vmem:[#allocation6_spill] sm:$0xff] }
 0x81e   : > { %4188 = vmax.xlane.f32.xlu2 %v11935_v53  ;;  %v15147_v18 = vsel %vm11959_vm13, 4294967295, %v15146_v18  ;;  %vm6957_vm14 = vmpackc.low %vm4236_vm3, %vm4234_vm0 }
 0x81f   : > { %v11877_v19 = vpop.f32.mrf.mxu0  ;;  %v4033_v3 = vpop.xlane.xlu1 %4032  ;;  %15148 = vst [vmem:[#allocation34_spill] sm:$0xff] %v15147_v18 }
 0x820   : > { %v4034_v61 = vcvt.f32.s32 %v4033_v3  ;;  %v11964_v39 = vpop.xlane.xlu0 %4140 }
 0x821   : > { %vm4142_vm10 = vcmp.eq.f32.partialorder %v11769_v22, %v11964_v39  ;;  %v4106_v22 = vcvt.s32.f32 %v4104_v58  ;;  %v4154_v58 = vcvt.s32.f32 %v4152_v2  ;;  %v15159_v2 = vld [vmem:[#allocation10_spill] sm:$0xff] }
 0x822   : > { %v4037_v36 = vadd.s32 %v4036_v35, %v4034_v61  ;;  %v4143_v12 = vsel %vm4142_vm10, %v4138_v44, -inf  ;;  %v15149_v35 = vmov 0  ;;  %v12001_v61 = vpop.f32.mrf.mxu2 }
 0x823   : > { %6958 = vmatmul.msk.bf16.gmra.mxu3 %vm6957_vm14, %v14735_v7 }
 0x824   : > { %v4203_v59 = vand.u32 255, %v4037_v36  ;;  %v12014_v36 = vsel %vm4231_vm12, 2147483648, %v15154_v1  ;;  %v15161_v1 = vld [vmem:[#allocation21_spill] sm:$0xff] }
 0x825   : > { %15155 = vst [vmem:[#allocation12_spill] sm:$0xff] %v12014_v36 }
 0x826   : > { %v11968_v63 = vsub.s32 255, %v4203_v59  ;;  %4144 = vmax.xlane.f32.xlu2 %v4143_v12  ;;  %v11984_v60 = vpop.xlane.xlu2 %4108 }
 0x827   : > { %v11923_v33 = vpop.f32.mrf.mxu0  ;;  %v11974_v13 = vpop.xlane.xlu1 %4048  ;;  %vm4110_vm4 = vcmp.eq.f32.partialorder %v11781_v57, %v11984_v60  ;;  %v12008_v57 = vsel %vm4230_vm9, 2147483648, %v15152_v8  ;;  %v12038_v8 = vsel %vm4233_vm11, 2147483648, %v15159_v2  ;;  %vm4238_vm11 = vcmp.eq.s32.totalorder %v7818_v43, %v4218_v41 }
 0x828   : > { %vm4241_vm1 = vcmp.eq.s32.totalorder %v7821_v50, %v11968_v63  ;;  %v4111_v24 = vsel %vm4110_vm4, %v4106_v22, -inf  ;;  %15153 = vst [vmem:[#allocation20_spill] sm:$0xff] %v12008_v57  ;;  %vm4520_vm10 = vcmp.gt.s32.totalorder %v12008_v57, %v12014_v36  ;;  %vm4240_vm9 = vcmp.eq.s32.totalorder %v7818_v43, %v11968_v63 }
 0x829   : > { %vm11997_vm8 = vmpackc.low %vm4241_vm1, %vm4239_vm7  ;;  %4112 = vmax.xlane.f32.xlu0 %v4111_v24  ;;  %v12026_v12 = vsel %vm4520_vm10, %v12008_v57, %v12014_v36  ;;  %v12032_v24 = vsel %vm4232_vm2, 2147483648, %v15157_v26  ;;  %15160 = vst [vmem:[#allocation56_spill] sm:$0xff] %v12038_v8  ;;  %v15163_v36 = vld [vmem:[#allocation24_spill] sm:$0xff]  ;;  %v15169_v57 = vld [vmem:[#allocation51_spill] sm:$0xff]  ;;  %v12165_v21 = vsel %vm4241_vm1, 2147483648, %v11368_v25 }
 0x82a   : > { %v15150_v35 = vsel %vm11997_vm8, 4294967295, %v15149_v35  ;;  %15156 = vst [vmem:[#allocation41_spill] sm:$0xff] %v12026_v12  ;;  %v3793_v22 = vpop.f32.mrf.mxu2  ;;  %v12051_v26 = vsel %vm4236_vm3, 2147483648, %v15163_v36  ;;  %v4523_v0 = vshra.s32 %v12026_v12, 16  ;;  %vm4536_vm2 = vcmp.gt.s32.totalorder %v12032_v24, %v12038_v8 }
 0x82b   : > { %15151 = vst [vmem:[#allocation27_spill] sm:$0xff] %v15150_v35 }
 0x82c   : > { %15158 = vst [vmem:[#allocation8_spill] sm:$0xff] %v12032_v24  ;;  %v12071_v2 = vcvt.s32.f32 %v4523_v0 }
 0x82d   : > { %15164 = vst [vmem:[#allocation38_spill] sm:$0xff] %v12051_v26 }
 0x82e   : > { %15166 = vst [vmem:[#allocation16_spill] sm:$0xff] %v12071_v2 }
 0x82f   : > { %v11948_v16 = vpop.f32.mrf.mxu0  ;;  %v12016_v59 = vpop.xlane.xlu1 %4156 }
 0x830   : > { %vm4158_vm14 = vcmp.eq.f32.partialorder %v11806_v56, %v12016_v59  ;;  %v4168_v56 = vand.u32 65535, %v11810_v37 }
 0x831   : > { %v4159_v44 = vsel %vm4158_vm14, %v4154_v58, -inf  ;;  %v12045_v58 = vsel %vm4237_vm5, 2147483648, %v15161_v1  ;;  %vm6959_vm5 = vmpackc.low %vm4240_vm9, %vm4238_vm11 }
 0x832   : > { %4160 = vmax.xlane.f32.xlu0 %v4159_v44  ;;  %15162 = vst [vmem:[#allocation55_spill] sm:$0xff] %v12045_v58  ;;  %v4170_v44 = vcvt.s32.f32 %v4168_v56  ;;  %vm4568_vm12 = vcmp.gt.s32.totalorder %v12051_v26, %v12045_v58  ;;  %v12075_v56 = vsel %vm4536_vm2, %v12032_v24, %v12038_v8 }
 0x833   : > { %6960 = vmatmul.msk.bf16.gmra.mxu3 %vm6959_vm5, %v14735_v7  ;;  %15167 = vst [vmem:[#allocation36_spill] sm:$0xff] %v12075_v56  ;;  %v12079_v1 = vsel %vm4568_vm12, %v12051_v26, %v12045_v58  ;;  %v4539_v0 = vshra.s32 %v12075_v56, 16  ;;  %v4067_v56 = vcvt.f32.s32 %v11860_v48 }
 0x834   : > { %15168 = vst [vmem:[#allocation43_spill] sm:$0xff] %v12079_v1  ;;  %v4571_v8 = vshra.s32 %v12079_v1, 16 }
 0x835   : > { %v4068_v46 = vshll.u32 %v4067_v56, 16 }
 0x836   : > { %v12096_v26 = vcvt.s32.f32 %v4571_v8 }
 0x837   : > { %v11990_v3 = vpop.f32.mrf.mxu0 }
 0x838   : > { %15174 = vst [vmem:[#allocation48_spill] sm:$0xff] %v12096_v26 }
 0x83a   : > { %4526 = vmax.xlane.f32.xlu0 %v12071_v2 }
 0x83b   : > { %v12059_v37 = vpop.xlane.xlu1 %4172 }
 0x83c   : > { %15165 = vst [vmem:[#allocation45_spill] sm:$0xff] %v12059_v37  ;;  %vm4174_vm3 = vcmp.eq.f32.partialorder %v11814_v23, %v12059_v37  ;;  %v12084_v23 = vsel %vm4239_vm7, 2147483648, %v15169_v57  ;;  %v12087_v37 = vsel %vm4238_vm11, 2147483648, %v15171_v10  ;;  %vm15177_vm7 = vcmask 64512  }
 0x83d   : > { %v4175_v36 = vsel %vm4174_vm3, %v4170_v44, -inf  ;;  %15170 = vst [vmem:[#allocation57_spill] sm:$0xff] %v12084_v23  ;;  %v3795_v44 = vpop.f32.mrf.mxu2  ;;  %vm4584_vm4 = vcmp.gt.s32.totalorder %v12087_v37, %v12084_v23  ;;  %vm15178_vm10 = vmmov %vm15177_vm7 }
 0x83e   : > { %4176 = vmax.xlane.f32.xlu1 %v4175_v36  ;;  %15172 = vst [vmem:[#allocation17_spill] sm:$0xff] %v12087_v37  ;;  %v12094_v36 = vcvt.s32.f32 %v4539_v0  ;;  %v12100_v41 = vsel %vm4584_vm4, %v12087_v37, %v12084_v23  ;;  %vm15179_vm12 = vmmov %vm15177_vm7 }
 0x83f   : > { %v12022_v30 = vpop.f32.mrf.mxu0  ;;  %15175 = vst [vmem:[#allocation32_spill] sm:$0xff] %v12100_v41  ;;  %v4587_v57 = vshra.s32 %v12100_v41, 16 }
 0x840   : > { %15173 = vst [vmem:[#allocation11_spill] sm:$0xff] %v12094_v36 }
 0x841   : > { %v12107_v35 = vcvt.s32.f32 %v4587_v57  ;;  %v4050_v57 = vcvt.f32.s32 %v11974_v13 }
 0x842   : > { %4574 = vmax.xlane.f32.xlu0 %v12096_v26  ;;  %v4051_v26 = vcvt.f32.s32 %v11776_v52 }
 0x843   : > { %15176 = vst [vmem:[#allocation6_spill] sm:$0xff] %v12107_v35 }
 0x844   : > { %v4052_v17 = vshll.u32 %v4051_v26, 16 }
 0x845   : > { %v3798_v58 = vpop.f32.mrf.mxu2 }
 0x846   : > { %4542 = vmax.xlane.f32.xlu1 %v12094_v36  ;;  %v4053_v47 = vadd.s32 %v4052_v17, %v4050_v57  ;;  %v4083_v17 = vcvt.f32.s32 %v11887_v31  ;;  %v4115_v57 = vcvt.f32.s32 %v11984_v60  ;;  %v3835_v60 = vadd.f32 %v11990_v3, %v11896_v54 }
 0x847   : > { %v12069_v9 = vpop.f32.mrf.mxu0 }
 0x848   : > { %v4204_v12 = vand.u32 255, %v4053_v47 }
 0x84d   : > { %v3800_v8 = vpop.f32.mrf.mxu2 }
 0x84e   : > { %4590 = vmax.xlane.f32.xlu1 %v12107_v35 }
 0x84f   : > { %v3842_v24 = vpop.f32.mrf.mxu0 }
 0x850   : > { %v12102_v10 = vadd.f32 %v3842_v24, %v3793_v22 }
 0x855   : > { %v3803_v5 = vpop.f32.mrf.mxu2 }
 0x857   : > { %v3844_v0 = vpop.f32.mrf.mxu0 }
 0x85d   : > { %v3805_v23 = vpop.f32.mrf.mxu2 }
 0x85f   : > { %v3847_v18 = vpop.f32.mrf.mxu0 }
 0x860   : > { %v3848_v13 = vadd.f32 %v3847_v18, %v3798_v58  ;;  %v4084_v18 = vshll.u32 %v4083_v17, 16 }
 0x865   : > { %v3808_v24 = vpop.f32.mrf.mxu2 }
 0x867   : > { %v3849_v27 = vpop.f32.mrf.mxu0 }
 0x868   : > { %v3850_v52 = vadd.f32 %v3849_v27, %v3800_v8  ;;  %v4184_v27 = vand.u32 65535, %v11894_v55 }
 0x86d   : > { %v3810_v40 = vpop.f32.mrf.mxu2 }
 0x86f   : > { %v3852_v37 = vpop.f32.mrf.mxu0 }
 0x870   : > { %v3853_v62 = vadd.f32 %v3852_v37, %v3803_v5 }
 0x877   : > { %v3854_v22 = vpop.f32.mrf.mxu0 }
 0x878   : > { %v3855_v35 = vadd.f32 %v3854_v22, %v3805_v23 }
 0x87a   : > { %v3868_v2 = vpack.c.bf16 %v3855_v35, %v3853_v62  ;;  %v4099_v35 = vcvt.f32.s32 %v11939_v34 }
 0x87c   : > { %v4100_v56 = vshll.u32 %v4099_v35, 16 }
 0x87d   : > { %v4065_v6 = vpop.xlane.xlu2 %4064 }
 0x87e   : > { %v4066_v4 = vcvt.f32.s32 %v4065_v6  ;;  %v15181_v6 = vld [vmem:[#allocation58_spill] sm:$0xff] }
 0x87f   : > { %v3857_v45 = vpop.f32.mrf.mxu0  ;;  %v12142_v31 = vsel %vm4234_vm0, 2147483648, %v15181_v6  ;;  %vm15182_vm0 = vmmov %vm15177_vm7 }
 0x880   : > { %v3858_v41 = vadd.f32 %v3857_v45, %v3808_v24  ;;  %v4069_v45 = vadd.s32 %v4068_v46, %v4066_v4  ;;  %v3845_v4 = vadd.f32 %v3844_v0, %v3795_v44  ;;  %v15180_v46 = vld [vmem:[#allocation59_spill] sm:$0xff]  ;;  %v4132_v24 = vshll.u32 %v4131_v32, 16  ;;  %vm15183_vm3 = vmmov %vm15182_vm0 }
 0x881   : > { %v12136_v47 = vsel %vm4235_vm15, 2147483648, %v15180_v46 }
 0x882   : > { %v4205_v26 = vand.u32 255, %v4069_v45  ;;  %v3866_v58 = vpack.c.bf16 %v3845_v4, %v12102_v10  ;;  %vm4552_vm5 = vcmp.gt.s32.totalorder %v12142_v31, %v12136_v47 }
 0x883   : > { %v12156_v34 = vsel %vm4552_vm5, %v12142_v31, %v12136_v47 }
 0x884   : > { %v3883_v0 = vsel %vm15182_vm0, %v3866_v58, 0  ;;  %v4555_v22 = vshra.s32 %v12156_v34, 16 }
 0x887   : > { %v3859_v11 = vpop.f32.mrf.mxu0 }
 0x888   : > { %v3860_v36 = vadd.f32 %v3859_v11, %v3810_v40  ;;  %v3889_v11 = vsel %vm15178_vm10, %v3868_v2, 0  ;;  %v12115_v40 = vsub.s32 255, %v4204_v12  ;;  %v4186_v2 = vcvt.s32.f32 %v4184_v27 }
 0x889   : > { %v4081_v48 = vpop.xlane.xlu2 %4080 }
 0x88a   : > { %v3869_v1 = vpack.c.bf16 %v3860_v36, %v3858_v41  ;;  %vm4242_vm14 = vcmp.eq.s32.totalorder %v7818_v43, %v12115_v40  ;;  %v4082_v5 = vcvt.f32.s32 %v4081_v48  ;;  %v3840_v36 = vadd.f32 %v12069_v9, %v12001_v61 }
 0x88b   : > { %v3838_v61 = vadd.f32 %v12022_v30, %v11944_v14  ;;  %v12185_v14 = vcvt.s32.f32 %v4555_v22  ;;  %v4147_v30 = vcvt.f32.s32 %v11964_v39  ;;  %v12214_v39 = vsel %vm4242_vm14, 2147483648, %v11401_v15  ;;  %v15252_v15 = vld [vmem:[#allocation18_spill] sm:$0xff] }
 0x88c   : > { %v3892_v49 = vsel %vm15177_vm7, %v3869_v1, 0  ;;  %v12117_v1 = vsub.s32 255, %v4205_v26  ;;  %v4085_v12 = vadd.s32 %v4084_v18, %v4082_v5 }
 0x88d   : > { %3894 = vmatpush.bf16.xpose.msra.mxu1 %v3892_v49  ;;  %v3867_v49 = vpack.c.bf16 %v3850_v52, %v3848_v13  ;;  %v3865_v45 = vpack.c.bf16 %v3840_v36, %v3838_v61  ;;  %v4148_v46 = vshll.u32 %v4147_v30, 16 }
 0x88e   : > { %vm4244_vm2 = vcmp.eq.s32.totalorder %v7818_v43, %v12117_v1  ;;  %v4129_v23 = vpop.xlane.xlu1 %4128  ;;  %v4206_v41 = vand.u32 255, %v4085_v12 }
 0x88f   : > { %vm6961_vm11 = vmpackc.low %vm4244_vm2, %vm4242_vm14  ;;  %v3886_v62 = vsel %vm15179_vm12, %v3867_v49, 0  ;;  %v4130_v9 = vcvt.f32.s32 %v4129_v23  ;;  %v3880_v48 = vsel %vm15183_vm3, %v3865_v45, 0 }
 0x890   : > { %6962 = vmatmul.msk.bf16.gmra.mxu3 %vm6961_vm11, %v14735_v7  ;;  %v4097_v44 = vpop.xlane.xlu0 %4096  ;;  %v12177_v52 = vsub.s32 255, %v4206_v41 }
 0x891   : > { %v12149_v37 = vpop.xlane.xlu2 %4188  ;;  %v4098_v10 = vcvt.f32.s32 %v4097_v44 }
 0x892   : > { %vm4190_vm15 = vcmp.eq.f32.partialorder %v11935_v53, %v12149_v37  ;;  %v12171_v53 = vsel %vm4240_vm9, 2147483648, %v11374_v42  ;;  %vm4243_vm9 = vcmp.eq.s32.totalorder %v7821_v50, %v12115_v40  ;;  %v4133_v42 = vadd.s32 %v4132_v24, %v4130_v9  ;;  %v15241_v40 = vld [vmem:[#allocation19_spill] sm:$0xff] }
 0x893   : > { %v4191_v55 = vsel %vm4190_vm15, %v4186_v2, -inf  ;;  %v4101_v8 = vadd.s32 %v4100_v56, %v4098_v10  ;;  %vm4600_vm1 = vcmp.gt.s32.totalorder %v12171_v53, %v12165_v21  ;;  %vm4246_vm4 = vcmp.eq.s32.totalorder %v7818_v43, %v12177_v52  ;;  %vm15186_vm15 = vmmov %vm15182_vm0 }
 0x894   : > { %4192 = vmax.xlane.f32.xlu2 %v4191_v55  ;;  %v12192_v26 = vsel %vm4600_vm1, %v12171_v53, %v12165_v21  ;;  %v12206_v54 = vsel %vm4243_vm9, 2147483648, %v11396_v29  ;;  %vm4247_vm11 = vcmp.eq.s32.totalorder %v7821_v50, %v12177_v52  ;;  %v3833_v29 = vadd.f32 %v11948_v16, %v11858_v28 }
 0x895   : > { %3895 = vmatpush.bf16.xpose.msra.mxu1 %v3889_v11  ;;  %v4207_v25 = vand.u32 255, %v4101_v8  ;;  %v4116_v11 = vshll.u32 %v4115_v57, 16  ;;  %v4209_v17 = vand.u32 255, %v4133_v42  ;;  %v4603_v5 = vshra.s32 %v12192_v26, 16  ;;  %v15193_v57 = vld [vmem:[#allocation44_spill] sm:$0xff] }
 0x896   : > { %v3864_v6 = vpack.c.bf16 %v3835_v60, %v3833_v29  ;;  %vm4616_vm5 = vcmp.gt.s32.totalorder %v12214_v39, %v12206_v54  ;;  %v4163_v28 = vcvt.f32.s32 %v12016_v59  ;;  %v3830_v2 = vadd.f32 %v11923_v33, %v11851_v51  ;;  %v15196_v60 = vld [vmem:[#allocation16_spill] sm:$0xff] }
 0x897   : > { %v12183_v63 = vsub.s32 255, %v4207_v25  ;;  %v12239_v27 = vsub.s32 255, %v4209_v17  ;;  %v12241_v35 = vcvt.s32.f32 %v4603_v5  ;;  %v12247_v58 = vsel %vm4616_vm5, %v12214_v39, %v12206_v54  ;;  %v15194_v25 = vld [vmem:[#allocation60_spill] sm:$0xff] }
 0x898   : > { %v3877_v59 = vsel %vm15186_vm15, %v3864_v6, 0  ;;  %v4164_v56 = vshll.u32 %v4163_v28, 16  ;;  %vm14602_vm0 = vcmp.eq.s32.totalorder %v7821_v50, %v12117_v1  ;;  %v3828_v55 = vadd.f32 %v11877_v19, %v11845_v20  ;;  %v15190_v19 = vld [vmem:[#allocation14_spill] sm:$0xff]  ;;  %v15199_v17 = vld [vmem:[#allocation36_spill] sm:$0xff]  ;;  %v15204_v6 = vld [vmem:[#allocation15_spill] sm:$0xff] }
 0x899   : > { %v4145_v13 = vpop.xlane.xlu2 %4144  ;;  %vm14601_vm7 = vcmp.eq.s32.totalorder %v7818_v43, %v12183_v63  ;;  %vm14600_vm10 = vcmp.eq.s32.totalorder %v7821_v50, %v12183_v63  ;;  %vm4253_vm3 = vcmp.eq.s32.totalorder %v7821_v50, %v12239_v27  ;;  %v4619_v33 = vshra.s32 %v12247_v58, 16 }
 0x89a   : > { %vm6963_vm12 = vmpackc.low %vm14601_vm7, %vm4246_vm4  ;;  %v4146_v4 = vcvt.f32.s32 %v4145_v13  ;;  %v12276_v20 = vsel %vm14602_vm0, 2147483648, %v11519_v38  ;;  %v12282_v41 = vsel %vm4244_vm2, 2147483648, %v15190_v19  ;;  %v3863_v10 = vpack.c.bf16 %v3830_v2, %v3828_v55  ;;  %v15197_v13 = vld [vmem:[#allocation40_spill] sm:$0xff] }
 0x89b   : > { %vm12232_vm14 = vmpackc.low %vm14600_vm10, %vm4247_vm11  ;;  %15189 = vst [vmem:[#allocation7_spill] sm:$0xff] %v12276_v20  ;;  %v12287_v22 = vcvt.s32.f32 %v4619_v33  ;;  %vm4632_vm15 = vcmp.gt.s32.totalorder %v12282_v41, %v12276_v20  ;;  %v3825_v45 = vadd.f32 %v15194_v25, %v15193_v57  ;;  %vm15195_vm2 = vcmask 64512   ;;  %v15209_v33 = vld [vmem:[#allocation48_spill] sm:$0xff]  ;;  %v15211_v25 = vld [vmem:[#allocation5_spill] sm:$0xff] }
 0x89c   : > { %4558 = vmax.xlane.f32.xlu2 %v12185_v14  ;;  %v4113_v49 = vpop.xlane.xlu0 %4112  ;;  %v4149_v18 = vadd.s32 %v4148_v46, %v4146_v4  ;;  %15191 = vst [vmem:[#allocation22_spill] sm:$0xff] %v12282_v41  ;;  %v3874_v30 = vsel %vm15195_vm2, %v3863_v10, 0  ;;  %v12322_v29 = vsel %vm4632_vm15, %v12282_v41, %v12276_v20  ;;  %v4538_v4 = vand.u32 65535, %v15199_v17  ;;  %v12363_v10 = vld [vmem:[%s8022_s10 + $0x78] sm:$0xff] }
 0x89d   : > { %3896 = vmatpush.bf16.xpose.msra.mxu1 %v3886_v62  ;;  %v4114_v3 = vcvt.f32.s32 %v4113_v49  ;;  %v15198_v49 = vld [vmem:[#allocation52_spill] sm:$0xff]  ;;  %v12345_v28 = vsel %vm4246_vm4, 2147483648, %v15204_v6 }
 0x89e   : > { %v4210_v51 = vand.u32 255, %v4149_v18  ;;  %15205 = vst [vmem:[#allocation21_spill] sm:$0xff] %v12345_v28  ;;  %v15206_v18 = vld [vmem:[#allocation43_spill] sm:$0xff] }
 0x89f   : > { %v4117_v62 = vadd.s32 %v4116_v11, %v4114_v3  ;;  %v4570_v2 = vand.u32 65535, %v15206_v18 }
 0x8a0   : > { %6964 = vmatmul.msk.bf16.gmra.mxu3 %vm6963_vm12, %v14735_v7  ;;  %v12285_v8 = vsub.s32 255, %v4210_v51 }
 0x8a1   : > { %v4208_v16 = vand.u32 255, %v4117_v62  ;;  %v15202_v62 = vld [vmem:[#allocation47_spill] sm:$0xff]  ;;  %v4572_v51 = vcvt.s32.f32 %v4570_v2  ;;  %v15221_v2 = vld [vmem:[#allocation9_spill] sm:$0xff] }
 0x8a2   : > { %vm4255_vm2 = vcmp.eq.s32.totalorder %v7821_v50, %v12285_v8  ;;  %v12339_v46 = vsel %vm4247_vm11, 2147483648, %v15202_v62  ;;  %v12412_v62 = vld [vmem:[%s8022_s10 + $0x68] sm:$0xff] }
 0x8a3   : > { %v12243_v12 = vsub.s32 255, %v4208_v16  ;;  %15203 = vst [vmem:[#allocation10_spill] sm:$0xff] %v12339_v46 }
 0x8a4   : > { %4606 = vmax.xlane.f32.xlu2 %v12241_v35  ;;  %15218 = vst [vmem:[#allocation59_spill] sm:$0xff] %v12412_v62 }
 0x8a5   : > { %3897 = vmatpush.bf16.xpose.msra.mxu1 %v3883_v0  ;;  %v4161_v32 = vpop.xlane.xlu0 %4160  ;;  %vm14599_vm1 = vcmp.eq.s32.totalorder %v7821_v50, %v12243_v12  ;;  %v15192_v0 = vld [vmem:[#allocation41_spill] sm:$0xff]  ;;  %vm14603_vm5 = vcmp.eq.s32.totalorder %v7818_v43, %v12243_v12 }
 0x8a6   : > { %v4162_v23 = vcvt.f32.s32 %v4161_v32  ;;  %vm12268_vm12 = vmpackc.low %vm4253_vm3, %vm14599_vm1  ;;  %v4522_v61 = vand.u32 65535, %v15192_v0  ;;  %vm4252_vm1 = vcmp.eq.s32.totalorder %v7818_v43, %v12239_v27  ;;  %v4635_v32 = vshra.s32 %v12322_v29, 16  ;;  %v12398_v27 = vld [vmem:[%s14380_s3] sm:$0xff] }
 0x8a7   : > { %vm6965_vm0 = vmpackc.low %vm4252_vm1, %vm14603_vm5  ;;  %15215 = vst [vmem:[#allocation50_spill] sm:$0xff] %v12398_v27 }
 0x8a8   : > { %v4165_v44 = vadd.s32 %v4164_v56, %v4162_v23  ;;  %v4524_v11 = vcvt.s32.f32 %v4522_v61  ;;  %v4540_v56 = vcvt.s32.f32 %v4538_v4  ;;  %v15207_v23 = vld [vmem:[#allocation11_spill] sm:$0xff]  ;;  %v12360_v19 = vcvt.s32.f32 %v4635_v32 }
 0x8aa   : > { %v4211_v9 = vand.u32 255, %v4165_v44 }
 0x8ac   : > { %v12291_v24 = vsub.s32 255, %v4211_v9  ;;  %4622 = vmax.xlane.f32.xlu2 %v12287_v22  ;;  %v15210_v9 = vld [vmem:[#allocation32_spill] sm:$0xff] }
 0x8ad   : > { %3898 = vmatpush.bf16.xpose.msra.mxu1 %v3880_v48  ;;  %v12300_v42 = vpop.xlane.xlu0 %4526  ;;  %v3823_v48 = vadd.f32 %v15198_v49, %v15197_v13  ;;  %v4586_v57 = vand.u32 65535, %v15210_v9  ;;  %v12386_v13 = vld [vmem:[%s8022_s10 + $0x70] sm:$0xff]  ;;  %v12456_v9 = vld [vmem:[%s8022_s10 + $0x48] sm:$0xff] }
 0x8ae   : > { %vm4257_vm10 = vcmp.eq.s32.totalorder %v7821_v50, %v12291_v24  ;;  %vm4528_vm7 = vcmp.eq.f32.partialorder %v15196_v60, %v12300_v42  ;;  %vm4256_vm15 = vcmp.eq.s32.totalorder %v7818_v43, %v12291_v24  ;;  %15226 = vst [vmem:[#allocation16_spill] sm:$0xff] %v12456_v9 }
 0x8af   : > { %v4529_v3 = vsel %vm4528_vm7, %v4524_v11, -inf  ;;  %vm12331_vm5 = vmpackc.low %vm4257_vm10, %vm4255_vm2  ;;  %v3862_v16 = vpack.c.bf16 %v3825_v45, %v3823_v48  ;;  %vm4648_vm7 = vcmp.gt.s32.totalorder %v12345_v28, %v12339_v46  ;;  %v12376_v45 = vsel %vm4253_vm3, 2147483648, %v15211_v25  ;;  %v12465_v25 = vld [vmem:[%s8022_s10 + $0x38] sm:$0xff] }
 0x8b0   : > { %6966 = vmatmul.msk.bf16.gmra.mxu3 %vm6965_vm0, %v14735_v7  ;;  %4530 = vmax.xlane.f32.xlu0 %v4529_v3  ;;  %vm15208_vm0 = vcmask 64512   ;;  %v12368_v61 = vsel %vm4648_vm7, %v12345_v28, %v12339_v46  ;;  %15212 = vst [vmem:[#allocation24_spill] sm:$0xff] %v12376_v45  ;;  %v4588_v48 = vcvt.s32.f32 %v4586_v57  ;;  %v15217_v3 = vld [vmem:[#allocation6_spill] sm:$0xff]  ;;  %v12461_v57 = vld [vmem:[%s8022_s10 + $0x40] sm:$0xff] }
 0x8b1   : > { %v12293_v38 = vpop.xlane.xlu1 %4176  ;;  %v3871_v52 = vsel %vm15208_vm0, %v3862_v16, 0  ;;  %v4651_v60 = vshra.s32 %v12368_v61, 16  ;;  %v15219_v16 = vld [vmem:[#allocation25_spill] sm:$0xff]  ;;  %15227 = vst [vmem:[#allocation40_spill] sm:$0xff] %v12461_v57 }
 0x8b2   : > { %v12425_v18 = vsel %vm4255_vm2, 2147483648, %v15219_v16  ;;  %15228 = vst [vmem:[#allocation52_spill] sm:$0xff] %v12465_v25  ;;  %vm15242_vm2 = vcmp.eq.s32.totalorder %v7821_v50, %v12183_v63 }
 0x8b3   : > { %v12406_v17 = vcvt.s32.f32 %v4651_v60  ;;  %15220 = vst [vmem:[#allocation58_spill] sm:$0xff] %v12425_v18  ;;  %v12472_v60 = vld [vmem:[%s8022_s10 + $0x30] sm:$0xff] }
 0x8b4   : > { %15230 = vst [vmem:[#allocation36_spill] sm:$0xff] %v12472_v60 }
 0x8b5   : > { %3899 = vmatpush.bf16.xpose.msra.mxu1 %v3877_v59  ;;  %v12355_v55 = vpop.xlane.xlu0 %4574 }
 0x8b6   : > { %vm4576_vm4 = vcmp.eq.f32.partialorder %v15209_v33, %v12355_v55 }
 0x8b7   : > { %v4577_v0 = vsel %vm4576_vm4, %v4572_v51, -inf }
 0x8b8   : > { %4638 = vmax.xlane.f32.xlu0 %v12360_v19  ;;  %4578 = vmax.xlane.f32.xlu2 %v4577_v0 }
 0x8b9   : > { %v12349_v59 = vpop.xlane.xlu1 %4542 }
 0x8ba   : > { %vm4544_vm11 = vcmp.eq.f32.partialorder %v15207_v23, %v12349_v59  ;;  %v12432_v23 = vld [vmem:[%s8022_s10 + $0x60] sm:$0xff] }
 0x8bb   : > { %v4545_v44 = vsel %vm4544_vm11, %v4540_v56, -inf  ;;  %vm4254_vm11 = vcmp.eq.s32.totalorder %v7818_v43, %v12285_v8  ;;  %15223 = vst [vmem:[#allocation41_spill] sm:$0xff] %v12432_v23  ;;  %v12440_v8 = vld [vmem:[%s8022_s10 + $0x58] sm:$0xff] }
 0x8bc   : > { %4546 = vmax.xlane.f32.xlu1 %v4545_v44  ;;  %v12428_v32 = vsel %vm4254_vm11, 2147483648, %v15221_v2  ;;  %15224 = vst [vmem:[#allocation44_spill] sm:$0xff] %v12440_v8  ;;  %v12450_v44 = vld [vmem:[%s8022_s10 + $0x50] sm:$0xff] }
 0x8bd   : > { %3900 = vmatpush.bf16.xpose.msra.mxu1 %v3874_v30  ;;  %v15213_v30 = vld [vmem:[#allocation28_spill] sm:$0xff]  ;;  %15222 = vst [vmem:[#allocation14_spill] sm:$0xff] %v12428_v32  ;;  %vm4712_vm4 = vcmp.gt.s32.totalorder %v12428_v32, %v12425_v18  ;;  %v7530_v2 = vld [vmem:[%s8022_s10 + $0x10] sm:$0xff] }
 0x8be   : > { %v12382_v11 = vsel %vm4252_vm1, 2147483648, %v15213_v30  ;;  %vm15216_vm1 = vmmov %vm15208_vm0  ;;  %v12445_v51 = vsel %vm4712_vm4, %v12428_v32, %v12425_v18  ;;  %15225 = vst [vmem:[#allocation60_spill] sm:$0xff] %v12450_v44  ;;  %v15236_v32 = vld [vmem:[#allocation45_spill] sm:$0xff]  ;;  %v4178_v18 = vcvt.f32.s32 %v12293_v38  ;;  %v15238_v30 = vld [vmem:[#allocation23_spill] sm:$0xff]  ;;  %v4554_v38 = vand.u32 65535, %v12156_v34 }
 0x8bf   : > { %15214 = vst [vmem:[#allocation51_spill] sm:$0xff] %v12382_v11  ;;  %vm4696_vm3 = vcmp.gt.s32.totalorder %v12382_v11, %v12376_v45  ;;  %vm6967_vm0 = vmpackc.low %vm4256_vm15, %vm4254_vm11  ;;  %v4715_v33 = vshra.s32 %v12445_v51, 16 }
 0x8c0   : > { %6968 = vmatmul.msk.bf16.gmra.mxu3 %vm6967_vm0, %v14735_v7  ;;  %v12418_v6 = vsel %vm4696_vm3, %v12382_v11, %v12376_v45  ;;  %4654 = vmax.xlane.f32.xlu0 %v12406_v17 }
 0x8c1   : > { %v12391_v49 = vpop.xlane.xlu1 %4590  ;;  %v4699_v56 = vshra.s32 %v12418_v6, 16  ;;  %v12453_v0 = vcvt.s32.f32 %v4715_v33  ;;  %v7532_v33 = vld [vmem:[%s8022_s10] sm:$0xff] }
 0x8c2   : > { %vm4592_vm7 = vcmp.eq.f32.partialorder %v15217_v3, %v12391_v49  ;;  %v12480_v3 = vld [vmem:[%s8022_s10 + $0x20] sm:$0xff] }
 0x8c3   : > { %v4593_v4 = vsel %vm4592_vm7, %v4588_v48, -inf  ;;  %v12476_v48 = vld [vmem:[%s8022_s10 + $0x28] sm:$0xff]  ;;  %15232 = vst [vmem:[#allocation15_spill] sm:$0xff] %v12480_v3 }
 0x8c4   : > { %4594 = vmax.xlane.f32.xlu2 %v4593_v4  ;;  %15231 = vst [vmem:[#allocation47_spill] sm:$0xff] %v12476_v48  ;;  %v12484_v4 = vld [vmem:[%s8022_s10 + $0x18] sm:$0xff] }
 0x8c5   : > { %3901 = vmatpush.bf16.xpose.msra.mxu1 %v3871_v52  ;;  %v12437_v52 = vcvt.s32.f32 %v4699_v56  ;;  %15233 = vst [vmem:[#allocation43_spill] sm:$0xff] %v12484_v4  ;;  %v7531_v56 = vld [vmem:[%s8022_s10 + $0x8] sm:$0xff] }
 0x8cc   : > { %6922 = vmatmul.msk.bf16.vlgmr.msra.gmra.mxu1 %vm15216_vm1, %v12398_v27  ;;  %4702 = vmax.xlane.f32.xlu2 %v12437_v52 }
 0x8cd   : > { %4391 = vmatpush.bf16.msrb.mxu1 %v12363_v10 }
 0x8d1   : > { %4392 = vmatpush.bf16.msrb.mxu1 %v12386_v13 }
 0x8d4   : > { %4718 = vmax.xlane.f32.xlu2 %v12453_v0 }
 0x8d5   : > { %4393 = vmatpush.bf16.msrb.mxu1 %v12412_v62 }
 0x8d9   : > { %4394 = vmatpush.bf16.msrb.mxu1 %v12432_v23 }
 0x8dd   : > { %4395 = vmatpush.bf16.msrb.mxu1 %v12440_v8 }
 0x8e1   : > { %4396 = vmatpush.bf16.msrb.mxu1 %v12450_v44 }
 0x8e5   : > { %4397 = vmatpush.bf16.msrb.mxu1 %v12456_v9  ;;  %v4597_v9 = vcvt.f32.s32 %v12391_v49 }
 0x8e7   : > { %v4598_v20 = vshll.u32 %v4597_v9, 16 }
 0x8e9   : > { %4398 = vmatpush.bf16.msrb.mxu1 %v12461_v57 }
 0x8ec   : > { %6972 = vmatmul.msk.bf16.vlgmr.msrb.gmra.mxu1 %vm11918_vm6, %v14735_v7  ;;  %vm15237_vm6 = vcmp.eq.s32.totalorder %v7821_v50, %v12117_v1  ;;  %v12517_v1 = vsel %vm15242_vm2, 2147483648, %v15241_v40 }
 0x8ed   : > { %5498 = vmatpush.bf16.msra.mxu1 %v12465_v25  ;;  %15243 = vst [vmem:[#allocation48_spill] sm:$0xff] %v12517_v1 }
 0x8f1   : > { %5499 = vmatpush.bf16.msra.mxu1 %v12472_v60 }
 0x8f5   : > { %5500 = vmatpush.bf16.msra.mxu1 %v12476_v48 }
 0x8f9   : > { %5501 = vmatpush.bf16.msra.mxu1 %v12480_v3  ;;  %v4179_v3 = vcvt.f32.s32 %v15236_v32 }
 0x8fb   : > { %v4180_v48 = vshll.u32 %v4179_v3, 16 }
 0x8fc   : > { %6974 = vmatmul.msk.bf16.gmra.mxu1 %vm11959_vm13, %v14735_v7  ;;  %vm6977_vm13 = vmpackc.low %vm15237_vm6, %vm4243_vm9 }
 0x8fd   : > { %5502 = vmatpush.bf16.msra.mxu1 %v12484_v4  ;;  %v4195_v4 = vcvt.f32.s32 %v12149_v37  ;;  %v4181_v60 = vadd.s32 %v4180_v48, %v4178_v18 }
 0x901   : > { %5503 = vmatpush.bf16.msra.mxu1 %v7530_v2  ;;  %v4196_v2 = vshll.u32 %v4195_v4, 16  ;;  %v4556_v4 = vcvt.s32.f32 %v4554_v38 }
 0x905   : > { %5504 = vmatpush.bf16.msra.mxu1 %v7531_v56  ;;  %v4212_v56 = vand.u32 255, %v4181_v60 }
 0x907   : > { %v4193_v16 = vpop.xlane.xlu2 %4192  ;;  %v4228_v18 = vsub.s32 255, %v4212_v56  ;;  %v15249_v56 = vld [vmem:[#allocation46_spill] sm:$0xff] }
 0x909   : > { %5505 = vmatpush.bf16.msra.mxu1 %v7532_v33  ;;  %v4194_v33 = vcvt.f32.s32 %v4193_v16  ;;  %vm4258_vm7 = vcmp.eq.s32.totalorder %v7818_v43, %v4228_v18  ;;  %vm4259_vm0 = vcmp.eq.s32.totalorder %v7821_v50, %v4228_v18  ;;  %v15246_v16 = vld [vmem:[#allocation35_spill] sm:$0xff] }
 0x90b   : > { %v4197_v32 = vadd.s32 %v4196_v2, %v4194_v33 }
 0x90c   : > { %6976 = vmatmul.msk.bf16.gmra.mxu1 %vm11997_vm8, %v14735_v7  ;;  %vm15239_vm8 = vcmp.eq.s32.totalorder %v7818_v43, %v12183_v63 }
 0x90d   : > { %v12510_v37 = vsel %vm15239_vm8, 2147483648, %v15238_v30  ;;  %v4213_v48 = vand.u32 255, %v4197_v32  ;;  %vm15250_vm8 = vcmp.eq.s32.totalorder %v7818_v43, %v12243_v12  ;;  %v4602_v32 = vand.u32 65535, %v12192_v26 }
 0x90e   : > { %15240 = vst [vmem:[#allocation11_spill] sm:$0xff] %v12510_v37  ;;  %vm4664_vm9 = vcmp.gt.s32.totalorder %v12510_v37, %v12517_v1  ;;  %v12562_v33 = vsel %vm15250_vm8, 2147483648, %v15249_v56 }
 0x90f   : > { %v12519_v3 = vsub.s32 255, %v4213_v48  ;;  %v12523_v60 = vpop.xlane.xlu2 %4558  ;;  %v12540_v63 = vsel %vm4664_vm9, %v12510_v37, %v12517_v1  ;;  %15251 = vst [vmem:[#allocation5_spill] sm:$0xff] %v12562_v33  ;;  %v4604_v40 = vcvt.s32.f32 %v4602_v32  ;;  %v15262_v37 = vld [vmem:[#allocation61_spill] sm:$0xff] }
 0x910   : > { %vm4560_vm1 = vcmp.eq.f32.partialorder %v12185_v14, %v12523_v60  ;;  %v4667_v30 = vshra.s32 %v12540_v63, 16  ;;  %v4565_v45 = vcvt.f32.s32 %v12523_v60  ;;  %v4666_v23 = vand.u32 65535, %v12540_v63 }
 0x911   : > { %vm4261_vm3 = vcmp.eq.s32.totalorder %v7821_v50, %v12519_v3  ;;  %vm4260_vm11 = vcmp.eq.s32.totalorder %v7818_v43, %v12519_v3  ;;  %v4561_v34 = vsel %vm4560_vm1, %v4556_v4, -inf  ;;  %v12586_v4 = vsel %vm4257_vm10, 2147483648, %v15252_v15 }
 0x912   : > { %vm6969_vm4 = vmpackc.low %vm4260_vm11, %vm4258_vm7  ;;  %4562 = vmax.xlane.f32.xlu1 %v4561_v34  ;;  %15253 = vst [vmem:[#allocation28_spill] sm:$0xff] %v12586_v4  ;;  %v15254_v34 = vld [vmem:[#allocation37_spill] sm:$0xff]  ;;  %v15264_v3 = vmov 0  ;;  %v4566_v46 = vshll.u32 %v4565_v45, 16 }
 0x913   : > { %6970 = vmatmul.msk.bf16.gmra.mxu3 %vm6969_vm4, %v14735_v7  ;;  %vm12548_vm6 = vmpackc.low %vm4261_vm3, %vm4259_vm0 }
 0x917   : > { %v12571_v38 = vpop.xlane.xlu2 %4606 }
 0x918   : > { %vm4608_vm9 = vcmp.eq.f32.partialorder %v12241_v35, %v12571_v38  ;;  %v12592_v35 = vsel %vm4256_vm15, 2147483648, %v15254_v34  ;;  %v15256_v34 = vld [vmem:[#allocation53_spill] sm:$0xff] }
 0x919   : > { %v4609_v48 = vsel %vm4608_vm9, %v4604_v40, -inf  ;;  %15255 = vst [vmem:[#allocation6_spill] sm:$0xff] %v12592_v35  ;;  %v4533_v40 = vcvt.f32.s32 %v12300_v42  ;;  %v15258_v42 = vld [vmem:[#allocation42_spill] sm:$0xff] }
 0x91a   : > { %4610 = vmax.xlane.f32.xlu0 %v4609_v48 }
 0x91c   : > { %6978 = vmatmul.msk.bf16.gmra.mxu1 %vm6977_vm13, %v14735_v7  ;;  %vm15247_vm13 = vcmp.eq.s32.totalorder %v7821_v50, %v12243_v12  ;;  %v12575_v12 = vcvt.s32.f32 %v4667_v30 }
 0x91d   : > { %v12556_v2 = vsel %vm15247_vm13, 2147483648, %v15246_v16  ;;  %v4618_v16 = vand.u32 65535, %v12247_v58 }
 0x91e   : > { %15248 = vst [vmem:[#allocation32_spill] sm:$0xff] %v12556_v2  ;;  %vm4680_vm2 = vcmp.gt.s32.totalorder %v12562_v33, %v12556_v2  ;;  %4670 = vmax.xlane.f32.xlu1 %v12575_v12 }
 0x91f   : > { %v12579_v26 = vsel %vm4680_vm2, %v12562_v33, %v12556_v2  ;;  %v12598_v32 = vpop.xlane.xlu2 %4622  ;;  %v4620_v30 = vcvt.s32.f32 %v4618_v16  ;;  %v12613_v16 = vsel %vm4259_vm0, 2147483648, %v15256_v34  ;;  %v4634_v34 = vand.u32 65535, %v12322_v29 }
 0x920   : > { %v4683_v56 = vshra.s32 %v12579_v26, 16  ;;  %vm4624_vm10 = vcmp.eq.f32.partialorder %v12287_v22, %v12598_v32  ;;  %15257 = vst [vmem:[#allocation25_spill] sm:$0xff] %v12613_v16  ;;  %v12618_v22 = vsel %vm4258_vm7, 2147483648, %v15258_v42 }
 0x921   : > { %v4625_v24 = vsel %vm4624_vm10, %v4620_v30, -inf  ;;  %15259 = vst [vmem:[#allocation9_spill] sm:$0xff] %v12618_v22  ;;  %v4534_v30 = vshll.u32 %v4533_v40, 16  ;;  %vm4744_vm15 = vcmp.gt.s32.totalorder %v12618_v22, %v12613_v16  ;;  %v4636_v29 = vcvt.s32.f32 %v4634_v34 }
 0x922   : > { %v12603_v48 = vcvt.s32.f32 %v4683_v56  ;;  %4626 = vmax.xlane.f32.xlu0 %v4625_v24  ;;  %v4549_v24 = vcvt.f32.s32 %v12349_v59  ;;  %v12632_v40 = vsel %vm4744_vm15, %v12618_v22, %v12613_v16  ;;  %v4650_v22 = vand.u32 65535, %v12368_v61 }
 0x923   : > { %v4531_v58 = vpop.xlane.xlu0 %4530 }
 0x924   : > { %v4532_v56 = vcvt.f32.s32 %v4531_v58  ;;  %v4550_v58 = vshll.u32 %v4549_v24, 16  ;;  %v15260_v24 = vld [vmem:[#allocation62_spill] sm:$0xff]  ;;  %v4652_v61 = vcvt.s32.f32 %v4650_v22 }
 0x926   : > { %4686 = vmax.xlane.f32.xlu1 %v12603_v48 }
 0x92b   : > { %v12635_v2 = vpop.xlane.xlu0 %4638  ;;  %v12637_v59 = vpop.xlane.xlu2 %4578 }
 0x92c   : > { %6980 = vmatmul.msk.bf16.gmra.mxu1 %vm12232_vm14, %v14735_v7  ;;  %vm4728_vm14 = vcmp.gt.s32.totalorder %v12592_v35, %v12586_v4 }
 0x92d   : > { %v12607_v15 = vsel %vm4728_vm14, %v12592_v35, %v12586_v4  ;;  %v4535_v35 = vadd.s32 %v4534_v30, %v4532_v56  ;;  %v4747_v56 = vshra.s32 %v12632_v40, 16 }
 0x92e   : > { %v4731_v33 = vshra.s32 %v12607_v15, 16 }
 0x92f   : > { %v4547_v18 = vpop.xlane.xlu1 %4546  ;;  %v4776_v42 = vand.u32 255, %v4535_v35 }
 0x930   : > { %v12628_v4 = vcvt.s32.f32 %v4731_v33  ;;  %v4548_v36 = vcvt.f32.s32 %v4547_v18  ;;  %v12649_v18 = vsel %vm4261_vm3, 2147483648, %v15260_v24 }
 0x931   : > { %v12643_v16 = vsub.s32 255, %v4776_v42  ;;  %15261 = vst [vmem:[#allocation39_spill] sm:$0xff] %v12649_v18 }
 0x932   : > { %4734 = vmax.xlane.f32.xlu0 %v12628_v4  ;;  %v4551_v33 = vadd.s32 %v4550_v58, %v4548_v36  ;;  %v12659_v58 = vcvt.s32.f32 %v4747_v56  ;;  %v4698_v36 = vand.u32 65535, %v12418_v6  ;;  %v12702_v56 = vpop.f32.mrf.mxu3  ;;  %v4714_v6 = vand.u32 65535, %v12445_v51 }
 0x933   : > { %vm4808_vm1 = vcmp.eq.s32.totalorder %v7818_v43, %v12643_v16  ;;  %v12668_v42 = vpop.xlane.xlu0 %4654  ;;  %vm4809_vm0 = vcmp.eq.s32.totalorder %v7821_v50, %v12643_v16 }
 0x934   : > { %v4777_v35 = vand.u32 255, %v4551_v33  ;;  %vm4656_vm13 = vcmp.eq.f32.partialorder %v12406_v17, %v12668_v42  ;;  %v4700_v5 = vcvt.s32.f32 %v4698_v36 }
 0x935   : > { %v4657_v22 = vsel %vm4656_vm13, %v4652_v61, -inf }
 0x936   : > { %v12657_v34 = vsub.s32 255, %v4777_v35  ;;  %v15268_v35 = vld [vmem:[#allocation30_spill] sm:$0xff] }
 0x938   : > { %vm4810_vm7 = vcmp.eq.s32.totalorder %v7818_v43, %v12657_v34  ;;  %vm4811_vm3 = vcmp.eq.s32.totalorder %v7821_v50, %v12657_v34 }
 0x939   : > { %vm7020_vm4 = vmpackc.low %vm4810_vm7, %vm4808_vm1 }
 0x93a   : > { %4750 = vmax.xlane.f32.xlu0 %v12659_v58  ;;  %vm12688_vm8 = vmpackc.low %vm4811_vm3, %vm4809_vm0  ;;  %7021 = vmatmul.msk.bf16.vlgmr.msra.gmra.mxu0 %vm7020_vm4, %v14735_v7 }
 0x93b   : > { %v15265_v3 = vsel %vm12688_vm8, 4294967295, %v15264_v3 }
 0x93c   : > { %6982 = vmatmul.msk.bf16.gmra.mxu1 %vm12268_vm12, %v14735_v7  ;;  %vm4640_vm12 = vcmp.eq.f32.partialorder %v12360_v19, %v12635_v2  ;;  %v12655_v19 = vsel %vm4260_vm11, 2147483648, %v15262_v37  ;;  %v4595_v37 = vpop.xlane.xlu2 %4594  ;;  %15266 = vst [vmem:[#allocation27_spill] sm:$0xff] %v15265_v3  ;;  %v4716_v3 = vcvt.s32.f32 %v4714_v6 }
 0x93d   : > { %v4641_v30 = vsel %vm4640_vm12, %v4636_v29, -inf  ;;  %15263 = vst [vmem:[#allocation34_spill] sm:$0xff] %v12655_v19  ;;  %vm4760_vm11 = vcmp.gt.s32.totalorder %v12655_v19, %v12649_v18  ;;  %v4596_v8 = vcvt.f32.s32 %v4595_v37  ;;  %v4668_v37 = vcvt.s32.f32 %v4666_v23 }
 0x93e   : > { %4642 = vmax.xlane.f32.xlu1 %v4641_v30  ;;  %v12698_v17 = vsel %vm4760_vm11, %v12655_v19, %v12649_v18  ;;  %v15267_v30 = vld [vmem:[#allocation26_spill] sm:$0xff] }
 0x93f   : > { %v4763_v29 = vshra.s32 %v12698_v17, 16  ;;  %v15269_v24 = vmax.f32 %v15267_v30, %v15268_v35 }
 0x941   : > { %v12713_v18 = vcvt.s32.f32 %v4763_v29 }
 0x944   : > { %v12709_v1 = vpop.xlane.xlu2 %4702 }
 0x946   : > { %4658 = vmax.xlane.f32.xlu1 %v4657_v22 }
 0x949   : > { %v3903_v33 = vpop.f32.mrf.mxu1 }
 0x94a   : > { %v12707_v61 = vmax.f32 %v15269_v24, %v3903_v33  ;;  %v12721_v33 = vpop.f32.mrf.mxu3 }
 0x94c   : > { %6984 = vmatmul.msk.bf16.gmra.mxu1 %vm12331_vm5, %v14735_v7  ;;  %15270 = vst [vmem:[#allocation45_spill] sm:$0xff] %v12707_v61  ;;  %vm4704_vm5 = vcmp.eq.f32.partialorder %v12437_v52, %v12709_v1  ;;  %v12717_v19 = vpop.xlane.xlu2 %4718  ;;  %v4580_v61 = vcvt.f32.s32 %v12637_v59  ;;  %v4613_v59 = vcvt.f32.s32 %v12571_v38 }
 0x94d   : > { %v4705_v22 = vsel %vm4704_vm5, %v4700_v5, -inf  ;;  %15271 = vst [vmem:[#allocation23_spill] sm:$0xff] %v12717_v19  ;;  %vm4720_vm2 = vcmp.eq.f32.partialorder %v12453_v0, %v12717_v19 }
 0x94e   : > { %4706 = vmax.xlane.f32.xlu0 %v4705_v22  ;;  %4766 = vmax.xlane.f32.xlu1 %v12713_v18  ;;  %v4721_v36 = vsel %vm4720_vm2, %v4716_v3, -inf }
 0x951   : > { %v12726_v52 = vpop.f32.mrf.mxu1 }
 0x952   : > { %15272 = vst [vmem:[#allocation19_spill] sm:$0xff] %v12726_v52  ;;  %v12728_v29 = vpop.f32.mrf.mxu3 }
 0x956   : > { %4722 = vmax.xlane.f32.xlu1 %v4721_v36  ;;  %v4581_v36 = vcvt.f32.s32 %v12355_v55 }
 0x958   : > { %v4582_v11 = vshll.u32 %v4581_v36, 16  ;;  %v4599_v36 = vadd.s32 %v4598_v20, %v4596_v8 }
 0x95a   : > { %v12732_v51 = vpop.f32.mrf.mxu3  ;;  %v4583_v57 = vadd.s32 %v4582_v11, %v4580_v61 }
 0x95c   : > { %6986 = vmatmul.msk.bf16.gmra.mxu1 %vm12548_vm6, %v14735_v7  ;;  %v4779_v41 = vand.u32 255, %v4583_v57  ;;  %v4780_v57 = vand.u32 255, %v4599_v36 }
 0x95e   : > { %v12762_v27 = vsub.s32 255, %v4779_v41  ;;  %v12782_v23 = vsub.s32 255, %v4780_v57 }
 0x960   : > { %15273 = vst [vmem:[#allocation35_spill] sm:$0xff] %v12762_v27  ;;  %vm4814_vm14 = vcmp.eq.s32.totalorder %v7818_v43, %v12762_v27  ;;  %vm4816_vm12 = vcmp.eq.s32.totalorder %v7818_v43, %v12782_v23  ;;  %vm4817_vm2 = vcmp.eq.s32.totalorder %v7821_v50, %v12782_v23 }
 0x961   : > { %15275 = vst [vmem:[#allocation18_spill] sm:$0xff] %v12782_v23 }
 0x962   : > { %v12736_v24 = vpop.f32.mrf.mxu3 }
 0x969   : > { %v12730_v30 = vpop.f32.mrf.mxu1 }
 0x96a   : > { %v12742_v5 = vpop.f32.mrf.mxu3 }
 0x971   : > { %v12734_v35 = vpop.f32.mrf.mxu1 }
 0x972   : > { %v12746_v22 = vpop.f32.mrf.mxu3 }
 0x979   : > { %v12738_v0 = vpop.f32.mrf.mxu1 }
 0x97a   : > { %v12751_v52 = vpop.f32.mrf.mxu3 }
 0x981   : > { %v12740_v3 = vpop.f32.mrf.mxu1 }
 0x982   : > { %v4371_v44 = vpop.f32.mrf.mxu3 }
 0x985   : > { %v4563_v28 = vpop.xlane.xlu1 %4562 }
 0x986   : > { %v4564_v19 = vcvt.f32.s32 %v4563_v28  ;;  %v4614_v28 = vshll.u32 %v4613_v59, 16  ;;  %v15279_v59 = vld [vmem:[#allocation20_spill] sm:$0xff] }
 0x987   : > { %v12809_v36 = vsel %vm4808_vm1, 2147483648, %v15279_v59 }
 0x988   : > { %v4567_v55 = vadd.s32 %v4566_v46, %v4564_v19  ;;  %15280 = vst [vmem:[#allocation53_spill] sm:$0xff] %v12809_v36 }
 0x989   : > { %v12744_v14 = vpop.f32.mrf.mxu1 }
 0x98a   : > { %v4778_v62 = vand.u32 255, %v4567_v55  ;;  %v4373_v20 = vpop.f32.mrf.mxu3  ;;  %v15287_v55 = vld [vmem:[#allocation8_spill] sm:$0xff] }
 0x98c   : > { %v12764_v11 = vsub.s32 255, %v4778_v62  ;;  %v4682_v62 = vand.u32 65535, %v12579_v26 }
 0x98d   : > { %v4611_v45 = vpop.xlane.xlu0 %4610 }
 0x98e   : > { %15274 = vst [vmem:[#allocation46_spill] sm:$0xff] %v12764_v11  ;;  %v4612_v46 = vcvt.f32.s32 %v4611_v45  ;;  %vm4812_vm9 = vcmp.eq.s32.totalorder %v7818_v43, %v12764_v11  ;;  %v4684_v19 = vcvt.s32.f32 %v4682_v62  ;;  %v15281_v45 = vld [vmem:[#allocation12_spill] sm:$0xff] }
 0x98f   : > { %vm7022_vm10 = vmpackc.low %vm4814_vm14, %vm4812_vm9 }
 0x990   : > { %v4615_v41 = vadd.s32 %v4614_v28, %v4612_v46  ;;  %7023 = vmatmul.msk.bf16.gmra.mxu0 %vm7022_vm10, %v14735_v7 }
 0x991   : > { %v12748_v6 = vpop.f32.mrf.mxu1  ;;  %v12766_v49 = vpop.xlane.xlu1 %4670 }
 0x992   : > { %vm4672_vm6 = vcmp.eq.f32.partialorder %v12575_v12, %v12766_v49  ;;  %v4781_v8 = vand.u32 255, %v4615_v41  ;;  %v12817_v28 = vpop.f32.mrf.mxu3 }
 0x993   : > { %v4673_v9 = vsel %vm4672_vm6, %v4668_v37, -inf  ;;  %v12815_v37 = vsel %vm4809_vm0, 2147483648, %v15281_v45  ;;  %vm4815_vm0 = vcmp.eq.s32.totalorder %v7821_v50, %v12762_v27  ;;  %vm4813_vm6 = vcmp.eq.s32.totalorder %v7821_v50, %v12764_v11 }
 0x994   : > { %4674 = vmax.xlane.f32.xlu2 %v4673_v9  ;;  %v12784_v38 = vsub.s32 255, %v4781_v8  ;;  %15282 = vst [vmem:[#allocation42_spill] sm:$0xff] %v12815_v37  ;;  %v4730_v9 = vand.u32 65535, %v12607_v15  ;;  %v4645_v8 = vcvt.f32.s32 %v12635_v2  ;;  %vm5098_vm1 = vcmp.gt.s32.totalorder %v12809_v36, %v12815_v37 }
 0x995   : > { %v4627_v61 = vpop.xlane.xlu0 %4626  ;;  %v12837_v2 = vsel %vm5098_vm1, %v12809_v36, %v12815_v37 }
 0x996   : > { %15276 = vst [vmem:[#allocation37_spill] sm:$0xff] %v12784_v38  ;;  %vm4818_vm11 = vcmp.eq.s32.totalorder %v7818_v43, %v12784_v38  ;;  %v4628_v57 = vcvt.f32.s32 %v4627_v61  ;;  %v4732_v61 = vcvt.s32.f32 %v4730_v9  ;;  %v4646_v15 = vshll.u32 %v4645_v8, 16 }
 0x997   : > { %vm12800_vm4 = vmpackc.low %vm4818_vm11, %vm4816_vm12 }
 0x999   : > { %v12755_v25 = vpop.f32.mrf.mxu1  ;;  %v12786_v12 = vpop.xlane.xlu1 %4686 }
 0x99a   : > { %vm4688_vm15 = vcmp.eq.f32.partialorder %v12603_v48, %v12786_v12  ;;  %v4629_v48 = vcvt.f32.s32 %v12598_v32 }
 0x99b   : > { %v4689_v26 = vsel %vm4688_vm15, %v4684_v19, -inf }
 0x99c   : > { %4690 = vmax.xlane.f32.xlu2 %v4689_v26  ;;  %v4630_v62 = vshll.u32 %v4629_v48, 16  ;;  %v15283_v48 = vld [vmem:[#allocation55_spill] sm:$0xff] }
 0x99d   : > { %v12847_v59 = vsel %vm4815_vm0, 2147483648, %v15283_v48 }
 0x99e   : > { %v4631_v16 = vadd.s32 %v4630_v62, %v4628_v57  ;;  %15284 = vst [vmem:[#allocation62_spill] sm:$0xff] %v12847_v59  ;;  %v15289_v62 = vld [vmem:[#allocation56_spill] sm:$0xff] }
 0x99f   : > { %v12867_v8 = vsel %vm4811_vm3, 2147483648, %v15289_v62 }
 0x9a0   : > { %7025 = vmatmul.msk.bf16.gmra.mxu0 %vm12800_vm4, %v14735_v7  ;;  %v4782_v57 = vand.u32 255, %v4631_v16  ;;  %15290 = vst [vmem:[#allocation30_spill] sm:$0xff] %v12867_v8 }
 0x9a1   : > { %v12760_v60 = vpop.f32.mrf.mxu1 }
 0x9a5   : > { %v12829_v26 = vpop.xlane.xlu0 %4734 }
 0x9a6   : > { %vm4736_vm13 = vcmp.eq.f32.partialorder %v12628_v4, %v12829_v26  ;;  %v15285_v4 = vld [vmem:[#allocation38_spill] sm:$0xff] }
 0x9a7   : > { %v12853_v45 = vsel %vm4814_vm14, 2147483648, %v15285_v4 }
 0x9a8   : > { %15286 = vst [vmem:[#allocation61_spill] sm:$0xff] %v12853_v45  ;;  %vm5146_vm5 = vcmp.gt.s32.totalorder %v12853_v45, %v12847_v59 }
 0x9a9   : > { %v4420_v63 = vpop.f32.mrf.mxu1 }
 0x9aa   : > { %v12820_v32 = vadd.f32 %v4420_v63, %v4371_v44  ;;  %v4737_v44 = vsel %vm4736_vm13, %v4732_v61, -inf  ;;  %v4746_v63 = vand.u32 65535, %v12632_v40  ;;  %v12861_v40 = vsel %vm4810_vm7, 2147483648, %v15287_v55 }
 0x9ab   : > { %4738 = vmax.xlane.f32.xlu2 %v4737_v44  ;;  %15288 = vst [vmem:[#allocation26_spill] sm:$0xff] %v12861_v40  ;;  %v5101_v61 = vshra.s32 %v12837_v2, 16  ;;  %v12870_v44 = vpop.f32.mrf.mxu3  ;;  %vm5114_vm7 = vcmp.gt.s32.totalorder %v12861_v40, %v12867_v8 }
 0x9ac   : > { %v4748_v55 = vcvt.s32.f32 %v4746_v63 }
 0x9ad   : > { %v12874_v4 = vpop.xlane.xlu0 %4750  ;;  %v12880_v34 = vcvt.s32.f32 %v5101_v61  ;;  %v15291_v61 = vld [vmem:[#allocation57_spill] sm:$0xff] }
 0x9ae   : > { %vm4752_vm3 = vcmp.eq.f32.partialorder %v12659_v58, %v12874_v4  ;;  %v12895_v58 = vsel %vm5114_vm7, %v12861_v40, %v12867_v8 }
 0x9af   : > { %v5117_v19 = vshra.s32 %v12895_v58, 16 }
 0x9b1   : > { %v4422_v46 = vpop.f32.mrf.mxu1  ;;  %v12952_v37 = vcvt.s32.f32 %v5117_v19 }
 0x9b2   : > { %v12822_v41 = vadd.f32 %v4422_v46, %v4373_v20  ;;  %v4643_v20 = vpop.xlane.xlu1 %4642 }
 0x9b3   : > { %v4644_v46 = vcvt.f32.s32 %v4643_v20  ;;  %v4798_v20 = vsub.s32 255, %v4782_v57  ;;  %v12888_v57 = vsel %vm5146_vm5, %v12853_v45, %v12847_v59  ;;  %5104 = vmax.xlane.f32.xlu2 %v12880_v34  ;;  %v12945_v45 = vsel %vm4812_vm9, 2147483648, %v12142_v31  ;;  %v4381_v8 = vpop.f32.mrf.mxu3 }
 0x9b4   : > { %15299 = vst [vmem:[#allocation8_spill] sm:$0xff] %v12945_v45  ;;  %v4762_v59 = vand.u32 65535, %v12698_v17  ;;  %vm14660_vm9 = vcmp.eq.s32.totalorder %v7821_v50, %v12784_v38 }
 0x9b5   : > { %v4647_v16 = vadd.s32 %v4646_v15, %v4644_v46  ;;  %v4753_v46 = vsel %vm4752_vm3, %v4748_v55, -inf  ;;  %vm4820_vm10 = vcmp.eq.s32.totalorder %v7818_v43, %v4798_v20  ;;  %vm4821_vm4 = vcmp.eq.s32.totalorder %v7821_v50, %v4798_v20 }
 0x9b6   : > { %4754 = vmax.xlane.f32.xlu0 %v4753_v46  ;;  %v5149_v46 = vshra.s32 %v12888_v57, 16  ;;  %v4764_v31 = vcvt.s32.f32 %v4762_v59 }
 0x9b7   : > { %v4783_v48 = vand.u32 255, %v4647_v16  ;;  %v12910_v16 = vsel %vm4817_vm2, 2147483648, %v15291_v61  ;;  %v15295_v61 = vmov 0 }
 0x9b8   : > { %15292 = vst [vmem:[#allocation20_spill] sm:$0xff] %v12910_v16  ;;  %v12950_v40 = vcvt.s32.f32 %v5149_v46 }
 0x9b9   : > { %v12855_v9 = vpop.f32.mrf.mxu1  ;;  %v12884_v15 = vsub.s32 255, %v4783_v48  ;;  %v15293_v48 = vld [vmem:[#allocation17_spill] sm:$0xff] }
 0x9ba   : > { %v12891_v63 = vpop.xlane.xlu1 %4658  ;;  %v12917_v55 = vsel %vm4816_vm12, 2147483648, %v15293_v48  ;;  %v12939_v48 = vsel %vm4813_vm6, 2147483648, %v12136_v47 }
 0x9bb   : > { %vm4823_vm14 = vcmp.eq.s32.totalorder %v7821_v50, %v12884_v15  ;;  %vm4822_vm15 = vcmp.eq.s32.totalorder %v7818_v43, %v12884_v15  ;;  %15294 = vst [vmem:[#allocation12_spill] sm:$0xff] %v12917_v55  ;;  %vm5162_vm12 = vcmp.gt.s32.totalorder %v12917_v55, %v12910_v16  ;;  %vm5130_vm5 = vcmp.gt.s32.totalorder %v12945_v45, %v12939_v48 }
 0x9bc   : > { %vm7026_vm1 = vmpackc.low %vm4822_vm15, %vm4820_vm10  ;;  %15298 = vst [vmem:[#allocation38_spill] sm:$0xff] %v12939_v48  ;;  %5152 = vmax.xlane.f32.xlu2 %v12950_v40  ;;  %v12962_v17 = vsel %vm5162_vm12, %v12917_v55, %v12910_v16  ;;  %v12971_v36 = vsel %vm5130_vm5, %v12945_v45, %v12939_v48  ;;  %v12978_v55 = vsel %vm14660_vm9, 2147483648, %v12165_v21  ;;  %v4383_v16 = vpop.f32.mrf.mxu3 }
 0x9bd   : > { %vm12931_vm13 = vmpackc.low %vm4823_vm14, %vm4821_vm4  ;;  %7027 = vmatmul.msk.bf16.gmra.mxu0 %vm7026_vm1, %v14735_v7  ;;  %v5165_v59 = vshra.s32 %v12962_v17, 16  ;;  %15300 = vst [vmem:[#allocation56_spill] sm:$0xff] %v12978_v55 }
 0x9be   : > { %v15296_v61 = vsel %vm12931_vm13, 4294967295, %v15295_v61  ;;  %5120 = vmax.xlane.f32.xlu0 %v12952_v37 }
 0x9bf   : > { %15297 = vst [vmem:[#allocation55_spill] sm:$0xff] %v15296_v61  ;;  %v12987_v45 = vcvt.s32.f32 %v5165_v59  ;;  %v13007_v59 = vsel %vm4820_vm10, 2147483648, %v12214_v39  ;;  %vm15308_vm10 = vcmask 64512  }
 0x9c0   : > { %15306 = vst [vmem:[#allocation66_spill] sm:$0xff] %v13007_v59 }
 0x9c1   : > { %v12901_v62 = vpop.f32.mrf.mxu1  ;;  %15302 = vst [vmem:[#allocation17_spill] sm:$0xff] %v12987_v45 }
 0x9c2   : > { %v12958_v47 = vpop.xlane.xlu1 %4766 }
 0x9c3   : > { %vm4768_vm7 = vcmp.eq.f32.partialorder %v12713_v18, %v12958_v47  ;;  %v12984_v18 = vsel %vm4818_vm11, 2147483648, %v12171_v53  ;;  %v13002_v53 = vsel %vm4821_vm4, 2147483648, %v12206_v54  ;;  %vm15309_vm4 = vmmov %vm15308_vm10 }
 0x9c4   : > { %v4769_v46 = vsel %vm4768_vm7, %v4764_v31, -inf  ;;  %15301 = vst [vmem:[#allocation57_spill] sm:$0xff] %v12984_v18  ;;  %v5133_v31 = vshra.s32 %v12971_v36, 16  ;;  %vm5178_vm3 = vcmp.gt.s32.totalorder %v12984_v18, %v12978_v55  ;;  %vm5194_vm11 = vcmp.gt.s32.totalorder %v13007_v59, %v13002_v53  ;;  %vm15310_vm1 = vmmov %vm15309_vm4 }
 0x9c5   : > { %4770 = vmax.xlane.f32.xlu1 %v4769_v46  ;;  %v12996_v21 = vsel %vm5178_vm3, %v12984_v18, %v12978_v55  ;;  %15305 = vst [vmem:[#allocation65_spill] sm:$0xff] %v13002_v53  ;;  %v13016_v38 = vsel %vm5194_vm11, %v13007_v59, %v13002_v53  ;;  %v4428_v53 = vadd.f32 %v12901_v62, %v12870_v44  ;;  %vm15312_vm12 = vmmov %vm15310_vm1 }
 0x9c6   : > { %5168 = vmax.xlane.f32.xlu0 %v12987_v45  ;;  %v12992_v48 = vcvt.s32.f32 %v5133_v31  ;;  %15304 = vst [vmem:[#allocation64_spill] sm:$0xff] %v12996_v21  ;;  %v5181_v61 = vshra.s32 %v12996_v21, 16  ;;  %v4386_v31 = vpop.f32.mrf.mxu3  ;;  %v5197_v54 = vshra.s32 %v13016_v38, 16  ;;  %vm15313_vm5 = vmmov %vm15310_vm1  ;;  %v4411_v44 = vadd.f32 %v12744_v14, %v12736_v24 }
 0x9c7   : > { %15307 = vst [vmem:[#allocation67_spill] sm:$0xff] %v13016_v38  ;;  %vm15314_vm7 = vmmov %vm15310_vm1  ;;  %v4403_v62 = vadd.f32 %v12734_v35, %v12721_v33  ;;  %v4693_v35 = vcvt.f32.s32 %v12786_v12  ;;  %v13426_v12 = vpop.f32.mrf.mxu0 }
 0x9c8   : > { %15303 = vst [vmem:[#allocation63_spill] sm:$0xff] %v12992_v48  ;;  %v13012_v55 = vcvt.s32.f32 %v5181_v61  ;;  %v13020_v23 = vcvt.s32.f32 %v5197_v54  ;;  %v4426_v54 = vadd.f32 %v12855_v9, %v12817_v28  ;;  %v4413_v28 = vadd.f32 %v12748_v6, %v12742_v5  ;;  %vm15315_vm3 = vmmov %vm15310_vm1 }
 0x9c9   : > { %v4430_v19 = vpop.f32.mrf.mxu1  ;;  %v4660_v5 = vcvt.f32.s32 %v12891_v63  ;;  %vm15316_vm11 = vmmov %vm15310_vm1 }
 0x9ca   : > { %v4431_v45 = vadd.f32 %v4430_v19, %v4381_v8  ;;  %v4416_v8 = vadd.f32 %v12755_v25, %v12746_v22  ;;  %v4406_v25 = vadd.f32 %v12738_v0, %v12728_v29 }
 0x9cd   : > { %5136 = vmax.xlane.f32.xlu1 %v12992_v48 }
 0x9ce   : > { %v4388_v20 = vpop.f32.mrf.mxu3 }
 0x9d1   : > { %v4432_v46 = vpop.f32.mrf.mxu1 }
 0x9d2   : > { %v4433_v48 = vadd.f32 %v4432_v46, %v4383_v16  ;;  %v4709_v16 = vcvt.f32.s32 %v12709_v1  ;;  %v4694_v1 = vshll.u32 %v4693_v35, 16 }
 0x9d4   : > { %v4446_v59 = vpack.c.bf16 %v4433_v48, %v4431_v45 }
 0x9d5   : > { %5184 = vmax.xlane.f32.xlu1 %v13012_v55 }
 0x9d6   : > { %v4467_v38 = vsel %vm15309_vm4, %v4446_v59, 0 }
 0x9d9   : > { %v4435_v18 = vpop.f32.mrf.mxu1 }
 0x9da   : > { %v4436_v27 = vadd.f32 %v4435_v18, %v4386_v31  ;;  %v4445_v18 = vpack.c.bf16 %v4428_v53, %v4426_v54  ;;  %v15319_v54 = vld [vmem:[#allocation50_spill] sm:$0xff] }
 0x9dc   : > { %v4464_v31 = vsel %vm15310_vm1, %v4445_v18, 0 }
 0x9dd   : > { %5200 = vmax.xlane.f32.xlu1 %v13020_v23 }
 0x9e1   : > { %v4437_v39 = vpop.f32.mrf.mxu1 }
 0x9e2   : > { %v4438_v11 = vadd.f32 %v4437_v39, %v4388_v20 }
 0x9e4   : > { %v4447_v21 = vpack.c.bf16 %v4438_v11, %v4436_v27  ;;  %v4418_v27 = vadd.f32 %v12760_v60, %v12751_v52  ;;  %v15311_v11 = vpack.c.bf16 %v12822_v41, %v12820_v32  ;;  %v4442_v52 = vpack.c.bf16 %v4413_v28, %v4411_v44  ;;  %v15324_v28 = vld [vmem:[#allocation7_spill] sm:$0xff]  ;;  %v15325_v44 = vld [vmem:[#allocation22_spill] sm:$0xff] }
 0x9e5   : > { %v4408_v60 = vadd.f32 %v12740_v3, %v12732_v51  ;;  %v4661_v41 = vcvt.f32.s32 %v12668_v42  ;;  %v4677_v51 = vcvt.f32.s32 %v12766_v49  ;;  %v4401_v3 = vadd.f32 %v12730_v30, %v12702_v56  ;;  %v4707_v42 = vpop.xlane.xlu0 %4706 }
 0x9e6   : > { %v4470_v61 = vsel %vm15308_vm10, %v4447_v21, 0  ;;  %v4461_v45 = vsel %vm15312_vm12, %v15311_v11, 0  ;;  %v4455_v32 = vsel %vm15314_vm7, %v4442_v52, 0  ;;  %v4708_v19 = vcvt.f32.s32 %v4707_v42 }
 0x9e7   : > { %4472 = vmatpush.bf16.xpose.msra.mxu2 %v4470_v61  ;;  %v4441_v22 = vpack.c.bf16 %v4408_v60, %v4406_v25  ;;  %v4662_v6 = vshll.u32 %v4661_v41, 16  ;;  %v4440_v63 = vpack.c.bf16 %v4403_v62, %v4401_v3  ;;  %v4678_v48 = vshll.u32 %v4677_v51, 16  ;;  %v4723_v25 = vpop.xlane.xlu1 %4722 }
 0x9e8   : > { %v4710_v21 = vshll.u32 %v4709_v16, 16  ;;  %v13117_v52 = vsel %vm4822_vm15, 2147483648, %v15325_v44  ;;  %v5100_v60 = vand.u32 65535, %v12837_v2  ;;  %v15328_v2 = vld [vmem:[#allocation60_spill] sm:$0xff]  ;;  %v4757_v51 = vcvt.f32.s32 %v12874_v4  ;;  %v15330_v4 = vld [vmem:[#allocation21_spill] sm:$0xff] }
 0x9e9   : > { %v4663_v24 = vadd.s32 %v4662_v6, %v4660_v5  ;;  %v4452_v14 = vsel %vm15315_vm3, %v4441_v22, 0  ;;  %v4449_v49 = vsel %vm15316_vm11, %v4440_v63, 0  ;;  %v15327_v5 = vld [vmem:[#allocation44_spill] sm:$0xff]  ;;  %v4724_v6 = vcvt.f32.s32 %v4723_v25 }
 0x9ea   : > { %v4711_v59 = vadd.s32 %v4710_v21, %v4708_v19  ;;  %v5116_v21 = vand.u32 65535, %v12895_v58  ;;  %v4758_v35 = vshll.u32 %v4757_v51, 16  ;;  %v15332_v58 = vld [vmem:[#allocation40_spill] sm:$0xff]  ;;  %v5164_v25 = vand.u32 65535, %v12962_v17  ;;  %15373 = vst [vmem:[#allocation44_spill] sm:$0xff] %v13426_v12 }
 0x9eb   : > { %v4784_v29 = vand.u32 255, %v4663_v24 }
 0x9ec   : > { %v4787_v39 = vand.u32 255, %v4711_v59  ;;  %v5166_v51 = vcvt.s32.f32 %v5164_v25 }
 0x9ed   : > { %v4800_v53 = vsub.s32 255, %v4784_v29  ;;  %v5148_v29 = vand.u32 65535, %v12888_v57 }
 0x9ee   : > { %v13086_v18 = vsub.s32 255, %v4787_v39  ;;  %v5118_v39 = vcvt.s32.f32 %v5116_v21 }
 0x9ef   : > { %4473 = vmatpush.bf16.xpose.msra.mxu2 %v4467_v38  ;;  %v4443_v38 = vpack.c.bf16 %v4418_v27, %v4416_v8  ;;  %vm4824_vm10 = vcmp.eq.s32.totalorder %v7818_v43, %v4800_v53  ;;  %vm4825_vm12 = vcmp.eq.s32.totalorder %v7821_v50, %v4800_v53  ;;  %v15320_v27 = vld [vmem:[#allocation59_spill] sm:$0xff] }
 0x9f1   : > { %v4458_v9 = vsel %vm15313_vm5, %v4443_v38, 0  ;;  %v4741_v38 = vcvt.f32.s32 %v12829_v26 }
 0x9f3   : > { %v4742_v22 = vshll.u32 %v4741_v38, 16 }
 0x9f7   : > { %4474 = vmatpush.bf16.xpose.msra.mxu2 %v4464_v31 }
 0x9ff   : > { %4475 = vmatpush.bf16.xpose.msra.mxu2 %v4461_v45  ;;  %v15321_v45 = vld [vmem:[#allocation41_spill] sm:$0xff] }
 0xa07   : > { %4476 = vmatpush.bf16.xpose.msra.mxu2 %v4458_v9  ;;  %v4675_v0 = vpop.xlane.xlu2 %4674  ;;  %v13111_v9 = vsel %vm4823_vm14, 2147483648, %v15324_v28  ;;  %v15336_v28 = vld [vmem:[#allocation51_spill] sm:$0xff] }
 0xa08   : > { %v4676_v46 = vcvt.f32.s32 %v4675_v0  ;;  %vm5210_vm9 = vcmp.gt.s32.totalorder %v13117_v52, %v13111_v9  ;;  %v15329_v0 = vld [vmem:[#allocation10_spill] sm:$0xff] }
 0xa09   : > { %v13135_v16 = vsel %vm5210_vm9, %v13117_v52, %v13111_v9  ;;  %vm14664_vm9 = vcmp.eq.s32.totalorder %v7821_v50, %v13086_v18 }
 0xa0a   : > { %v4679_v33 = vadd.s32 %v4678_v48, %v4676_v46  ;;  %v13146_v48 = vsel %vm4824_vm10, 2147483648, %v15330_v4  ;;  %v15331_v46 = vld [vmem:[#allocation16_spill] sm:$0xff] }
 0xa0c   : > { %v4785_v20 = vand.u32 255, %v4679_v33  ;;  %v5213_v33 = vshra.s32 %v13135_v16, 16 }
 0xa0e   : > { %v13060_v56 = vsub.s32 255, %v4785_v20 }
 0xa0f   : > { %4477 = vmatpush.bf16.xpose.msra.mxu2 %v4455_v32  ;;  %v4691_v30 = vpop.xlane.xlu2 %4690  ;;  %v15326_v32 = vld [vmem:[#allocation23_spill] sm:$0xff] }
 0xa10   : > { %vm4827_vm4 = vcmp.eq.s32.totalorder %v7821_v50, %v13060_v56  ;;  %v4692_v61 = vcvt.f32.s32 %v4691_v30  ;;  %vm4826_vm1 = vcmp.eq.s32.totalorder %v7818_v43, %v13060_v56  ;;  %v4725_v41 = vcvt.f32.s32 %v15326_v32 }
 0xa11   : > { %vm7028_vm5 = vmpackc.low %vm4826_vm1, %vm4824_vm10 }
 0xa12   : > { %7029 = vmatmul.msk.bf16.gmra.mxu0 %vm7028_vm5, %v14735_v7  ;;  %vm13080_vm7 = vmpackc.low %vm4827_vm4, %vm4825_vm12  ;;  %vm4830_vm5 = vcmp.eq.s32.totalorder %v7818_v43, %v13086_v18  ;;  %v4726_v15 = vshll.u32 %v4725_v41, 16 }
 0xa13   : > { %v13187_v44 = vsel %vm4830_vm5, 2147483648, %v15336_v28 }
 0xa14   : > { %v4727_v63 = vadd.s32 %v4726_v15, %v4724_v6  ;;  %15337 = vst [vmem:[#allocation59_spill] sm:$0xff] %v13187_v44  ;;  %v15340_v6 = vld [vmem:[#allocation48_spill] sm:$0xff] }
 0xa16   : > { %v4788_v53 = vand.u32 255, %v4727_v63  ;;  %v15344_v63 = vld [vmem:[#allocation58_spill] sm:$0xff] }
 0xa17   : > { %4478 = vmatpush.bf16.xpose.msra.mxu2 %v4452_v14  ;;  %v5102_v14 = vcvt.s32.f32 %v5100_v60 }
 0xa1e   : > { %v4739_v11 = vpop.xlane.xlu2 %4738 }
 0xa1f   : > { %4479 = vmatpush.bf16.xpose.msra.mxu2 %v4449_v49  ;;  %v4740_v26 = vcvt.f32.s32 %v4739_v11  ;;  %v4773_v49 = vcvt.f32.s32 %v12958_v47  ;;  %v13163_v47 = vcvt.s32.f32 %v5213_v33  ;;  %v15334_v11 = vld [vmem:[#allocation24_spill] sm:$0xff] }
 0xa21   : > { %v4743_v3 = vadd.s32 %v4742_v22, %v4740_v26  ;;  %v5132_v26 = vand.u32 65535, %v12971_v36  ;;  %v15339_v22 = vld [vmem:[#allocation36_spill] sm:$0xff] }
 0xa23   : > { %v4789_v57 = vand.u32 255, %v4743_v3 }
 0xa26   : > { %6987 = vmatmul.msk.bf16.vlgmr.msra.gmra.mxu2 %vm15315_vm3, %v15319_v54  ;;  %v13124_v24 = vpop.xlane.xlu2 %5104 }
 0xa27   : > { %4969 = vmatpush.bf16.msrb.mxu2 %v12363_v10  ;;  %v4695_v10 = vadd.s32 %v4694_v1, %v4692_v61  ;;  %vm5106_vm14 = vcmp.eq.f32.partialorder %v12880_v34, %v13124_v24  ;;  %v13141_v34 = vsel %vm4825_vm12, 2147483648, %v15329_v0  ;;  %v5150_v1 = vcvt.s32.f32 %v5148_v29  ;;  %v15343_v0 = vld [vmem:[#allocation47_spill] sm:$0xff] }
 0xa28   : > { %v5107_v42 = vsel %vm5106_vm14, %v5102_v14, -inf  ;;  %vm5226_vm15 = vcmp.gt.s32.totalorder %v13146_v48, %v13141_v34  ;;  %v13165_v61 = vsub.s32 255, %v4789_v57  ;;  %v15341_v14 = vld [vmem:[#allocation11_spill] sm:$0xff]  ;;  %v5134_v29 = vcvt.s32.f32 %v5132_v26 }
 0xa29   : > { %v4786_v31 = vand.u32 255, %v4695_v10  ;;  %v4755_v62 = vpop.xlane.xlu0 %4754  ;;  %5108 = vmax.xlane.f32.xlu2 %v5107_v42  ;;  %v13171_v54 = vsel %vm5226_vm15, %v13146_v48, %v13141_v34  ;;  %v13208_v15 = vsel %vm4826_vm1, 2147483648, %v15341_v14  ;;  %v15342_v42 = vld [vmem:[#allocation17_spill] sm:$0xff]  ;;  %v15348_v57 = vld [vmem:[#allocation63_spill] sm:$0xff] }
 0xa2a   : > { %v4756_v19 = vcvt.f32.s32 %v4755_v62  ;;  %v5229_v41 = vshra.s32 %v13171_v54, 16  ;;  %v13202_v62 = vsel %vm4827_vm4, 2147483648, %v15340_v6 }
 0xa2b   : > { %4970 = vmatpush.bf16.msrb.mxu2 %v12386_v13  ;;  %v13089_v13 = vsub.s32 255, %v4786_v31  ;;  %v15333_v31 = vld [vmem:[#allocation52_spill] sm:$0xff]  ;;  %vm5242_vm15 = vcmp.gt.s32.totalorder %v13208_v15, %v13202_v62 }
 0xa2c   : > { %v4759_v59 = vadd.s32 %v4758_v35, %v4756_v19  ;;  %v13223_v56 = vcvt.s32.f32 %v5229_v41  ;;  %v15346_v19 = vld [vmem:[#allocation14_spill] sm:$0xff] }
 0xa2d   : > { %vm4828_vm11 = vcmp.eq.s32.totalorder %v7818_v43, %v13089_v13 }
 0xa2e   : > { %vm13102_vm3 = vmpackc.low %vm4830_vm5, %vm4828_vm11  ;;  %v4790_v38 = vand.u32 255, %v4759_v59 }
 0xa2f   : > { %4971 = vmatpush.bf16.msrb.mxu2 %v15320_v27  ;;  %7031 = vmatmul.msk.bf16.gmra.mxu0 %vm13102_vm3, %v14735_v7  ;;  %v13156_v20 = vpop.xlane.xlu2 %5152  ;;  %v4774_v27 = vshll.u32 %v4773_v49, 16  ;;  %vm4834_vm3 = vcmp.eq.s32.totalorder %v7818_v43, %v13165_v61 }
 0xa30   : > { %vm5154_vm10 = vcmp.eq.f32.partialorder %v12950_v40, %v13156_v20  ;;  %v13178_v40 = vsel %vm14664_vm9, 2147483648, %v15334_v11  ;;  %v13214_v36 = vsub.s32 255, %v4790_v38 }
 0xa31   : > { %v13158_v30 = vpop.xlane.xlu0 %5120  ;;  %v5155_v10 = vsel %vm5154_vm10, %v5150_v1, -inf  ;;  %15335 = vst [vmem:[#allocation50_spill] sm:$0xff] %v13178_v40  ;;  %5216 = vmax.xlane.f32.xlu2 %v13163_v47  ;;  %vm4829_vm10 = vcmp.eq.s32.totalorder %v7821_v50, %v13089_v13 }
 0xa32   : > { %vm5122_vm12 = vcmp.eq.f32.partialorder %v12952_v37, %v13158_v30  ;;  %5156 = vmax.xlane.f32.xlu1 %v5155_v10  ;;  %v13181_v37 = vsub.s32 255, %v4788_v53  ;;  %v13264_v53 = vsel %vm5242_vm15, %v13208_v15, %v13202_v62  ;;  %v15354_v10 = vld [vmem:[#allocation32_spill] sm:$0xff] }
 0xa33   : > { %4972 = vmatpush.bf16.msrb.mxu2 %v15321_v45  ;;  %v5123_v45 = vsel %vm5122_vm12, %v5118_v39, -inf  ;;  %v15353_v39 = vld [vmem:[#allocation15_spill] sm:$0xff]  ;;  %v5245_v38 = vshra.s32 %v13264_v53, 16 }
 0xa34   : > { %5124 = vmax.xlane.f32.xlu0 %v5123_v45  ;;  %vm14661_vm5 = vcmp.eq.s32.totalorder %v7821_v50, %v13181_v37  ;;  %vm4832_vm14 = vcmp.eq.s32.totalorder %v7818_v43, %v13181_v37  ;;  %v15356_v45 = vld [vmem:[#allocation64_spill] sm:$0xff] }
 0xa35   : > { %vm7032_vm4 = vmpackc.low %vm4834_vm3, %vm4832_vm14  ;;  %v13237_v4 = vsel %vm14661_vm5, 2147483648, %v15344_v63 }
 0xa36   : > { %15345 = vst [vmem:[#allocation41_spill] sm:$0xff] %v13237_v4 }
 0xa37   : > { %4973 = vmatpush.bf16.msrb.mxu2 %v15327_v5 }
 0xa38   : > { %v4771_v8 = vpop.xlane.xlu1 %4770 }
 0xa39   : > { %v4772_v60 = vcvt.f32.s32 %v4771_v8  ;;  %5232 = vmax.xlane.f32.xlu2 %v13223_v56  ;;  %v5180_v8 = vand.u32 65535, %v15356_v45  ;;  %v15363_v45 = vld [vmem:[#allocation25_spill] sm:$0xff] }
 0xa3b   : > { %4974 = vmatpush.bf16.msrb.mxu2 %v15328_v2  ;;  %v4775_v5 = vadd.s32 %v4774_v27, %v4772_v60  ;;  %v13218_v2 = vpop.xlane.xlu0 %5168  ;;  %v15355_v27 = vld [vmem:[#allocation5_spill] sm:$0xff]  ;;  %v15357_v60 = vld [vmem:[#allocation43_spill] sm:$0xff] }
 0xa3c   : > { %vm5170_vm1 = vcmp.eq.f32.partialorder %v15342_v42, %v13218_v2  ;;  %v13300_v11 = vsel %vm4828_vm11, 2147483648, %v15355_v27  ;;  %vm7038_vm11 = vmpackc.low %vm4815_vm0, %vm4813_vm6  ;;  %v15361_v42 = vld [vmem:[#allocation6_spill] sm:$0xff] }
 0xa3d   : > { %v4791_v17 = vand.u32 255, %v4775_v5  ;;  %v5171_v21 = vsel %vm5170_vm1, %v5166_v51, -inf  ;;  %vm4837_vm1 = vcmp.eq.s32.totalorder %v7821_v50, %v13214_v36  ;;  %v5182_v5 = vcvt.s32.f32 %v5180_v8  ;;  %v15360_v51 = vld [vmem:[#allocation28_spill] sm:$0xff] }
 0xa3e   : > { %5172 = vmax.xlane.f32.xlu1 %v5171_v21  ;;  %v13376_v8 = vsel %vm4837_vm1, 2147483648, %v15363_v45 }
 0xa3f   : > { %4975 = vmatpush.bf16.msrb.mxu2 %v15331_v46  ;;  %v13225_v3 = vsub.s32 255, %v4791_v17  ;;  %7033 = vmatmul.msk.bf16.gmra.mxu0 %vm7032_vm4, %v14735_v7  ;;  %v13240_v46 = vsel %vm4832_vm14, 2147483648, %v15346_v19  ;;  %vm4836_vm14 = vcmp.eq.s32.totalorder %v7818_v43, %v13214_v36  ;;  %v7533_v19 = vld [vmem:[%s8022_s10 + $0x10] sm:$0xff]  ;;  %15364 = vst [vmem:[#allocation22_spill] sm:$0xff] %v13376_v8 }
 0xa40   : > { %15347 = vst [vmem:[#allocation7_spill] sm:$0xff] %v13240_v46  ;;  %v13243_v33 = vpop.xlane.xlu1 %5136 }
 0xa41   : > { %vm5138_vm12 = vcmp.eq.f32.partialorder %v15348_v57, %v13243_v33  ;;  %vm14663_vm4 = vcmp.eq.s32.totalorder %v7818_v43, %v13225_v3  ;;  %vm14662_vm5 = vcmp.eq.s32.totalorder %v7821_v50, %v13225_v3 }
 0xa42   : > { %v5139_v49 = vsel %vm5138_vm12, %v5134_v29, -inf  ;;  %vm13285_vm15 = vmpackc.low %vm14662_vm5, %vm4837_vm1  ;;  %vm5290_vm12 = vcmp.gt.s32.totalorder %v13240_v46, %v13237_v4  ;;  %v13347_v29 = vsel %vm4834_vm3, 2147483648, %v15361_v42  ;;  %vm15372_vm1 = vcmp.eq.s32.totalorder %v7821_v50, %v13181_v37 }
 0xa43   : > { %4976 = vmatpush.bf16.msrb.mxu2 %v15332_v58  ;;  %5140 = vmax.xlane.f32.xlu0 %v5139_v49  ;;  %v13321_v26 = vsel %vm5290_vm12, %v13240_v46, %v13237_v4  ;;  %v5212_v37 = vand.u32 65535, %v13135_v16  ;;  %v5159_v16 = vcvt.f32.s32 %v13156_v20  ;;  %v15377_v58 = vld [vmem:[#allocation34_spill] sm:$0xff]  ;;  %v5228_v20 = vand.u32 65535, %v13171_v54 }
 0xa44   : > { %v5293_v17 = vshra.s32 %v13321_v26, 16 }
 0xa45   : > { %v5230_v54 = vcvt.s32.f32 %v5228_v20 }
 0xa46   : > { %7037 = vmatmul.msk.bf16.vlgmr.msrb.gmra.mxu2 %vm12688_vm8, %v14735_v7  ;;  %vm5274_vm8 = vcmp.gt.s32.totalorder %v13187_v44, %v13178_v40  ;;  %v13355_v57 = vcvt.s32.f32 %v5293_v17 }
 0xa47   : > { %6076 = vmatpush.bf16.msra.mxu2 %v15333_v31  ;;  %v13250_v35 = vsel %vm5274_vm8, %v13187_v44, %v13178_v40  ;;  %vm13272_vm8 = vmpackc.low %vm14663_vm4, %vm4836_vm14  ;;  %v13294_v31 = vsel %vm4829_vm10, 2147483648, %v15354_v10  ;;  %vm4835_vm4 = vcmp.eq.s32.totalorder %v7821_v50, %v13165_v61 }
 0xa48   : > { %v5277_v1 = vshra.s32 %v13250_v35, 16  ;;  %vm5258_vm5 = vcmp.gt.s32.totalorder %v13300_v11, %v13294_v31  ;;  %v13311_v32 = vpop.xlane.xlu1 %5184 }
 0xa49   : > { %vm5186_vm9 = vcmp.eq.f32.partialorder %v13012_v55, %v13311_v32  ;;  %v13333_v14 = vsel %vm5258_vm5, %v13300_v11, %v13294_v31  ;;  %v13341_v55 = vsel %vm4835_vm4, 2147483648, %v15360_v51 }
 0xa4a   : > { %v13306_v28 = vcvt.s32.f32 %v5277_v1  ;;  %v5187_v6 = vsel %vm5186_vm9, %v5182_v5, -inf  ;;  %v5261_v21 = vshra.s32 %v13333_v14, 16  ;;  %vm5306_vm0 = vcmp.gt.s32.totalorder %v13347_v29, %v13341_v55  ;;  %v15368_v5 = vld [vmem:[#allocation37_spill] sm:$0xff] }
 0xa4b   : > { %6077 = vmatpush.bf16.msra.mxu2 %v15339_v22  ;;  %v13329_v22 = vcvt.s32.f32 %v5245_v38  ;;  %5188 = vmax.xlane.f32.xlu2 %v5187_v6  ;;  %v13369_v27 = vsel %vm5306_vm0, %v13347_v29, %v13341_v55  ;;  %v15365_v38 = vld [vmem:[#allocation9_spill] sm:$0xff]  ;;  %vm15369_vm3 = vcmp.eq.s32.totalorder %v7821_v50, %v15368_v5 }
 0xa4c   : > { %5280 = vmax.xlane.f32.xlu1 %v13306_v28  ;;  %v13365_v10 = vcvt.s32.f32 %v5261_v21  ;;  %v5309_v41 = vshra.s32 %v13369_v27, 16  ;;  %vm7040_vm5 = vmpackc.low %vm15369_vm3, %vm4817_vm2  ;;  %vm15371_vm2 = vcmp.eq.s32.totalorder %v7821_v50, %v13086_v18 }
 0xa4d   : > { %5248 = vmax.xlane.f32.xlu0 %v13329_v22 }
 0xa4e   : > { %v13395_v6 = vcvt.s32.f32 %v5309_v41 }
 0xa4f   : > { %6078 = vmatpush.bf16.msra.mxu2 %v15343_v0  ;;  %v15362_v0 = vld [vmem:[#allocation67_spill] sm:$0xff]  ;;  %7035 = vmatmul.msk.bf16.gmra.mxu0 %vm13272_vm8, %v14735_v7 }
 0xa50   : > { %v5196_v63 = vand.u32 65535, %v15362_v0  ;;  %v13359_v49 = vpop.xlane.xlu1 %5200  ;;  %v5111_v0 = vcvt.f32.s32 %v13124_v24 }
 0xa51   : > { %vm5202_vm6 = vcmp.eq.f32.partialorder %v13020_v23, %v13359_v49  ;;  %v13382_v23 = vsel %vm4836_vm14, 2147483648, %v15365_v38  ;;  %vm7046_vm14 = vmpackc.low %vm15371_vm2, %vm4829_vm10  ;;  %v5214_v38 = vcvt.s32.f32 %v5212_v37  ;;  %vm15378_vm10 = vcmp.eq.s32.totalorder %v7818_v43, %v13225_v3 }
 0xa52   : > { %v5198_v1 = vcvt.s32.f32 %v5196_v63  ;;  %15366 = vst [vmem:[#allocation23_spill] sm:$0xff] %v13382_v23  ;;  %vm5322_vm9 = vcmp.gt.s32.totalorder %v13382_v23, %v13376_v8 }
 0xa53   : > { %6079 = vmatpush.bf16.msra.mxu2 %v15353_v39  ;;  %v7534_v39 = vld [vmem:[%s8022_s10 + $0x8] sm:$0xff]  ;;  %v13399_v36 = vsel %vm5322_vm9, %v13382_v23, %v13376_v8 }
 0xa54   : > { %5296 = vmax.xlane.f32.xlu1 %v13355_v57  ;;  %v5203_v59 = vsel %vm5202_vm6, %v5198_v1, -inf  ;;  %v5325_v17 = vshra.s32 %v13399_v36, 16  ;;  %v5112_v1 = vshll.u32 %v5111_v0, 16  ;;  %v13449_v0 = vsel %vm15378_vm10, 2147483648, %v15377_v58 }
 0xa55   : > { %5264 = vmax.xlane.f32.xlu0 %v13365_v10  ;;  %5204 = vmax.xlane.f32.xlu2 %v5203_v59  ;;  %15379 = vst [vmem:[#allocation21_spill] sm:$0xff] %v13449_v0  ;;  %v5276_v58 = vand.u32 65535, %v13250_v35 }
 0xa56   : > { %7039 = vmatmul.msk.bf16.gmra.mxu2 %vm7038_vm11, %v14735_v7  ;;  %v13403_v51 = vcvt.s32.f32 %v5325_v17 }
 0xa57   : > { %6080 = vmatpush.bf16.msra.mxu2 %v15357_v60  ;;  %v7535_v60 = vld [vmem:[%s8022_s10] sm:$0xff] }
 0xa5b   : > { %6081 = vmatpush.bf16.msra.mxu2 %v7533_v19 }
 0xa5d   : > { %5312 = vmax.xlane.f32.xlu2 %v13395_v6 }
 0xa5f   : > { %6082 = vmatpush.bf16.msra.mxu2 %v7534_v39  ;;  %v5127_v39 = vcvt.f32.s32 %v13158_v30 }
 0xa61   : > { %v5128_v41 = vshll.u32 %v5127_v39, 16  ;;  %v5143_v39 = vcvt.f32.s32 %v13243_v33 }
 0xa63   : > { %6083 = vmatpush.bf16.msra.mxu2 %v7535_v60  ;;  %v13442_v60 = vpop.f32.mrf.mxu0 }
 0xa64   : > { %15376 = vst [vmem:[#allocation10_spill] sm:$0xff] %v13442_v60 }
 0xa65   : > { %5328 = vmax.xlane.f32.xlu2 %v13403_v51 }
 0xa66   : > { %7041 = vmatmul.msk.bf16.gmra.mxu2 %vm7040_vm5, %v14735_v7 }
 0xa76   : > { %7043 = vmatmul.msk.bf16.gmra.mxu2 %vm12931_vm13, %v14735_v7  ;;  %vm7048_vm13 = vmpackc.low %vm4835_vm4, %vm15372_vm1  ;;  %vm15381_vm4 = vcmp.eq.s32.totalorder %v7821_v50, %v13225_v3 }
 0xa86   : > { %7045 = vmatmul.msk.bf16.gmra.mxu2 %vm13080_vm7, %v14735_v7 }
 0xa96   : > { %7047 = vmatmul.msk.bf16.gmra.mxu2 %vm7046_vm14, %v14735_v7 }
 0xa9c   : > { %v5109_v13 = vpop.xlane.xlu2 %5108 }
 0xa9d   : > { %v5110_v21 = vcvt.f32.s32 %v5109_v13  ;;  %v15380_v13 = vld [vmem:[#allocation39_spill] sm:$0xff] }
 0xa9f   : > { %v5113_v61 = vadd.s32 %v5112_v1, %v5110_v21  ;;  %v5160_v21 = vshll.u32 %v5159_v16, 16 }
 0xaa1   : > { %v5354_v25 = vand.u32 255, %v5113_v61 }
 0xaa3   : > { %v13458_v1 = vsub.s32 255, %v5354_v25  ;;  %v5175_v25 = vcvt.f32.s32 %v13218_v2 }
 0xaa4   : > { %v13438_v45 = vpop.xlane.xlu2 %5216 }
 0xaa5   : > { %v5157_v59 = vpop.xlane.xlu1 %5156  ;;  %vm5218_vm7 = vcmp.eq.f32.partialorder %v13163_v47, %v13438_v45  ;;  %v13455_v47 = vsel %vm15381_vm4, 2147483648, %v15380_v13  ;;  %vm5386_vm12 = vcmp.eq.s32.totalorder %v7818_v43, %v13458_v1  ;;  %vm5387_vm6 = vcmp.eq.s32.totalorder %v7821_v50, %v13458_v1 }
 0xaa6   : > { %7049 = vmatmul.msk.bf16.gmra.mxu2 %vm7048_vm13, %v14735_v7  ;;  %v5219_v5 = vsel %vm5218_vm7, %v5214_v38, -inf  ;;  %v5158_v42 = vcvt.f32.s32 %v5157_v59  ;;  %15382 = vst [vmem:[#allocation16_spill] sm:$0xff] %v13455_v47  ;;  %vm5338_vm8 = vcmp.gt.s32.totalorder %v13449_v0, %v13455_v47  ;;  %v5223_v60 = vcvt.f32.s32 %v13438_v45 }
 0xaa7   : > { %v5125_v24 = vpop.xlane.xlu0 %5124  ;;  %5220 = vmax.xlane.f32.xlu0 %v5219_v5  ;;  %v13489_v16 = vsel %vm5338_vm8, %v13449_v0, %v13455_v47  ;;  %v15385_v5 = vmov 0 }
 0xaa8   : > { %v5126_v30 = vcvt.f32.s32 %v5125_v24  ;;  %v5161_v59 = vadd.s32 %v5160_v21, %v5158_v42  ;;  %v5341_v20 = vshra.s32 %v13489_v16, 16  ;;  %v5244_v21 = vand.u32 65535, %v13264_v53 }
 0xaa9   : > { %v13429_v63 = vpop.f32.mrf.mxu2 }
 0xaaa   : > { %15374 = vst [vmem:[#allocation60_spill] sm:$0xff] %v13429_v63  ;;  %v5129_v17 = vadd.s32 %v5128_v41, %v5126_v30  ;;  %v13471_v41 = vpop.f32.mrf.mxu0  ;;  %v5144_v30 = vshll.u32 %v5143_v39, 16  ;;  %v5191_v39 = vcvt.f32.s32 %v13311_v32  ;;  %v13515_v35 = vcvt.s32.f32 %v5341_v20  ;;  %v15394_v20 = vld [vmem:[#allocation8_spill] sm:$0xff] }
 0xaab   : > { %15384 = vst [vmem:[#allocation52_spill] sm:$0xff] %v13471_v41  ;;  %v5246_v32 = vcvt.s32.f32 %v5244_v21 }
 0xaac   : > { %v5355_v37 = vand.u32 255, %v5129_v17  ;;  %v13463_v24 = vpop.xlane.xlu2 %5232  ;;  %v5357_v17 = vand.u32 255, %v5161_v59 }
 0xaae   : > { %v13461_v61 = vsub.s32 255, %v5355_v37  ;;  %v5176_v37 = vshll.u32 %v5175_v25, 16 }
 0xab0   : > { %vm5388_vm11 = vcmp.eq.s32.totalorder %v7818_v43, %v13461_v61  ;;  %vm5389_vm0 = vcmp.eq.s32.totalorder %v7821_v50, %v13461_v61 }
 0xab1   : > { %v13467_v38 = vpop.f32.mrf.mxu2  ;;  %v5173_v3 = vpop.xlane.xlu1 %5172  ;;  %vm7085_vm9 = vmpackc.low %vm5388_vm11, %vm5386_vm12 }
 0xab2   : > { %15383 = vst [vmem:[#allocation40_spill] sm:$0xff] %v13467_v38  ;;  %vm13498_vm3 = vmpackc.low %vm5389_vm0, %vm5387_vm6  ;;  %7086 = vmatmul.msk.bf16.vlgmr.msra.gmra.mxu1 %vm7085_vm9, %v14735_v7  ;;  %v5174_v13 = vcvt.f32.s32 %v5173_v3 }
 0xab3   : > { %v15386_v5 = vsel %vm13498_vm3, 4294967295, %v15385_v5 }
 0xab4   : > { %15387 = vst [vmem:[#allocation24_spill] sm:$0xff] %v15386_v5  ;;  %v5207_v5 = vcvt.f32.s32 %v13359_v49  ;;  %v5239_v49 = vcvt.f32.s32 %v13463_v24 }
 0xab6   : > { %7051 = vmatmul.msk.bf16.gmra.mxu2 %vm13285_vm15, %v14735_v7  ;;  %vm5234_vm15 = vcmp.eq.f32.partialorder %v13223_v56, %v13463_v24  ;;  %v5141_v33 = vpop.xlane.xlu0 %5140 }
 0xab7   : > { %v5235_v56 = vsel %vm5234_vm15, %v5230_v54, -inf  ;;  %v5142_v42 = vcvt.f32.s32 %v5141_v33  ;;  %v13507_v54 = vsub.s32 255, %v5357_v17  ;;  %v5177_v33 = vadd.s32 %v5176_v37, %v5174_v13  ;;  %v13520_v17 = vpop.f32.mrf.mxu0 }
 0xab8   : > { %5236 = vmax.xlane.f32.xlu0 %v5235_v56  ;;  %v5278_v56 = vcvt.s32.f32 %v5276_v58  ;;  %15389 = vst [vmem:[#allocation27_spill] sm:$0xff] %v13520_v17  ;;  %v5260_v37 = vand.u32 65535, %v13333_v14  ;;  %v5224_v17 = vshll.u32 %v5223_v60, 16  ;;  %v5340_v60 = vand.u32 65535, %v13489_v16 }
 0xab9   : > { %v5145_v2 = vadd.s32 %v5144_v30, %v5142_v42  ;;  %v5292_v30 = vand.u32 65535, %v13321_v26  ;;  %v5192_v42 = vshll.u32 %v5191_v39, 16  ;;  %vm5393_vm2 = vcmp.eq.s32.totalorder %v7821_v50, %v13507_v54 }
 0xaba   : > { %v15391_v26 = vmov 0  ;;  %vm5392_vm8 = vcmp.eq.s32.totalorder %v7818_v43, %v13507_v54 }
 0xabb   : > { %v5356_v19 = vand.u32 255, %v5145_v2  ;;  %v5358_v2 = vand.u32 255, %v5177_v33 }
 0xabd   : > { %v5372_v63 = vsub.s32 255, %v5356_v19 }
 0xabe   : > { %v5189_v25 = vpop.xlane.xlu2 %5188 }
 0xabf   : > { %v13509_v38 = vpop.xlane.xlu1 %5280  ;;  %vm5391_vm14 = vcmp.eq.s32.totalorder %v7821_v50, %v5372_v63  ;;  %v5190_v58 = vcvt.f32.s32 %v5189_v25  ;;  %vm5390_vm13 = vcmp.eq.s32.totalorder %v7818_v43, %v5372_v63  ;;  %v13565_v63 = vpop.f32.mrf.mxu0 }
 0xac0   : > { %vm5282_vm5 = vcmp.eq.f32.partialorder %v13306_v28, %v13509_v38  ;;  %v13517_v53 = vpop.xlane.xlu0 %5248  ;;  %5344 = vmax.xlane.f32.xlu0 %v13515_v35  ;;  %v15390_v28 = vld [vmem:[#allocation38_spill] sm:$0xff]  ;;  %vm13533_vm7 = vmpackc.low %vm5393_vm2, %vm5391_vm14  ;;  %v5646_v21 = vsel %vm5390_vm13, 2147483648, %v15394_v20  ;;  %15396 = vst [vmem:[#allocation11_spill] sm:$0xff] %v13565_v63 }
 0xac1   : > { %v5283_v3 = vsel %vm5282_vm5, %v5278_v56, -inf  ;;  %vm5250_vm1 = vcmp.eq.f32.partialorder %v13329_v22, %v13517_v53  ;;  %v5647_v19 = vsel %vm5391_vm14, 2147483648, %v15390_v28  ;;  %v15392_v26 = vsel %vm13533_vm7, 4294967295, %v15391_v26  ;;  %vm7087_vm15 = vmpackc.low %vm5392_vm8, %vm5390_vm13 }
 0xac2   : > { %5284 = vmax.xlane.f32.xlu2 %v5283_v3  ;;  %v5251_v13 = vsel %vm5250_vm1, %v5246_v32, -inf  ;;  %15393 = vst [vmem:[#allocation36_spill] sm:$0xff] %v15392_v26  ;;  %v5193_v22 = vadd.s32 %v5192_v42, %v5190_v58  ;;  %vm5708_vm10 = vcmp.gt.s32.totalorder %v5646_v21, %v5647_v19  ;;  %v5294_v32 = vcvt.s32.f32 %v5292_v30  ;;  %7088 = vmatmul.msk.bf16.gmra.mxu1 %vm7087_vm15, %v14735_v7  ;;  %v15397_v58 = vld [vmem:[#allocation56_spill] sm:$0xff] }
 0xac3   : > { %5252 = vmax.xlane.f32.xlu1 %v5251_v13  ;;  %v13541_v39 = vsel %vm5708_vm10, %v5646_v21, %v5647_v19  ;;  %v5374_v28 = vsub.s32 255, %v5358_v2  ;;  %v5262_v30 = vcvt.s32.f32 %v5260_v37  ;;  %v15398_v2 = vld [vmem:[#allocation57_spill] sm:$0xff] }
 0xac4   : > { %v5359_v56 = vand.u32 255, %v5193_v22  ;;  %v15399_v21 = vld [vmem:[#allocation53_spill] sm:$0xff]  ;;  %v15400_v22 = vld [vmem:[#allocation42_spill] sm:$0xff] }
 0xac5   : > { %vm5395_vm1 = vcmp.eq.s32.totalorder %v7821_v50, %v5374_v28  ;;  %v5643_v37 = vsel %vm5387_vm6, 2147483648, %v15400_v22 }
 0xac6   : > { %v5375_v33 = vsub.s32 255, %v5359_v56  ;;  %v5308_v56 = vand.u32 65535, %v13369_v27 }
 0xac7   : > { %v13543_v3 = vpop.xlane.xlu1 %5296 }
 0xac8   : > { %vm5298_vm4 = vcmp.eq.f32.partialorder %v13355_v57, %v13543_v3  ;;  %v13556_v42 = vpop.xlane.xlu0 %5264  ;;  %v13558_v19 = vpop.xlane.xlu2 %5204  ;;  %vm5397_vm5 = vcmp.eq.s32.totalorder %v7821_v50, %v5375_v33  ;;  %vm5396_vm14 = vcmp.eq.s32.totalorder %v7818_v43, %v5375_v33  ;;  %v15412_v33 = vld [vmem:[#allocation20_spill] sm:$0xff] }
 0xac9   : > { %v13511_v59 = vpop.f32.mrf.mxu2  ;;  %v5299_v14 = vsel %vm5298_vm4, %v5294_v32, -inf  ;;  %vm5266_vm9 = vcmp.eq.f32.partialorder %v13365_v10, %v13556_v42  ;;  %v5653_v13 = vsel %vm5397_vm5, 2147483648, %v15397_v58  ;;  %v5652_v20 = vsel %vm5396_vm14, 2147483648, %v15398_v2  ;;  %vm13583_vm10 = vmpackc.low %vm5397_vm5, %vm5395_vm1 }
 0xaca   : > { %15388 = vst [vmem:[#allocation51_spill] sm:$0xff] %v13511_v59  ;;  %5300 = vmax.xlane.f32.xlu0 %v5299_v14  ;;  %v5267_v57 = vsel %vm5266_vm9, %v5262_v30, -inf  ;;  %v5642_v10 = vsel %vm5386_vm12, 2147483648, %v15399_v21  ;;  %vm5756_vm13 = vcmp.gt.s32.totalorder %v5652_v20, %v5653_v13  ;;  %v15401_v32 = vmov 0  ;;  %v15405_v21 = vld [vmem:[#allocation26_spill] sm:$0xff] }
 0xacb   : > { %5268 = vmax.xlane.f32.xlu1 %v5267_v57  ;;  %v15402_v32 = vsel %vm13583_vm10, 4294967295, %v15401_v32  ;;  %v13587_v14 = vsel %vm5756_vm13, %v5652_v20, %v5653_v13  ;;  %vm5676_vm4 = vcmp.gt.s32.totalorder %v5642_v10, %v5643_v37  ;;  %v5310_v58 = vcvt.s32.f32 %v5308_v56  ;;  %v15406_v20 = vld [vmem:[#allocation30_spill] sm:$0xff] }
 0xacc   : > { %15403 = vst [vmem:[#allocation17_spill] sm:$0xff] %v15402_v32  ;;  %v13595_v27 = vsel %vm5676_vm4, %v5642_v10, %v5643_v37  ;;  %v5324_v2 = vand.u32 65535, %v13399_v36  ;;  %v5644_v13 = vsel %vm5388_vm11, 2147483648, %v15405_v21  ;;  %v5645_v22 = vsel %vm5389_vm0, 2147483648, %v15406_v20  ;;  %v15407_v56 = vld [vmem:[#allocation62_spill] sm:$0xff]  ;;  %v15408_v10 = vld [vmem:[#allocation61_spill] sm:$0xff]  ;;  %v13614_v37 = vpop.f32.mrf.mxu0 }
 0xacd   : > { %v5648_v36 = vsel %vm5392_vm8, 2147483648, %v15408_v10  ;;  %15409 = vst [vmem:[#allocation58_spill] sm:$0xff] %v13614_v37  ;;  %vm5692_vm11 = vcmp.gt.s32.totalorder %v5644_v13, %v5645_v22  ;;  %vm5394_vm0 = vcmp.eq.s32.totalorder %v7818_v43, %v5374_v28  ;;  %v5651_v18 = vsel %vm5395_vm1, 2147483648, %v15412_v33 }
 0xace   : > { %vm7089_vm15 = vmpackc.low %vm5396_vm14, %vm5394_vm0  ;;  %v5326_v21 = vcvt.s32.f32 %v5324_v2  ;;  %v13631_v10 = vsel %vm5692_vm11, %v5644_v13, %v5645_v22  ;;  %v15413_v2 = vld [vmem:[#allocation12_spill] sm:$0xff]  ;;  %v5206_v59 = vcvt.f32.s32 %v13558_v19  ;;  %v5271_v40 = vcvt.f32.s32 %v13556_v42 }
 0xacf   : > { %v5650_v0 = vsel %vm5394_vm0, 2147483648, %v15413_v2  ;;  %vm15421_vm4 = vcmask 64512  }
 0xad0   : > { %v13591_v57 = vpop.xlane.xlu2 %5312  ;;  %vm5740_vm8 = vcmp.gt.s32.totalorder %v5650_v0, %v5651_v18 }
 0xad1   : > { %v13545_v25 = vpop.f32.mrf.mxu2  ;;  %vm5314_vm12 = vcmp.eq.f32.partialorder %v13395_v6, %v13591_v57  ;;  %v5649_v6 = vsel %vm5393_vm2, 2147483648, %v15407_v56 }
 0xad2   : > { %15395 = vst [vmem:[#allocation48_spill] sm:$0xff] %v13545_v25  ;;  %v5315_v1 = vsel %vm5314_vm12, %v5310_v58, -inf  ;;  %v5679_v58 = vshra.s32 %v13595_v27, 16  ;;  %vm5724_vm6 = vcmp.gt.s32.totalorder %v5648_v36, %v5649_v6  ;;  %7090 = vmatmul.msk.bf16.gmra.mxu1 %vm7089_vm15, %v14735_v7  ;;  %v5208_v25 = vshll.u32 %v5207_v5, 16 }
 0xad3   : > { %5316 = vmax.xlane.f32.xlu1 %v5315_v1  ;;  %v13629_v56 = vsel %vm5724_vm6, %v5648_v36, %v5649_v6  ;;  %v13648_v6 = vsel %vm5740_vm8, %v5650_v0, %v5651_v18  ;;  %v5255_v5 = vcvt.f32.s32 %v13517_v53 }
 0xad4   : > { %v13627_v54 = vcvt.s32.f32 %v5679_v58  ;;  %v5727_v47 = vshra.s32 %v13629_v56, 16  ;;  %15417 = vst [vmem:[#allocation64_spill] sm:$0xff] %v13648_v6  ;;  %v5743_v28 = vshra.s32 %v13648_v6, 16 }
 0xad6   : > { %v13644_v13 = vcvt.s32.f32 %v5727_v47  ;;  %v13657_v33 = vcvt.s32.f32 %v5743_v28 }
 0xad8   : > { %v13622_v61 = vpop.xlane.xlu2 %5328  ;;  %15415 = vst [vmem:[#allocation32_spill] sm:$0xff] %v13644_v13 }
 0xad9   : > { %v13589_v30 = vpop.f32.mrf.mxu2  ;;  %15411 = vst [vmem:[#allocation63_spill] sm:$0xff] %v13622_v61  ;;  %vm5330_vm2 = vcmp.eq.f32.partialorder %v13403_v51, %v13622_v61  ;;  %v5695_v51 = vshra.s32 %v13631_v10, 16 }
 0xada   : > { %15404 = vst [vmem:[#allocation47_spill] sm:$0xff] %v13589_v30  ;;  %v5331_v20 = vsel %vm5330_vm2, %v5326_v21, -inf  ;;  %v13642_v21 = vpop.f32.mrf.mxu0  ;;  %v5209_v30 = vadd.s32 %v5208_v25, %v5206_v59 }
 0xadb   : > { %5682 = vmax.xlane.f32.xlu1 %v13627_v54  ;;  %5332 = vmax.xlane.f32.xlu2 %v5331_v20  ;;  %v13646_v22 = vcvt.s32.f32 %v5695_v51  ;;  %15419 = vst [vmem:[#allocation46_spill] sm:$0xff] %v13657_v33 }
 0xadc   : > { %v5360_v46 = vand.u32 255, %v5209_v30  ;;  %v5287_v30 = vcvt.f32.s32 %v13509_v38 }
 0xadd   : > { %15416 = vst [vmem:[#allocation5_spill] sm:$0xff] %v13646_v22 }
 0xade   : > { %v13683_v63 = vsub.s32 255, %v5360_v46  ;;  %v5240_v46 = vshll.u32 %v5239_v49, 16 }
 0xae0   : > { %vm5398_vm9 = vcmp.eq.s32.totalorder %v7818_v43, %v13683_v63  ;;  %vm14684_vm13 = vcmp.eq.s32.totalorder %v7821_v50, %v13683_v63 }
 0xae1   : > { %v13617_v1 = vpop.f32.mrf.mxu2 }
 0xae2   : > { %15410 = vst [vmem:[#allocation14_spill] sm:$0xff] %v13617_v1  ;;  %v13655_v20 = vpop.f32.mrf.mxu0 }
 0xae3   : > { %5730 = vmax.xlane.f32.xlu1 %v13644_v13  ;;  %5698 = vmax.xlane.f32.xlu2 %v13646_v22  ;;  %v5711_v22 = vshra.s32 %v13541_v39, 16 }
 0xae9   : > { %v13640_v58 = vpop.f32.mrf.mxu2 }
 0xaea   : > { %15414 = vst [vmem:[#allocation15_spill] sm:$0xff] %v13640_v58  ;;  %v13662_v2 = vpop.f32.mrf.mxu0 }
 0xaeb   : > { %5746 = vmax.xlane.f32.xlu2 %v13657_v33 }
 0xaf1   : > { %v13653_v36 = vpop.f32.mrf.mxu2 }
 0xaf2   : > { %15418 = vst [vmem:[#allocation43_spill] sm:$0xff] %v13653_v36  ;;  %v13666_v0 = vpop.f32.mrf.mxu0 }
 0xaf9   : > { %v13660_v47 = vpop.f32.mrf.mxu2 }
 0xafa   : > { %v13670_v23 = vpop.f32.mrf.mxu0 }
 0xb01   : > { %v13664_v18 = vpop.f32.mrf.mxu2 }
 0xb02   : > { %v13676_v28 = vpop.f32.mrf.mxu0 }
 0xb09   : > { %v13668_v51 = vpop.f32.mrf.mxu2 }
 0xb0a   : > { %v4959_v61 = vpop.f32.mrf.mxu0 }
 0xb11   : > { %v13672_v8 = vpop.f32.mrf.mxu2 }
 0xb12   : > { %v4961_v41 = vpop.f32.mrf.mxu0 }
 0xb19   : > { %v13674_v32 = vpop.f32.mrf.mxu2 }
 0xb1a   : > { %v5221_v1 = vpop.xlane.xlu0 %5220  ;;  %v4964_v6 = vpop.f32.mrf.mxu0 }
 0xb1b   : > { %v5222_v4 = vcvt.f32.s32 %v5221_v1 }
 0xb1d   : > { %v5225_v58 = vadd.s32 %v5224_v17, %v5222_v4  ;;  %v5342_v17 = vcvt.s32.f32 %v5340_v60 }
 0xb1f   : > { %v5361_v36 = vand.u32 255, %v5225_v58 }
 0xb21   : > { %v13678_v26 = vpop.f32.mrf.mxu2  ;;  %v13685_v37 = vsub.s32 255, %v5361_v36 }
 0xb22   : > { %v4966_v44 = vpop.f32.mrf.mxu0 }
 0xb23   : > { %vm5400_vm5 = vcmp.eq.s32.totalorder %v7818_v43, %v13685_v37 }
 0xb24   : > { %vm7091_vm14 = vmpackc.low %vm5400_vm5, %vm5398_vm9 }
 0xb25   : > { %7092 = vmatmul.msk.bf16.gmra.mxu1 %vm7091_vm14, %v14735_v7 }
 0xb29   : > { %v5008_v12 = vpop.f32.mrf.mxu2 }
 0xb2b   : > { %v5237_v19 = vpop.xlane.xlu0 %5236 }
 0xb2c   : > { %v5238_v45 = vcvt.f32.s32 %v5237_v19  ;;  %v5256_v19 = vshll.u32 %v5255_v5, 16  ;;  %v5009_v5 = vadd.f32 %v5008_v12, %v4959_v61  ;;  %v15423_v12 = vld [vmem:[#allocation66_spill] sm:$0xff] }
 0xb2e   : > { %v5241_v24 = vadd.s32 %v5240_v46, %v5238_v45 }
 0xb30   : > { %v5362_v1 = vand.u32 255, %v5241_v24 }
 0xb31   : > { %v5010_v33 = vpop.f32.mrf.mxu2 }
 0xb32   : > { %v13708_v13 = vsub.s32 255, %v5362_v1 }
 0xb33   : > { %v13701_v59 = vpop.xlane.xlu0 %5344 }
 0xb34   : > { %15420 = vst [vmem:[#allocation35_spill] sm:$0xff] %v13701_v59  ;;  %vm5346_vm1 = vcmp.eq.f32.partialorder %v13515_v35, %v13701_v59  ;;  %v5288_v35 = vshll.u32 %v5287_v30, 16  ;;  %v5011_v59 = vadd.f32 %v5010_v33, %v4961_v41  ;;  %v15422_v41 = vld [vmem:[#allocation65_spill] sm:$0xff]  ;;  %vm5403_vm12 = vcmp.eq.s32.totalorder %v7821_v50, %v13708_v13 }
 0xb35   : > { %v5285_v25 = vpop.xlane.xlu2 %5284  ;;  %v5347_v58 = vsel %vm5346_vm1, %v5342_v17, -inf  ;;  %v5655_v33 = vsel %vm14684_vm13, 2147483648, %v15422_v41  ;;  %vm5402_vm6 = vcmp.eq.s32.totalorder %v7818_v43, %v13708_v13  ;;  %vm15426_vm1 = vmmov %vm15421_vm4 }
 0xb36   : > { %v5253_v36 = vpop.xlane.xlu1 %5252  ;;  %5348 = vmax.xlane.f32.xlu0 %v5347_v58  ;;  %v5286_v46 = vcvt.f32.s32 %v5285_v25  ;;  %v13714_v58 = vcvt.s32.f32 %v5711_v22  ;;  %v5024_v30 = vpack.c.bf16 %v5011_v59, %v5009_v5 }
 0xb37   : > { %v5254_v49 = vcvt.f32.s32 %v5253_v36 }
 0xb38   : > { %v5289_v17 = vadd.s32 %v5288_v35, %v5286_v46  ;;  %v5006_v46 = vadd.f32 %v13678_v26, %v13676_v28 }
 0xb39   : > { %v5013_v4 = vpop.f32.mrf.mxu2  ;;  %v5257_v60 = vadd.s32 %v5256_v19, %v5254_v49  ;;  %v5759_v49 = vshra.s32 %v13587_v14, 16 }
 0xb3a   : > { %v5014_v45 = vadd.f32 %v5013_v4, %v4964_v6  ;;  %v5272_v4 = vshll.u32 %v5271_v40, 16  ;;  %v5365_v22 = vand.u32 255, %v5289_v17 }
 0xb3b   : > { %v5363_v24 = vand.u32 255, %v5257_v60  ;;  %v5004_v60 = vadd.f32 %v13674_v32, %v13670_v23  ;;  %v5656_v23 = vsel %vm5400_vm5, 2147483648, %v13117_v52 }
 0xb3c   : > { %v13754_v35 = vsub.s32 255, %v5365_v22 }
 0xb3d   : > { %v5379_v42 = vsub.s32 255, %v5363_v24  ;;  %v5301_v25 = vpop.xlane.xlu0 %5300  ;;  %v5045_v24 = vsel %vm15426_vm1, %v5024_v30, 0  ;;  %v5023_v28 = vpack.c.bf16 %v5006_v46, %v5004_v60  ;;  %v4996_v46 = vadd.f32 %v13664_v18, %v13655_v20  ;;  %v15434_v20 = vld [vmem:[#allocation5_spill] sm:$0xff] }
 0xb3e   : > { %v5269_v40 = vpop.xlane.xlu1 %5268  ;;  %5714 = vmax.xlane.f32.xlu0 %v13714_v58  ;;  %v5302_v1 = vcvt.f32.s32 %v5301_v25 }
 0xb3f   : > { %vm5405_vm11 = vcmp.eq.s32.totalorder %v7821_v50, %v5379_v42  ;;  %v5270_v61 = vcvt.f32.s32 %v5269_v40  ;;  %vm5404_vm0 = vcmp.eq.s32.totalorder %v7818_v43, %v5379_v42 }
 0xb40   : > { %v5661_v59 = vsel %vm5405_vm11, 2147483648, %v13202_v62  ;;  %vm7093_vm15 = vmpackc.low %vm5404_vm0, %vm5402_vm6  ;;  %v5660_v36 = vsel %vm5404_vm0, 2147483648, %v13208_v15  ;;  %vm14685_vm0 = vcmp.eq.s32.totalorder %v7821_v50, %v13754_v35 }
 0xb41   : > { %v5015_v16 = vpop.f32.mrf.mxu2  ;;  %v5273_v19 = vadd.s32 %v5272_v4, %v5270_v61  ;;  %7094 = vmatmul.msk.bf16.gmra.mxu1 %vm7093_vm15, %v14735_v7  ;;  %vm5820_vm2 = vcmp.gt.s32.totalorder %v5660_v36, %v5661_v59  ;;  %vm13741_vm8 = vmpackc.low %vm5405_vm11, %vm5403_vm12 }
 0xb42   : > { %v5016_v53 = vadd.f32 %v5015_v16, %v4966_v44  ;;  %v5303_v44 = vcvt.f32.s32 %v13543_v3  ;;  %v5654_v3 = vsel %vm5398_vm9, 2147483648, %v15423_v12  ;;  %v13748_v15 = vsel %vm5820_vm2, %v5660_v36, %v5661_v59 }
 0xb43   : > { %vm14683_vm9 = vcmp.eq.s32.totalorder %v7821_v50, %v13685_v37  ;;  %vm5772_vm14 = vcmp.gt.s32.totalorder %v5654_v3, %v5655_v33  ;;  %v4999_v12 = vadd.f32 %v13668_v51, %v13662_v2  ;;  %v5659_v36 = vsel %vm5403_vm12, 2147483648, %v13141_v34 }
 0xb44   : > { %v5025_v38 = vpack.c.bf16 %v5016_v53, %v5014_v45  ;;  %v5304_v62 = vshll.u32 %v5303_v44, 16  ;;  %v5319_v45 = vcvt.f32.s32 %v13591_v57  ;;  %v5364_v53 = vand.u32 255, %v5273_v19 }
 0xb45   : > { %v13757_v57 = vcvt.s32.f32 %v5759_v49  ;;  %v5657_v17 = vsel %vm14683_vm9, 2147483648, %v13111_v9  ;;  %v13763_v44 = vsel %vm5772_vm14, %v5654_v3, %v5655_v33  ;;  %v5001_v33 = vadd.f32 %v13672_v8, %v13666_v0  ;;  %vm15429_vm14 = vmmov %vm15426_vm1 }
 0xb46   : > { %v5048_v6 = vsel %vm15421_vm4, %v5025_v38, 0  ;;  %v5305_v38 = vadd.s32 %v5304_v62, %v5302_v1  ;;  %v5380_v5 = vsub.s32 255, %v5364_v53  ;;  %v5320_v26 = vshll.u32 %v5319_v45, 16 }
 0xb47   : > { %5050 = vmatpush.bf16.xpose.msra.mxu3 %v5048_v6  ;;  %v5317_v6 = vpop.xlane.xlu1 %5316  ;;  %5762 = vmax.xlane.f32.xlu0 %v13757_v57  ;;  %v5775_v52 = vshra.s32 %v13763_v44, 16  ;;  %vm5788_vm2 = vcmp.gt.s32.totalorder %v5656_v23, %v5657_v17  ;;  %v5042_v40 = vsel %vm15429_vm14, %v5023_v28, 0  ;;  %v5022_v0 = vpack.c.bf16 %v5001_v33, %v4999_v12  ;;  %v15437_v28 = vld [vmem:[#allocation59_spill] sm:$0xff] }
 0xb48   : > { %vm5407_vm4 = vcmp.eq.s32.totalorder %v7821_v50, %v5380_v5  ;;  %v5318_v32 = vcvt.f32.s32 %v5317_v6  ;;  %vm5406_vm11 = vcmp.eq.s32.totalorder %v7818_v43, %v5380_v5  ;;  %v5366_v4 = vand.u32 255, %v5305_v38  ;;  %v15443_v33 = vld [vmem:[#allocation15_spill] sm:$0xff] }
 0xb49   : > { %v5663_v9 = vsel %vm5407_vm4, 2147483648, %v13294_v31  ;;  %v5662_v42 = vsel %vm5406_vm11, 2147483648, %v13300_v11  ;;  %vm13782_vm15 = vmpackc.low %vm14685_vm0, %vm5407_vm4  ;;  %v5678_v31 = vand.u32 65535, %v13595_v27  ;;  %v13796_v22 = vcvt.s32.f32 %v5775_v52  ;;  %v15442_v52 = vld [vmem:[#allocation11_spill] sm:$0xff] }
 0xb4a   : > { %v5321_v25 = vadd.s32 %v5320_v26, %v5318_v32  ;;  %vm5836_vm5 = vcmp.gt.s32.totalorder %v5662_v42, %v5663_v9  ;;  %v13793_v3 = vsub.s32 255, %v5366_v4  ;;  %v13800_v27 = vsel %vm5788_vm2, %v5656_v23, %v5657_v17  ;;  %v15438_v23 = vld [vmem:[#allocation64_spill] sm:$0xff]  ;;  %v15439_v4 = vld [vmem:[#allocation58_spill] sm:$0xff] }
 0xb4b   : > { %v13789_v30 = vsel %vm5836_vm5, %v5662_v42, %v5663_v9  ;;  %v5680_v8 = vcvt.s32.f32 %v5678_v31  ;;  %vm5408_vm5 = vcmp.eq.s32.totalorder %v7818_v43, %v13754_v35  ;;  %v5726_v19 = vand.u32 65535, %v13629_v56  ;;  %v15433_v56 = vld [vmem:[#allocation32_spill] sm:$0xff]  ;;  %v15440_v9 = vld [vmem:[#allocation43_spill] sm:$0xff] }
 0xb4c   : > { %v5367_v11 = vand.u32 255, %v5321_v25  ;;  %vm5411_vm9 = vcmp.eq.s32.totalorder %v7821_v50, %v13793_v3  ;;  %vm7095_vm2 = vmpackc.low %vm5408_vm5, %vm5406_vm11  ;;  %v5791_v62 = vshra.s32 %v13800_v27, 16  ;;  %v5694_v45 = vand.u32 65535, %v13631_v10 }
 0xb4d   : > { %vm15432_vm11 = vcmask 64512   ;;  %v4994_v34 = vadd.f32 %v13660_v47, %v13642_v21  ;;  %v15435_v47 = vld [vmem:[#allocation50_spill] sm:$0xff]  ;;  %v5664_v17 = vsel %vm5408_vm5, 2147483648, %v15437_v28  ;;  %v5742_v32 = vand.u32 65535, %v15438_v23  ;;  %v15456_v28 = vld [vmem:[#allocation51_spill] sm:$0xff] }
 0xb4e   : > { %v5383_v61 = vsub.s32 255, %v5367_v11  ;;  %v13806_v2 = vpop.xlane.xlu2 %5332  ;;  %v5039_v53 = vsel %vm15432_vm11, %v5022_v0, 0  ;;  %v13854_v38 = vcvt.s32.f32 %v5791_v62  ;;  %v5696_v10 = vcvt.s32.f32 %v5694_v45  ;;  %v15448_v62 = vld [vmem:[#allocation14_spill] sm:$0xff] }
 0xb4f   : > { %5051 = vmatpush.bf16.xpose.msra.mxu3 %v5045_v24  ;;  %v13798_v59 = vpop.xlane.xlu1 %5682  ;;  %5778 = vmax.xlane.f32.xlu0 %v13796_v22  ;;  %v5021_v24 = vpack.c.bf16 %v4996_v46, %v4994_v34  ;;  %v4991_v42 = vadd.f32 %v15440_v9, %v15439_v4  ;;  %v4989_v31 = vadd.f32 %v15443_v33, %v15442_v52  ;;  %v15451_v34 = vld [vmem:[#allocation47_spill] sm:$0xff]  ;;  %v13917_v4 = vld [vmem:[%s8022_s10 + $0x78] sm:$0xff]  ;;  %v13936_v52 = vld [vmem:[%s8022_s10 + $0x60] sm:$0xff] }
 0xb50   : > { %vm5413_vm1 = vcmp.eq.s32.totalorder %v7821_v50, %v5383_v61  ;;  %vm5684_vm4 = vcmp.eq.f32.partialorder %v13627_v54, %v13798_v59  ;;  %vm5412_vm14 = vcmp.eq.s32.totalorder %v7818_v43, %v5383_v61  ;;  %vm5410_vm5 = vcmp.eq.s32.totalorder %v7818_v43, %v13793_v3  ;;  %v13921_v9 = vld [vmem:[%s8022_s10 + $0x70] sm:$0xff]  ;;  %v13940_v33 = vld [vmem:[%s8022_s10 + $0x58] sm:$0xff] }
 0xb51   : > { %v5669_v51 = vsel %vm5413_vm1, 2147483648, %v13341_v55  ;;  %v5685_v1 = vsel %vm5684_vm4, %v5680_v8, -inf  ;;  %v5668_v54 = vsel %vm5412_vm14, 2147483648, %v13347_v29  ;;  %7096 = vmatmul.msk.bf16.gmra.mxu1 %vm7095_vm2, %v14735_v7  ;;  %vm13826_vm0 = vmpackc.low %vm5413_vm1, %vm5411_vm9  ;;  %v5658_v29 = vsel %vm5402_vm6, 2147483648, %v13146_v48 }
 0xb52   : > { %5686 = vmax.xlane.f32.xlu1 %v5685_v1  ;;  %vm5884_vm13 = vcmp.gt.s32.totalorder %v5668_v54, %v5669_v51  ;;  %vm5804_vm1 = vcmp.gt.s32.totalorder %v5658_v29, %v5659_v36  ;;  %v5728_v48 = vcvt.s32.f32 %v5726_v19  ;;  %vm15436_vm6 = vcmp.eq.s32.totalorder %v7821_v50, %v13754_v35  ;;  %vm15441_vm4 = vmmov %vm15432_vm11  ;;  %v15445_v1 = vld [vmem:[#allocation41_spill] sm:$0xff]  ;;  %v15447_v19 = vld [vmem:[#allocation27_spill] sm:$0xff] }
 0xb53   : > { %v13839_v49 = vsel %vm5884_vm13, %v5668_v54, %v5669_v51  ;;  %v13858_v5 = vsel %vm5804_vm1, %v5658_v29, %v5659_v36  ;;  %v5665_v26 = vsel %vm15436_vm6, 2147483648, %v15435_v47  ;;  %v5036_v25 = vsel %vm15441_vm4, %v5021_v24, 0  ;;  %vm7097_vm1 = vmpackc.low %vm5412_vm14, %vm5410_vm5  ;;  %v15446_v36 = vld [vmem:[#allocation7_spill] sm:$0xff] }
 0xb54   : > { %v5807_v6 = vshra.s32 %v13858_v5, 16  ;;  %vm5852_vm2 = vcmp.gt.s32.totalorder %v5664_v17, %v5665_v26  ;;  %v5744_v35 = vcvt.s32.f32 %v5742_v32  ;;  %v5020_v8 = vpack.c.bf16 %v4991_v42, %v4989_v31  ;;  %vm15449_vm14 = vmmov %vm15441_vm4  ;;  %v13927_v42 = vld [vmem:[%s14380_s3] sm:$0xff]  ;;  %v13944_v31 = vld [vmem:[%s8022_s10 + $0x50] sm:$0xff] }
 0xb55   : > { %v13888_v51 = vsel %vm5852_vm2, %v5664_v17, %v5665_v26  ;;  %v5667_v54 = vsel %vm5411_vm9, 2147483648, %v15445_v1  ;;  %v5666_v29 = vsel %vm5410_vm5, 2147483648, %v15446_v36  ;;  %v4986_v61 = vadd.f32 %v15448_v62, %v15447_v19  ;;  %vm15454_vm9 = vmmov %vm15441_vm4  ;;  %v15455_v26 = vld [vmem:[#allocation44_spill] sm:$0xff]  ;;  %v15462_v19 = vld [vmem:[#allocation35_spill] sm:$0xff] }
 0xb56   : > { %v13852_v60 = vpop.xlane.xlu2 %5698  ;;  %v13878_v12 = vcvt.s32.f32 %v5807_v6  ;;  %v5033_v45 = vsel %vm15449_vm14, %v5020_v8, 0  ;;  %v5855_v46 = vshra.s32 %v13888_v51, 16  ;;  %v4979_v17 = vadd.f32 %v15456_v28, %v15455_v26  ;;  %vm15458_vm6 = vmmov %vm15441_vm4 }
 0xb57   : > { %5052 = vmatpush.bf16.xpose.msra.mxu3 %v5042_v40  ;;  %v13848_v13 = vpop.xlane.xlu1 %5730  ;;  %vm5700_vm12 = vcmp.eq.f32.partialorder %v15434_v20, %v13852_v60  ;;  %v15444_v40 = vld [vmem:[#allocation46_spill] sm:$0xff]  ;;  %v5351_v62 = vcvt.f32.s32 %v15462_v19  ;;  %v5758_v26 = vand.u32 65535, %v13587_v14  ;;  %v5823_v28 = vshra.s32 %v13748_v15, 16 }
 0xb58   : > { %vm5732_vm13 = vcmp.eq.f32.partialorder %v15433_v56, %v13848_v13  ;;  %v5701_v21 = vsel %vm5700_vm12, %v5696_v10, -inf  ;;  %v13901_v56 = vcvt.s32.f32 %v5855_v46  ;;  %v15452_v20 = vld [vmem:[#allocation10_spill] sm:$0xff]  ;;  %vm15457_vm12 = vmmov %vm15441_vm4 }
 0xb59   : > { %v5733_v18 = vsel %vm5732_vm13, %v5728_v48, -inf  ;;  %5702 = vmax.xlane.f32.xlu2 %v5701_v21  ;;  %vm5868_vm13 = vcmp.gt.s32.totalorder %v5666_v29, %v5667_v54  ;;  %v5352_v46 = vshll.u32 %v5351_v62, 16  ;;  %v15469_v62 = vld [vmem:[#allocation23_spill] sm:$0xff] }
 0xb5a   : > { %5794 = vmax.xlane.f32.xlu1 %v13854_v38  ;;  %5734 = vmax.xlane.f32.xlu0 %v5733_v18  ;;  %v13903_v10 = vsel %vm5868_vm13, %v5666_v29, %v5667_v54  ;;  %v15453_v18 = vld [vmem:[#allocation48_spill] sm:$0xff]  ;;  %v5334_v54 = vcvt.f32.s32 %v13806_v2  ;;  %vm15466_vm13 = vcmp.eq.s32.totalorder %v7821_v50, %v13683_v63  ;;  %v5790_v63 = vand.u32 65535, %v13800_v27 }
 0xb5b   : > { %v4981_v24 = vadd.f32 %v15453_v18, %v15452_v20  ;;  %v5871_v47 = vshra.s32 %v13903_v10, 16 }
 0xb5d   : > { %v13912_v6 = vcvt.s32.f32 %v5871_v47  ;;  %v5018_v23 = vpack.c.bf16 %v4981_v24, %v4979_v17 }
 0xb5e   : > { %v13876_v11 = vpop.xlane.xlu2 %5746 }
 0xb5f   : > { %5053 = vmatpush.bf16.xpose.msra.mxu3 %v5039_v53  ;;  %vm5748_vm11 = vcmp.eq.f32.partialorder %v15444_v40, %v13876_v11  ;;  %v15450_v53 = vld [vmem:[#allocation52_spill] sm:$0xff]  ;;  %v5027_v32 = vsel %vm15457_vm12, %v5018_v23, 0  ;;  %v13952_v40 = vld [vmem:[%s8022_s10 + $0x40] sm:$0xff]  ;;  %v5760_v23 = vcvt.s32.f32 %v5758_v26 }
 0xb60   : > { %v5749_v0 = vsel %vm5748_vm11, %v5744_v35, -inf  ;;  %v4984_v48 = vadd.f32 %v15451_v34, %v15450_v53  ;;  %v13948_v35 = vld [vmem:[%s8022_s10 + $0x48] sm:$0xff]  ;;  %v15470_v26 = vld [vmem:[#allocation16_spill] sm:$0xff] }
 0xb61   : > { %7098 = vmatmul.msk.bf16.gmra.mxu1 %vm7097_vm1, %v14735_v7 }
 0xb62   : > { %5810 = vmax.xlane.f32.xlu1 %v13878_v12  ;;  %5750 = vmax.xlane.f32.xlu0 %v5749_v0  ;;  %v5019_v3 = vpack.c.bf16 %v4986_v61, %v4984_v48  ;;  %v15460_v0 = vld [vmem:[#allocation63_spill] sm:$0xff] }
 0xb63   : > { %v5335_v1 = vcvt.f32.s32 %v15460_v0  ;;  %v5774_v0 = vand.u32 65535, %v13763_v44  ;;  %v15468_v44 = vld [vmem:[#allocation22_spill] sm:$0xff] }
 0xb64   : > { %v5030_v21 = vsel %vm15454_vm9, %v5019_v3, 0  ;;  %v5710_v3 = vand.u32 65535, %v13541_v39  ;;  %vm15467_vm9 = vcmp.eq.s32.totalorder %v7821_v50, %v13685_v37  ;;  %v5705_v37 = vcvt.f32.s32 %v13852_v60 }
 0xb65   : > { %v5336_v36 = vshll.u32 %v5335_v1, 16  ;;  %v5839_v1 = vshra.s32 %v13789_v30, 16  ;;  %v5776_v14 = vcvt.s32.f32 %v5774_v0  ;;  %vm7107_vm12 = vmpackc.low %vm15467_vm9, %vm15466_vm13 }
 0xb66   : > { %v5712_v2 = vcvt.s32.f32 %v5710_v3  ;;  %v5706_v27 = vshll.u32 %v5705_v37, 16  ;;  %v5870_v37 = vand.u32 65535, %v13903_v10 }
 0xb67   : > { %5054 = vmatpush.bf16.xpose.msra.mxu3 %v5036_v25  ;;  %v13932_v25 = vld [vmem:[%s8022_s10 + $0x68] sm:$0xff]  ;;  %v5337_v61 = vadd.s32 %v5336_v36, %v5334_v54  ;;  %v14004_v36 = vcvt.s32.f32 %v5839_v1  ;;  %s6241_s10 = scalar_lea.hbm %s14382_s5, %s7185_s27 }
 0xb68   : > { %s6244_s21 = sshll.u32 %s6241_s10, 4  ;;  %s6245_s21 = int_to_ptr.hbm [resolvable:$true] %s6244_s21 }
 0xb69   : > { %v5368_v53 = vand.u32 255, %v5337_v61  ;;  %s7559_s13 = sshra.s32 %s6245_s21, 4  ;;  %s7560_s13 = int_to_ptr.hbm [resolvable:$true] %s7559_s13 }
 0xb6a   : > { %5858 = vmax.xlane.f32.xlu0 %v13901_v56  ;;  %s7561_s14 = scalar_lea.hbm %s7560_s13, 16  ;;  %p7566_p2 = scmp.lt.s32.totalorder %s7560_s13, %s14382_s5 }
 0xb6b   : > { %v5384_v20 = vsub.s32 255, %v5368_v53  ;;  %p7562_p13 = scmp.ne.s32.totalorder %s7560_s13, %s7561_s14  ;;  %p7567_p4 = scmp.lt.s32.totalorder %s7565_s26, %s7561_s14 }
 0xb6d   : > { %vm5414_vm4 = vcmp.eq.s32.totalorder %v7818_v43, %v5384_v20  ;;  %vm5415_vm5 = vcmp.eq.s32.totalorder %v7821_v50, %v5384_v20  ;;  %v5792_v20 = vcvt.s32.f32 %v5790_v63  ;;  %p7563_p0 = pnand %p7562_p13, %p7727_p3  ;;  %p7568_p5 = por %p7567_p4, %p7566_p2 }
 0xb6f   : > { %5055 = vmatpush.bf16.xpose.msra.mxu3 %v5033_v45  ;;  %p7564_p1 = pneg %p7563_p0 }
 0xb71   : > { %p7569_p6 = pnand %p7568_p5, %p7564_p1 }
 0xb72   : > { %5874 = vmax.xlane.f32.xlu0 %v13912_v6 }
 0xb77   : > { %5056 = vmatpush.bf16.xpose.msra.mxu3 %v5030_v21 }
 0xb7f   : > { %5057 = vmatpush.bf16.xpose.msra.mxu3 %v5027_v32  ;;  %v13995_v32 = vcvt.s32.f32 %v5823_v28 }
 0xb86   : > { %7052 = vmatmul.msk.bf16.vlgmr.msra.gmra.mxu3 %vm15458_vm6, %v13927_v42 }
 0xb87   : > { %5547 = vmatpush.bf16.msrb.mxu3 %v13917_v4 }
 0xb8b   : > { %5548 = vmatpush.bf16.msrb.mxu3 %v13921_v9 }
 0xb8f   : > { %5549 = vmatpush.bf16.msrb.mxu3 %v13932_v25 }
 0xb93   : > { %5550 = vmatpush.bf16.msrb.mxu3 %v13936_v52 }
 0xb97   : > { %5551 = vmatpush.bf16.msrb.mxu3 %v13940_v33 }
 0xb9b   : > { %5552 = vmatpush.bf16.msrb.mxu3 %v13944_v31 }
 0xb9f   : > { %5553 = vmatpush.bf16.msrb.mxu3 %v13948_v35 }
 0xba3   : > { %5554 = vmatpush.bf16.msrb.mxu3 %v13952_v40 }
 0xba6   : > { %7102 = vmatmul.msk.bf16.vlgmr.msrb.gmra.mxu3 %vm13498_vm3, %v14735_v7 }
 0xba9   : > { %v5349_v45 = vpop.xlane.xlu0 %5348 }
 0xbaa   : > { %v5350_v34 = vcvt.f32.s32 %v5349_v45  ;;  %v5887_v45 = vshra.s32 %v13839_v49, 16 }
 0xbac   : > { %v5353_v48 = vadd.s32 %v5352_v46, %v5350_v34  ;;  %v14024_v34 = vcvt.s32.f32 %v5887_v45 }
 0xbae   : > { %v5369_v18 = vand.u32 255, %v5353_v48 }
 0xbb0   : > { %v5385_v24 = vsub.s32 255, %v5369_v18 }
 0xbb1   : > { %v13965_v21 = vpop.xlane.xlu0 %5714 }
 0xbb2   : > { %vm5417_vm3 = vcmp.eq.s32.totalorder %v7821_v50, %v5385_v24  ;;  %vm5416_vm2 = vcmp.eq.s32.totalorder %v7818_v43, %v5385_v24 }
 0xbb3   : > { %vm7099_vm11 = vmpackc.low %vm5416_vm2, %vm5414_vm4  ;;  %v5673_v28 = vsel %vm5417_vm3, 2147483648, %v15470_v26 }
 0xbb4   : > { %7100 = vmatmul.msk.bf16.gmra.mxu1 %vm7099_vm11, %v14735_v7  ;;  %vm13982_vm1 = vmpackc.low %vm5417_vm3, %vm5415_vm5 }
 0xbb6   : > { %7104 = vmatmul.msk.bf16.gmra.mxu3 %vm13533_vm7, %v14735_v7  ;;  %vm5716_vm7 = vcmp.eq.f32.partialorder %v13714_v58, %v13965_v21 }
 0xbb7   : > { %v5717_v39 = vsel %vm5716_vm7, %v5712_v2, -inf }
 0xbb8   : > { %5718 = vmax.xlane.f32.xlu2 %v5717_v39 }
 0xbba   : > { %v13991_v17 = vpop.xlane.xlu0 %5762 }
 0xbbb   : > { %vm5764_vm14 = vcmp.eq.f32.partialorder %v13757_v57, %v13991_v17  ;;  %v5689_v57 = vcvt.f32.s32 %v13798_v59  ;;  %v5670_v59 = vsel %vm5414_vm4, 2147483648, %v15469_v62 }
 0xbbc   : > { %v5765_v8 = vsel %vm5764_vm14, %v5760_v23, -inf  ;;  %v15471_v23 = vld [vmem:[#allocation21_spill] sm:$0xff] }
 0xbbd   : > { %5766 = vmax.xlane.f32.xlu1 %v5765_v8  ;;  %v5690_v46 = vshll.u32 %v5689_v57, 16  ;;  %v5672_v8 = vsel %vm5416_vm2, 2147483648, %v15471_v23 }
 0xbbe   : > { %vm5916_vm4 = vcmp.gt.s32.totalorder %v5672_v8, %v5673_v28 }
 0xbbf   : > { %v14050_v62 = vsel %vm5916_vm4, %v5672_v8, %v5673_v28  ;;  %v5737_v28 = vcvt.f32.s32 %v13848_v13 }
 0xbc0   : > { %5826 = vmax.xlane.f32.xlu2 %v13995_v32 }
 0xbc2   : > { %v14000_v54 = vpop.xlane.xlu0 %5778 }
 0xbc5   : > { %v5687_v19 = vpop.xlane.xlu1 %5686 }
 0xbc6   : > { %7106 = vmatmul.msk.bf16.gmra.mxu3 %vm13583_vm10, %v14735_v7  ;;  %vm5780_vm10 = vcmp.eq.f32.partialorder %v13796_v22, %v14000_v54  ;;  %v5671_v22 = vsel %vm5415_vm5, 2147483648, %v15468_v44  ;;  %v5688_v61 = vcvt.f32.s32 %v5687_v19 }
 0xbc7   : > { %v5781_v29 = vsel %vm5780_vm10, %v5776_v14, -inf  ;;  %vm5900_vm6 = vcmp.gt.s32.totalorder %v5670_v59, %v5671_v22  ;;  %v5806_v14 = vand.u32 65535, %v13858_v5 }
 0xbc8   : > { %5782 = vmax.xlane.f32.xlu1 %v5781_v29  ;;  %5842 = vmax.xlane.f32.xlu2 %v14004_v36  ;;  %v5691_v53 = vadd.s32 %v5690_v46, %v5688_v61  ;;  %v14030_v18 = vsel %vm5900_vm6, %v5670_v59, %v5671_v22  ;;  %v5919_v59 = vshra.s32 %v14050_v62, 16  ;;  %v5854_v61 = vand.u32 65535, %v13888_v51 }
 0xbc9   : > { %v5903_v0 = vshra.s32 %v14030_v18, 16  ;;  %v5808_v22 = vcvt.s32.f32 %v5806_v14  ;;  %v5738_v14 = vshll.u32 %v5737_v28, 16 }
 0xbca   : > { %v5932_v39 = vand.u32 255, %v5691_v53  ;;  %v14068_v46 = vcvt.s32.f32 %v5919_v59  ;;  %v5856_v16 = vcvt.s32.f32 %v5854_v61 }
 0xbcb   : > { %v14043_v29 = vcvt.s32.f32 %v5903_v0 }
 0xbcc   : > { %v5703_v2 = vpop.xlane.xlu2 %5702 }
 0xbcd   : > { %v14026_v48 = vpop.xlane.xlu0 %5734  ;;  %v14028_v3 = vpop.xlane.xlu1 %5794  ;;  %v5704_v47 = vcvt.f32.s32 %v5703_v2  ;;  %v15474_v2 = vld [vmem:[#allocation45_spill] sm:$0xff] }
 0xbce   : > { %vm5796_vm7 = vcmp.eq.f32.partialorder %v13854_v38, %v14028_v3  ;;  %v5948_v38 = vsub.s32 255, %v5932_v39  ;;  %v5736_v23 = vcvt.f32.s32 %v14026_v48 }
 0xbcf   : > { %v5797_v60 = vsel %vm5796_vm7, %v5792_v20, -inf  ;;  %v5707_v1 = vadd.s32 %v5706_v27, %v5704_v47  ;;  %v5872_v20 = vcvt.s32.f32 %v5870_v37  ;;  %v15475_v27 = vld [vmem:[#allocation60_spill] sm:$0xff]  ;;  %v5507_v47 = vpop.f32.mrf.mxu1 }
 0xbd0   : > { %5890 = vmax.xlane.f32.xlu1 %v14024_v34  ;;  %5798 = vmax.xlane.f32.xlu2 %v5797_v60  ;;  %vm5964_vm2 = vcmp.eq.s32.totalorder %v7818_v43, %v5948_v38  ;;  %vm5965_vm14 = vcmp.eq.s32.totalorder %v7821_v50, %v5948_v38  ;;  %v15476_v10 = vmax.f32 %v15474_v2, %v15475_v27 }
 0xbd1   : > { %v5933_v57 = vand.u32 255, %v5707_v1  ;;  %v5739_v38 = vadd.s32 %v5738_v14, %v5736_v23 }
 0xbd3   : > { %v5949_v19 = vsub.s32 255, %v5933_v57  ;;  %v5721_v57 = vcvt.f32.s32 %v13965_v21 }
 0xbd5   : > { %v14045_v44 = vpop.xlane.xlu1 %5810  ;;  %v5751_v24 = vpop.xlane.xlu0 %5750  ;;  %vm5966_vm5 = vcmp.eq.s32.totalorder %v7818_v43, %v5949_v19  ;;  %vm5967_vm11 = vcmp.eq.s32.totalorder %v7821_v50, %v5949_v19  ;;  %v5753_v19 = vcvt.f32.s32 %v13876_v11  ;;  %v5722_v48 = vshll.u32 %v5721_v57, 16 }
 0xbd6   : > { %7108 = vmatmul.msk.bf16.gmra.mxu3 %vm7107_vm12, %v14735_v7  ;;  %vm5812_vm3 = vcmp.eq.f32.partialorder %v13878_v12, %v14045_v44  ;;  %vm7150_vm10 = vmpackc.low %vm5966_vm5, %vm5964_vm2  ;;  %v5752_v61 = vcvt.f32.s32 %v5751_v24  ;;  %v15510_v12 = vld [vmem:[#allocation19_spill] sm:$0xff] }
 0xbd7   : > { %v5813_v5 = vsel %vm5812_vm3, %v5808_v22, -inf  ;;  %vm14059_vm13 = vmpackc.low %vm5967_vm11, %vm5965_vm14  ;;  %7151 = vmatmul.msk.bf16.vlgmr.msra.gmra.mxu2 %vm7150_vm10, %v14735_v7  ;;  %v5935_v22 = vand.u32 255, %v5739_v38 }
 0xbd8   : > { %5906 = vmax.xlane.f32.xlu1 %v14043_v29  ;;  %5814 = vmax.xlane.f32.xlu2 %v5813_v5 }
 0xbdd   : > { %v14066_v45 = vpop.xlane.xlu0 %5858 }
 0xbe0   : > { %5922 = vmax.xlane.f32.xlu2 %v14068_v46 }
 0xbe5   : > { %v14074_v53 = vpop.xlane.xlu0 %5874 }
 0xbe6   : > { %7110 = vmatmul.msk.bf16.gmra.mxu3 %vm13741_vm8, %v14735_v7  ;;  %vm5860_vm8 = vcmp.eq.f32.partialorder %v13901_v56, %v14066_v45  ;;  %vm5876_vm9 = vcmp.eq.f32.partialorder %v13912_v6, %v14074_v53  ;;  %v5509_v6 = vpop.f32.mrf.mxu1 }
 0xbe7   : > { %v5861_v63 = vsel %vm5860_vm8, %v5856_v16, -inf  ;;  %v5877_v51 = vsel %vm5876_vm9, %v5872_v20, -inf  ;;  %v5769_v20 = vcvt.f32.s32 %v13991_v17 }
 0xbe8   : > { %5862 = vmax.xlane.f32.xlu1 %v5861_v63  ;;  %5878 = vmax.xlane.f32.xlu2 %v5877_v51  ;;  %v5754_v63 = vshll.u32 %v5753_v19, 16  ;;  %v5951_v51 = vsub.s32 255, %v5935_v22 }
 0xbea   : > { %v5755_v2 = vadd.s32 %v5754_v63, %v5752_v61 }
 0xbec   : > { %v5936_v24 = vand.u32 255, %v5755_v2 }
 0xbee   : > { %v5512_v60 = vpop.f32.mrf.mxu1  ;;  %v5952_v38 = vsub.s32 255, %v5936_v24 }
 0xbf0   : > { %vm5972_vm2 = vcmp.eq.s32.totalorder %v7818_v43, %v5952_v38  ;;  %vm5973_vm14 = vcmp.eq.s32.totalorder %v7821_v50, %v5952_v38 }
 0xbf6   : > { %7112 = vmatmul.msk.bf16.gmra.mxu3 %vm13782_vm15, %v14735_v7  ;;  %v5514_v55 = vpop.f32.mrf.mxu1  ;;  %vm5971_vm15 = vcmp.eq.s32.totalorder %v7821_v50, %v5951_v51 }
 0xbfe   : > { %v14104_v59 = vpop.f32.mrf.mxu1 }
 0xc06   : > { %7114 = vmatmul.msk.bf16.gmra.mxu3 %vm13826_vm0, %v14735_v7  ;;  %vm5970_vm0 = vcmp.eq.s32.totalorder %v7818_v43, %v5951_v51 }
 0xc09   : > { %v5059_v56 = vpop.f32.mrf.mxu3 }
 0xc0a   : > { %v14087_v39 = vmax.f32 %v15476_v10, %v5059_v56  ;;  %v5822_v56 = vand.u32 65535, %v13748_v15  ;;  %v5770_v10 = vshll.u32 %v5769_v20, 16  ;;  %v5886_v20 = vand.u32 65535, %v13839_v49 }
 0xc11   : > { %v14092_v41 = vpop.f32.mrf.mxu3 }
 0xc16   : > { %7116 = vmatmul.msk.bf16.gmra.mxu3 %vm13982_vm1, %v14735_v7 }
 0xc29   : > { %v5556_v26 = vpop.f32.mrf.mxu3 }
 0xc2a   : > { %v14096_v0 = vadd.f32 %v5556_v26, %v5507_v47 }
 0xc2b   : > { %v5719_v5 = vpop.xlane.xlu2 %5718 }
 0xc2c   : > { %v5720_v16 = vcvt.f32.s32 %v5719_v5 }
 0xc2e   : > { %v5723_v37 = vadd.s32 %v5722_v48, %v5720_v16  ;;  %v5785_v48 = vcvt.f32.s32 %v14000_v54  ;;  %v7642_v54 = vmov 0  }
 0xc2f   : > { %7477 = vset.pattern.permute.xlu1 %v7642_v54  ;;  %7476 = vset.pattern.permute.xlu0 %v7642_v54 }
 0xc30   : > { %v5934_v27 = vand.u32 255, %v5723_v37  ;;  %v5767_v11 = vpop.xlane.xlu1 %5766  ;;  %v5786_v51 = vshll.u32 %v5785_v48, 16 }
 0xc31   : > { %v5558_v8 = vpop.f32.mrf.mxu3  ;;  %v5768_v26 = vcvt.f32.s32 %v5767_v11 }
 0xc32   : > { %v14098_v1 = vadd.f32 %v5558_v8, %v5509_v6  ;;  %v5950_v21 = vsub.s32 255, %v5934_v27  ;;  %v5824_v6 = vcvt.s32.f32 %v5822_v56  ;;  %v5519_v8 = vpop.f32.mrf.mxu1  ;;  %v5801_v56 = vcvt.f32.s32 %v14028_v3 }
 0xc33   : > { %v14108_v47 = vpop.xlane.xlu2 %5826  ;;  %v5771_v14 = vadd.s32 %v5770_v10, %v5768_v26 }
 0xc34   : > { %vm5828_vm1 = vcmp.eq.f32.partialorder %v13995_v32, %v14108_v47  ;;  %vm5968_vm12 = vcmp.eq.s32.totalorder %v7818_v43, %v5950_v21  ;;  %vm5969_vm7 = vcmp.eq.s32.totalorder %v7821_v50, %v5950_v21  ;;  %v5888_v21 = vcvt.s32.f32 %v5886_v20 }
 0xc35   : > { %vm7152_vm6 = vmpackc.low %vm5970_vm0, %vm5968_vm12  ;;  %v5829_v23 = vsel %vm5828_vm1, %v5824_v6, -inf  ;;  %v5937_v57 = vand.u32 255, %v5771_v14  ;;  %v5802_v49 = vshll.u32 %v5801_v56, 16 }
 0xc36   : > { %7153 = vmatmul.msk.bf16.gmra.mxu2 %vm7152_vm6, %v14735_v7  ;;  %5830 = vmax.xlane.f32.xlu0 %v5829_v23  ;;  %vm14123_vm4 = vmpackc.low %vm5971_vm15, %vm5969_vm7 }
 0xc37   : > { %v5953_v19 = vsub.s32 255, %v5937_v57 }
 0xc39   : > { %v5561_v13 = vpop.f32.mrf.mxu3  ;;  %vm5974_vm5 = vcmp.eq.s32.totalorder %v7818_v43, %v5953_v19  ;;  %vm5975_vm10 = vcmp.eq.s32.totalorder %v7821_v50, %v5953_v19 }
 0xc3a   : > { %v14115_v15 = vadd.f32 %v5561_v13, %v5512_v60  ;;  %vm14137_vm11 = vmpackc.low %vm5974_vm5, %vm5972_vm2  ;;  %v5522_v63 = vpop.f32.mrf.mxu1  ;;  %vm15485_vm5 = vcmask 64512  }
 0xc3b   : > { %v5783_v22 = vpop.xlane.xlu1 %5782  ;;  %v14130_v5 = vpop.xlane.xlu2 %5842  ;;  %vm14143_vm8 = vmpackc.low %vm5975_vm10, %vm5973_vm14 }
 0xc3c   : > { %vm5844_vm3 = vcmp.eq.f32.partialorder %v14004_v36, %v14130_v5  ;;  %v5784_v37 = vcvt.f32.s32 %v5783_v22  ;;  %vm15487_vm14 = vmmov %vm15485_vm5 }
 0xc3d   : > { %vm15488_vm10 = vmmov %vm15485_vm5 }
 0xc3e   : > { %v5787_v2 = vadd.s32 %v5786_v51, %v5784_v37 }
 0xc41   : > { %v5563_v17 = vpop.f32.mrf.mxu3 }
 0xc42   : > { %v14117_v28 = vadd.f32 %v5563_v17, %v5514_v55  ;;  %v5838_v55 = vand.u32 65535, %v13789_v30  ;;  %v5938_v17 = vand.u32 255, %v5787_v2  ;;  %v5524_v14 = vpop.f32.mrf.mxu1 }
 0xc43   : > { %v14149_v27 = vpop.xlane.xlu1 %5890  ;;  %v5799_v26 = vpop.xlane.xlu2 %5798 }
 0xc44   : > { %v5840_v13 = vcvt.s32.f32 %v5838_v55  ;;  %vm5892_vm9 = vcmp.eq.f32.partialorder %v14024_v34, %v14149_v27  ;;  %v5800_v3 = vcvt.f32.s32 %v5799_v26  ;;  %v5902_v34 = vand.u32 65535, %v14030_v18 }
 0xc45   : > { %v5893_v24 = vsel %vm5892_vm9, %v5888_v21, -inf  ;;  %v5954_v55 = vsub.s32 255, %v5938_v17 }
 0xc46   : > { %v5845_v16 = vsel %vm5844_vm3, %v5840_v13, -inf  ;;  %7155 = vmatmul.msk.bf16.gmra.mxu2 %vm14137_vm11, %v14735_v7  ;;  %v5904_v57 = vcvt.s32.f32 %v5902_v34  ;;  %vm15486_vm11 = vmmov %vm15485_vm5 }
 0xc47   : > { %5846 = vmax.xlane.f32.xlu0 %v5845_v16  ;;  %vm5976_vm15 = vcmp.eq.s32.totalorder %v7818_v43, %v5954_v55  ;;  %vm5977_vm7 = vcmp.eq.s32.totalorder %v7821_v50, %v5954_v55 }
 0xc49   : > { %v5566_v61 = vpop.f32.mrf.mxu3 }
 0xc4a   : > { %v14154_v11 = vadd.f32 %v5566_v61, %v14104_v59  ;;  %v5803_v59 = vadd.s32 %v5802_v49, %v5800_v3  ;;  %v5527_v18 = vpop.f32.mrf.mxu1 }
 0xc4b   : > { %v14164_v38 = vpop.xlane.xlu1 %5906  ;;  %v5815_v48 = vpop.xlane.xlu2 %5814 }
 0xc4c   : > { %vm5908_vm0 = vcmp.eq.f32.partialorder %v14043_v29, %v14164_v38  ;;  %v5918_v29 = vand.u32 65535, %v14050_v62  ;;  %v850_v62 = vld [vmem:[%s14381_s4] sm:$0xff] }
 0xc4d   : > { %v5909_v13 = vsel %vm5908_vm0, %v5904_v57, -inf }
 0xc4e   : > { %5910 = vmax.xlane.f32.xlu1 %v5909_v13  ;;  %v5920_v20 = vcvt.s32.f32 %v5918_v29 }
 0xc4f   : > { %5894 = vmax.xlane.f32.xlu0 %v5893_v24  ;;  %v851_v24 = vld [vmem:[%s14381_s4 + $0x8] sm:$0xff] }
 0xc51   : > { %v5568_v10 = vpop.f32.mrf.mxu3 }
 0xc52   : > { %v14156_v6 = vadd.f32 %v5568_v10, %v5519_v8  ;;  %v5939_v8 = vand.u32 255, %v5803_v59 }
 0xc53   : > { %v14181_v54 = vpop.xlane.xlu2 %5922 }
 0xc54   : > { %v5955_v19 = vsub.s32 255, %v5939_v8  ;;  %vm5924_vm2 = vcmp.eq.f32.partialorder %v14068_v46, %v14181_v54 }
 0xc55   : > { %v5925_v56 = vsel %vm5924_vm2, %v5920_v20, -inf }
 0xc56   : > { %vm5978_vm1 = vcmp.eq.s32.totalorder %v7818_v43, %v5955_v19  ;;  %vm5979_vm12 = vcmp.eq.s32.totalorder %v7821_v50, %v5955_v19  ;;  %5926 = vmax.xlane.f32.xlu2 %v5925_v56 }
 0xc57   : > { %vm7156_vm6 = vmpackc.low %vm5978_vm1, %vm5976_vm15 }
 0xc58   : > { %vm14172_vm3 = vmpackc.low %vm5979_vm12, %vm5977_vm7  ;;  %7157 = vmatmul.msk.bf16.gmra.mxu2 %vm7156_vm6, %v14735_v7 }
 0xc59   : > { %v5571_v22 = vpop.f32.mrf.mxu3  ;;  %vm15491_vm7 = vmmov %vm15485_vm5 }
 0xc5a   : > { %v14177_v30 = vadd.f32 %v5571_v22, %v5522_v63  ;;  %v5529_v63 = vpop.f32.mrf.mxu1 }
 0xc61   : > { %v5573_v16 = vpop.f32.mrf.mxu3 }
 0xc62   : > { %v14179_v37 = vadd.f32 %v5573_v16, %v5524_v14  ;;  %v5532_v21 = vpop.f32.mrf.mxu1 }
 0xc63   : > { %854 = vperm.xlu0 %7476, %v850_v62  }
 0xc64   : > { %v5599_v51 = vpack.c.bf16 %v14179_v37, %v14177_v30 }
 0xc67   : > { %859 = vperm.xlu1 %7477, %v851_v24  }
 0xc69   : > { %v5576_v2 = vpop.f32.mrf.mxu3 }
 0xc6a   : > { %v5577_v26 = vadd.f32 %v5576_v2, %v5527_v18  ;;  %v5534_v3 = vpop.f32.mrf.mxu1  ;;  %v5817_v2 = vcvt.f32.s32 %v14045_v44 }
 0xc71   : > { %v5578_v10 = vpop.f32.mrf.mxu3 }
 0xc72   : > { %v5579_v46 = vadd.f32 %v5578_v10, %v5529_v63  ;;  %v5537_v14 = vpop.f32.mrf.mxu1  ;;  %v5816_v10 = vcvt.f32.s32 %v5815_v48 }
 0xc74   : > { %v5600_v49 = vpack.c.bf16 %v5579_v46, %v5577_v26  ;;  %v5818_v46 = vshll.u32 %v5817_v2, 16 }
 0xc76   : > { %v5819_v60 = vadd.s32 %v5818_v46, %v5816_v10 }
 0xc79   : > { %v5581_v17 = vpop.f32.mrf.mxu3 }
 0xc7a   : > { %v5539_v55 = vpop.f32.mrf.mxu1  ;;  %v5582_v58 = vadd.f32 %v5581_v17, %v5532_v21 }
 0xc81   : > { %v5583_v34 = vpop.f32.mrf.mxu3 }
 0xc82   : > { %v5542_v57 = vpop.f32.mrf.mxu1  ;;  %v5584_v24 = vadd.f32 %v5583_v34, %v5534_v3 }
 0xc84   : > { %v5601_v23 = vpack.c.bf16 %v5584_v24, %v5582_v58 }
 0xc89   : > { %v5586_v59 = vpop.f32.mrf.mxu3 }
 0xc8a   : > { %v5544_v22 = vpop.f32.mrf.mxu1  ;;  %v5587_v56 = vadd.f32 %v5586_v59, %v5537_v14  ;;  %v5620_v14 = vsel %vm15487_vm14, %v5601_v23, 0 }
 0xc91   : > { %v5588_v8 = vpop.f32.mrf.mxu3 }
 0xc92   : > { %v5589_v62 = vadd.f32 %v5588_v8, %v5539_v55  ;;  %v5865_v55 = vcvt.f32.s32 %v14066_v45  ;;  %v5940_v8 = vand.u32 255, %v5819_v60 }
 0xc94   : > { %v5602_v63 = vpack.c.bf16 %v5589_v62, %v5587_v56  ;;  %v5866_v3 = vshll.u32 %v5865_v55, 16  ;;  %v5956_v21 = vsub.s32 255, %v5940_v8  ;;  %v5897_v56 = vcvt.f32.s32 %v14149_v27 }
 0xc96   : > { %v5623_v26 = vsel %vm15486_vm11, %v5602_v63, 0  ;;  %vm5980_vm9 = vcmp.eq.s32.totalorder %v7818_v43, %v5956_v21  ;;  %vm5981_vm12 = vcmp.eq.s32.totalorder %v7821_v50, %v5956_v21 }
 0xc99   : > { %v5591_v19 = vpop.f32.mrf.mxu3 }
 0xc9a   : > { %v5592_v29 = vadd.f32 %v5591_v19, %v5542_v57  ;;  %v5833_v57 = vcvt.f32.s32 %v14108_v47  ;;  %v5863_v19 = vpop.xlane.xlu1 %5862 }
 0xc9b   : > { %v5864_v44 = vcvt.f32.s32 %v5863_v19 }
 0xc9c   : > { %v5834_v59 = vshll.u32 %v5833_v57, 16  ;;  %v5614_v57 = vsel %vm15491_vm7, %v5599_v51, 0 }
 0xc9d   : > { %v5867_v17 = vadd.s32 %v5866_v3, %v5864_v44  ;;  %v5913_v44 = vcvt.f32.s32 %v14164_v38  ;;  %v15496_v3 = vmov 0 }
 0xc9f   : > { %v5943_v23 = vand.u32 255, %v5867_v17 }
 0xca1   : > { %v5593_v13 = vpop.f32.mrf.mxu3  ;;  %v5959_v63 = vsub.s32 255, %v5943_v23 }
 0xca2   : > { %v5594_v16 = vadd.f32 %v5593_v13, %v5544_v22  ;;  %v5849_v13 = vcvt.f32.s32 %v14130_v5 }
 0xca4   : > { %v5603_v20 = vpack.c.bf16 %v5594_v16, %v5592_v29  ;;  %v5879_v29 = vpop.xlane.xlu2 %5878  ;;  %v5881_v16 = vcvt.f32.s32 %v14074_v53  ;;  %v5850_v45 = vshll.u32 %v5849_v13, 16  ;;  %v5929_v13 = vcvt.f32.s32 %v14181_v54 }
 0xca5   : > { %v5880_v5 = vcvt.f32.s32 %v5879_v29 }
 0xca6   : > { %v5626_v18 = vsel %vm15485_vm5, %v5603_v20, 0  ;;  %v5617_v20 = vsel %vm15488_vm10, %v5600_v49, 0  ;;  %v5882_v49 = vshll.u32 %v5881_v16, 16  ;;  %vm5986_vm5 = vcmp.eq.s32.totalorder %v7818_v43, %v5959_v63 }
 0xca7   : > { %5628 = vmatpush.bf16.xpose.msrb.mxu0 %v5626_v18  ;;  %vm5987_vm10 = vcmp.eq.s32.totalorder %v7821_v50, %v5959_v63  ;;  %v5930_v17 = vshll.u32 %v5929_v13, 16 }
 0xca8   : > { %v5883_v10 = vadd.s32 %v5882_v49, %v5880_v5 }
 0xca9   : > { %v5831_v22 = vpop.xlane.xlu0 %5830 }
 0xcaa   : > { %v5832_v48 = vcvt.f32.s32 %v5831_v22  ;;  %v5944_v27 = vand.u32 255, %v5883_v10 }
 0xcac   : > { %v5835_v34 = vadd.s32 %v5834_v59, %v5832_v48  ;;  %v5960_v37 = vsub.s32 255, %v5944_v27 }
 0xcae   : > { %v5941_v58 = vand.u32 255, %v5835_v34  ;;  %v5914_v34 = vshll.u32 %v5913_v44, 16 }
 0xcaf   : > { %5629 = vmatpush.bf16.xpose.msrb.mxu0 %v5623_v26  ;;  %v5898_v26 = vshll.u32 %v5897_v56, 16 }
 0xcb0   : > { %v5957_v47 = vsub.s32 255, %v5941_v58 }
 0xcb2   : > { %vm5982_vm0 = vcmp.eq.s32.totalorder %v7818_v43, %v5957_v47  ;;  %vm5983_vm15 = vcmp.eq.s32.totalorder %v7821_v50, %v5957_v47 }
 0xcb3   : > { %vm7158_vm1 = vmpackc.low %vm5982_vm0, %vm5980_vm9 }
 0xcb4   : > { %7159 = vmatmul.msk.bf16.gmra.mxu2 %vm7158_vm1, %v14735_v7  ;;  %vm14208_vm6 = vmpackc.low %vm5983_vm15, %vm5981_vm12  ;;  %vm5989_vm1 = vcmp.eq.s32.totalorder %v7821_v50, %v5960_v37 }
 0xcb5   : > { %vm15495_vm0 = vmmov %vm15491_vm7 }
 0xcb6   : > { %vm15499_vm7 = vmmov %vm15495_vm0 }
 0xcb7   : > { %5630 = vmatpush.bf16.xpose.msrb.mxu0 %v5620_v14  ;;  %v15494_v14 = vpack.c.bf16 %v14156_v6, %v14154_v11  ;;  %v15498_v6 = vpack.c.bf16 %v14117_v28, %v14115_v15  ;;  %v15511_v15 = vld [vmem:[#allocation40_spill] sm:$0xff] }
 0xcb9   : > { %v5611_v59 = vsel %vm15495_vm0, %v15494_v14, 0  ;;  %v5608_v38 = vsel %vm15499_vm7, %v15498_v6, 0 }
 0xcba   : > { %v5847_v60 = vpop.xlane.xlu0 %5846 }
 0xcbb   : > { %v5848_v62 = vcvt.f32.s32 %v5847_v60  ;;  %v15500_v60 = vpack.c.bf16 %v14098_v1, %v14096_v0 }
 0xcbd   : > { %v5851_v18 = vadd.s32 %v5850_v45, %v5848_v62 }
 0xcbf   : > { %5631 = vmatpush.bf16.xpose.msrb.mxu0 %v5617_v20  ;;  %v5942_v2 = vand.u32 255, %v5851_v18 }
 0xcc1   : > { %v5958_v24 = vsub.s32 255, %v5942_v2  ;;  %v5911_v22 = vpop.xlane.xlu1 %5910 }
 0xcc2   : > { %v5895_v46 = vpop.xlane.xlu0 %5894  ;;  %v5912_v48 = vcvt.f32.s32 %v5911_v22 }
 0xcc3   : > { %v5896_v19 = vcvt.f32.s32 %v5895_v46  ;;  %vm5984_vm2 = vcmp.eq.s32.totalorder %v7818_v43, %v5958_v24  ;;  %vm5985_vm11 = vcmp.eq.s32.totalorder %v7821_v50, %v5958_v24 }
 0xcc4   : > { %vm7160_vm14 = vmpackc.low %vm5986_vm5, %vm5984_vm2  ;;  %v5915_v11 = vadd.s32 %v5914_v34, %v5912_v48 }
 0xcc5   : > { %v5899_v55 = vadd.s32 %v5898_v26, %v5896_v19  ;;  %vm14221_vm9 = vmpackc.low %vm5987_vm10, %vm5985_vm11  ;;  %7161 = vmatmul.msk.bf16.gmra.mxu2 %vm7160_vm14, %v14735_v7  ;;  %vm5988_vm11 = vcmp.eq.s32.totalorder %v7818_v43, %v5960_v37 }
 0xcc6   : > { %v5946_v58 = vand.u32 255, %v5915_v11  ;;  %vm15501_vm5 = vmmov %vm15495_vm0 }
 0xcc7   : > { %5632 = vmatpush.bf16.xpose.msrb.mxu0 %v5614_v57  ;;  %v5945_v30 = vand.u32 255, %v5899_v55  ;;  %v5605_v54 = vsel %vm15501_vm5, %v15500_v60, 0 }
 0xcc8   : > { %v5962_v16 = vsub.s32 255, %v5946_v58 }
 0xcc9   : > { %v5961_v51 = vsub.s32 255, %v5945_v30  ;;  %v5927_v21 = vpop.xlane.xlu2 %5926 }
 0xcca   : > { %v5928_v29 = vcvt.f32.s32 %v5927_v21  ;;  %vm5992_vm10 = vcmp.eq.s32.totalorder %v7818_v43, %v5962_v16  ;;  %vm5993_vm7 = vcmp.eq.s32.totalorder %v7821_v50, %v5962_v16 }
 0xccb   : > { %vm5991_vm15 = vcmp.eq.s32.totalorder %v7821_v50, %v5961_v51  ;;  %vm5990_vm2 = vcmp.eq.s32.totalorder %v7818_v43, %v5961_v51 }
 0xccc   : > { %vm14233_vm12 = vmpackc.low %vm5991_vm15, %vm5989_vm1  ;;  %v5931_v47 = vadd.s32 %v5930_v17, %v5928_v29 }
 0xccd   : > { %v15497_v3 = vsel %vm14233_vm12, 4294967295, %v15496_v3  ;;  %vm7162_vm14 = vmpackc.low %vm5990_vm2, %vm5988_vm11 }
 0xcce   : > { %v5947_v45 = vand.u32 255, %v5931_v47  ;;  %vm15504_vm2 = vmmov %vm15501_vm5 }
 0xccf   : > { %5633 = vmatpush.bf16.xpose.msrb.mxu0 %v5611_v59  ;;  %vm15518_vm5 = vmmov %vm15504_vm2 }
 0xcd0   : > { %v5963_v20 = vsub.s32 255, %v5947_v45  ;;  %vm15519_vm11 = vmmov %vm15504_vm2 }
 0xcd2   : > { %vm5994_vm0 = vcmp.eq.s32.totalorder %v7818_v43, %v5963_v20  ;;  %vm5995_vm15 = vcmp.eq.s32.totalorder %v7821_v50, %v5963_v20  ;;  %v15506_v43 = vld [vmem:[#allocation49_spill] sm:$0xff] }
 0xcd3   : > { %vm7164_vm1 = vmpackc.low %vm5994_vm0, %vm5992_vm10  ;;  %v15507_v50 = vld [vmem:[#allocation13_spill] sm:$0xff] }
 0xcd4   : > { %vm14254_vm12 = vmpackc.low %vm5995_vm15, %vm5993_vm7 }
 0xcd5   : > { %7163 = vmatmul.msk.bf16.gmra.mxu2 %vm7162_vm14, %v14735_v7  ;;  %vm15520_vm14 = vmmov %vm15504_vm2 }
 0xcd7   : > { %5634 = vmatpush.bf16.xpose.msrb.mxu0 %v5608_v38 }
 0xcdf   : > { %5635 = vmatpush.bf16.xpose.msrb.mxu0 %v5605_v54 }
 0xce5   : > { %7165 = vmatmul.msk.bf16.gmra.mxu2 %vm7164_vm1, %v14735_v7 }
 0xce6   : > { %7117 = vmatmul.msk.bf16.vlgmr.msrb.gmra.mxu0 %vm15504_vm2, %v13927_v42 }
 0xce7   : > { %6125 = vmatpush.bf16.msra.mxu0 %v13917_v4  ;;  %v2207_v4 = vmax.f32 %v15507_v50, %v15506_v43 }
 0xceb   : > { %6126 = vmatpush.bf16.msra.mxu0 %v13921_v9  ;;  %v15508_v9 = vld [vmem:[#allocation31_spill] sm:$0xff] }
 0xcef   : > { %6127 = vmatpush.bf16.msra.mxu0 %v13932_v25  ;;  %v2785_v25 = vmax.f32 %v2207_v4, %v15508_v9 }
 0xcf3   : > { %6128 = vmatpush.bf16.msra.mxu0 %v13936_v52  ;;  %v6085_v52 = vpop.f32.mrf.mxu2 }
 0xcf7   : > { %6129 = vmatpush.bf16.msra.mxu0 %v13940_v33 }
 0xcfb   : > { %6130 = vmatpush.bf16.msra.mxu0 %v13944_v31  ;;  %v15509_v31 = vld [vmem:[#allocation54_spill] sm:$0xff]  ;;  %v6087_v61 = vpop.f32.mrf.mxu2 }
 0xcff   : > { %6131 = vmatpush.bf16.msra.mxu0 %v13948_v35  ;;  %v3363_v35 = vmax.f32 %v2785_v25, %v15509_v31 }
 0xd01   : > { %v3941_v1 = vmax.f32 %v3363_v35, %v15510_v12 }
 0xd03   : > { %6132 = vmatpush.bf16.msra.mxu0 %v13952_v40  ;;  %v4519_v28 = vmax.f32 %v3941_v1, %v15511_v15  ;;  %v6090_v62 = vpop.f32.mrf.mxu2 }
 0xd05   : > { %v14300_v32 = vmax.f32 %v4519_v28, %v14092_v41 }
 0xd06   : > { %7167 = vmatmul.msk.bf16.vlgmr.msra.gmra.mxu0 %vm14059_vm13, %v14735_v7  ;;  %vm15505_vm13 = vnez %v15497_v3 }
 0xd0b   : > { %v6092_v18 = vpop.f32.mrf.mxu2 }
 0xd13   : > { %v6095_v63 = vpop.f32.mrf.mxu2 }
 0xd16   : > { %7169 = vmatmul.msk.bf16.gmra.mxu0 %vm14123_vm4, %v14735_v7  ;;  %vm15512_vm4 = vmmov %vm15504_vm2 }
 0xd1b   : > { %v6097_v10 = vpop.f32.mrf.mxu2 }
 0xd23   : > { %v6100_v19 = vpop.f32.mrf.mxu2 }
 0xd26   : > { %7171 = vmatmul.msk.bf16.gmra.mxu0 %vm14143_vm8, %v14735_v7  ;;  %vm15513_vm8 = vmmov %vm15504_vm2 }
 0xd2b   : > { %v6102_v30 = vpop.f32.mrf.mxu2 }
 0xd36   : > { %7173 = vmatmul.msk.bf16.gmra.mxu0 %vm14172_vm3, %v14735_v7  ;;  %vm15514_vm3 = vmmov %vm15504_vm2 }
 0xd37   : > { %v6105_v22 = vpop.f32.mrf.mxu2 }
 0xd3f   : > { %v6107_v3 = vpop.f32.mrf.mxu2 }
 0xd46   : > { %7175 = vmatmul.msk.bf16.gmra.mxu0 %vm14208_vm6, %v14735_v7  ;;  %vm15515_vm6 = vmmov %vm15504_vm2 }
 0xd48   : > { %v6110_v13 = vpop.f32.mrf.mxu2 }
 0xd50   : > { %v6112_v17 = vpop.f32.mrf.mxu2 }
 0xd56   : > { %7177 = vmatmul.msk.bf16.gmra.mxu0 %vm14221_vm9, %v14735_v7  ;;  %vm15516_vm9 = vmmov %vm15504_vm2 }
 0xd58   : > { %v6115_v47 = vpop.f32.mrf.mxu2 }
 0xd60   : > { %v6117_v45 = vpop.f32.mrf.mxu2 }
 0xd63   : > { %v14292_v33 = vpop.f32.mrf.mxu0 }
 0xd64   : > { %v5674_v40 = vmax.f32 %v14087_v39, %v14292_v33 }
 0xd66   : > { %7179 = vmatmul.msk.bf16.gmra.mxu0 %vm15505_vm13, %v14735_v7 }
 0xd68   : > { %v6120_v54 = vpop.f32.mrf.mxu2 }
 0xd6b   : > { %v14302_v36 = vpop.f32.mrf.mxu0 }
 0xd6c   : > { %v5675_v23 = vmax.f32 %v14300_v32, %v14302_v36 }
 0xd70   : > { %v6122_v0 = vpop.f32.mrf.mxu2 }
 0xd76   : > { %7181 = vmatmul.msk.bf16.gmra.mxu0 %vm14254_vm12, %v14735_v7  ;;  %vm15517_vm12 = vmmov %vm15504_vm2 }
 0xd83   : > { %v6134_v5 = vpop.f32.mrf.mxu0 }
 0xd84   : > { %v14309_v49 = vadd.f32 %v6134_v5, %v6085_v52 }
 0xd8b   : > { %v6136_v53 = vpop.f32.mrf.mxu0 }
 0xd8c   : > { %v14311_v56 = vadd.f32 %v6136_v53, %v6087_v61 }
 0xd8e   : > { %v6174_v41 = vpack.c.bf16 %v14311_v56, %v14309_v49  ;;  %v855_v56 = vpop.permute.xlu0 %854 }
 0xd90   : > { %v6183_v49 = vsel %vm15519_vm11, %v6174_v41, 0  ;;  %v860_v41 = vpop.permute.xlu1 %859 }
 0xd93   : > { %v6139_v2 = vpop.f32.mrf.mxu0 }
 0xd94   : > { %v6140_v26 = vadd.f32 %v6139_v2, %v6090_v62  ;;  %v15521_v2 = vld [vmem:[#allocation29_spill] sm:$0xff] }
 0xd9b   : > { %v6141_v24 = vpop.f32.mrf.mxu0 }
 0xd9c   : > { %v6142_v46 = vadd.f32 %v6141_v24, %v6092_v18 }
 0xd9e   : > { %v6175_v57 = vpack.c.bf16 %v6142_v46, %v6140_v26 }
 0xda0   : > { %v6186_v53 = vsel %vm15518_vm5, %v6175_v57, 0  ;;  %v15522_v57 = vld [vmem:[#allocation33_spill] sm:$0xff] }
 0xda3   : > { %v6144_v7 = vpop.f32.mrf.mxu0 }
 0xda4   : > { %v6145_v55 = vadd.f32 %v6144_v7, %v6095_v63 }
 0xdab   : > { %v6146_v27 = vpop.f32.mrf.mxu0 }
 0xdac   : > { %v6147_v8 = vadd.f32 %v6146_v27, %v6097_v10  ;;  %v944_v10 = vadd.f32 %v15521_v2, %v855_v56 }
 0xdae   : > { %v6176_v37 = vpack.c.bf16 %v6147_v8, %v6145_v55 }
 0xdb0   : > { %v6189_v18 = vsel %vm15517_vm12, %v6176_v37, 0 }
 0xdb3   : > { %v6149_v51 = vpop.f32.mrf.mxu0 }
 0xdb4   : > { %v6150_v59 = vadd.f32 %v6149_v51, %v6100_v19  ;;  %v946_v19 = vadd.f32 %v15522_v57, %v860_v41 }
 0xdbb   : > { %v6151_v14 = vpop.f32.mrf.mxu0 }
 0xdbc   : > { %v6152_v44 = vadd.f32 %v6151_v14, %v6102_v30 }
 0xdbe   : > { %v6177_v48 = vpack.c.bf16 %v6152_v44, %v6150_v59 }
 0xdc0   : > { %v6192_v5 = vsel %vm15516_vm9, %v6177_v48, 0 }
 0xdc3   : > { %v6154_v34 = vpop.f32.mrf.mxu0 }
 0xdc4   : > { %v6155_v6 = vadd.f32 %v6154_v34, %v6105_v22 }
 0xdcb   : > { %v6156_v11 = vpop.f32.mrf.mxu0 }
 0xdcc   : > { %v6157_v38 = vadd.f32 %v6156_v11, %v6107_v3 }
 0xdce   : > { %v6178_v21 = vpack.c.bf16 %v6157_v38, %v6155_v6 }
 0xdd0   : > { %v6195_v62 = vsel %vm15515_vm6, %v6178_v21, 0 }
 0xdd3   : > { %v6159_v58 = vpop.f32.mrf.mxu0 }
 0xdd4   : > { %v6160_v15 = vadd.f32 %v6159_v58, %v6110_v13 }
 0xddb   : > { %v6161_v29 = vpop.f32.mrf.mxu0 }
 0xddc   : > { %v6162_v12 = vadd.f32 %v6161_v29, %v6112_v17 }
 0xdde   : > { %v6179_v28 = vpack.c.bf16 %v6162_v12, %v6160_v15 }
 0xde0   : > { %v6198_v61 = vsel %vm15514_vm3, %v6179_v28, 0 }
 0xde3   : > { %v6164_v16 = vpop.f32.mrf.mxu0 }
 0xde4   : > { %v6165_v31 = vadd.f32 %v6164_v16, %v6115_v47 }
 0xdeb   : > { %v6166_v60 = vpop.f32.mrf.mxu0 }
 0xdec   : > { %v6167_v25 = vadd.f32 %v6166_v60, %v6117_v45 }
 0xdee   : > { %v6180_v35 = vpack.c.bf16 %v6167_v25, %v6165_v31 }
 0xdf0   : > { %v6201_v1 = vsel %vm15513_vm8, %v6180_v35, 0 }
 0xdf3   : > { %v6169_v20 = vpop.f32.mrf.mxu0 }
 0xdf4   : > { %v6170_v50 = vadd.f32 %v6169_v20, %v6120_v54 }
 0xdfb   : > { %v6171_v43 = vpop.f32.mrf.mxu0 }
 0xdfc   : > { %v6172_v4 = vadd.f32 %v6171_v43, %v6122_v0 }
 0xdfe   : > { %v6181_v9 = vpack.c.bf16 %v6172_v4, %v6170_v50 }
 0xe00   : > { %v6204_v52 = vsel %vm15512_vm4, %v6181_v9, 0 }
 0xe01   : > { %6206 = vmatpush.bf16.xpose.msrb.mxu2 %v6204_v52 }
 0xe09   : > { %6207 = vmatpush.bf16.xpose.msrb.mxu2 %v6201_v1 }
 0xe11   : > { %6208 = vmatpush.bf16.xpose.msrb.mxu2 %v6198_v61 }
 0xe19   : > { %6209 = vmatpush.bf16.xpose.msrb.mxu2 %v6195_v62 }
 0xe21   : > { %6210 = vmatpush.bf16.xpose.msrb.mxu2 %v6192_v5 }
 0xe29   : > { %6211 = vmatpush.bf16.xpose.msrb.mxu2 %v6189_v18 }
 0xe31   : > { %6212 = vmatpush.bf16.xpose.msrb.mxu2 %v6186_v53 }
 0xe39   : > { %6213 = vmatpush.bf16.xpose.msrb.mxu2 %v6183_v49 }
 0xe40   : > { %7182 = vmatmul.msk.bf16.vlgmr.msrb.gmra.mxu2 %vm15520_vm14, %v13927_v42 }
 0xec3   : > { %v6215_v63 = vpop.f32.mrf.mxu2 }
 0xec4   : > { %v6220_v24 = vmax.f32 %v5674_v40, %v6215_v63 }
 0xec6   : > { %v6222_v26 = vadd.f32 %v6220_v24, %v944_v10 }
 0xec8   : > { %v6224_v46 = vmax.f32 %v6222_v26, 0.0 }
 0xeca   : > { %6226 = vst [vmem:[%s246_s30] sm:$0xff] %v6224_v46 }
 0xecb   : > { %v6217_v42 = vpop.f32.mrf.mxu2 }
 0xecc   : > { %v6221_v39 = vmax.f32 %v5675_v23, %v6217_v42 }
 0xece   : > { %v6223_v33 = vadd.f32 %v6221_v39, %v946_v19 }
 0xed0   : > { %v6225_v40 = vmax.f32 %v6223_v33, 0.0 }
 0xed2   : > { %6227 = vst [vmem:[%s246_s30 + $0x8] sm:$0xff] %v6225_v40 }
 0xed3   : > { %7572 = shalt.err (!%p7569_p6)
}
 0xed4   : > { %s7643_s15 = smov 128   ;;  %s7644_s30 = smov 256  }
 0xed5   : > { %s7645_s9 = smov 8  }
 0xed6   : > { %7400 = dma.vmem_to_hbm [thread:$0]  (%p7727_p3), %s6243_s22, 256, %s6245_s21, %s6229_s12, %s7643_s15, %s7644_s30, %s7645_s9  }
 0xed7 PF: > { %p7406_p7 = scmp.ge.s32.totalorder %s7639_s25, 2  ;;  %s6259_s10 = sand.u32 1, %s7611_s18  }
 0xed8   : > { %s6260_s13 = scalar_lea.sflag [#allocation3], %s6259_s10 }
 0xed9   : > { %p7403_p9 = pnand %p7406_p7, %p7736_p8 }
 0xedb   : > { %p7404_p10 = pneg %p7403_p9 }
 0xedd   : > { %7606 = dma.done.wait (%p7404_p10), %s6260_s13, 256  }
 0xede   : > { %7608 = vsyncadd (%p7404_p10), %s6260_s13, 4294967040  ;;  %s18_s25 = sadd.s32 1, %s7639_s25   ;;  %s15523_s18 = smov %s7615_s19 }
 0xedf   : > { %p15_p11 = scmp.ge.s32.totalorder %s18_s25, 6   ;;  %s15524_s19 = smov %s7619_s20 }
 0xee0   : > { %s15525_s20 = smov %s7745_s11  ;;  %s15526_s21 = smov %s7631_s23 }
 0xee1   : > { %s15527_s22 = smov %s7635_s24  ;;  %s15528_s23 = smov %s15531_s28 }
 0xee2   : > { %s15529_s24 = smov %s15535_s29  ;;  %17 = sbr.rel (!%p15_p11) target bundleno = 5 (0x5), region = 80 }
 0xee7   :  { %6266 = vsyncpa [#allocation3], 1 }
 0xee8   :  { %6268 = vsyncpa [#allocation3 + $0x1], 1 }

</bundles_post_ra>
